<compile_context>
chip_gen: v7x
topology: tpu7x:2x2x1
jax: 0.10.0
libtpu: 0.0.40
codegen_flags: <defaults>
</compile_context>

<pallas_src>
import functools
import numpy as np

import jax
import jax.numpy as jnp
from jax.experimental import pallas as pl
from jax.experimental.pallas import tpu as pltpu


_EXT = 128   # lane offset at which the current activation is staged in scratch


# ----------------------------------------------------------------------------
# Trace-time (numpy) spatial-operator builders.  Flattened index convention:
# m = n*H*W + h*W + w  ("NHW-flat"); channels live on the sublane axis.
# ----------------------------------------------------------------------------
def _conv_masks(N, H, W):
    """(9, N*H*W) 0/1 masks: tap (kh,kw) is valid at (n,h,w) iff the shifted
    source pixel (h+kh-1, w+kw-1) lies inside the image (zero 'same' pad)."""
    n, h, w = np.meshgrid(np.arange(N), np.arange(H), np.arange(W), indexing="ij")
    h = h.reshape(-1)
    w = w.reshape(-1)
    masks = np.zeros((9, N * H * W), np.float32)
    for k in range(9):
        dh, dw = k // 3 - 1, k % 3 - 1
        valid = (h + dh >= 0) & (h + dh < H) & (w + dw >= 0) & (w + dw < W)
        masks[k] = valid.astype(np.float32)
    return masks


def _pool_selector(N, H, W):
    """(N*H*W, N*(H/2)*(W/2)) 0/1 matrix selecting the top-left anchor of each
    2x2 window (used after a 4-tap running max to realize MaxPool2d(2,2))."""
    Ho, Wo = H // 2, W // 2
    P = np.zeros((N * H * W, N * Ho * Wo), np.float32)
    for n in range(N):
        for oh in range(Ho):
            for ow in range(Wo):
                mo = (n * Ho + oh) * Wo + ow
                mi = (n * H + 2 * oh) * W + 2 * ow
                P[mi, mo] = 1.0
    return P


def _bilinear_matrix(n_in, n_out):
    """(n_out, n_in) 1-D bilinear interpolation matrix, align_corners=True."""
    A = np.zeros((n_out, n_in), np.float32)
    if n_in == 1:
        A[:, 0] = 1.0
        return A
    for o in range(n_out):
        s = o * (n_in - 1) / (n_out - 1)
        i0 = min(int(np.floor(s)), n_in - 1)
        i1 = min(i0 + 1, n_in - 1)
        f = s - i0
        A[o, i0] += 1.0 - f
        A[o, i1] += f
    return A


def _upsample_operator(N, H, W):
    """(N*H*W, N*2H*2W) operator U with  out_flat = x_flat @ U  implementing
    UpsamplingBilinear2d(scale_factor=2) (align_corners=True)."""
    Ah = _bilinear_matrix(H, 2 * H)
    Aw = _bilinear_matrix(W, 2 * W)
    K = np.kron(Ah, Aw)                                 # (4HW, HW)
    return np.kron(np.eye(N, dtype=np.float32), K.T).astype(np.float32)


# ----------------------------------------------------------------------------
# The fused forward-pass kernel.
# ----------------------------------------------------------------------------
def _autoencoder_kernel(
    x_ref,
    w1_ref, w2_ref, w3_ref, w4_ref, w5_ref, w6_ref,
    b1_ref, b2_ref, b3_ref, b4_ref, b5_ref, b6_ref,
    mA_ref, mB_ref, mC_ref, mD_ref,            # conv masks at H, H/2, H/4, H/8
    p1_ref, p2_ref, p3_ref,                    # maxpool anchor selectors
    u1_ref, u2_ref, u3_ref,                    # bilinear upsample operators
    bn1_ref, bn2_ref, bn3_ref, bn4_ref, bn5_ref, bn6_ref,
    out_ref,
    scratch_ref,                               # VMEM staging buffer
    *, widths,                                 # (W, W/2, W/4, W/8)
):
    f32 = jnp.float32

    # Masked-out tap positions may read never-written scratch lanes; keep them
    # finite (NaN * 0 == NaN) by zeroing the staging buffer once.
    scratch_ref[...] = jnp.zeros_like(scratch_ref)

    def conv3x3(x, w_ref, b_ref, mask_ref, W):
        """3x3 'same' conv (cross-correlation).  x: (Cin, M) -> (Cout, M)."""
        Cin, M = x.shape
        Cout = w_ref.shape[1]
        scratch_ref[0:Cin, _EXT:_EXT + M] = x
        masks = mask_ref[...]                                   # (9, M)
        acc = jnp.zeros((Cout, M), f32)
        for k in range(9):
            dh, dw = k // 3 - 1, k % 3 - 1
            off = _EXT + dh * W + dw
            tap = scratch_ref[0:Cin, off:off + M] * masks[k:k + 1, :]
            wk = w_ref[k]                                       # (Cout, Cin)
            if Cin == 1:
                acc = acc + wk * tap                            # VPU broadcast
            else:
                acc = acc + jnp.dot(wk, tap, preferred_element_type=f32)
        return acc + b_ref[...]                                 # bias (Cout, 1)

    def maxpool2x2(x, sel_ref, W):
        """MaxPool2d(2,2).  x: (C, M) at (H, W) -> (C, M/4) at (H/2, W/2)."""
        C, M = x.shape
        scratch_ref[0:C, _EXT:_EXT + M] = x

        def tap(off):
            return scratch_ref[0:C, _EXT + off:_EXT + off + M]

        m = jnp.maximum(jnp.maximum(tap(0), tap(1)),
                        jnp.maximum(tap(W), tap(W + 1)))
        # 0/1 anchor selection -> compact to pooled resolution (lane-dense).
        return jnp.dot(m, sel_ref[...], preferred_element_type=f32)

    def batchnorm(x, p_ref, eps=1e-5):
        """Training-mode BatchNorm2d: batch stats over the N*H*W (lane) axis."""
        mu = jnp.mean(x, axis=1, keepdims=True)
        xc = x - mu
        var = jnp.mean(xc * xc, axis=1, keepdims=True)          # biased variance
        gamma = p_ref[:, 0:1]
        beta = p_ref[:, 1:2]
        return xc * jax.lax.rsqrt(var + eps) * gamma + beta

    def relu(x):
        return jnp.maximum(x, 0.0)

    wA, wB, wC, wD = widths
    x = x_ref[...]                                              # (1, N*H*W)

    # -------------------------------- encoder ------------------------------
    y = conv3x3(x, w1_ref, b1_ref, mA_ref, wA)                  # (8,  N*H*W)
    y = maxpool2x2(y, p1_ref, wA)                               # (8,  N*H*W/4)
    y = relu(batchnorm(y, bn1_ref))
    y = conv3x3(y, w2_ref, b2_ref, mB_ref, wB)                  # (32, ...)
    y = maxpool2x2(y, p2_ref, wB)
    y = relu(batchnorm(y, bn2_ref))
    y = conv3x3(y, w3_ref, b3_ref, mC_ref, wC)                  # (1,  ...)
    y = maxpool2x2(y, p3_ref, wC)
    y = batchnorm(y, bn3_ref)

    # -------------------------------- decoder ------------------------------
    y = conv3x3(y, w4_ref, b4_ref, mD_ref, wD)                  # (32, N*H*W/64)
    y = jnp.dot(y, u1_ref[...], preferred_element_type=f32)     # x2 upsample
    y = relu(batchnorm(y, bn4_ref))
    y = conv3x3(y, w5_ref, b5_ref, mC_ref, wC)                  # (16, ...)
    y = jnp.dot(y, u2_ref[...], preferred_element_type=f32)
    y = relu(batchnorm(y, bn5_ref))
    y = conv3x3(y, w6_ref, b6_ref, mB_ref, wB)                  # (1,  ...)
    y = jnp.dot(y, u3_ref[...], preferred_element_type=f32)     # (1, N*H*W)
    y = batchnorm(y, bn6_ref)

    out_ref[...] = jax.nn.sigmoid(y)


# ----------------------------------------------------------------------------
# Wrapper: repack PyTorch-layout parameters, build spatial operators, launch.
# ----------------------------------------------------------------------------
def autoencoder_forward(x_nchw, params):
    """x_nchw: (N, 1, H, W) float32, H and W divisible by 8.  Returns (N,1,H,W)."""
    N, C, H, W = x_nchw.shape
    assert C == 1 and H % 8 == 0 and W % 8 == 0
    M = N * H * W
    f32 = jnp.float32

    # ---- trace-time spatial operators (numpy constants) ----
    sizes = [(H, W), (H // 2, W // 2), (H // 4, W // 4), (H // 8, W // 8)]
    masks = [jnp.asarray(_conv_masks(N, h, w)) for (h, w) in sizes]
    pools = [jnp.asarray(_pool_selector(N, h, w)) for (h, w) in sizes[:3]]
    ups = [jnp.asarray(_upsample_operator(N, h, w))
           for (h, w) in (sizes[3], sizes[2], sizes[1])]

    # ---- parameter repacking (PyTorch layouts -> kernel layouts) ----
    def conv_w(w):                      # (Cout, Cin, 3, 3) -> (9, Cout, Cin)
        co, ci = w.shape[0], w.shape[1]
        return jnp.transpose(jnp.asarray(w, f32), (2, 3, 0, 1)).reshape(9, co, ci)

    def conv_b(b):                      # (Cout,) -> (Cout, 1)
        return jnp.asarray(b, f32).reshape(-1, 1)

    def bn_p(g, b):                     # -> (C, 2): [gamma | beta]
        return jnp.stack([jnp.asarray(g, f32), jnp.asarray(b, f32)], axis=1)

    inputs = (
        x_nchw.astype(f32).reshape(1, M),                       # NHW-flat, C=1
        conv_w(params["w1"]), conv_w(params["w2"]), conv_w(params["w3"]),
        conv_w(params["w4"]), conv_w(params["w5"]), conv_w(params["w6"]),
        conv_b(params["b1"]), conv_b(params["b2"]), conv_b(params["b3"]),
        conv_b(params["b4"]), conv_b(params["b5"]), conv_b(params["b6"]),
        masks[0], masks[1], masks[2], masks[3],
        pools[0], pools[1], pools[2],
        ups[0], ups[1], ups[2],
        bn_p(params["bn1_g"], params["bn1_b"]),
        bn_p(params["bn2_g"], params["bn2_b"]),
        bn_p(params["bn3_g"], params["bn3_b"]),
        bn_p(params["bn4_g"], params["bn4_b"]),
        bn_p(params["bn5_g"], params["bn5_b"]),
        bn_p(params["bn6_g"], params["bn6_b"]),
    )

    def full_spec(shape):
        zeros = (0,) * len(shape)
        return pl.BlockSpec(shape, lambda i: zeros)

    kernel = functools.partial(
        _autoencoder_kernel, widths=(W, W // 2, W // 4, W // 8))

    y_flat = pl.pallas_call(
        kernel,
        out_shape=jax.ShapeDtypeStruct((1, M), f32),
        grid=(1,),
        in_specs=[full_spec(a.shape) for a in inputs],
        out_specs=full_spec((1, M)),
        scratch_shapes=[pltpu.VMEM((32, _EXT + M + W + 8), jnp.float32)],
        compiler_params=pltpu.CompilerParams(
            dimension_semantics=("arbitrary",)),
    )(*inputs)

    return y_flat.reshape(N, 1, H, W)


# ----------------------------------------------------------------------------
# Parameter init (PyTorch-default-style) and self-contained run.
# ----------------------------------------------------------------------------
def init_params(key):
    conv_specs = [("1", 1, 8), ("2", 8, 32), ("3", 32, 1),
                  ("4", 1, 32), ("5", 32, 16), ("6", 16, 1)]
    bn_specs = [("1", 8), ("2", 32), ("3", 1), ("4", 32), ("5", 16), ("6", 1)]
    keys = jax.random.split(key, 2 * len(conv_specs))
    params = {}
    for i, (name, cin, cout) in enumerate(conv_specs):
        bound = 1.0 / np.sqrt(cin * 9)
        params["w" + name] = jax.random.uniform(
            keys[2 * i], (cout, cin, 3, 3), jnp.float32, -bound, bound)
        params["b" + name] = jax.random.uniform(
            keys[2 * i + 1], (cout,), jnp.float32, -bound, bound)
    for name, c in bn_specs:
        params["bn" + name + "_g"] = jnp.ones((c,), jnp.float32)   # gamma
        params["bn" + name + "_b"] = jnp.zeros((c,), jnp.float32)  # beta
    return params


if __name__ == "__main__":
    key = jax.random.PRNGKey(0)
    kx, kp = jax.random.split(key)
    x = jax.random.normal(kx, (2, 1, 16, 16), jnp.float32)   # NCHW, like PyTorch
    params = init_params(kp)

    fwd = jax.jit(autoencoder_forward)
    y = jax.block_until_ready(fwd(x, params))

    assert y.shape == (2, 1, 16, 16)
    assert bool(jnp.all(jnp.isfinite(y)))
    assert bool(jnp.all((y >= 0.0) & (y <= 1.0)))            # sigmoid output range
    print("KERNEL_OK")
</pallas_src>

<mosaic_0001>
module attributes {stable_mosaic.version = 11 : i64} {
  func.func @_autoencoder_kernel(%arg0: i32, %arg1: memref<1x512xf32, #tpu.memory_space<vmem>>, %arg2: memref<9x8x1xf32, #tpu.memory_space<vmem>>, %arg3: memref<9x32x8xf32, #tpu.memory_space<vmem>>, %arg4: memref<9x1x32xf32, #tpu.memory_space<vmem>>, %arg5: memref<9x32x1xf32, #tpu.memory_space<vmem>>, %arg6: memref<9x16x32xf32, #tpu.memory_space<vmem>>, %arg7: memref<9x1x16xf32, #tpu.memory_space<vmem>>, %arg8: memref<8x1xf32, #tpu.memory_space<vmem>>, %arg9: memref<32x1xf32, #tpu.memory_space<vmem>>, %arg10: memref<1x1xf32, #tpu.memory_space<vmem>>, %arg11: memref<32x1xf32, #tpu.memory_space<vmem>>, %arg12: memref<16x1xf32, #tpu.memory_space<vmem>>, %arg13: memref<1x1xf32, #tpu.memory_space<vmem>>, %arg14: memref<9x512xf32, #tpu.memory_space<vmem>>, %arg15: memref<9x128xf32, #tpu.memory_space<vmem>>, %arg16: memref<9x32xf32, #tpu.memory_space<vmem>>, %arg17: memref<9x8xf32, #tpu.memory_space<vmem>>, %arg18: memref<512x128xf32, #tpu.memory_space<vmem>>, %arg19: memref<128x32xf32, #tpu.memory_space<vmem>>, %arg20: memref<32x8xf32, #tpu.memory_space<vmem>>, %arg21: memref<8x32xf32, #tpu.memory_space<vmem>>, %arg22: memref<32x128xf32, #tpu.memory_space<vmem>>, %arg23: memref<128x512xf32, #tpu.memory_space<vmem>>, %arg24: memref<8x2xf32, #tpu.memory_space<vmem>>, %arg25: memref<32x2xf32, #tpu.memory_space<vmem>>, %arg26: memref<1x2xf32, #tpu.memory_space<vmem>>, %arg27: memref<32x2xf32, #tpu.memory_space<vmem>>, %arg28: memref<16x2xf32, #tpu.memory_space<vmem>>, %arg29: memref<1x2xf32, #tpu.memory_space<vmem>>, %arg30: memref<1x512xf32, #tpu.memory_space<vmem>>, %arg31: memref<32x664xf32, #tpu.memory_space<vmem>>) attributes {dimension_semantics = [#tpu.dimension_semantics<arbitrary>], iteration_bounds = array<i64: 1>, scalar_prefetch = 0 : i64, scratch_operands = 1 : i64, tpu.core_type = #tpu.core_type<tc>, window_params = [{pipeline_mode = #tpu.pipeline_mode<synchronous>, transform_indices = @transform_0, window_bounds = array<i64: 1, 512>}, {pipeline_mode = #tpu.pipeline_mode<synchronous>, transform_indices = @transform_1, window_bounds = array<i64: 9, 8, 1>}, {pipeline_mode = #tpu.pipeline_mode<synchronous>, transform_indices = @transform_2, window_bounds = array<i64: 9, 32, 8>}, {pipeline_mode = #tpu.pipeline_mode<synchronous>, transform_indices = @transform_3, window_bounds = array<i64: 9, 1, 32>}, {pipeline_mode = #tpu.pipeline_mode<synchronous>, transform_indices = @transform_4, window_bounds = array<i64: 9, 32, 1>}, {pipeline_mode = #tpu.pipeline_mode<synchronous>, transform_indices = @transform_5, window_bounds = array<i64: 9, 16, 32>}, {pipeline_mode = #tpu.pipeline_mode<synchronous>, transform_indices = @transform_6, window_bounds = array<i64: 9, 1, 16>}, {pipeline_mode = #tpu.pipeline_mode<synchronous>, transform_indices = @transform_7, window_bounds = array<i64: 8, 1>}, {pipeline_mode = #tpu.pipeline_mode<synchronous>, transform_indices = @transform_8, window_bounds = array<i64: 32, 1>}, {pipeline_mode = #tpu.pipeline_mode<synchronous>, transform_indices = @transform_9, window_bounds = array<i64: 1, 1>}, {pipeline_mode = #tpu.pipeline_mode<synchronous>, transform_indices = @transform_10, window_bounds = array<i64: 32, 1>}, {pipeline_mode = #tpu.pipeline_mode<synchronous>, transform_indices = @transform_11, window_bounds = array<i64: 16, 1>}, {pipeline_mode = #tpu.pipeline_mode<synchronous>, transform_indices = @transform_12, window_bounds = array<i64: 1, 1>}, {pipeline_mode = #tpu.pipeline_mode<synchronous>, transform_indices = @transform_13, window_bounds = array<i64: 9, 512>}, {pipeline_mode = #tpu.pipeline_mode<synchronous>, transform_indices = @transform_14, window_bounds = array<i64: 9, 128>}, {pipeline_mode = #tpu.pipeline_mode<synchronous>, transform_indices = @transform_15, window_bounds = array<i64: 9, 32>}, {pipeline_mode = #tpu.pipeline_mode<synchronous>, transform_indices = @transform_16, window_bounds = array<i64: 9, 8>}, {pipeline_mode = #tpu.pipeline_mode<synchronous>, transform_indices = @transform_17, window_bounds = array<i64: 512, 128>}, {pipeline_mode = #tpu.pipeline_mode<synchronous>, transform_indices = @transform_18, window_bounds = array<i64: 128, 32>}, {pipeline_mode = #tpu.pipeline_mode<synchronous>, transform_indices = @transform_19, window_bounds = array<i64: 32, 8>}, {pipeline_mode = #tpu.pipeline_mode<synchronous>, transform_indices = @transform_20, window_bounds = array<i64: 8, 32>}, {pipeline_mode = #tpu.pipeline_mode<synchronous>, transform_indices = @transform_21, window_bounds = array<i64: 32, 128>}, {pipeline_mode = #tpu.pipeline_mode<synchronous>, transform_indices = @transform_22, window_bounds = array<i64: 128, 512>}, {pipeline_mode = #tpu.pipeline_mode<synchronous>, transform_indices = @transform_23, window_bounds = array<i64: 8, 2>}, {pipeline_mode = #tpu.pipeline_mode<synchronous>, transform_indices = @transform_24, window_bounds = array<i64: 32, 2>}, {pipeline_mode = #tpu.pipeline_mode<synchronous>, transform_indices = @transform_25, window_bounds = array<i64: 1, 2>}, {pipeline_mode = #tpu.pipeline_mode<synchronous>, transform_indices = @transform_26, window_bounds = array<i64: 32, 2>}, {pipeline_mode = #tpu.pipeline_mode<synchronous>, transform_indices = @transform_27, window_bounds = array<i64: 16, 2>}, {pipeline_mode = #tpu.pipeline_mode<synchronous>, transform_indices = @transform_28, window_bounds = array<i64: 1, 2>}, {pipeline_mode = #tpu.pipeline_mode<synchronous>, transform_indices = @transform_29, window_bounds = array<i64: 1, 512>}]} {
    %cst = arith.constant 0.000000e+00 : f32
    %0 = vector.broadcast %cst : f32 to vector<32x664xf32>
    %c0 = arith.constant 0 : index
    %c0_0 = arith.constant 0 : index
    %1 = vector.load %arg31[%c0, %c0_0] : memref<32x664xf32, #tpu.memory_space<vmem>>, vector<32x664xf32>
    tpu.vector_store %arg31[%c0, %c0_0], %0 {strides = array<i32>} : memref<32x664xf32, #tpu.memory_space<vmem>>, vector<32x664xf32>,
    %c0_1 = arith.constant 0 : index
    %c0_2 = arith.constant 0 : index
    %2 = vector.load %arg1[%c0_1, %c0_2] : memref<1x512xf32, #tpu.memory_space<vmem>>, vector<1x512xf32>
    %c0_3 = arith.constant 0 : index
    %c128 = arith.constant 128 : index
    %3 = vector.load %arg31[%c0_3, %c128] : memref<32x664xf32, #tpu.memory_space<vmem>>, vector<1x512xf32>
    tpu.vector_store %arg31[%c0_3, %c128], %2 {strides = array<i32>} : memref<32x664xf32, #tpu.memory_space<vmem>>, vector<1x512xf32>,
    %c0_4 = arith.constant 0 : index
    %c0_5 = arith.constant 0 : index
    %4 = vector.load %arg14[%c0_4, %c0_5] : memref<9x512xf32, #tpu.memory_space<vmem>>, vector<9x512xf32>
    %cst_6 = arith.constant 0.000000e+00 : f32
    %5 = vector.broadcast %cst_6 : f32 to vector<8x512xf32>
    %c0_7 = arith.constant 0 : index
    %c111 = arith.constant 111 : index
    %6 = vector.load %arg31[%c0_7, %c111] : memref<32x664xf32, #tpu.memory_space<vmem>>, vector<1x512xf32>
    %7 = vector.extract_strided_slice %4 {offsets = [0, 0], sizes = [1, 512], strides = [1, 1]} : vector<9x512xf32> to vector<1x512xf32>
    %8 = arith.mulf %6, %7 : vector<1x512xf32>
    %c0_8 = arith.constant 0 : index
    %c0_9 = arith.constant 0 : index
    %c0_10 = arith.constant 0 : index
    %9 = vector.load %arg2[%c0_8, %c0_9, %c0_10] : memref<9x8x1xf32, #tpu.memory_space<vmem>>, vector<1x8x1xf32>
    %10 = vector.shape_cast %9 : vector<1x8x1xf32> to vector<8x1xf32>
    %11 = vector.broadcast %10 : vector<8x1xf32> to vector<8x512xf32>
    %12 = vector.broadcast %8 : vector<1x512xf32> to vector<8x512xf32>
    %13 = arith.mulf %11, %12 : vector<8x512xf32>
    %14 = arith.addf %5, %13 : vector<8x512xf32>
    %c0_11 = arith.constant 0 : index
    %c112 = arith.constant 112 : index
    %15 = vector.load %arg31[%c0_11, %c112] : memref<32x664xf32, #tpu.memory_space<vmem>>, vector<1x512xf32>
    %16 = vector.extract_strided_slice %4 {offsets = [1, 0], sizes = [1, 512], strides = [1, 1]} : vector<9x512xf32> to vector<1x512xf32>
    %17 = arith.mulf %15, %16 : vector<1x512xf32>
    %c1 = arith.constant 1 : index
    %c0_12 = arith.constant 0 : index
    %c0_13 = arith.constant 0 : index
    %18 = vector.load %arg2[%c1, %c0_12, %c0_13] : memref<9x8x1xf32, #tpu.memory_space<vmem>>, vector<1x8x1xf32>
    %19 = vector.shape_cast %18 : vector<1x8x1xf32> to vector<8x1xf32>
    %20 = vector.broadcast %19 : vector<8x1xf32> to vector<8x512xf32>
    %21 = vector.broadcast %17 : vector<1x512xf32> to vector<8x512xf32>
    %22 = arith.mulf %20, %21 : vector<8x512xf32>
    %23 = arith.addf %14, %22 : vector<8x512xf32>
    %c0_14 = arith.constant 0 : index
    %c113 = arith.constant 113 : index
    %24 = vector.load %arg31[%c0_14, %c113] : memref<32x664xf32, #tpu.memory_space<vmem>>, vector<1x512xf32>
    %25 = vector.extract_strided_slice %4 {offsets = [2, 0], sizes = [1, 512], strides = [1, 1]} : vector<9x512xf32> to vector<1x512xf32>
    %26 = arith.mulf %24, %25 : vector<1x512xf32>
    %c2 = arith.constant 2 : index
    %c0_15 = arith.constant 0 : index
    %c0_16 = arith.constant 0 : index
    %27 = vector.load %arg2[%c2, %c0_15, %c0_16] : memref<9x8x1xf32, #tpu.memory_space<vmem>>, vector<1x8x1xf32>
    %28 = vector.shape_cast %27 : vector<1x8x1xf32> to vector<8x1xf32>
    %29 = vector.broadcast %28 : vector<8x1xf32> to vector<8x512xf32>
    %30 = vector.broadcast %26 : vector<1x512xf32> to vector<8x512xf32>
    %31 = arith.mulf %29, %30 : vector<8x512xf32>
    %32 = arith.addf %23, %31 : vector<8x512xf32>
    %c0_17 = arith.constant 0 : index
    %c127 = arith.constant 127 : index
    %33 = vector.load %arg31[%c0_17, %c127] : memref<32x664xf32, #tpu.memory_space<vmem>>, vector<1x512xf32>
    %34 = vector.extract_strided_slice %4 {offsets = [3, 0], sizes = [1, 512], strides = [1, 1]} : vector<9x512xf32> to vector<1x512xf32>
    %35 = arith.mulf %33, %34 : vector<1x512xf32>
    %c3 = arith.constant 3 : index
    %c0_18 = arith.constant 0 : index
    %c0_19 = arith.constant 0 : index
    %36 = vector.load %arg2[%c3, %c0_18, %c0_19] : memref<9x8x1xf32, #tpu.memory_space<vmem>>, vector<1x8x1xf32>
    %37 = vector.shape_cast %36 : vector<1x8x1xf32> to vector<8x1xf32>
    %38 = vector.broadcast %37 : vector<8x1xf32> to vector<8x512xf32>
    %39 = vector.broadcast %35 : vector<1x512xf32> to vector<8x512xf32>
    %40 = arith.mulf %38, %39 : vector<8x512xf32>
    %41 = arith.addf %32, %40 : vector<8x512xf32>
    %c0_20 = arith.constant 0 : index
    %c128_21 = arith.constant 128 : index
    %42 = vector.load %arg31[%c0_20, %c128_21] : memref<32x664xf32, #tpu.memory_space<vmem>>, vector<1x512xf32>
    %43 = vector.extract_strided_slice %4 {offsets = [4, 0], sizes = [1, 512], strides = [1, 1]} : vector<9x512xf32> to vector<1x512xf32>
    %44 = arith.mulf %42, %43 : vector<1x512xf32>
    %c4 = arith.constant 4 : index
    %c0_22 = arith.constant 0 : index
    %c0_23 = arith.constant 0 : index
    %45 = vector.load %arg2[%c4, %c0_22, %c0_23] : memref<9x8x1xf32, #tpu.memory_space<vmem>>, vector<1x8x1xf32>
    %46 = vector.shape_cast %45 : vector<1x8x1xf32> to vector<8x1xf32>
    %47 = vector.broadcast %46 : vector<8x1xf32> to vector<8x512xf32>
    %48 = vector.broadcast %44 : vector<1x512xf32> to vector<8x512xf32>
    %49 = arith.mulf %47, %48 : vector<8x512xf32>
    %50 = arith.addf %41, %49 : vector<8x512xf32>
    %c0_24 = arith.constant 0 : index
    %c129 = arith.constant 129 : index
    %51 = vector.load %arg31[%c0_24, %c129] : memref<32x664xf32, #tpu.memory_space<vmem>>, vector<1x512xf32>
    %52 = vector.extract_strided_slice %4 {offsets = [5, 0], sizes = [1, 512], strides = [1, 1]} : vector<9x512xf32> to vector<1x512xf32>
    %53 = arith.mulf %51, %52 : vector<1x512xf32>
    %c5 = arith.constant 5 : index
    %c0_25 = arith.constant 0 : index
    %c0_26 = arith.constant 0 : index
    %54 = vector.load %arg2[%c5, %c0_25, %c0_26] : memref<9x8x1xf32, #tpu.memory_space<vmem>>, vector<1x8x1xf32>
    %55 = vector.shape_cast %54 : vector<1x8x1xf32> to vector<8x1xf32>
    %56 = vector.broadcast %55 : vector<8x1xf32> to vector<8x512xf32>
    %57 = vector.broadcast %53 : vector<1x512xf32> to vector<8x512xf32>
    %58 = arith.mulf %56, %57 : vector<8x512xf32>
    %59 = arith.addf %50, %58 : vector<8x512xf32>
    %c0_27 = arith.constant 0 : index
    %c143 = arith.constant 143 : index
    %60 = vector.load %arg31[%c0_27, %c143] : memref<32x664xf32, #tpu.memory_space<vmem>>, vector<1x512xf32>
    %61 = vector.extract_strided_slice %4 {offsets = [6, 0], sizes = [1, 512], strides = [1, 1]} : vector<9x512xf32> to vector<1x512xf32>
    %62 = arith.mulf %60, %61 : vector<1x512xf32>
    %c6 = arith.constant 6 : index
    %c0_28 = arith.constant 0 : index
    %c0_29 = arith.constant 0 : index
    %63 = vector.load %arg2[%c6, %c0_28, %c0_29] : memref<9x8x1xf32, #tpu.memory_space<vmem>>, vector<1x8x1xf32>
    %64 = vector.shape_cast %63 : vector<1x8x1xf32> to vector<8x1xf32>
    %65 = vector.broadcast %64 : vector<8x1xf32> to vector<8x512xf32>
    %66 = vector.broadcast %62 : vector<1x512xf32> to vector<8x512xf32>
    %67 = arith.mulf %65, %66 : vector<8x512xf32>
    %68 = arith.addf %59, %67 : vector<8x512xf32>
    %c0_30 = arith.constant 0 : index
    %c144 = arith.constant 144 : index
    %69 = vector.load %arg31[%c0_30, %c144] : memref<32x664xf32, #tpu.memory_space<vmem>>, vector<1x512xf32>
    %70 = vector.extract_strided_slice %4 {offsets = [7, 0], sizes = [1, 512], strides = [1, 1]} : vector<9x512xf32> to vector<1x512xf32>
    %71 = arith.mulf %69, %70 : vector<1x512xf32>
    %c7 = arith.constant 7 : index
    %c0_31 = arith.constant 0 : index
    %c0_32 = arith.constant 0 : index
    %72 = vector.load %arg2[%c7, %c0_31, %c0_32] : memref<9x8x1xf32, #tpu.memory_space<vmem>>, vector<1x8x1xf32>
    %73 = vector.shape_cast %72 : vector<1x8x1xf32> to vector<8x1xf32>
    %74 = vector.broadcast %73 : vector<8x1xf32> to vector<8x512xf32>
    %75 = vector.broadcast %71 : vector<1x512xf32> to vector<8x512xf32>
    %76 = arith.mulf %74, %75 : vector<8x512xf32>
    %77 = arith.addf %68, %76 : vector<8x512xf32>
    %c0_33 = arith.constant 0 : index
    %c145 = arith.constant 145 : index
    %78 = vector.load %arg31[%c0_33, %c145] : memref<32x664xf32, #tpu.memory_space<vmem>>, vector<1x512xf32>
    %79 = vector.extract_strided_slice %4 {offsets = [8, 0], sizes = [1, 512], strides = [1, 1]} : vector<9x512xf32> to vector<1x512xf32>
    %80 = arith.mulf %78, %79 : vector<1x512xf32>
    %c8 = arith.constant 8 : index
    %c0_34 = arith.constant 0 : index
    %c0_35 = arith.constant 0 : index
    %81 = vector.load %arg2[%c8, %c0_34, %c0_35] : memref<9x8x1xf32, #tpu.memory_space<vmem>>, vector<1x8x1xf32>
    %82 = vector.shape_cast %81 : vector<1x8x1xf32> to vector<8x1xf32>
    %83 = vector.broadcast %82 : vector<8x1xf32> to vector<8x512xf32>
    %84 = vector.broadcast %80 : vector<1x512xf32> to vector<8x512xf32>
    %85 = arith.mulf %83, %84 : vector<8x512xf32>
    %86 = arith.addf %77, %85 : vector<8x512xf32>
    %c0_36 = arith.constant 0 : index
    %c0_37 = arith.constant 0 : index
    %87 = vector.load %arg8[%c0_36, %c0_37] : memref<8x1xf32, #tpu.memory_space<vmem>>, vector<8x1xf32>
    %88 = vector.broadcast %87 : vector<8x1xf32> to vector<8x512xf32>
    %89 = arith.addf %86, %88 : vector<8x512xf32>
    %c0_38 = arith.constant 0 : index
    %c128_39 = arith.constant 128 : index
    %90 = vector.load %arg31[%c0_38, %c128_39] : memref<32x664xf32, #tpu.memory_space<vmem>>, vector<8x512xf32>
    tpu.vector_store %arg31[%c0_38, %c128_39], %89 {strides = array<i32>} : memref<32x664xf32, #tpu.memory_space<vmem>>, vector<8x512xf32>,
    %c0_40 = arith.constant 0 : index
    %c128_41 = arith.constant 128 : index
    %91 = vector.load %arg31[%c0_40, %c128_41] : memref<32x664xf32, #tpu.memory_space<vmem>>, vector<8x512xf32>
    %c0_42 = arith.constant 0 : index
    %c129_43 = arith.constant 129 : index
    %92 = vector.load %arg31[%c0_42, %c129_43] : memref<32x664xf32, #tpu.memory_space<vmem>>, vector<8x512xf32>
    %93 = arith.maximumf %91, %92 : vector<8x512xf32>
    %c0_44 = arith.constant 0 : index
    %c144_45 = arith.constant 144 : index
    %94 = vector.load %arg31[%c0_44, %c144_45] : memref<32x664xf32, #tpu.memory_space<vmem>>, vector<8x512xf32>
    %c0_46 = arith.constant 0 : index
    %c145_47 = arith.constant 145 : index
    %95 = vector.load %arg31[%c0_46, %c145_47] : memref<32x664xf32, #tpu.memory_space<vmem>>, vector<8x512xf32>
    %96 = arith.maximumf %94, %95 : vector<8x512xf32>
    %97 = arith.maximumf %93, %96 : vector<8x512xf32>
    %c0_48 = arith.constant 0 : index
    %c0_49 = arith.constant 0 : index
    %98 = vector.load %arg18[%c0_48, %c0_49] : memref<512x128xf32, #tpu.memory_space<vmem>>, vector<512x128xf32>
    %cst_50 = arith.constant dense<0.000000e+00> : vector<8x128xf32>
    %99 = tpu.matmul %97, %98, %cst_50 {dimension_numbers = #tpu.dot_dimension_numbers<[1], [0], [0], [1], [0, 0, 1, 1], [], []>} : vector<8x512xf32>, vector<512x128xf32>, vector<8x128xf32> -> vector<8x128xf32>
    %cst_51 = arith.constant dense<0.000000e+00> : vector<8xf32>
    %100 = vector.multi_reduction <add>, %99, %cst_51 [1] : vector<8x128xf32> to vector<8xf32>
    %101 = vector.shape_cast %100 : vector<8xf32> to vector<8x1xf32>
    %cst_52 = arith.constant 1.280000e+02 : f32
    %102 = vector.broadcast %cst_52 : f32 to vector<8x1xf32>
    %103 = arith.divf %101, %102 : vector<8x1xf32>
    %104 = vector.broadcast %103 : vector<8x1xf32> to vector<8x128xf32>
    %105 = arith.subf %99, %104 : vector<8x128xf32>
    %106 = arith.mulf %105, %105 : vector<8x128xf32>
    %cst_53 = arith.constant dense<0.000000e+00> : vector<8xf32>
    %107 = vector.multi_reduction <add>, %106, %cst_53 [1] : vector<8x128xf32> to vector<8xf32>
    %108 = vector.shape_cast %107 : vector<8xf32> to vector<8x1xf32>
    %cst_54 = arith.constant 1.280000e+02 : f32
    %109 = vector.broadcast %cst_54 : f32 to vector<8x1xf32>
    %110 = arith.divf %108, %109 : vector<8x1xf32>
    %c0_55 = arith.constant 0 : index
    %c0_56 = arith.constant 0 : index
    %111 = vector.load %arg24[%c0_55, %c0_56] : memref<8x2xf32, #tpu.memory_space<vmem>>, vector<8x1xf32>
    %c0_57 = arith.constant 0 : index
    %c1_58 = arith.constant 1 : index
    %112 = vector.load %arg24[%c0_57, %c1_58] : memref<8x2xf32, #tpu.memory_space<vmem>>, vector<8x1xf32>
    %cst_59 = arith.constant 9.99999974E-6 : f32
    %113 = vector.broadcast %cst_59 : f32 to vector<8x1xf32>
    %114 = arith.addf %110, %113 : vector<8x1xf32>
    %115 = math.rsqrt %114 : vector<8x1xf32>
    %116 = vector.broadcast %115 : vector<8x1xf32> to vector<8x128xf32>
    %117 = arith.mulf %105, %116 : vector<8x128xf32>
    %118 = vector.broadcast %111 : vector<8x1xf32> to vector<8x128xf32>
    %119 = arith.mulf %117, %118 : vector<8x128xf32>
    %120 = vector.broadcast %112 : vector<8x1xf32> to vector<8x128xf32>
    %121 = arith.addf %119, %120 : vector<8x128xf32>
    %cst_60 = arith.constant 0.000000e+00 : f32
    %122 = vector.broadcast %cst_60 : f32 to vector<8x128xf32>
    %123 = arith.maximumf %121, %122 : vector<8x128xf32>
    %c0_61 = arith.constant 0 : index
    %c128_62 = arith.constant 128 : index
    %124 = vector.load %arg31[%c0_61, %c128_62] : memref<32x664xf32, #tpu.memory_space<vmem>>, vector<8x128xf32>
    tpu.vector_store %arg31[%c0_61, %c128_62], %123 {strides = array<i32>} : memref<32x664xf32, #tpu.memory_space<vmem>>, vector<8x128xf32>,
    %c0_63 = arith.constant 0 : index
    %c0_64 = arith.constant 0 : index
    %125 = vector.load %arg15[%c0_63, %c0_64] : memref<9x128xf32, #tpu.memory_space<vmem>>, vector<9x128xf32>
    %cst_65 = arith.constant 0.000000e+00 : f32
    %126 = vector.broadcast %cst_65 : f32 to vector<32x128xf32>
    %c0_66 = arith.constant 0 : index
    %c119 = arith.constant 119 : index
    %127 = vector.load %arg31[%c0_66, %c119] : memref<32x664xf32, #tpu.memory_space<vmem>>, vector<8x128xf32>
    %128 = vector.extract_strided_slice %125 {offsets = [0, 0], sizes = [1, 128], strides = [1, 1]} : vector<9x128xf32> to vector<1x128xf32>
    %129 = vector.broadcast %128 : vector<1x128xf32> to vector<8x128xf32>
    %130 = arith.mulf %127, %129 : vector<8x128xf32>
    %c0_67 = arith.constant 0 : index
    %c0_68 = arith.constant 0 : index
    %c0_69 = arith.constant 0 : index
    %131 = vector.load %arg3[%c0_67, %c0_68, %c0_69] : memref<9x32x8xf32, #tpu.memory_space<vmem>>, vector<1x32x8xf32>
    %132 = vector.shape_cast %131 : vector<1x32x8xf32> to vector<32x8xf32>
    %cst_70 = arith.constant dense<0.000000e+00> : vector<32x128xf32>
    %133 = tpu.matmul %132, %130, %cst_70 {dimension_numbers = #tpu.dot_dimension_numbers<[1], [0], [0], [1], [0, 0, 1, 1], [], []>} : vector<32x8xf32>, vector<8x128xf32>, vector<32x128xf32> -> vector<32x128xf32>
    %134 = arith.addf %126, %133 : vector<32x128xf32>
    %c0_71 = arith.constant 0 : index
    %c120 = arith.constant 120 : index
    %135 = vector.load %arg31[%c0_71, %c120] : memref<32x664xf32, #tpu.memory_space<vmem>>, vector<8x128xf32>
    %136 = vector.extract_strided_slice %125 {offsets = [1, 0], sizes = [1, 128], strides = [1, 1]} : vector<9x128xf32> to vector<1x128xf32>
    %137 = vector.broadcast %136 : vector<1x128xf32> to vector<8x128xf32>
    %138 = arith.mulf %135, %137 : vector<8x128xf32>
    %c1_72 = arith.constant 1 : index
    %c0_73 = arith.constant 0 : index
    %c0_74 = arith.constant 0 : index
    %139 = vector.load %arg3[%c1_72, %c0_73, %c0_74] : memref<9x32x8xf32, #tpu.memory_space<vmem>>, vector<1x32x8xf32>
    %140 = vector.shape_cast %139 : vector<1x32x8xf32> to vector<32x8xf32>
    %cst_75 = arith.constant dense<0.000000e+00> : vector<32x128xf32>
    %141 = tpu.matmul %140, %138, %cst_75 {dimension_numbers = #tpu.dot_dimension_numbers<[1], [0], [0], [1], [0, 0, 1, 1], [], []>} : vector<32x8xf32>, vector<8x128xf32>, vector<32x128xf32> -> vector<32x128xf32>
    %142 = arith.addf %134, %141 : vector<32x128xf32>
    %c0_76 = arith.constant 0 : index
    %c121 = arith.constant 121 : index
    %143 = vector.load %arg31[%c0_76, %c121] : memref<32x664xf32, #tpu.memory_space<vmem>>, vector<8x128xf32>
    %144 = vector.extract_strided_slice %125 {offsets = [2, 0], sizes = [1, 128], strides = [1, 1]} : vector<9x128xf32> to vector<1x128xf32>
    %145 = vector.broadcast %144 : vector<1x128xf32> to vector<8x128xf32>
    %146 = arith.mulf %143, %145 : vector<8x128xf32>
    %c2_77 = arith.constant 2 : index
    %c0_78 = arith.constant 0 : index
    %c0_79 = arith.constant 0 : index
    %147 = vector.load %arg3[%c2_77, %c0_78, %c0_79] : memref<9x32x8xf32, #tpu.memory_space<vmem>>, vector<1x32x8xf32>
    %148 = vector.shape_cast %147 : vector<1x32x8xf32> to vector<32x8xf32>
    %cst_80 = arith.constant dense<0.000000e+00> : vector<32x128xf32>
    %149 = tpu.matmul %148, %146, %cst_80 {dimension_numbers = #tpu.dot_dimension_numbers<[1], [0], [0], [1], [0, 0, 1, 1], [], []>} : vector<32x8xf32>, vector<8x128xf32>, vector<32x128xf32> -> vector<32x128xf32>
    %150 = arith.addf %142, %149 : vector<32x128xf32>
    %c0_81 = arith.constant 0 : index
    %c127_82 = arith.constant 127 : index
    %151 = vector.load %arg31[%c0_81, %c127_82] : memref<32x664xf32, #tpu.memory_space<vmem>>, vector<8x128xf32>
    %152 = vector.extract_strided_slice %125 {offsets = [3, 0], sizes = [1, 128], strides = [1, 1]} : vector<9x128xf32> to vector<1x128xf32>
    %153 = vector.broadcast %152 : vector<1x128xf32> to vector<8x128xf32>
    %154 = arith.mulf %151, %153 : vector<8x128xf32>
    %c3_83 = arith.constant 3 : index
    %c0_84 = arith.constant 0 : index
    %c0_85 = arith.constant 0 : index
    %155 = vector.load %arg3[%c3_83, %c0_84, %c0_85] : memref<9x32x8xf32, #tpu.memory_space<vmem>>, vector<1x32x8xf32>
    %156 = vector.shape_cast %155 : vector<1x32x8xf32> to vector<32x8xf32>
    %cst_86 = arith.constant dense<0.000000e+00> : vector<32x128xf32>
    %157 = tpu.matmul %156, %154, %cst_86 {dimension_numbers = #tpu.dot_dimension_numbers<[1], [0], [0], [1], [0, 0, 1, 1], [], []>} : vector<32x8xf32>, vector<8x128xf32>, vector<32x128xf32> -> vector<32x128xf32>
    %158 = arith.addf %150, %157 : vector<32x128xf32>
    %c0_87 = arith.constant 0 : index
    %c128_88 = arith.constant 128 : index
    %159 = vector.load %arg31[%c0_87, %c128_88] : memref<32x664xf32, #tpu.memory_space<vmem>>, vector<8x128xf32>
    %160 = vector.extract_strided_slice %125 {offsets = [4, 0], sizes = [1, 128], strides = [1, 1]} : vector<9x128xf32> to vector<1x128xf32>
    %161 = vector.broadcast %160 : vector<1x128xf32> to vector<8x128xf32>
    %162 = arith.mulf %159, %161 : vector<8x128xf32>
    %c4_89 = arith.constant 4 : index
    %c0_90 = arith.constant 0 : index
    %c0_91 = arith.constant 0 : index
    %163 = vector.load %arg3[%c4_89, %c0_90, %c0_91] : memref<9x32x8xf32, #tpu.memory_space<vmem>>, vector<1x32x8xf32>
    %164 = vector.shape_cast %163 : vector<1x32x8xf32> to vector<32x8xf32>
    %cst_92 = arith.constant dense<0.000000e+00> : vector<32x128xf32>
    %165 = tpu.matmul %164, %162, %cst_92 {dimension_numbers = #tpu.dot_dimension_numbers<[1], [0], [0], [1], [0, 0, 1, 1], [], []>} : vector<32x8xf32>, vector<8x128xf32>, vector<32x128xf32> -> vector<32x128xf32>
    %166 = arith.addf %158, %165 : vector<32x128xf32>
    %c0_93 = arith.constant 0 : index
    %c129_94 = arith.constant 129 : index
    %167 = vector.load %arg31[%c0_93, %c129_94] : memref<32x664xf32, #tpu.memory_space<vmem>>, vector<8x128xf32>
    %168 = vector.extract_strided_slice %125 {offsets = [5, 0], sizes = [1, 128], strides = [1, 1]} : vector<9x128xf32> to vector<1x128xf32>
    %169 = vector.broadcast %168 : vector<1x128xf32> to vector<8x128xf32>
    %170 = arith.mulf %167, %169 : vector<8x128xf32>
    %c5_95 = arith.constant 5 : index
    %c0_96 = arith.constant 0 : index
    %c0_97 = arith.constant 0 : index
    %171 = vector.load %arg3[%c5_95, %c0_96, %c0_97] : memref<9x32x8xf32, #tpu.memory_space<vmem>>, vector<1x32x8xf32>
    %172 = vector.shape_cast %171 : vector<1x32x8xf32> to vector<32x8xf32>
    %cst_98 = arith.constant dense<0.000000e+00> : vector<32x128xf32>
    %173 = tpu.matmul %172, %170, %cst_98 {dimension_numbers = #tpu.dot_dimension_numbers<[1], [0], [0], [1], [0, 0, 1, 1], [], []>} : vector<32x8xf32>, vector<8x128xf32>, vector<32x128xf32> -> vector<32x128xf32>
    %174 = arith.addf %166, %173 : vector<32x128xf32>
    %c0_99 = arith.constant 0 : index
    %c135 = arith.constant 135 : index
    %175 = vector.load %arg31[%c0_99, %c135] : memref<32x664xf32, #tpu.memory_space<vmem>>, vector<8x128xf32>
    %176 = vector.extract_strided_slice %125 {offsets = [6, 0], sizes = [1, 128], strides = [1, 1]} : vector<9x128xf32> to vector<1x128xf32>
    %177 = vector.broadcast %176 : vector<1x128xf32> to vector<8x128xf32>
    %178 = arith.mulf %175, %177 : vector<8x128xf32>
    %c6_100 = arith.constant 6 : index
    %c0_101 = arith.constant 0 : index
    %c0_102 = arith.constant 0 : index
    %179 = vector.load %arg3[%c6_100, %c0_101, %c0_102] : memref<9x32x8xf32, #tpu.memory_space<vmem>>, vector<1x32x8xf32>
    %180 = vector.shape_cast %179 : vector<1x32x8xf32> to vector<32x8xf32>
    %cst_103 = arith.constant dense<0.000000e+00> : vector<32x128xf32>
    %181 = tpu.matmul %180, %178, %cst_103 {dimension_numbers = #tpu.dot_dimension_numbers<[1], [0], [0], [1], [0, 0, 1, 1], [], []>} : vector<32x8xf32>, vector<8x128xf32>, vector<32x128xf32> -> vector<32x128xf32>
    %182 = arith.addf %174, %181 : vector<32x128xf32>
    %c0_104 = arith.constant 0 : index
    %c136 = arith.constant 136 : index
    %183 = vector.load %arg31[%c0_104, %c136] : memref<32x664xf32, #tpu.memory_space<vmem>>, vector<8x128xf32>
    %184 = vector.extract_strided_slice %125 {offsets = [7, 0], sizes = [1, 128], strides = [1, 1]} : vector<9x128xf32> to vector<1x128xf32>
    %185 = vector.broadcast %184 : vector<1x128xf32> to vector<8x128xf32>
    %186 = arith.mulf %183, %185 : vector<8x128xf32>
    %c7_105 = arith.constant 7 : index
    %c0_106 = arith.constant 0 : index
    %c0_107 = arith.constant 0 : index
    %187 = vector.load %arg3[%c7_105, %c0_106, %c0_107] : memref<9x32x8xf32, #tpu.memory_space<vmem>>, vector<1x32x8xf32>
    %188 = vector.shape_cast %187 : vector<1x32x8xf32> to vector<32x8xf32>
    %cst_108 = arith.constant dense<0.000000e+00> : vector<32x128xf32>
    %189 = tpu.matmul %188, %186, %cst_108 {dimension_numbers = #tpu.dot_dimension_numbers<[1], [0], [0], [1], [0, 0, 1, 1], [], []>} : vector<32x8xf32>, vector<8x128xf32>, vector<32x128xf32> -> vector<32x128xf32>
    %190 = arith.addf %182, %189 : vector<32x128xf32>
    %c0_109 = arith.constant 0 : index
    %c137 = arith.constant 137 : index
    %191 = vector.load %arg31[%c0_109, %c137] : memref<32x664xf32, #tpu.memory_space<vmem>>, vector<8x128xf32>
    %192 = vector.extract_strided_slice %125 {offsets = [8, 0], sizes = [1, 128], strides = [1, 1]} : vector<9x128xf32> to vector<1x128xf32>
    %193 = vector.broadcast %192 : vector<1x128xf32> to vector<8x128xf32>
    %194 = arith.mulf %191, %193 : vector<8x128xf32>
    %c8_110 = arith.constant 8 : index
    %c0_111 = arith.constant 0 : index
    %c0_112 = arith.constant 0 : index
    %195 = vector.load %arg3[%c8_110, %c0_111, %c0_112] : memref<9x32x8xf32, #tpu.memory_space<vmem>>, vector<1x32x8xf32>
    %196 = vector.shape_cast %195 : vector<1x32x8xf32> to vector<32x8xf32>
    %cst_113 = arith.constant dense<0.000000e+00> : vector<32x128xf32>
    %197 = tpu.matmul %196, %194, %cst_113 {dimension_numbers = #tpu.dot_dimension_numbers<[1], [0], [0], [1], [0, 0, 1, 1], [], []>} : vector<32x8xf32>, vector<8x128xf32>, vector<32x128xf32> -> vector<32x128xf32>
    %198 = arith.addf %190, %197 : vector<32x128xf32>
    %c0_114 = arith.constant 0 : index
    %c0_115 = arith.constant 0 : index
    %199 = vector.load %arg9[%c0_114, %c0_115] : memref<32x1xf32, #tpu.memory_space<vmem>>, vector<32x1xf32>
    %200 = vector.broadcast %199 : vector<32x1xf32> to vector<32x128xf32>
    %201 = arith.addf %198, %200 : vector<32x128xf32>
    %c0_116 = arith.constant 0 : index
    %c128_117 = arith.constant 128 : index
    %202 = vector.load %arg31[%c0_116, %c128_117] : memref<32x664xf32, #tpu.memory_space<vmem>>, vector<32x128xf32>
    tpu.vector_store %arg31[%c0_116, %c128_117], %201 {strides = array<i32>} : memref<32x664xf32, #tpu.memory_space<vmem>>, vector<32x128xf32>,
    %c0_118 = arith.constant 0 : index
    %c128_119 = arith.constant 128 : index
    %203 = vector.load %arg31[%c0_118, %c128_119] : memref<32x664xf32, #tpu.memory_space<vmem>>, vector<32x128xf32>
    %c0_120 = arith.constant 0 : index
    %c129_121 = arith.constant 129 : index
    %204 = vector.load %arg31[%c0_120, %c129_121] : memref<32x664xf32, #tpu.memory_space<vmem>>, vector<32x128xf32>
    %205 = arith.maximumf %203, %204 : vector<32x128xf32>
    %c0_122 = arith.constant 0 : index
    %c136_123 = arith.constant 136 : index
    %206 = vector.load %arg31[%c0_122, %c136_123] : memref<32x664xf32, #tpu.memory_space<vmem>>, vector<32x128xf32>
    %c0_124 = arith.constant 0 : index
    %c137_125 = arith.constant 137 : index
    %207 = vector.load %arg31[%c0_124, %c137_125] : memref<32x664xf32, #tpu.memory_space<vmem>>, vector<32x128xf32>
    %208 = arith.maximumf %206, %207 : vector<32x128xf32>
    %209 = arith.maximumf %205, %208 : vector<32x128xf32>
    %c0_126 = arith.constant 0 : index
    %c0_127 = arith.constant 0 : index
    %210 = vector.load %arg19[%c0_126, %c0_127] : memref<128x32xf32, #tpu.memory_space<vmem>>, vector<128x32xf32>
    %cst_128 = arith.constant dense<0.000000e+00> : vector<32x32xf32>
    %211 = tpu.matmul %209, %210, %cst_128 {dimension_numbers = #tpu.dot_dimension_numbers<[1], [0], [0], [1], [0, 0, 1, 1], [], []>} : vector<32x128xf32>, vector<128x32xf32>, vector<32x32xf32> -> vector<32x32xf32>
    %cst_129 = arith.constant dense<0.000000e+00> : vector<32xf32>
    %212 = vector.multi_reduction <add>, %211, %cst_129 [1] : vector<32x32xf32> to vector<32xf32>
    %213 = vector.shape_cast %212 : vector<32xf32> to vector<32x1xf32>
    %cst_130 = arith.constant 3.200000e+01 : f32
    %214 = vector.broadcast %cst_130 : f32 to vector<32x1xf32>
    %215 = arith.divf %213, %214 : vector<32x1xf32>
    %216 = vector.broadcast %215 : vector<32x1xf32> to vector<32x32xf32>
    %217 = arith.subf %211, %216 : vector<32x32xf32>
    %218 = arith.mulf %217, %217 : vector<32x32xf32>
    %cst_131 = arith.constant dense<0.000000e+00> : vector<32xf32>
    %219 = vector.multi_reduction <add>, %218, %cst_131 [1] : vector<32x32xf32> to vector<32xf32>
    %220 = vector.shape_cast %219 : vector<32xf32> to vector<32x1xf32>
    %cst_132 = arith.constant 3.200000e+01 : f32
    %221 = vector.broadcast %cst_132 : f32 to vector<32x1xf32>
    %222 = arith.divf %220, %221 : vector<32x1xf32>
    %c0_133 = arith.constant 0 : index
    %c0_134 = arith.constant 0 : index
    %223 = vector.load %arg25[%c0_133, %c0_134] : memref<32x2xf32, #tpu.memory_space<vmem>>, vector<32x1xf32>
    %c0_135 = arith.constant 0 : index
    %c1_136 = arith.constant 1 : index
    %224 = vector.load %arg25[%c0_135, %c1_136] : memref<32x2xf32, #tpu.memory_space<vmem>>, vector<32x1xf32>
    %cst_137 = arith.constant 9.99999974E-6 : f32
    %225 = vector.broadcast %cst_137 : f32 to vector<32x1xf32>
    %226 = arith.addf %222, %225 : vector<32x1xf32>
    %227 = math.rsqrt %226 : vector<32x1xf32>
    %228 = vector.broadcast %227 : vector<32x1xf32> to vector<32x32xf32>
    %229 = arith.mulf %217, %228 : vector<32x32xf32>
    %230 = vector.broadcast %223 : vector<32x1xf32> to vector<32x32xf32>
    %231 = arith.mulf %229, %230 : vector<32x32xf32>
    %232 = vector.broadcast %224 : vector<32x1xf32> to vector<32x32xf32>
    %233 = arith.addf %231, %232 : vector<32x32xf32>
    %cst_138 = arith.constant 0.000000e+00 : f32
    %234 = vector.broadcast %cst_138 : f32 to vector<32x32xf32>
    %235 = arith.maximumf %233, %234 : vector<32x32xf32>
    %c0_139 = arith.constant 0 : index
    %c128_140 = arith.constant 128 : index
    %236 = vector.load %arg31[%c0_139, %c128_140] : memref<32x664xf32, #tpu.memory_space<vmem>>, vector<32x32xf32>
    tpu.vector_store %arg31[%c0_139, %c128_140], %235 {strides = array<i32>} : memref<32x664xf32, #tpu.memory_space<vmem>>, vector<32x32xf32>,
    %c0_141 = arith.constant 0 : index
    %c0_142 = arith.constant 0 : index
    %237 = vector.load %arg16[%c0_141, %c0_142] : memref<9x32xf32, #tpu.memory_space<vmem>>, vector<9x32xf32>
    %cst_143 = arith.constant 0.000000e+00 : f32
    %238 = vector.broadcast %cst_143 : f32 to vector<1x32xf32>
    %c0_144 = arith.constant 0 : index
    %c123 = arith.constant 123 : index
    %239 = vector.load %arg31[%c0_144, %c123] : memref<32x664xf32, #tpu.memory_space<vmem>>, vector<32x32xf32>
    %240 = vector.extract_strided_slice %237 {offsets = [0, 0], sizes = [1, 32], strides = [1, 1]} : vector<9x32xf32> to vector<1x32xf32>
    %241 = vector.broadcast %240 : vector<1x32xf32> to vector<32x32xf32>
    %242 = arith.mulf %239, %241 : vector<32x32xf32>
    %c0_145 = arith.constant 0 : index
    %c0_146 = arith.constant 0 : index
    %c0_147 = arith.constant 0 : index
    %243 = vector.load %arg4[%c0_145, %c0_146, %c0_147] : memref<9x1x32xf32, #tpu.memory_space<vmem>>, vector<1x1x32xf32>
    %244 = vector.shape_cast %243 : vector<1x1x32xf32> to vector<1x32xf32>
    %cst_148 = arith.constant dense<0.000000e+00> : vector<1x32xf32>
    %245 = tpu.matmul %244, %242, %cst_148 {dimension_numbers = #tpu.dot_dimension_numbers<[1], [0], [0], [1], [0, 0, 1, 1], [], []>} : vector<1x32xf32>, vector<32x32xf32>, vector<1x32xf32> -> vector<1x32xf32>
    %246 = arith.addf %238, %245 : vector<1x32xf32>
    %c0_149 = arith.constant 0 : index
    %c124 = arith.constant 124 : index
    %247 = vector.load %arg31[%c0_149, %c124] : memref<32x664xf32, #tpu.memory_space<vmem>>, vector<32x32xf32>
    %248 = vector.extract_strided_slice %237 {offsets = [1, 0], sizes = [1, 32], strides = [1, 1]} : vector<9x32xf32> to vector<1x32xf32>
    %249 = vector.broadcast %248 : vector<1x32xf32> to vector<32x32xf32>
    %250 = arith.mulf %247, %249 : vector<32x32xf32>
    %c1_150 = arith.constant 1 : index
    %c0_151 = arith.constant 0 : index
    %c0_152 = arith.constant 0 : index
    %251 = vector.load %arg4[%c1_150, %c0_151, %c0_152] : memref<9x1x32xf32, #tpu.memory_space<vmem>>, vector<1x1x32xf32>
    %252 = vector.shape_cast %251 : vector<1x1x32xf32> to vector<1x32xf32>
    %cst_153 = arith.constant dense<0.000000e+00> : vector<1x32xf32>
    %253 = tpu.matmul %252, %250, %cst_153 {dimension_numbers = #tpu.dot_dimension_numbers<[1], [0], [0], [1], [0, 0, 1, 1], [], []>} : vector<1x32xf32>, vector<32x32xf32>, vector<1x32xf32> -> vector<1x32xf32>
    %254 = arith.addf %246, %253 : vector<1x32xf32>
    %c0_154 = arith.constant 0 : index
    %c125 = arith.constant 125 : index
    %255 = vector.load %arg31[%c0_154, %c125] : memref<32x664xf32, #tpu.memory_space<vmem>>, vector<32x32xf32>
    %256 = vector.extract_strided_slice %237 {offsets = [2, 0], sizes = [1, 32], strides = [1, 1]} : vector<9x32xf32> to vector<1x32xf32>
    %257 = vector.broadcast %256 : vector<1x32xf32> to vector<32x32xf32>
    %258 = arith.mulf %255, %257 : vector<32x32xf32>
    %c2_155 = arith.constant 2 : index
    %c0_156 = arith.constant 0 : index
    %c0_157 = arith.constant 0 : index
    %259 = vector.load %arg4[%c2_155, %c0_156, %c0_157] : memref<9x1x32xf32, #tpu.memory_space<vmem>>, vector<1x1x32xf32>
    %260 = vector.shape_cast %259 : vector<1x1x32xf32> to vector<1x32xf32>
    %cst_158 = arith.constant dense<0.000000e+00> : vector<1x32xf32>
    %261 = tpu.matmul %260, %258, %cst_158 {dimension_numbers = #tpu.dot_dimension_numbers<[1], [0], [0], [1], [0, 0, 1, 1], [], []>} : vector<1x32xf32>, vector<32x32xf32>, vector<1x32xf32> -> vector<1x32xf32>
    %262 = arith.addf %254, %261 : vector<1x32xf32>
    %c0_159 = arith.constant 0 : index
    %c127_160 = arith.constant 127 : index
    %263 = vector.load %arg31[%c0_159, %c127_160] : memref<32x664xf32, #tpu.memory_space<vmem>>, vector<32x32xf32>
    %264 = vector.extract_strided_slice %237 {offsets = [3, 0], sizes = [1, 32], strides = [1, 1]} : vector<9x32xf32> to vector<1x32xf32>
    %265 = vector.broadcast %264 : vector<1x32xf32> to vector<32x32xf32>
    %266 = arith.mulf %263, %265 : vector<32x32xf32>
    %c3_161 = arith.constant 3 : index
    %c0_162 = arith.constant 0 : index
    %c0_163 = arith.constant 0 : index
    %267 = vector.load %arg4[%c3_161, %c0_162, %c0_163] : memref<9x1x32xf32, #tpu.memory_space<vmem>>, vector<1x1x32xf32>
    %268 = vector.shape_cast %267 : vector<1x1x32xf32> to vector<1x32xf32>
    %cst_164 = arith.constant dense<0.000000e+00> : vector<1x32xf32>
    %269 = tpu.matmul %268, %266, %cst_164 {dimension_numbers = #tpu.dot_dimension_numbers<[1], [0], [0], [1], [0, 0, 1, 1], [], []>} : vector<1x32xf32>, vector<32x32xf32>, vector<1x32xf32> -> vector<1x32xf32>
    %270 = arith.addf %262, %269 : vector<1x32xf32>
    %c0_165 = arith.constant 0 : index
    %c128_166 = arith.constant 128 : index
    %271 = vector.load %arg31[%c0_165, %c128_166] : memref<32x664xf32, #tpu.memory_space<vmem>>, vector<32x32xf32>
    %272 = vector.extract_strided_slice %237 {offsets = [4, 0], sizes = [1, 32], strides = [1, 1]} : vector<9x32xf32> to vector<1x32xf32>
    %273 = vector.broadcast %272 : vector<1x32xf32> to vector<32x32xf32>
    %274 = arith.mulf %271, %273 : vector<32x32xf32>
    %c4_167 = arith.constant 4 : index
    %c0_168 = arith.constant 0 : index
    %c0_169 = arith.constant 0 : index
    %275 = vector.load %arg4[%c4_167, %c0_168, %c0_169] : memref<9x1x32xf32, #tpu.memory_space<vmem>>, vector<1x1x32xf32>
    %276 = vector.shape_cast %275 : vector<1x1x32xf32> to vector<1x32xf32>
    %cst_170 = arith.constant dense<0.000000e+00> : vector<1x32xf32>
    %277 = tpu.matmul %276, %274, %cst_170 {dimension_numbers = #tpu.dot_dimension_numbers<[1], [0], [0], [1], [0, 0, 1, 1], [], []>} : vector<1x32xf32>, vector<32x32xf32>, vector<1x32xf32> -> vector<1x32xf32>
    %278 = arith.addf %270, %277 : vector<1x32xf32>
    %c0_171 = arith.constant 0 : index
    %c129_172 = arith.constant 129 : index
    %279 = vector.load %arg31[%c0_171, %c129_172] : memref<32x664xf32, #tpu.memory_space<vmem>>, vector<32x32xf32>
    %280 = vector.extract_strided_slice %237 {offsets = [5, 0], sizes = [1, 32], strides = [1, 1]} : vector<9x32xf32> to vector<1x32xf32>
    %281 = vector.broadcast %280 : vector<1x32xf32> to vector<32x32xf32>
    %282 = arith.mulf %279, %281 : vector<32x32xf32>
    %c5_173 = arith.constant 5 : index
    %c0_174 = arith.constant 0 : index
    %c0_175 = arith.constant 0 : index
    %283 = vector.load %arg4[%c5_173, %c0_174, %c0_175] : memref<9x1x32xf32, #tpu.memory_space<vmem>>, vector<1x1x32xf32>
    %284 = vector.shape_cast %283 : vector<1x1x32xf32> to vector<1x32xf32>
    %cst_176 = arith.constant dense<0.000000e+00> : vector<1x32xf32>
    %285 = tpu.matmul %284, %282, %cst_176 {dimension_numbers = #tpu.dot_dimension_numbers<[1], [0], [0], [1], [0, 0, 1, 1], [], []>} : vector<1x32xf32>, vector<32x32xf32>, vector<1x32xf32> -> vector<1x32xf32>
    %286 = arith.addf %278, %285 : vector<1x32xf32>
    %c0_177 = arith.constant 0 : index
    %c131 = arith.constant 131 : index
    %287 = vector.load %arg31[%c0_177, %c131] : memref<32x664xf32, #tpu.memory_space<vmem>>, vector<32x32xf32>
    %288 = vector.extract_strided_slice %237 {offsets = [6, 0], sizes = [1, 32], strides = [1, 1]} : vector<9x32xf32> to vector<1x32xf32>
    %289 = vector.broadcast %288 : vector<1x32xf32> to vector<32x32xf32>
    %290 = arith.mulf %287, %289 : vector<32x32xf32>
    %c6_178 = arith.constant 6 : index
    %c0_179 = arith.constant 0 : index
    %c0_180 = arith.constant 0 : index
    %291 = vector.load %arg4[%c6_178, %c0_179, %c0_180] : memref<9x1x32xf32, #tpu.memory_space<vmem>>, vector<1x1x32xf32>
    %292 = vector.shape_cast %291 : vector<1x1x32xf32> to vector<1x32xf32>
    %cst_181 = arith.constant dense<0.000000e+00> : vector<1x32xf32>
    %293 = tpu.matmul %292, %290, %cst_181 {dimension_numbers = #tpu.dot_dimension_numbers<[1], [0], [0], [1], [0, 0, 1, 1], [], []>} : vector<1x32xf32>, vector<32x32xf32>, vector<1x32xf32> -> vector<1x32xf32>
    %294 = arith.addf %286, %293 : vector<1x32xf32>
    %c0_182 = arith.constant 0 : index
    %c132 = arith.constant 132 : index
    %295 = vector.load %arg31[%c0_182, %c132] : memref<32x664xf32, #tpu.memory_space<vmem>>, vector<32x32xf32>
    %296 = vector.extract_strided_slice %237 {offsets = [7, 0], sizes = [1, 32], strides = [1, 1]} : vector<9x32xf32> to vector<1x32xf32>
    %297 = vector.broadcast %296 : vector<1x32xf32> to vector<32x32xf32>
    %298 = arith.mulf %295, %297 : vector<32x32xf32>
    %c7_183 = arith.constant 7 : index
    %c0_184 = arith.constant 0 : index
    %c0_185 = arith.constant 0 : index
    %299 = vector.load %arg4[%c7_183, %c0_184, %c0_185] : memref<9x1x32xf32, #tpu.memory_space<vmem>>, vector<1x1x32xf32>
    %300 = vector.shape_cast %299 : vector<1x1x32xf32> to vector<1x32xf32>
    %cst_186 = arith.constant dense<0.000000e+00> : vector<1x32xf32>
    %301 = tpu.matmul %300, %298, %cst_186 {dimension_numbers = #tpu.dot_dimension_numbers<[1], [0], [0], [1], [0, 0, 1, 1], [], []>} : vector<1x32xf32>, vector<32x32xf32>, vector<1x32xf32> -> vector<1x32xf32>
    %302 = arith.addf %294, %301 : vector<1x32xf32>
    %c0_187 = arith.constant 0 : index
    %c133 = arith.constant 133 : index
    %303 = vector.load %arg31[%c0_187, %c133] : memref<32x664xf32, #tpu.memory_space<vmem>>, vector<32x32xf32>
    %304 = vector.extract_strided_slice %237 {offsets = [8, 0], sizes = [1, 32], strides = [1, 1]} : vector<9x32xf32> to vector<1x32xf32>
    %305 = vector.broadcast %304 : vector<1x32xf32> to vector<32x32xf32>
    %306 = arith.mulf %303, %305 : vector<32x32xf32>
    %c8_188 = arith.constant 8 : index
    %c0_189 = arith.constant 0 : index
    %c0_190 = arith.constant 0 : index
    %307 = vector.load %arg4[%c8_188, %c0_189, %c0_190] : memref<9x1x32xf32, #tpu.memory_space<vmem>>, vector<1x1x32xf32>
    %308 = vector.shape_cast %307 : vector<1x1x32xf32> to vector<1x32xf32>
    %cst_191 = arith.constant dense<0.000000e+00> : vector<1x32xf32>
    %309 = tpu.matmul %308, %306, %cst_191 {dimension_numbers = #tpu.dot_dimension_numbers<[1], [0], [0], [1], [0, 0, 1, 1], [], []>} : vector<1x32xf32>, vector<32x32xf32>, vector<1x32xf32> -> vector<1x32xf32>
    %310 = arith.addf %302, %309 : vector<1x32xf32>
    %c0_192 = arith.constant 0 : index
    %c0_193 = arith.constant 0 : index
    %311 = vector.load %arg10[%c0_192, %c0_193] : memref<1x1xf32, #tpu.memory_space<vmem>>, vector<1x1xf32>
    %312 = vector.broadcast %311 : vector<1x1xf32> to vector<1x32xf32>
    %313 = arith.addf %310, %312 : vector<1x32xf32>
    %c0_194 = arith.constant 0 : index
    %c128_195 = arith.constant 128 : index
    %314 = vector.load %arg31[%c0_194, %c128_195] : memref<32x664xf32, #tpu.memory_space<vmem>>, vector<1x32xf32>
    tpu.vector_store %arg31[%c0_194, %c128_195], %313 {strides = array<i32>} : memref<32x664xf32, #tpu.memory_space<vmem>>, vector<1x32xf32>,
    %c0_196 = arith.constant 0 : index
    %c128_197 = arith.constant 128 : index
    %315 = vector.load %arg31[%c0_196, %c128_197] : memref<32x664xf32, #tpu.memory_space<vmem>>, vector<1x32xf32>
    %c0_198 = arith.constant 0 : index
    %c129_199 = arith.constant 129 : index
    %316 = vector.load %arg31[%c0_198, %c129_199] : memref<32x664xf32, #tpu.memory_space<vmem>>, vector<1x32xf32>
    %317 = arith.maximumf %315, %316 : vector<1x32xf32>
    %c0_200 = arith.constant 0 : index
    %c132_201 = arith.constant 132 : index
    %318 = vector.load %arg31[%c0_200, %c132_201] : memref<32x664xf32, #tpu.memory_space<vmem>>, vector<1x32xf32>
    %c0_202 = arith.constant 0 : index
    %c133_203 = arith.constant 133 : index
    %319 = vector.load %arg31[%c0_202, %c133_203] : memref<32x664xf32, #tpu.memory_space<vmem>>, vector<1x32xf32>
    %320 = arith.maximumf %318, %319 : vector<1x32xf32>
    %321 = arith.maximumf %317, %320 : vector<1x32xf32>
    %c0_204 = arith.constant 0 : index
    %c0_205 = arith.constant 0 : index
    %322 = vector.load %arg20[%c0_204, %c0_205] : memref<32x8xf32, #tpu.memory_space<vmem>>, vector<32x8xf32>
    %cst_206 = arith.constant dense<0.000000e+00> : vector<1x8xf32>
    %323 = tpu.matmul %321, %322, %cst_206 {dimension_numbers = #tpu.dot_dimension_numbers<[1], [0], [0], [1], [0, 0, 1, 1], [], []>} : vector<1x32xf32>, vector<32x8xf32>, vector<1x8xf32> -> vector<1x8xf32>
    %cst_207 = arith.constant dense<0.000000e+00> : vector<1xf32>
    %324 = vector.multi_reduction <add>, %323, %cst_207 [1] : vector<1x8xf32> to vector<1xf32>
    %325 = vector.shape_cast %324 : vector<1xf32> to vector<1x1xf32>
    %cst_208 = arith.constant 8.000000e+00 : f32
    %326 = vector.broadcast %cst_208 : f32 to vector<1x1xf32>
    %327 = arith.divf %325, %326 : vector<1x1xf32>
    %328 = vector.broadcast %327 : vector<1x1xf32> to vector<1x8xf32>
    %329 = arith.subf %323, %328 : vector<1x8xf32>
    %330 = arith.mulf %329, %329 : vector<1x8xf32>
    %cst_209 = arith.constant dense<0.000000e+00> : vector<1xf32>
    %331 = vector.multi_reduction <add>, %330, %cst_209 [1] : vector<1x8xf32> to vector<1xf32>
    %332 = vector.shape_cast %331 : vector<1xf32> to vector<1x1xf32>
    %cst_210 = arith.constant 8.000000e+00 : f32
    %333 = vector.broadcast %cst_210 : f32 to vector<1x1xf32>
    %334 = arith.divf %332, %333 : vector<1x1xf32>
    %c0_211 = arith.constant 0 : index
    %c0_212 = arith.constant 0 : index
    %335 = vector.load %arg26[%c0_211, %c0_212] : memref<1x2xf32, #tpu.memory_space<vmem>>, vector<1x1xf32>
    %c0_213 = arith.constant 0 : index
    %c1_214 = arith.constant 1 : index
    %336 = vector.load %arg26[%c0_213, %c1_214] : memref<1x2xf32, #tpu.memory_space<vmem>>, vector<1x1xf32>
    %cst_215 = arith.constant 9.99999974E-6 : f32
    %337 = vector.broadcast %cst_215 : f32 to vector<1x1xf32>
    %338 = arith.addf %334, %337 : vector<1x1xf32>
    %339 = math.rsqrt %338 : vector<1x1xf32>
    %340 = vector.broadcast %339 : vector<1x1xf32> to vector<1x8xf32>
    %341 = arith.mulf %329, %340 : vector<1x8xf32>
    %342 = vector.broadcast %335 : vector<1x1xf32> to vector<1x8xf32>
    %343 = arith.mulf %341, %342 : vector<1x8xf32>
    %344 = vector.broadcast %336 : vector<1x1xf32> to vector<1x8xf32>
    %345 = arith.addf %343, %344 : vector<1x8xf32>
    %c0_216 = arith.constant 0 : index
    %c128_217 = arith.constant 128 : index
    %346 = vector.load %arg31[%c0_216, %c128_217] : memref<32x664xf32, #tpu.memory_space<vmem>>, vector<1x8xf32>
    tpu.vector_store %arg31[%c0_216, %c128_217], %345 {strides = array<i32>} : memref<32x664xf32, #tpu.memory_space<vmem>>, vector<1x8xf32>,
    %c0_218 = arith.constant 0 : index
    %c0_219 = arith.constant 0 : index
    %347 = vector.load %arg17[%c0_218, %c0_219] : memref<9x8xf32, #tpu.memory_space<vmem>>, vector<9x8xf32>
    %cst_220 = arith.constant 0.000000e+00 : f32
    %348 = vector.broadcast %cst_220 : f32 to vector<32x8xf32>
    %c0_221 = arith.constant 0 : index
    %c125_222 = arith.constant 125 : index
    %349 = vector.load %arg31[%c0_221, %c125_222] : memref<32x664xf32, #tpu.memory_space<vmem>>, vector<1x8xf32>
    %350 = vector.extract_strided_slice %347 {offsets = [0, 0], sizes = [1, 8], strides = [1, 1]} : vector<9x8xf32> to vector<1x8xf32>
    %351 = arith.mulf %349, %350 : vector<1x8xf32>
    %c0_223 = arith.constant 0 : index
    %c0_224 = arith.constant 0 : index
    %c0_225 = arith.constant 0 : index
    %352 = vector.load %arg5[%c0_223, %c0_224, %c0_225] : memref<9x32x1xf32, #tpu.memory_space<vmem>>, vector<1x32x1xf32>
    %353 = vector.shape_cast %352 : vector<1x32x1xf32> to vector<32x1xf32>
    %354 = vector.broadcast %353 : vector<32x1xf32> to vector<32x8xf32>
    %355 = vector.broadcast %351 : vector<1x8xf32> to vector<32x8xf32>
    %356 = arith.mulf %354, %355 : vector<32x8xf32>
    %357 = arith.addf %348, %356 : vector<32x8xf32>
    %c0_226 = arith.constant 0 : index
    %c126 = arith.constant 126 : index
    %358 = vector.load %arg31[%c0_226, %c126] : memref<32x664xf32, #tpu.memory_space<vmem>>, vector<1x8xf32>
    %359 = vector.extract_strided_slice %347 {offsets = [1, 0], sizes = [1, 8], strides = [1, 1]} : vector<9x8xf32> to vector<1x8xf32>
    %360 = arith.mulf %358, %359 : vector<1x8xf32>
    %c1_227 = arith.constant 1 : index
    %c0_228 = arith.constant 0 : index
    %c0_229 = arith.constant 0 : index
    %361 = vector.load %arg5[%c1_227, %c0_228, %c0_229] : memref<9x32x1xf32, #tpu.memory_space<vmem>>, vector<1x32x1xf32>
    %362 = vector.shape_cast %361 : vector<1x32x1xf32> to vector<32x1xf32>
    %363 = vector.broadcast %362 : vector<32x1xf32> to vector<32x8xf32>
    %364 = vector.broadcast %360 : vector<1x8xf32> to vector<32x8xf32>
    %365 = arith.mulf %363, %364 : vector<32x8xf32>
    %366 = arith.addf %357, %365 : vector<32x8xf32>
    %c0_230 = arith.constant 0 : index
    %c127_231 = arith.constant 127 : index
    %367 = vector.load %arg31[%c0_230, %c127_231] : memref<32x664xf32, #tpu.memory_space<vmem>>, vector<1x8xf32>
    %368 = vector.extract_strided_slice %347 {offsets = [2, 0], sizes = [1, 8], strides = [1, 1]} : vector<9x8xf32> to vector<1x8xf32>
    %369 = arith.mulf %367, %368 : vector<1x8xf32>
    %c2_232 = arith.constant 2 : index
    %c0_233 = arith.constant 0 : index
    %c0_234 = arith.constant 0 : index
    %370 = vector.load %arg5[%c2_232, %c0_233, %c0_234] : memref<9x32x1xf32, #tpu.memory_space<vmem>>, vector<1x32x1xf32>
    %371 = vector.shape_cast %370 : vector<1x32x1xf32> to vector<32x1xf32>
    %372 = vector.broadcast %371 : vector<32x1xf32> to vector<32x8xf32>
    %373 = vector.broadcast %369 : vector<1x8xf32> to vector<32x8xf32>
    %374 = arith.mulf %372, %373 : vector<32x8xf32>
    %375 = arith.addf %366, %374 : vector<32x8xf32>
    %c0_235 = arith.constant 0 : index
    %c127_236 = arith.constant 127 : index
    %376 = vector.load %arg31[%c0_235, %c127_236] : memref<32x664xf32, #tpu.memory_space<vmem>>, vector<1x8xf32>
    %377 = vector.extract_strided_slice %347 {offsets = [3, 0], sizes = [1, 8], strides = [1, 1]} : vector<9x8xf32> to vector<1x8xf32>
    %378 = arith.mulf %376, %377 : vector<1x8xf32>
    %c3_237 = arith.constant 3 : index
    %c0_238 = arith.constant 0 : index
    %c0_239 = arith.constant 0 : index
    %379 = vector.load %arg5[%c3_237, %c0_238, %c0_239] : memref<9x32x1xf32, #tpu.memory_space<vmem>>, vector<1x32x1xf32>
    %380 = vector.shape_cast %379 : vector<1x32x1xf32> to vector<32x1xf32>
    %381 = vector.broadcast %380 : vector<32x1xf32> to vector<32x8xf32>
    %382 = vector.broadcast %378 : vector<1x8xf32> to vector<32x8xf32>
    %383 = arith.mulf %381, %382 : vector<32x8xf32>
    %384 = arith.addf %375, %383 : vector<32x8xf32>
    %c0_240 = arith.constant 0 : index
    %c128_241 = arith.constant 128 : index
    %385 = vector.load %arg31[%c0_240, %c128_241] : memref<32x664xf32, #tpu.memory_space<vmem>>, vector<1x8xf32>
    %386 = vector.extract_strided_slice %347 {offsets = [4, 0], sizes = [1, 8], strides = [1, 1]} : vector<9x8xf32> to vector<1x8xf32>
    %387 = arith.mulf %385, %386 : vector<1x8xf32>
    %c4_242 = arith.constant 4 : index
    %c0_243 = arith.constant 0 : index
    %c0_244 = arith.constant 0 : index
    %388 = vector.load %arg5[%c4_242, %c0_243, %c0_244] : memref<9x32x1xf32, #tpu.memory_space<vmem>>, vector<1x32x1xf32>
    %389 = vector.shape_cast %388 : vector<1x32x1xf32> to vector<32x1xf32>
    %390 = vector.broadcast %389 : vector<32x1xf32> to vector<32x8xf32>
    %391 = vector.broadcast %387 : vector<1x8xf32> to vector<32x8xf32>
    %392 = arith.mulf %390, %391 : vector<32x8xf32>
    %393 = arith.addf %384, %392 : vector<32x8xf32>
    %c0_245 = arith.constant 0 : index
    %c129_246 = arith.constant 129 : index
    %394 = vector.load %arg31[%c0_245, %c129_246] : memref<32x664xf32, #tpu.memory_space<vmem>>, vector<1x8xf32>
    %395 = vector.extract_strided_slice %347 {offsets = [5, 0], sizes = [1, 8], strides = [1, 1]} : vector<9x8xf32> to vector<1x8xf32>
    %396 = arith.mulf %394, %395 : vector<1x8xf32>
    %c5_247 = arith.constant 5 : index
    %c0_248 = arith.constant 0 : index
    %c0_249 = arith.constant 0 : index
    %397 = vector.load %arg5[%c5_247, %c0_248, %c0_249] : memref<9x32x1xf32, #tpu.memory_space<vmem>>, vector<1x32x1xf32>
    %398 = vector.shape_cast %397 : vector<1x32x1xf32> to vector<32x1xf32>
    %399 = vector.broadcast %398 : vector<32x1xf32> to vector<32x8xf32>
    %400 = vector.broadcast %396 : vector<1x8xf32> to vector<32x8xf32>
    %401 = arith.mulf %399, %400 : vector<32x8xf32>
    %402 = arith.addf %393, %401 : vector<32x8xf32>
    %c0_250 = arith.constant 0 : index
    %c129_251 = arith.constant 129 : index
    %403 = vector.load %arg31[%c0_250, %c129_251] : memref<32x664xf32, #tpu.memory_space<vmem>>, vector<1x8xf32>
    %404 = vector.extract_strided_slice %347 {offsets = [6, 0], sizes = [1, 8], strides = [1, 1]} : vector<9x8xf32> to vector<1x8xf32>
    %405 = arith.mulf %403, %404 : vector<1x8xf32>
    %c6_252 = arith.constant 6 : index
    %c0_253 = arith.constant 0 : index
    %c0_254 = arith.constant 0 : index
    %406 = vector.load %arg5[%c6_252, %c0_253, %c0_254] : memref<9x32x1xf32, #tpu.memory_space<vmem>>, vector<1x32x1xf32>
    %407 = vector.shape_cast %406 : vector<1x32x1xf32> to vector<32x1xf32>
    %408 = vector.broadcast %407 : vector<32x1xf32> to vector<32x8xf32>
    %409 = vector.broadcast %405 : vector<1x8xf32> to vector<32x8xf32>
    %410 = arith.mulf %408, %409 : vector<32x8xf32>
    %411 = arith.addf %402, %410 : vector<32x8xf32>
    %c0_255 = arith.constant 0 : index
    %c130 = arith.constant 130 : index
    %412 = vector.load %arg31[%c0_255, %c130] : memref<32x664xf32, #tpu.memory_space<vmem>>, vector<1x8xf32>
    %413 = vector.extract_strided_slice %347 {offsets = [7, 0], sizes = [1, 8], strides = [1, 1]} : vector<9x8xf32> to vector<1x8xf32>
    %414 = arith.mulf %412, %413 : vector<1x8xf32>
    %c7_256 = arith.constant 7 : index
    %c0_257 = arith.constant 0 : index
    %c0_258 = arith.constant 0 : index
    %415 = vector.load %arg5[%c7_256, %c0_257, %c0_258] : memref<9x32x1xf32, #tpu.memory_space<vmem>>, vector<1x32x1xf32>
    %416 = vector.shape_cast %415 : vector<1x32x1xf32> to vector<32x1xf32>
    %417 = vector.broadcast %416 : vector<32x1xf32> to vector<32x8xf32>
    %418 = vector.broadcast %414 : vector<1x8xf32> to vector<32x8xf32>
    %419 = arith.mulf %417, %418 : vector<32x8xf32>
    %420 = arith.addf %411, %419 : vector<32x8xf32>
    %c0_259 = arith.constant 0 : index
    %c131_260 = arith.constant 131 : index
    %421 = vector.load %arg31[%c0_259, %c131_260] : memref<32x664xf32, #tpu.memory_space<vmem>>, vector<1x8xf32>
    %422 = vector.extract_strided_slice %347 {offsets = [8, 0], sizes = [1, 8], strides = [1, 1]} : vector<9x8xf32> to vector<1x8xf32>
    %423 = arith.mulf %421, %422 : vector<1x8xf32>
    %c8_261 = arith.constant 8 : index
    %c0_262 = arith.constant 0 : index
    %c0_263 = arith.constant 0 : index
    %424 = vector.load %arg5[%c8_261, %c0_262, %c0_263] : memref<9x32x1xf32, #tpu.memory_space<vmem>>, vector<1x32x1xf32>
    %425 = vector.shape_cast %424 : vector<1x32x1xf32> to vector<32x1xf32>
    %426 = vector.broadcast %425 : vector<32x1xf32> to vector<32x8xf32>
    %427 = vector.broadcast %423 : vector<1x8xf32> to vector<32x8xf32>
    %428 = arith.mulf %426, %427 : vector<32x8xf32>
    %429 = arith.addf %420, %428 : vector<32x8xf32>
    %c0_264 = arith.constant 0 : index
    %c0_265 = arith.constant 0 : index
    %430 = vector.load %arg11[%c0_264, %c0_265] : memref<32x1xf32, #tpu.memory_space<vmem>>, vector<32x1xf32>
    %431 = vector.broadcast %430 : vector<32x1xf32> to vector<32x8xf32>
    %432 = arith.addf %429, %431 : vector<32x8xf32>
    %c0_266 = arith.constant 0 : index
    %c0_267 = arith.constant 0 : index
    %433 = vector.load %arg21[%c0_266, %c0_267] : memref<8x32xf32, #tpu.memory_space<vmem>>, vector<8x32xf32>
    %cst_268 = arith.constant dense<0.000000e+00> : vector<32x32xf32>
    %434 = tpu.matmul %432, %433, %cst_268 {dimension_numbers = #tpu.dot_dimension_numbers<[1], [0], [0], [1], [0, 0, 1, 1], [], []>} : vector<32x8xf32>, vector<8x32xf32>, vector<32x32xf32> -> vector<32x32xf32>
    %cst_269 = arith.constant dense<0.000000e+00> : vector<32xf32>
    %435 = vector.multi_reduction <add>, %434, %cst_269 [1] : vector<32x32xf32> to vector<32xf32>
    %436 = vector.shape_cast %435 : vector<32xf32> to vector<32x1xf32>
    %cst_270 = arith.constant 3.200000e+01 : f32
    %437 = vector.broadcast %cst_270 : f32 to vector<32x1xf32>
    %438 = arith.divf %436, %437 : vector<32x1xf32>
    %439 = vector.broadcast %438 : vector<32x1xf32> to vector<32x32xf32>
    %440 = arith.subf %434, %439 : vector<32x32xf32>
    %441 = arith.mulf %440, %440 : vector<32x32xf32>
    %cst_271 = arith.constant dense<0.000000e+00> : vector<32xf32>
    %442 = vector.multi_reduction <add>, %441, %cst_271 [1] : vector<32x32xf32> to vector<32xf32>
    %443 = vector.shape_cast %442 : vector<32xf32> to vector<32x1xf32>
    %cst_272 = arith.constant 3.200000e+01 : f32
    %444 = vector.broadcast %cst_272 : f32 to vector<32x1xf32>
    %445 = arith.divf %443, %444 : vector<32x1xf32>
    %c0_273 = arith.constant 0 : index
    %c0_274 = arith.constant 0 : index
    %446 = vector.load %arg27[%c0_273, %c0_274] : memref<32x2xf32, #tpu.memory_space<vmem>>, vector<32x1xf32>
    %c0_275 = arith.constant 0 : index
    %c1_276 = arith.constant 1 : index
    %447 = vector.load %arg27[%c0_275, %c1_276] : memref<32x2xf32, #tpu.memory_space<vmem>>, vector<32x1xf32>
    %cst_277 = arith.constant 9.99999974E-6 : f32
    %448 = vector.broadcast %cst_277 : f32 to vector<32x1xf32>
    %449 = arith.addf %445, %448 : vector<32x1xf32>
    %450 = math.rsqrt %449 : vector<32x1xf32>
    %451 = vector.broadcast %450 : vector<32x1xf32> to vector<32x32xf32>
    %452 = arith.mulf %440, %451 : vector<32x32xf32>
    %453 = vector.broadcast %446 : vector<32x1xf32> to vector<32x32xf32>
    %454 = arith.mulf %452, %453 : vector<32x32xf32>
    %455 = vector.broadcast %447 : vector<32x1xf32> to vector<32x32xf32>
    %456 = arith.addf %454, %455 : vector<32x32xf32>
    %cst_278 = arith.constant 0.000000e+00 : f32
    %457 = vector.broadcast %cst_278 : f32 to vector<32x32xf32>
    %458 = arith.maximumf %456, %457 : vector<32x32xf32>
    %c0_279 = arith.constant 0 : index
    %c128_280 = arith.constant 128 : index
    %459 = vector.load %arg31[%c0_279, %c128_280] : memref<32x664xf32, #tpu.memory_space<vmem>>, vector<32x32xf32>
    tpu.vector_store %arg31[%c0_279, %c128_280], %458 {strides = array<i32>} : memref<32x664xf32, #tpu.memory_space<vmem>>, vector<32x32xf32>,
    %c0_281 = arith.constant 0 : index
    %c0_282 = arith.constant 0 : index
    %460 = vector.load %arg16[%c0_281, %c0_282] : memref<9x32xf32, #tpu.memory_space<vmem>>, vector<9x32xf32>
    %cst_283 = arith.constant 0.000000e+00 : f32
    %461 = vector.broadcast %cst_283 : f32 to vector<16x32xf32>
    %c0_284 = arith.constant 0 : index
    %c123_285 = arith.constant 123 : index
    %462 = vector.load %arg31[%c0_284, %c123_285] : memref<32x664xf32, #tpu.memory_space<vmem>>, vector<32x32xf32>
    %463 = vector.extract_strided_slice %460 {offsets = [0, 0], sizes = [1, 32], strides = [1, 1]} : vector<9x32xf32> to vector<1x32xf32>
    %464 = vector.broadcast %463 : vector<1x32xf32> to vector<32x32xf32>
    %465 = arith.mulf %462, %464 : vector<32x32xf32>
    %c0_286 = arith.constant 0 : index
    %c0_287 = arith.constant 0 : index
    %c0_288 = arith.constant 0 : index
    %466 = vector.load %arg6[%c0_286, %c0_287, %c0_288] : memref<9x16x32xf32, #tpu.memory_space<vmem>>, vector<1x16x32xf32>
    %467 = vector.shape_cast %466 : vector<1x16x32xf32> to vector<16x32xf32>
    %cst_289 = arith.constant dense<0.000000e+00> : vector<16x32xf32>
    %468 = tpu.matmul %467, %465, %cst_289 {dimension_numbers = #tpu.dot_dimension_numbers<[1], [0], [0], [1], [0, 0, 1, 1], [], []>} : vector<16x32xf32>, vector<32x32xf32>, vector<16x32xf32> -> vector<16x32xf32>
    %469 = arith.addf %461, %468 : vector<16x32xf32>
    %c0_290 = arith.constant 0 : index
    %c124_291 = arith.constant 124 : index
    %470 = vector.load %arg31[%c0_290, %c124_291] : memref<32x664xf32, #tpu.memory_space<vmem>>, vector<32x32xf32>
    %471 = vector.extract_strided_slice %460 {offsets = [1, 0], sizes = [1, 32], strides = [1, 1]} : vector<9x32xf32> to vector<1x32xf32>
    %472 = vector.broadcast %471 : vector<1x32xf32> to vector<32x32xf32>
    %473 = arith.mulf %470, %472 : vector<32x32xf32>
    %c1_292 = arith.constant 1 : index
    %c0_293 = arith.constant 0 : index
    %c0_294 = arith.constant 0 : index
    %474 = vector.load %arg6[%c1_292, %c0_293, %c0_294] : memref<9x16x32xf32, #tpu.memory_space<vmem>>, vector<1x16x32xf32>
    %475 = vector.shape_cast %474 : vector<1x16x32xf32> to vector<16x32xf32>
    %cst_295 = arith.constant dense<0.000000e+00> : vector<16x32xf32>
    %476 = tpu.matmul %475, %473, %cst_295 {dimension_numbers = #tpu.dot_dimension_numbers<[1], [0], [0], [1], [0, 0, 1, 1], [], []>} : vector<16x32xf32>, vector<32x32xf32>, vector<16x32xf32> -> vector<16x32xf32>
    %477 = arith.addf %469, %476 : vector<16x32xf32>
    %c0_296 = arith.constant 0 : index
    %c125_297 = arith.constant 125 : index
    %478 = vector.load %arg31[%c0_296, %c125_297] : memref<32x664xf32, #tpu.memory_space<vmem>>, vector<32x32xf32>
    %479 = vector.extract_strided_slice %460 {offsets = [2, 0], sizes = [1, 32], strides = [1, 1]} : vector<9x32xf32> to vector<1x32xf32>
    %480 = vector.broadcast %479 : vector<1x32xf32> to vector<32x32xf32>
    %481 = arith.mulf %478, %480 : vector<32x32xf32>
    %c2_298 = arith.constant 2 : index
    %c0_299 = arith.constant 0 : index
    %c0_300 = arith.constant 0 : index
    %482 = vector.load %arg6[%c2_298, %c0_299, %c0_300] : memref<9x16x32xf32, #tpu.memory_space<vmem>>, vector<1x16x32xf32>
    %483 = vector.shape_cast %482 : vector<1x16x32xf32> to vector<16x32xf32>
    %cst_301 = arith.constant dense<0.000000e+00> : vector<16x32xf32>
    %484 = tpu.matmul %483, %481, %cst_301 {dimension_numbers = #tpu.dot_dimension_numbers<[1], [0], [0], [1], [0, 0, 1, 1], [], []>} : vector<16x32xf32>, vector<32x32xf32>, vector<16x32xf32> -> vector<16x32xf32>
    %485 = arith.addf %477, %484 : vector<16x32xf32>
    %c0_302 = arith.constant 0 : index
    %c127_303 = arith.constant 127 : index
    %486 = vector.load %arg31[%c0_302, %c127_303] : memref<32x664xf32, #tpu.memory_space<vmem>>, vector<32x32xf32>
    %487 = vector.extract_strided_slice %460 {offsets = [3, 0], sizes = [1, 32], strides = [1, 1]} : vector<9x32xf32> to vector<1x32xf32>
    %488 = vector.broadcast %487 : vector<1x32xf32> to vector<32x32xf32>
    %489 = arith.mulf %486, %488 : vector<32x32xf32>
    %c3_304 = arith.constant 3 : index
    %c0_305 = arith.constant 0 : index
    %c0_306 = arith.constant 0 : index
    %490 = vector.load %arg6[%c3_304, %c0_305, %c0_306] : memref<9x16x32xf32, #tpu.memory_space<vmem>>, vector<1x16x32xf32>
    %491 = vector.shape_cast %490 : vector<1x16x32xf32> to vector<16x32xf32>
    %cst_307 = arith.constant dense<0.000000e+00> : vector<16x32xf32>
    %492 = tpu.matmul %491, %489, %cst_307 {dimension_numbers = #tpu.dot_dimension_numbers<[1], [0], [0], [1], [0, 0, 1, 1], [], []>} : vector<16x32xf32>, vector<32x32xf32>, vector<16x32xf32> -> vector<16x32xf32>
    %493 = arith.addf %485, %492 : vector<16x32xf32>
    %c0_308 = arith.constant 0 : index
    %c128_309 = arith.constant 128 : index
    %494 = vector.load %arg31[%c0_308, %c128_309] : memref<32x664xf32, #tpu.memory_space<vmem>>, vector<32x32xf32>
    %495 = vector.extract_strided_slice %460 {offsets = [4, 0], sizes = [1, 32], strides = [1, 1]} : vector<9x32xf32> to vector<1x32xf32>
    %496 = vector.broadcast %495 : vector<1x32xf32> to vector<32x32xf32>
    %497 = arith.mulf %494, %496 : vector<32x32xf32>
    %c4_310 = arith.constant 4 : index
    %c0_311 = arith.constant 0 : index
    %c0_312 = arith.constant 0 : index
    %498 = vector.load %arg6[%c4_310, %c0_311, %c0_312] : memref<9x16x32xf32, #tpu.memory_space<vmem>>, vector<1x16x32xf32>
    %499 = vector.shape_cast %498 : vector<1x16x32xf32> to vector<16x32xf32>
    %cst_313 = arith.constant dense<0.000000e+00> : vector<16x32xf32>
    %500 = tpu.matmul %499, %497, %cst_313 {dimension_numbers = #tpu.dot_dimension_numbers<[1], [0], [0], [1], [0, 0, 1, 1], [], []>} : vector<16x32xf32>, vector<32x32xf32>, vector<16x32xf32> -> vector<16x32xf32>
    %501 = arith.addf %493, %500 : vector<16x32xf32>
    %c0_314 = arith.constant 0 : index
    %c129_315 = arith.constant 129 : index
    %502 = vector.load %arg31[%c0_314, %c129_315] : memref<32x664xf32, #tpu.memory_space<vmem>>, vector<32x32xf32>
    %503 = vector.extract_strided_slice %460 {offsets = [5, 0], sizes = [1, 32], strides = [1, 1]} : vector<9x32xf32> to vector<1x32xf32>
    %504 = vector.broadcast %503 : vector<1x32xf32> to vector<32x32xf32>
    %505 = arith.mulf %502, %504 : vector<32x32xf32>
    %c5_316 = arith.constant 5 : index
    %c0_317 = arith.constant 0 : index
    %c0_318 = arith.constant 0 : index
    %506 = vector.load %arg6[%c5_316, %c0_317, %c0_318] : memref<9x16x32xf32, #tpu.memory_space<vmem>>, vector<1x16x32xf32>
    %507 = vector.shape_cast %506 : vector<1x16x32xf32> to vector<16x32xf32>
    %cst_319 = arith.constant dense<0.000000e+00> : vector<16x32xf32>
    %508 = tpu.matmul %507, %505, %cst_319 {dimension_numbers = #tpu.dot_dimension_numbers<[1], [0], [0], [1], [0, 0, 1, 1], [], []>} : vector<16x32xf32>, vector<32x32xf32>, vector<16x32xf32> -> vector<16x32xf32>
    %509 = arith.addf %501, %508 : vector<16x32xf32>
    %c0_320 = arith.constant 0 : index
    %c131_321 = arith.constant 131 : index
    %510 = vector.load %arg31[%c0_320, %c131_321] : memref<32x664xf32, #tpu.memory_space<vmem>>, vector<32x32xf32>
    %511 = vector.extract_strided_slice %460 {offsets = [6, 0], sizes = [1, 32], strides = [1, 1]} : vector<9x32xf32> to vector<1x32xf32>
    %512 = vector.broadcast %511 : vector<1x32xf32> to vector<32x32xf32>
    %513 = arith.mulf %510, %512 : vector<32x32xf32>
    %c6_322 = arith.constant 6 : index
    %c0_323 = arith.constant 0 : index
    %c0_324 = arith.constant 0 : index
    %514 = vector.load %arg6[%c6_322, %c0_323, %c0_324] : memref<9x16x32xf32, #tpu.memory_space<vmem>>, vector<1x16x32xf32>
    %515 = vector.shape_cast %514 : vector<1x16x32xf32> to vector<16x32xf32>
    %cst_325 = arith.constant dense<0.000000e+00> : vector<16x32xf32>
    %516 = tpu.matmul %515, %513, %cst_325 {dimension_numbers = #tpu.dot_dimension_numbers<[1], [0], [0], [1], [0, 0, 1, 1], [], []>} : vector<16x32xf32>, vector<32x32xf32>, vector<16x32xf32> -> vector<16x32xf32>
    %517 = arith.addf %509, %516 : vector<16x32xf32>
    %c0_326 = arith.constant 0 : index
    %c132_327 = arith.constant 132 : index
    %518 = vector.load %arg31[%c0_326, %c132_327] : memref<32x664xf32, #tpu.memory_space<vmem>>, vector<32x32xf32>
    %519 = vector.extract_strided_slice %460 {offsets = [7, 0], sizes = [1, 32], strides = [1, 1]} : vector<9x32xf32> to vector<1x32xf32>
    %520 = vector.broadcast %519 : vector<1x32xf32> to vector<32x32xf32>
    %521 = arith.mulf %518, %520 : vector<32x32xf32>
    %c7_328 = arith.constant 7 : index
    %c0_329 = arith.constant 0 : index
    %c0_330 = arith.constant 0 : index
    %522 = vector.load %arg6[%c7_328, %c0_329, %c0_330] : memref<9x16x32xf32, #tpu.memory_space<vmem>>, vector<1x16x32xf32>
    %523 = vector.shape_cast %522 : vector<1x16x32xf32> to vector<16x32xf32>
    %cst_331 = arith.constant dense<0.000000e+00> : vector<16x32xf32>
    %524 = tpu.matmul %523, %521, %cst_331 {dimension_numbers = #tpu.dot_dimension_numbers<[1], [0], [0], [1], [0, 0, 1, 1], [], []>} : vector<16x32xf32>, vector<32x32xf32>, vector<16x32xf32> -> vector<16x32xf32>
    %525 = arith.addf %517, %524 : vector<16x32xf32>
    %c0_332 = arith.constant 0 : index
    %c133_333 = arith.constant 133 : index
    %526 = vector.load %arg31[%c0_332, %c133_333] : memref<32x664xf32, #tpu.memory_space<vmem>>, vector<32x32xf32>
    %527 = vector.extract_strided_slice %460 {offsets = [8, 0], sizes = [1, 32], strides = [1, 1]} : vector<9x32xf32> to vector<1x32xf32>
    %528 = vector.broadcast %527 : vector<1x32xf32> to vector<32x32xf32>
    %529 = arith.mulf %526, %528 : vector<32x32xf32>
    %c8_334 = arith.constant 8 : index
    %c0_335 = arith.constant 0 : index
    %c0_336 = arith.constant 0 : index
    %530 = vector.load %arg6[%c8_334, %c0_335, %c0_336] : memref<9x16x32xf32, #tpu.memory_space<vmem>>, vector<1x16x32xf32>
    %531 = vector.shape_cast %530 : vector<1x16x32xf32> to vector<16x32xf32>
    %cst_337 = arith.constant dense<0.000000e+00> : vector<16x32xf32>
    %532 = tpu.matmul %531, %529, %cst_337 {dimension_numbers = #tpu.dot_dimension_numbers<[1], [0], [0], [1], [0, 0, 1, 1], [], []>} : vector<16x32xf32>, vector<32x32xf32>, vector<16x32xf32> -> vector<16x32xf32>
    %533 = arith.addf %525, %532 : vector<16x32xf32>
    %c0_338 = arith.constant 0 : index
    %c0_339 = arith.constant 0 : index
    %534 = vector.load %arg12[%c0_338, %c0_339] : memref<16x1xf32, #tpu.memory_space<vmem>>, vector<16x1xf32>
    %535 = vector.broadcast %534 : vector<16x1xf32> to vector<16x32xf32>
    %536 = arith.addf %533, %535 : vector<16x32xf32>
    %c0_340 = arith.constant 0 : index
    %c0_341 = arith.constant 0 : index
    %537 = vector.load %arg22[%c0_340, %c0_341] : memref<32x128xf32, #tpu.memory_space<vmem>>, vector<32x128xf32>
    %cst_342 = arith.constant dense<0.000000e+00> : vector<16x128xf32>
    %538 = tpu.matmul %536, %537, %cst_342 {dimension_numbers = #tpu.dot_dimension_numbers<[1], [0], [0], [1], [0, 0, 1, 1], [], []>} : vector<16x32xf32>, vector<32x128xf32>, vector<16x128xf32> -> vector<16x128xf32>
    %cst_343 = arith.constant dense<0.000000e+00> : vector<16xf32>
    %539 = vector.multi_reduction <add>, %538, %cst_343 [1] : vector<16x128xf32> to vector<16xf32>
    %540 = vector.shape_cast %539 : vector<16xf32> to vector<16x1xf32>
    %cst_344 = arith.constant 1.280000e+02 : f32
    %541 = vector.broadcast %cst_344 : f32 to vector<16x1xf32>
    %542 = arith.divf %540, %541 : vector<16x1xf32>
    %543 = vector.broadcast %542 : vector<16x1xf32> to vector<16x128xf32>
    %544 = arith.subf %538, %543 : vector<16x128xf32>
    %545 = arith.mulf %544, %544 : vector<16x128xf32>
    %cst_345 = arith.constant dense<0.000000e+00> : vector<16xf32>
    %546 = vector.multi_reduction <add>, %545, %cst_345 [1] : vector<16x128xf32> to vector<16xf32>
    %547 = vector.shape_cast %546 : vector<16xf32> to vector<16x1xf32>
    %cst_346 = arith.constant 1.280000e+02 : f32
    %548 = vector.broadcast %cst_346 : f32 to vector<16x1xf32>
    %549 = arith.divf %547, %548 : vector<16x1xf32>
    %c0_347 = arith.constant 0 : index
    %c0_348 = arith.constant 0 : index
    %550 = vector.load %arg28[%c0_347, %c0_348] : memref<16x2xf32, #tpu.memory_space<vmem>>, vector<16x1xf32>
    %c0_349 = arith.constant 0 : index
    %c1_350 = arith.constant 1 : index
    %551 = vector.load %arg28[%c0_349, %c1_350] : memref<16x2xf32, #tpu.memory_space<vmem>>, vector<16x1xf32>
    %cst_351 = arith.constant 9.99999974E-6 : f32
    %552 = vector.broadcast %cst_351 : f32 to vector<16x1xf32>
    %553 = arith.addf %549, %552 : vector<16x1xf32>
    %554 = math.rsqrt %553 : vector<16x1xf32>
    %555 = vector.broadcast %554 : vector<16x1xf32> to vector<16x128xf32>
    %556 = arith.mulf %544, %555 : vector<16x128xf32>
    %557 = vector.broadcast %550 : vector<16x1xf32> to vector<16x128xf32>
    %558 = arith.mulf %556, %557 : vector<16x128xf32>
    %559 = vector.broadcast %551 : vector<16x1xf32> to vector<16x128xf32>
    %560 = arith.addf %558, %559 : vector<16x128xf32>
    %cst_352 = arith.constant 0.000000e+00 : f32
    %561 = vector.broadcast %cst_352 : f32 to vector<16x128xf32>
    %562 = arith.maximumf %560, %561 : vector<16x128xf32>
    %c0_353 = arith.constant 0 : index
    %c128_354 = arith.constant 128 : index
    %563 = vector.load %arg31[%c0_353, %c128_354] : memref<32x664xf32, #tpu.memory_space<vmem>>, vector<16x128xf32>
    tpu.vector_store %arg31[%c0_353, %c128_354], %562 {strides = array<i32>} : memref<32x664xf32, #tpu.memory_space<vmem>>, vector<16x128xf32>,
    %c0_355 = arith.constant 0 : index
    %c0_356 = arith.constant 0 : index
    %564 = vector.load %arg15[%c0_355, %c0_356] : memref<9x128xf32, #tpu.memory_space<vmem>>, vector<9x128xf32>
    %cst_357 = arith.constant 0.000000e+00 : f32
    %565 = vector.broadcast %cst_357 : f32 to vector<1x128xf32>
    %c0_358 = arith.constant 0 : index
    %c119_359 = arith.constant 119 : index
    %566 = vector.load %arg31[%c0_358, %c119_359] : memref<32x664xf32, #tpu.memory_space<vmem>>, vector<16x128xf32>
    %567 = vector.extract_strided_slice %564 {offsets = [0, 0], sizes = [1, 128], strides = [1, 1]} : vector<9x128xf32> to vector<1x128xf32>
    %568 = vector.broadcast %567 : vector<1x128xf32> to vector<16x128xf32>
    %569 = arith.mulf %566, %568 : vector<16x128xf32>
    %c0_360 = arith.constant 0 : index
    %c0_361 = arith.constant 0 : index
    %c0_362 = arith.constant 0 : index
    %570 = vector.load %arg7[%c0_360, %c0_361, %c0_362] : memref<9x1x16xf32, #tpu.memory_space<vmem>>, vector<1x1x16xf32>
    %571 = vector.shape_cast %570 : vector<1x1x16xf32> to vector<1x16xf32>
    %cst_363 = arith.constant dense<0.000000e+00> : vector<1x128xf32>
    %572 = tpu.matmul %571, %569, %cst_363 {dimension_numbers = #tpu.dot_dimension_numbers<[1], [0], [0], [1], [0, 0, 1, 1], [], []>} : vector<1x16xf32>, vector<16x128xf32>, vector<1x128xf32> -> vector<1x128xf32>
    %573 = arith.addf %565, %572 : vector<1x128xf32>
    %c0_364 = arith.constant 0 : index
    %c120_365 = arith.constant 120 : index
    %574 = vector.load %arg31[%c0_364, %c120_365] : memref<32x664xf32, #tpu.memory_space<vmem>>, vector<16x128xf32>
    %575 = vector.extract_strided_slice %564 {offsets = [1, 0], sizes = [1, 128], strides = [1, 1]} : vector<9x128xf32> to vector<1x128xf32>
    %576 = vector.broadcast %575 : vector<1x128xf32> to vector<16x128xf32>
    %577 = arith.mulf %574, %576 : vector<16x128xf32>
    %c1_366 = arith.constant 1 : index
    %c0_367 = arith.constant 0 : index
    %c0_368 = arith.constant 0 : index
    %578 = vector.load %arg7[%c1_366, %c0_367, %c0_368] : memref<9x1x16xf32, #tpu.memory_space<vmem>>, vector<1x1x16xf32>
    %579 = vector.shape_cast %578 : vector<1x1x16xf32> to vector<1x16xf32>
    %cst_369 = arith.constant dense<0.000000e+00> : vector<1x128xf32>
    %580 = tpu.matmul %579, %577, %cst_369 {dimension_numbers = #tpu.dot_dimension_numbers<[1], [0], [0], [1], [0, 0, 1, 1], [], []>} : vector<1x16xf32>, vector<16x128xf32>, vector<1x128xf32> -> vector<1x128xf32>
    %581 = arith.addf %573, %580 : vector<1x128xf32>
    %c0_370 = arith.constant 0 : index
    %c121_371 = arith.constant 121 : index
    %582 = vector.load %arg31[%c0_370, %c121_371] : memref<32x664xf32, #tpu.memory_space<vmem>>, vector<16x128xf32>
    %583 = vector.extract_strided_slice %564 {offsets = [2, 0], sizes = [1, 128], strides = [1, 1]} : vector<9x128xf32> to vector<1x128xf32>
    %584 = vector.broadcast %583 : vector<1x128xf32> to vector<16x128xf32>
    %585 = arith.mulf %582, %584 : vector<16x128xf32>
    %c2_372 = arith.constant 2 : index
    %c0_373 = arith.constant 0 : index
    %c0_374 = arith.constant 0 : index
    %586 = vector.load %arg7[%c2_372, %c0_373, %c0_374] : memref<9x1x16xf32, #tpu.memory_space<vmem>>, vector<1x1x16xf32>
    %587 = vector.shape_cast %586 : vector<1x1x16xf32> to vector<1x16xf32>
    %cst_375 = arith.constant dense<0.000000e+00> : vector<1x128xf32>
    %588 = tpu.matmul %587, %585, %cst_375 {dimension_numbers = #tpu.dot_dimension_numbers<[1], [0], [0], [1], [0, 0, 1, 1], [], []>} : vector<1x16xf32>, vector<16x128xf32>, vector<1x128xf32> -> vector<1x128xf32>
    %589 = arith.addf %581, %588 : vector<1x128xf32>
    %c0_376 = arith.constant 0 : index
    %c127_377 = arith.constant 127 : index
    %590 = vector.load %arg31[%c0_376, %c127_377] : memref<32x664xf32, #tpu.memory_space<vmem>>, vector<16x128xf32>
    %591 = vector.extract_strided_slice %564 {offsets = [3, 0], sizes = [1, 128], strides = [1, 1]} : vector<9x128xf32> to vector<1x128xf32>
    %592 = vector.broadcast %591 : vector<1x128xf32> to vector<16x128xf32>
    %593 = arith.mulf %590, %592 : vector<16x128xf32>
    %c3_378 = arith.constant 3 : index
    %c0_379 = arith.constant 0 : index
    %c0_380 = arith.constant 0 : index
    %594 = vector.load %arg7[%c3_378, %c0_379, %c0_380] : memref<9x1x16xf32, #tpu.memory_space<vmem>>, vector<1x1x16xf32>
    %595 = vector.shape_cast %594 : vector<1x1x16xf32> to vector<1x16xf32>
    %cst_381 = arith.constant dense<0.000000e+00> : vector<1x128xf32>
    %596 = tpu.matmul %595, %593, %cst_381 {dimension_numbers = #tpu.dot_dimension_numbers<[1], [0], [0], [1], [0, 0, 1, 1], [], []>} : vector<1x16xf32>, vector<16x128xf32>, vector<1x128xf32> -> vector<1x128xf32>
    %597 = arith.addf %589, %596 : vector<1x128xf32>
    %c0_382 = arith.constant 0 : index
    %c128_383 = arith.constant 128 : index
    %598 = vector.load %arg31[%c0_382, %c128_383] : memref<32x664xf32, #tpu.memory_space<vmem>>, vector<16x128xf32>
    %599 = vector.extract_strided_slice %564 {offsets = [4, 0], sizes = [1, 128], strides = [1, 1]} : vector<9x128xf32> to vector<1x128xf32>
    %600 = vector.broadcast %599 : vector<1x128xf32> to vector<16x128xf32>
    %601 = arith.mulf %598, %600 : vector<16x128xf32>
    %c4_384 = arith.constant 4 : index
    %c0_385 = arith.constant 0 : index
    %c0_386 = arith.constant 0 : index
    %602 = vector.load %arg7[%c4_384, %c0_385, %c0_386] : memref<9x1x16xf32, #tpu.memory_space<vmem>>, vector<1x1x16xf32>
    %603 = vector.shape_cast %602 : vector<1x1x16xf32> to vector<1x16xf32>
    %cst_387 = arith.constant dense<0.000000e+00> : vector<1x128xf32>
    %604 = tpu.matmul %603, %601, %cst_387 {dimension_numbers = #tpu.dot_dimension_numbers<[1], [0], [0], [1], [0, 0, 1, 1], [], []>} : vector<1x16xf32>, vector<16x128xf32>, vector<1x128xf32> -> vector<1x128xf32>
    %605 = arith.addf %597, %604 : vector<1x128xf32>
    %c0_388 = arith.constant 0 : index
    %c129_389 = arith.constant 129 : index
    %606 = vector.load %arg31[%c0_388, %c129_389] : memref<32x664xf32, #tpu.memory_space<vmem>>, vector<16x128xf32>
    %607 = vector.extract_strided_slice %564 {offsets = [5, 0], sizes = [1, 128], strides = [1, 1]} : vector<9x128xf32> to vector<1x128xf32>
    %608 = vector.broadcast %607 : vector<1x128xf32> to vector<16x128xf32>
    %609 = arith.mulf %606, %608 : vector<16x128xf32>
    %c5_390 = arith.constant 5 : index
    %c0_391 = arith.constant 0 : index
    %c0_392 = arith.constant 0 : index
    %610 = vector.load %arg7[%c5_390, %c0_391, %c0_392] : memref<9x1x16xf32, #tpu.memory_space<vmem>>, vector<1x1x16xf32>
    %611 = vector.shape_cast %610 : vector<1x1x16xf32> to vector<1x16xf32>
    %cst_393 = arith.constant dense<0.000000e+00> : vector<1x128xf32>
    %612 = tpu.matmul %611, %609, %cst_393 {dimension_numbers = #tpu.dot_dimension_numbers<[1], [0], [0], [1], [0, 0, 1, 1], [], []>} : vector<1x16xf32>, vector<16x128xf32>, vector<1x128xf32> -> vector<1x128xf32>
    %613 = arith.addf %605, %612 : vector<1x128xf32>
    %c0_394 = arith.constant 0 : index
    %c135_395 = arith.constant 135 : index
    %614 = vector.load %arg31[%c0_394, %c135_395] : memref<32x664xf32, #tpu.memory_space<vmem>>, vector<16x128xf32>
    %615 = vector.extract_strided_slice %564 {offsets = [6, 0], sizes = [1, 128], strides = [1, 1]} : vector<9x128xf32> to vector<1x128xf32>
    %616 = vector.broadcast %615 : vector<1x128xf32> to vector<16x128xf32>
    %617 = arith.mulf %614, %616 : vector<16x128xf32>
    %c6_396 = arith.constant 6 : index
    %c0_397 = arith.constant 0 : index
    %c0_398 = arith.constant 0 : index
    %618 = vector.load %arg7[%c6_396, %c0_397, %c0_398] : memref<9x1x16xf32, #tpu.memory_space<vmem>>, vector<1x1x16xf32>
    %619 = vector.shape_cast %618 : vector<1x1x16xf32> to vector<1x16xf32>
    %cst_399 = arith.constant dense<0.000000e+00> : vector<1x128xf32>
    %620 = tpu.matmul %619, %617, %cst_399 {dimension_numbers = #tpu.dot_dimension_numbers<[1], [0], [0], [1], [0, 0, 1, 1], [], []>} : vector<1x16xf32>, vector<16x128xf32>, vector<1x128xf32> -> vector<1x128xf32>
    %621 = arith.addf %613, %620 : vector<1x128xf32>
    %c0_400 = arith.constant 0 : index
    %c136_401 = arith.constant 136 : index
    %622 = vector.load %arg31[%c0_400, %c136_401] : memref<32x664xf32, #tpu.memory_space<vmem>>, vector<16x128xf32>
    %623 = vector.extract_strided_slice %564 {offsets = [7, 0], sizes = [1, 128], strides = [1, 1]} : vector<9x128xf32> to vector<1x128xf32>
    %624 = vector.broadcast %623 : vector<1x128xf32> to vector<16x128xf32>
    %625 = arith.mulf %622, %624 : vector<16x128xf32>
    %c7_402 = arith.constant 7 : index
    %c0_403 = arith.constant 0 : index
    %c0_404 = arith.constant 0 : index
    %626 = vector.load %arg7[%c7_402, %c0_403, %c0_404] : memref<9x1x16xf32, #tpu.memory_space<vmem>>, vector<1x1x16xf32>
    %627 = vector.shape_cast %626 : vector<1x1x16xf32> to vector<1x16xf32>
    %cst_405 = arith.constant dense<0.000000e+00> : vector<1x128xf32>
    %628 = tpu.matmul %627, %625, %cst_405 {dimension_numbers = #tpu.dot_dimension_numbers<[1], [0], [0], [1], [0, 0, 1, 1], [], []>} : vector<1x16xf32>, vector<16x128xf32>, vector<1x128xf32> -> vector<1x128xf32>
    %629 = arith.addf %621, %628 : vector<1x128xf32>
    %c0_406 = arith.constant 0 : index
    %c137_407 = arith.constant 137 : index
    %630 = vector.load %arg31[%c0_406, %c137_407] : memref<32x664xf32, #tpu.memory_space<vmem>>, vector<16x128xf32>
    %631 = vector.extract_strided_slice %564 {offsets = [8, 0], sizes = [1, 128], strides = [1, 1]} : vector<9x128xf32> to vector<1x128xf32>
    %632 = vector.broadcast %631 : vector<1x128xf32> to vector<16x128xf32>
    %633 = arith.mulf %630, %632 : vector<16x128xf32>
    %c8_408 = arith.constant 8 : index
    %c0_409 = arith.constant 0 : index
    %c0_410 = arith.constant 0 : index
    %634 = vector.load %arg7[%c8_408, %c0_409, %c0_410] : memref<9x1x16xf32, #tpu.memory_space<vmem>>, vector<1x1x16xf32>
    %635 = vector.shape_cast %634 : vector<1x1x16xf32> to vector<1x16xf32>
    %cst_411 = arith.constant dense<0.000000e+00> : vector<1x128xf32>
    %636 = tpu.matmul %635, %633, %cst_411 {dimension_numbers = #tpu.dot_dimension_numbers<[1], [0], [0], [1], [0, 0, 1, 1], [], []>} : vector<1x16xf32>, vector<16x128xf32>, vector<1x128xf32> -> vector<1x128xf32>
    %637 = arith.addf %629, %636 : vector<1x128xf32>
    %c0_412 = arith.constant 0 : index
    %c0_413 = arith.constant 0 : index
    %638 = vector.load %arg13[%c0_412, %c0_413] : memref<1x1xf32, #tpu.memory_space<vmem>>, vector<1x1xf32>
    %639 = vector.broadcast %638 : vector<1x1xf32> to vector<1x128xf32>
    %640 = arith.addf %637, %639 : vector<1x128xf32>
    %c0_414 = arith.constant 0 : index
    %c0_415 = arith.constant 0 : index
    %641 = vector.load %arg23[%c0_414, %c0_415] : memref<128x512xf32, #tpu.memory_space<vmem>>, vector<128x512xf32>
    %cst_416 = arith.constant dense<0.000000e+00> : vector<1x512xf32>
    %642 = tpu.matmul %640, %641, %cst_416 {dimension_numbers = #tpu.dot_dimension_numbers<[1], [0], [0], [1], [0, 0, 1, 1], [], []>} : vector<1x128xf32>, vector<128x512xf32>, vector<1x512xf32> -> vector<1x512xf32>
    %cst_417 = arith.constant dense<0.000000e+00> : vector<1xf32>
    %643 = vector.multi_reduction <add>, %642, %cst_417 [1] : vector<1x512xf32> to vector<1xf32>
    %644 = vector.shape_cast %643 : vector<1xf32> to vector<1x1xf32>
    %cst_418 = arith.constant 5.120000e+02 : f32
    %645 = vector.broadcast %cst_418 : f32 to vector<1x1xf32>
    %646 = arith.divf %644, %645 : vector<1x1xf32>
    %647 = vector.broadcast %646 : vector<1x1xf32> to vector<1x512xf32>
    %648 = arith.subf %642, %647 : vector<1x512xf32>
    %649 = arith.mulf %648, %648 : vector<1x512xf32>
    %cst_419 = arith.constant dense<0.000000e+00> : vector<1xf32>
    %650 = vector.multi_reduction <add>, %649, %cst_419 [1] : vector<1x512xf32> to vector<1xf32>
    %651 = vector.shape_cast %650 : vector<1xf32> to vector<1x1xf32>
    %cst_420 = arith.constant 5.120000e+02 : f32
    %652 = vector.broadcast %cst_420 : f32 to vector<1x1xf32>
    %653 = arith.divf %651, %652 : vector<1x1xf32>
    %c0_421 = arith.constant 0 : index
    %c0_422 = arith.constant 0 : index
    %654 = vector.load %arg29[%c0_421, %c0_422] : memref<1x2xf32, #tpu.memory_space<vmem>>, vector<1x1xf32>
    %c0_423 = arith.constant 0 : index
    %c1_424 = arith.constant 1 : index
    %655 = vector.load %arg29[%c0_423, %c1_424] : memref<1x2xf32, #tpu.memory_space<vmem>>, vector<1x1xf32>
    %cst_425 = arith.constant 9.99999974E-6 : f32
    %656 = vector.broadcast %cst_425 : f32 to vector<1x1xf32>
    %657 = arith.addf %653, %656 : vector<1x1xf32>
    %658 = math.rsqrt %657 : vector<1x1xf32>
    %659 = vector.broadcast %658 : vector<1x1xf32> to vector<1x512xf32>
    %660 = arith.mulf %648, %659 : vector<1x512xf32>
    %661 = vector.broadcast %654 : vector<1x1xf32> to vector<1x512xf32>
    %662 = arith.mulf %660, %661 : vector<1x512xf32>
    %663 = vector.broadcast %655 : vector<1x1xf32> to vector<1x512xf32>
    %664 = arith.addf %662, %663 : vector<1x512xf32>
    %665 = arith.negf %664 : vector<1x512xf32>
    %666 = math.exp %665 : vector<1x512xf32>
    %cst_426 = arith.constant 1.000000e+00 : f32
    %667 = vector.broadcast %cst_426 : f32 to vector<1x512xf32>
    %668 = arith.addf %667, %666 : vector<1x512xf32>
    %669 = arith.divf %667, %668 : vector<1x512xf32>
    %c0_427 = arith.constant 0 : index
    %c0_428 = arith.constant 0 : index
    %670 = vector.load %arg30[%c0_427, %c0_428] : memref<1x512xf32, #tpu.memory_space<vmem>>, vector<1x512xf32>
    tpu.vector_store %arg30[%c0_427, %c0_428], %669 {strides = array<i32>} : memref<1x512xf32, #tpu.memory_space<vmem>>, vector<1x512xf32>,
    return
  }
  func.func @transform_0(%arg0: i32) -> (i32, i32) {
    %c0_i32 = arith.constant 0 : i32
    %c0_i32_0 = arith.constant 0 : i32
    %c0_i32_1 = arith.constant 0 : i32
    return %c0_i32, %c0_i32_0 : i32, i32
  }
  func.func @transform_1(%arg0: i32) -> (i32, i32, i32) {
    %c0_i32 = arith.constant 0 : i32
    %c0_i32_0 = arith.constant 0 : i32
    %c0_i32_1 = arith.constant 0 : i32
    %c0_i32_2 = arith.constant 0 : i32
    return %c0_i32, %c0_i32_0, %c0_i32_1 : i32, i32, i32
  }
  func.func @transform_2(%arg0: i32) -> (i32, i32, i32) {
    %c0_i32 = arith.constant 0 : i32
    %c0_i32_0 = arith.constant 0 : i32
    %c0_i32_1 = arith.constant 0 : i32
    %c0_i32_2 = arith.constant 0 : i32
    return %c0_i32, %c0_i32_0, %c0_i32_1 : i32, i32, i32
  }
  func.func @transform_3(%arg0: i32) -> (i32, i32, i32) {
    %c0_i32 = arith.constant 0 : i32
    %c0_i32_0 = arith.constant 0 : i32
    %c0_i32_1 = arith.constant 0 : i32
    %c0_i32_2 = arith.constant 0 : i32
    return %c0_i32, %c0_i32_0, %c0_i32_1 : i32, i32, i32
  }
  func.func @transform_4(%arg0: i32) -> (i32, i32, i32) {
    %c0_i32 = arith.constant 0 : i32
    %c0_i32_0 = arith.constant 0 : i32
    %c0_i32_1 = arith.constant 0 : i32
    %c0_i32_2 = arith.constant 0 : i32
    return %c0_i32, %c0_i32_0, %c0_i32_1 : i32, i32, i32
  }
  func.func @transform_5(%arg0: i32) -> (i32, i32, i32) {
    %c0_i32 = arith.constant 0 : i32
    %c0_i32_0 = arith.constant 0 : i32
    %c0_i32_1 = arith.constant 0 : i32
    %c0_i32_2 = arith.constant 0 : i32
    return %c0_i32, %c0_i32_0, %c0_i32_1 : i32, i32, i32
  }
  func.func @transform_6(%arg0: i32) -> (i32, i32, i32) {
    %c0_i32 = arith.constant 0 : i32
    %c0_i32_0 = arith.constant 0 : i32
    %c0_i32_1 = arith.constant 0 : i32
    %c0_i32_2 = arith.constant 0 : i32
    return %c0_i32, %c0_i32_0, %c0_i32_1 : i32, i32, i32
  }
  func.func @transform_7(%arg0: i32) -> (i32, i32) {
    %c0_i32 = arith.constant 0 : i32
    %c0_i32_0 = arith.constant 0 : i32
    %c0_i32_1 = arith.constant 0 : i32
    return %c0_i32, %c0_i32_0 : i32, i32
  }
  func.func @transform_8(%arg0: i32) -> (i32, i32) {
    %c0_i32 = arith.constant 0 : i32
    %c0_i32_0 = arith.constant 0 : i32
    %c0_i32_1 = arith.constant 0 : i32
    return %c0_i32, %c0_i32_0 : i32, i32
  }
  func.func @transform_9(%arg0: i32) -> (i32, i32) {
    %c0_i32 = arith.constant 0 : i32
    %c0_i32_0 = arith.constant 0 : i32
    %c0_i32_1 = arith.constant 0 : i32
    return %c0_i32, %c0_i32_0 : i32, i32
  }
  func.func @transform_10(%arg0: i32) -> (i32, i32) {
    %c0_i32 = arith.constant 0 : i32
    %c0_i32_0 = arith.constant 0 : i32
    %c0_i32_1 = arith.constant 0 : i32
    return %c0_i32, %c0_i32_0 : i32, i32
  }
  func.func @transform_11(%arg0: i32) -> (i32, i32) {
    %c0_i32 = arith.constant 0 : i32
    %c0_i32_0 = arith.constant 0 : i32
    %c0_i32_1 = arith.constant 0 : i32
    return %c0_i32, %c0_i32_0 : i32, i32
  }
  func.func @transform_12(%arg0: i32) -> (i32, i32) {
    %c0_i32 = arith.constant 0 : i32
    %c0_i32_0 = arith.constant 0 : i32
    %c0_i32_1 = arith.constant 0 : i32
    return %c0_i32, %c0_i32_0 : i32, i32
  }
  func.func @transform_13(%arg0: i32) -> (i32, i32) {
    %c0_i32 = arith.constant 0 : i32
    %c0_i32_0 = arith.constant 0 : i32
    %c0_i32_1 = arith.constant 0 : i32
    return %c0_i32, %c0_i32_0 : i32, i32
  }
  func.func @transform_14(%arg0: i32) -> (i32, i32) {
    %c0_i32 = arith.constant 0 : i32
    %c0_i32_0 = arith.constant 0 : i32
    %c0_i32_1 = arith.constant 0 : i32
    return %c0_i32, %c0_i32_0 : i32, i32
  }
  func.func @transform_15(%arg0: i32) -> (i32, i32) {
    %c0_i32 = arith.constant 0 : i32
    %c0_i32_0 = arith.constant 0 : i32
    %c0_i32_1 = arith.constant 0 : i32
    return %c0_i32, %c0_i32_0 : i32, i32
  }
  func.func @transform_16(%arg0: i32) -> (i32, i32) {
    %c0_i32 = arith.constant 0 : i32
    %c0_i32_0 = arith.constant 0 : i32
    %c0_i32_1 = arith.constant 0 : i32
    return %c0_i32, %c0_i32_0 : i32, i32
  }
  func.func @transform_17(%arg0: i32) -> (i32, i32) {
    %c0_i32 = arith.constant 0 : i32
    %c0_i32_0 = arith.constant 0 : i32
    %c0_i32_1 = arith.constant 0 : i32
    return %c0_i32, %c0_i32_0 : i32, i32
  }
  func.func @transform_18(%arg0: i32) -> (i32, i32) {
    %c0_i32 = arith.constant 0 : i32
    %c0_i32_0 = arith.constant 0 : i32
    %c0_i32_1 = arith.constant 0 : i32
    return %c0_i32, %c0_i32_0 : i32, i32
  }
  func.func @transform_19(%arg0: i32) -> (i32, i32) {
    %c0_i32 = arith.constant 0 : i32
    %c0_i32_0 = arith.constant 0 : i32
    %c0_i32_1 = arith.constant 0 : i32
    return %c0_i32, %c0_i32_0 : i32, i32
  }
  func.func @transform_20(%arg0: i32) -> (i32, i32) {
    %c0_i32 = arith.constant 0 : i32
    %c0_i32_0 = arith.constant 0 : i32
    %c0_i32_1 = arith.constant 0 : i32
    return %c0_i32, %c0_i32_0 : i32, i32
  }
  func.func @transform_21(%arg0: i32) -> (i32, i32) {
    %c0_i32 = arith.constant 0 : i32
    %c0_i32_0 = arith.constant 0 : i32
    %c0_i32_1 = arith.constant 0 : i32
    return %c0_i32, %c0_i32_0 : i32, i32
  }
  func.func @transform_22(%arg0: i32) -> (i32, i32) {
    %c0_i32 = arith.constant 0 : i32
    %c0_i32_0 = arith.constant 0 : i32
    %c0_i32_1 = arith.constant 0 : i32
    return %c0_i32, %c0_i32_0 : i32, i32
  }
  func.func @transform_23(%arg0: i32) -> (i32, i32) {
    %c0_i32 = arith.constant 0 : i32
    %c0_i32_0 = arith.constant 0 : i32
    %c0_i32_1 = arith.constant 0 : i32
    return %c0_i32, %c0_i32_0 : i32, i32
  }
  func.func @transform_24(%arg0: i32) -> (i32, i32) {
    %c0_i32 = arith.constant 0 : i32
    %c0_i32_0 = arith.constant 0 : i32
    %c0_i32_1 = arith.constant 0 : i32
    return %c0_i32, %c0_i32_0 : i32, i32
  }
  func.func @transform_25(%arg0: i32) -> (i32, i32) {
    %c0_i32 = arith.constant 0 : i32
    %c0_i32_0 = arith.constant 0 : i32
    %c0_i32_1 = arith.constant 0 : i32
    return %c0_i32, %c0_i32_0 : i32, i32
  }
  func.func @transform_26(%arg0: i32) -> (i32, i32) {
    %c0_i32 = arith.constant 0 : i32
    %c0_i32_0 = arith.constant 0 : i32
    %c0_i32_1 = arith.constant 0 : i32
    return %c0_i32, %c0_i32_0 : i32, i32
  }
  func.func @transform_27(%arg0: i32) -> (i32, i32) {
    %c0_i32 = arith.constant 0 : i32
    %c0_i32_0 = arith.constant 0 : i32
    %c0_i32_1 = arith.constant 0 : i32
    return %c0_i32, %c0_i32_0 : i32, i32
  }
  func.func @transform_28(%arg0: i32) -> (i32, i32) {
    %c0_i32 = arith.constant 0 : i32
    %c0_i32_0 = arith.constant 0 : i32
    %c0_i32_1 = arith.constant 0 : i32
    return %c0_i32, %c0_i32_0 : i32, i32
  }
  func.func @transform_29(%arg0: i32) -> (i32, i32) {
    %c0_i32 = arith.constant 0 : i32
    %c0_i32_0 = arith.constant 0 : i32
    %c0_i32_1 = arith.constant 0 : i32
    return %c0_i32, %c0_i32_0 : i32, i32
  }
}

</mosaic_0001>

<bundles_post_ra>
// kernel: autoencoder_forward.1
= control target key start
LH: loop header
LB: loop body
LE: loop exit
PB: predicated region body
PF: predicated region fallthrough
CT: control target
= control target key end

     0   :  { %s9327_s6 = smov 1   ;;  %s9328_s10 = smov 2   ;;  %s11211_s0 = inlined_call_operand.smem [shape: u32[30], index: -1, kind: input, shape index: {}] }
   0x1   :  { %s9407_s5 = sld [smem:[%s11211_s0]]   ;;  %s9329_s14 = smov 3  }
   0x2   :  { %s9412_s9 = sld [smem:[%s11211_s0 + %s9327_s6]]   ;;  %s9330_s18 = smov 4  }
   0x3   :  { %s9417_s13 = sld [smem:[%s11211_s0 + %s9328_s10]]   ;;  %s9331_s22 = smov 5  }
   0x4   :  { %s9422_s17 = sld [smem:[%s11211_s0 + %s9329_s14]]   ;;  %s9332_s26 = smov 6  }
   0x5   :  { %s9427_s21 = sld [smem:[%s11211_s0 + %s9330_s18]]   ;;  %s9333_s30 = smov 7  }
   0x6   :  { %s9432_s25 = sld [smem:[%s11211_s0 + %s9331_s22]]   ;;  %s9334_s4 = smov 8  }
   0x7   :  { %s9437_s29 = sld [smem:[%s11211_s0 + %s9332_s26]]   ;;  %s9335_s10 = smov 9  }
   0x8   :  { %s9442_s3 = sld [smem:[%s11211_s0 + %s9333_s30]]   ;;  %s9336_s15 = smov 10  }
   0x9   :  { %11228 = sst [smem:[#allocation24_spill]] %s9417_s13  ;;  %s9337_s20 = smov 11  }
   0xa   :  { %s9447_s8 = sld [smem:[%s11211_s0 + %s9334_s4]]   ;;  %s9338_s26 = smov 13  }
   0xb   :  { %11229 = sst [smem:[#allocation25_spill]] %s9427_s21  ;;  %s9339_s1 = smov 14  }
   0xc   :  { %s7362_s14 = sld [smem:[%s11211_s0 + %s9335_s10]]   ;;  %s9340_s7 = smov 15  }
   0xd   :  { %s9455_s19 = sld [smem:[%s11211_s0 + %s9336_s15]]   ;;  %s9341_s15 = smov 16  }
   0xe   :  { %s9460_s24 = sld [smem:[%s11211_s0 + %s9337_s20]]   ;;  %s9342_s22 = smov 17  }
   0xf   :  { %s9465_s30 = sld [smem:[%s11211_s0 + %s9338_s26]]   ;;  %s9343_s28 = smov 18  }
  0x10   :  { %11230 = sst [smem:[#allocation26_spill]] %s9447_s8 }
  0x11   :  { %s9470_s6 = sld [smem:[%s11211_s0 + %s9339_s1]]  }
  0x12   :  { %s9475_s12 = sld [smem:[%s11211_s0 + %s9340_s7]]   ;;  %v64_v0 = vstv %s7362_s14  ;;  %s9344_s7 = smov 19  }
  0x13   :  { %11231 = sst [smem:[#allocation27_spill]] %s9455_s19  ;;  %65 = vst [vmem:[#allocation3] sm:$0x1] %v64_v0  ;;  %s9345_s14 = smov 20  }
  0x14   :  { %11232 = sst [smem:[#allocation28_spill]] %s9460_s24  ;;  %s9350_s24 = smov 25  }
  0x15   :  { %s9480_s20 = sld [smem:[%s11211_s0 + %s9341_s15]]  }
  0x16   :  { %s9485_s27 = sld [smem:[%s11211_s0 + %s9342_s22]]   ;;  %s9346_s22 = smov 21  }
  0x17   :  { %s9490_s4 = sld [smem:[%s11211_s0 + %s9343_s28]]   ;;  %s9347_s28 = smov 22  }
  0x18   :  { %s9495_s15 = sld [smem:[%s11211_s0 + %s9344_s7]]   ;;  %s9348_s7 = smov 23  }
  0x19   :  { %s9500_s23 = sld [smem:[%s11211_s0 + %s9345_s14]]   ;;  %s9349_s14 = smov 24  }
  0x1a   :  { %s9505_s19 = sld [smem:[%s11211_s0 + %s9346_s22]]  }
  0x1b   :  { %s9510_s21 = sld [smem:[%s11211_s0 + %s9347_s28]]   ;;  %s9351_s28 = smov 26  }
  0x1c   :  { %s9520_s8 = sld [smem:[%s11211_s0 + %s9349_s14]]   ;;  %s9353_s14 = smov 28  }
  0x1d   :  { %11233 = sst [smem:[#allocation29_spill]] %s9490_s4 }
  0x1e   :  { %s9515_s4 = sld [smem:[%s11211_s0 + %s9348_s7]]   ;;  %s9352_s7 = smov 27  }
  0x1f   :  { %s9525_s13 = sld [smem:[%s11211_s0 + %s9350_s24]]   ;;  %s9354_s24 = smov 29  }
  0x21   :  { %11234 = sst [smem:[#allocation30_spill]] %s9510_s21 }
  0x22   :  { %11236 = sst [smem:[#allocation32_spill]] %s9520_s8 }
  0x23   :  { %s9530_s21 = sld [smem:[%s11211_s0 + %s9351_s28]]   ;;  %s9355_s28 = smov 12  }
  0x24   :  { %11235 = sst [smem:[#allocation31_spill]] %s9515_s4 }
  0x25   :  { %11237 = sst [smem:[#allocation33_spill]] %s9525_s13 }
  0x26   :  { %s9535_s4 = sld [smem:[%s11211_s0 + %s9352_s7]]  }
  0x27   :  { %s9540_s8 = sld [smem:[%s11211_s0 + %s9353_s14]]  }
  0x28   :  { %s9545_s13 = sld [smem:[%s11211_s0 + %s9354_s24]]  }
  0x29   :  { %11238 = sst [smem:[#allocation34_spill]] %s9530_s21 }
  0x2a   :  { %s7365_s21 = sld [smem:[%s11211_s0 + %s9355_s28]]  }
  0x30   :  { %v66_v1 = vstv %s7365_s21 }
  0x31   :  { %67 = vst [vmem:[#allocation4] sm:$0x1] %v66_v1 }
  0x32   :  { %68 = vsyncpa [#allocation6], 0 }
  0x33   :  { %69 = vsyncpa [#allocation8], 0 }
  0x34   :  { %70 = vsyncpa [#allocation11], 0 }
  0x35   :  { %71 = vsyncpa [#allocation14], 0 }
  0x36   :  { %72 = vsyncpa [#allocation17], 0  ;;  %s9356_s7 = smov [#allocation7]   ;;  %s9119_s11 = scalar_lea.hbm %s9432_s25, 2304 }
  0x37   :  { %s98_s10 = sshll.u32 %s9356_s7, 4  ;;  %p9120_p0 = scmp.ne.s32.totalorder %s9432_s25, %s9119_s11  ;;  %s99_s10 = int_to_ptr.vmem [resolvable:$true] %s98_s10 }
  0x38   :  { %p9123_p1 = scmp.lt.u32.totalorder %s9119_s11, %s9432_s25 }
  0x3a   :  { %p9125_p2 = pnand %p9123_p1, %p9120_p0 }
  0x3c   :  { %9128 = shalt.err (!%p9125_p2)
}
  0x3d   :  { %s9129_s14 = scalar_lea.vmem %s99_s10, 2304  ;;  %p9134_p4 = scmp.lt.s32.totalorder %s99_s10, %s99_s10 }
  0x3e   :  { %p9130_p3 = scmp.ne.s32.totalorder %s99_s10, %s9129_s14  ;;  %p9135_p5 = scmp.lt.s32.totalorder %s9129_s14, %s9129_s14 }
  0x40   :  { %p9136_p6 = por %p9135_p5, %p9134_p4 }
  0x42   :  { %p9137_p7 = pnand %p9136_p6, %p9130_p3 }
  0x44   :  { %9140 = shalt.err (!%p9137_p7)
}
  0x45   :  { %s9357_s0 = smov 128   ;;  %s9358_s21 = smov 8  }
  0x46   :  { %104 = dma.hbm_to_vmem [thread:$0]  %s9432_s25, 2304, %s99_s10, [#allocation8], %s9357_s0, %s9357_s0, %s9358_s21  }
  0x47   :  { %s9359_s16 = smov [#allocation10]   ;;  %s9360_s24 = smov [#allocation13]  }
  0x48   :  { %s136_s18 = sshll.u32 %s9359_s16, 4  ;;  %s160_s22 = sshll.u32 %s9360_s24, 4  ;;  %s137_s18 = int_to_ptr.vmem [resolvable:$true] %s136_s18  ;;  %s161_s22 = int_to_ptr.vmem [resolvable:$true] %s160_s22 }
  0x49   :  { %s9141_s26 = scalar_lea.hbm %s9470_s6, 256 }
  0x4a   :  { %p9142_p8 = scmp.ne.s32.totalorder %s9470_s6, %s9141_s26  ;;  %p9145_p9 = scmp.lt.u32.totalorder %s9141_s26, %s9470_s6 }
  0x4c   :  { %p9147_p10 = pnand %p9145_p9, %p9142_p8 }
  0x4e   :  { %9150 = shalt.err (!%p9147_p10)
}
  0x4f   :  { %s9151_s28 = scalar_lea.vmem %s137_s18, 256  ;;  %p9156_p12 = scmp.lt.s32.totalorder %s137_s18, %s137_s18 }
  0x50   :  { %p9152_p11 = scmp.ne.s32.totalorder %s137_s18, %s9151_s28  ;;  %p9157_p13 = scmp.lt.s32.totalorder %s9151_s28, %s9151_s28 }
  0x52   :  { %p9158_p0 = por %p9157_p13, %p9156_p12 }
  0x54   :  { %p9159_p1 = pnand %p9158_p0, %p9152_p11 }
  0x56   :  { %9162 = shalt.err (!%p9159_p1)
}
  0x57   :  { %142 = dma.hbm_to_vmem [thread:$0]  %s9470_s6, 256, %s137_s18, [#allocation11], %s9357_s0, %s9357_s0, %s9358_s21  }
  0x58   :  { %s9163_s25 = scalar_lea.hbm %s9480_s20, 256 }
  0x59   :  { %p9164_p2 = scmp.ne.s32.totalorder %s9480_s20, %s9163_s25  ;;  %p9167_p3 = scmp.lt.u32.totalorder %s9163_s25, %s9480_s20 }
  0x5b   :  { %p9169_p4 = pnand %p9167_p3, %p9164_p2 }
  0x5d   :  { %9172 = shalt.err (!%p9169_p4)
}
  0x5e   :  { %s9173_s1 = scalar_lea.vmem %s161_s22, 256  ;;  %p9178_p6 = scmp.lt.s32.totalorder %s161_s22, %s161_s22 }
  0x5f   :  { %p9174_p5 = scmp.ne.s32.totalorder %s161_s22, %s9173_s1  ;;  %p9179_p7 = scmp.lt.s32.totalorder %s9173_s1, %s9173_s1 }
  0x61   :  { %p9180_p8 = por %p9179_p7, %p9178_p6 }
  0x63   :  { %p9181_p9 = pnand %p9180_p8, %p9174_p5 }
  0x65   :  { %9184 = shalt.err (!%p9181_p9)
}
  0x66   :  { %166 = dma.hbm_to_vmem [thread:$0]  %s9480_s20, 256, %s161_s22, [#allocation14], %s9357_s0, %s9357_s0, %s9358_s21  }
  0x67   :  { %s9361_s6 = smov [#allocation16]   ;;  %s9362_s7 = smov [#allocation5]  }
  0x68   :  { %s189_s2 = sshll.u32 %s9361_s6, 4  ;;  %s84_s10 = sshll.u32 %s9362_s7, 4  ;;  %s190_s2 = int_to_ptr.vmem [resolvable:$true] %s189_s2  ;;  %s85_s10 = int_to_ptr.vmem [resolvable:$true] %s84_s10 }
  0x69   :  { %s9185_s11 = scalar_lea.hbm %s9500_s23, 128 }
  0x6a   :  { %p9186_p10 = scmp.ne.s32.totalorder %s9500_s23, %s9185_s11  ;;  %p9189_p11 = scmp.lt.u32.totalorder %s9185_s11, %s9500_s23 }
  0x6c   :  { %p9191_p12 = pnand %p9189_p11, %p9186_p10 }
  0x6e   :  { %9194 = shalt.err (!%p9191_p12)
}
  0x6f   :  { %s9195_s14 = scalar_lea.vmem %s190_s2, 128  ;;  %p9200_p0 = scmp.lt.s32.totalorder %s190_s2, %s190_s2 }
  0x70   :  { %p9196_p13 = scmp.ne.s32.totalorder %s190_s2, %s9195_s14  ;;  %p9201_p1 = scmp.lt.s32.totalorder %s9195_s14, %s9195_s14 }
  0x72   :  { %p9202_p2 = por %p9201_p1, %p9200_p0 }
  0x74   :  { %p9203_p3 = pnand %p9202_p2, %p9196_p13 }
  0x76   :  { %9206 = shalt.err (!%p9203_p3)
}
  0x77   :  { %192 = dma.hbm_to_vmem [thread:$0]  %s9500_s23, 128, %s190_s2, [#allocation17]  }
  0x78   :  { %s9207_s20 = scalar_lea.hbm %s9422_s17, 144 }
  0x79   :  { %p9208_p4 = scmp.ne.s32.totalorder %s9422_s17, %s9207_s20  ;;  %p9211_p5 = scmp.lt.u32.totalorder %s9207_s20, %s9422_s17 }
  0x7b   :  { %p9213_p6 = pnand %p9211_p5, %p9208_p4 }
  0x7d   :  { %9216 = shalt.err (!%p9213_p6)
}
  0x7e   :  { %s9217_s16 = scalar_lea.vmem %s85_s10, 144  ;;  %s9221_s18 = scalar_lea.vmem %s85_s10, 160 }
  0x7f   :  { %p9218_p7 = scmp.ne.s32.totalorder %s85_s10, %s9217_s16  ;;  %p9222_p8 = scmp.lt.s32.totalorder %s85_s10, %s85_s10 }
  0x80   :  { %p9223_p9 = scmp.lt.s32.totalorder %s9221_s18, %s9217_s16 }
  0x82   :  { %p9224_p10 = por %p9223_p9, %p9222_p8 }
  0x84   :  { %p9225_p11 = pnand %p9224_p10, %p9218_p7 }
  0x86   :  { %9228 = shalt.err (!%p9225_p11)
}
  0x87   :  { %s9363_s24 = smov 16   ;;  %s9364_s23 = smov 1  }
  0x88   :  { %90 = dma.hbm_to_vmem [thread:$0]  %s9422_s17, 144, %s85_s10, [#allocation6], %s9363_s24, %s9363_s24, %s9364_s23  }
  0x89   :  { %s9365_s22 = smov [#allocation9]   ;;  %s9366_s28 = smov [#allocation12]  }
  0x8a   :  { %s110_s26 = sshll.u32 %s9365_s22, 4  ;;  %s148_s25 = sshll.u32 %s9366_s28, 4  ;;  %s111_s26 = int_to_ptr.vmem [resolvable:$true] %s110_s26  ;;  %s149_s25 = int_to_ptr.vmem [resolvable:$true] %s148_s25 }
  0x8b   :  { %s9229_s1 = scalar_lea.hbm %s9437_s29, 144 }
  0x8c   :  { %p9230_p12 = scmp.ne.s32.totalorder %s9437_s29, %s9229_s1  ;;  %p9233_p13 = scmp.lt.u32.totalorder %s9229_s1, %s9437_s29 }
  0x8e   :  { %p9235_p0 = pnand %p9233_p13, %p9230_p12 }
  0x90   :  { %9238 = shalt.err (!%p9235_p0)
}
  0x91   :  { %s9239_s6 = scalar_lea.vmem %s111_s26, 144  ;;  %s9243_s2 = scalar_lea.vmem %s111_s26, 160 }
  0x92   :  { %p9240_p1 = scmp.ne.s32.totalorder %s111_s26, %s9239_s6  ;;  %p9244_p2 = scmp.lt.s32.totalorder %s111_s26, %s111_s26 }
  0x93   :  { %p9245_p3 = scmp.lt.s32.totalorder %s9243_s2, %s9239_s6 }
  0x95   :  { %p9246_p4 = por %p9245_p3, %p9244_p2 }
  0x97   :  { %p9247_p5 = pnand %p9246_p4, %p9240_p1 }
  0x99   :  { %9250 = shalt.err (!%p9247_p5)
}
  0x9a   :  { %116 = dma.hbm_to_vmem [thread:$0]  %s9437_s29, 144, %s111_s26, [#allocation8], %s9363_s24, %s9363_s24, %s9364_s23  }
  0x9b   :  { %s9251_s17 = scalar_lea.hbm %s9475_s12, 256 }
  0x9c   :  { %p9252_p6 = scmp.ne.s32.totalorder %s9475_s12, %s9251_s17  ;;  %p9255_p7 = scmp.lt.u32.totalorder %s9251_s17, %s9475_s12 }
  0x9e   :  { %p9257_p8 = pnand %p9255_p7, %p9252_p6 }
  0xa0   :  { %9260 = shalt.err (!%p9257_p8)
}
  0xa1   :  { %s9261_s7 = scalar_lea.vmem %s149_s25, 256  ;;  %p9266_p10 = scmp.lt.s32.totalorder %s149_s25, %s149_s25 }
  0xa2   :  { %p9262_p9 = scmp.ne.s32.totalorder %s149_s25, %s9261_s7  ;;  %p9267_p11 = scmp.lt.s32.totalorder %s9261_s7, %s9261_s7 }
  0xa4   :  { %p9268_p12 = por %p9267_p11, %p9266_p10 }
  0xa6   :  { %p9269_p13 = pnand %p9268_p12, %p9262_p9 }
  0xa8   :  { %9272 = shalt.err (!%p9269_p13)
}
  0xa9   :  { %154 = dma.hbm_to_vmem [thread:$0]  %s9475_s12, 256, %s149_s25, [#allocation11], %s9357_s0, %s9357_s0, %s9358_s21  }
  0xaa   :  { %s9367_s29 = smov [#allocation15]   ;;  %s9368_s11 = smov [#allocation18]  }
  0xab   :  { %s176_s10 = sshll.u32 %s9367_s29, 4  ;;  %s198_s14 = sshll.u32 %s9368_s11, 4  ;;  %s177_s10 = int_to_ptr.vmem [resolvable:$true] %s176_s10  ;;  %s199_s14 = int_to_ptr.vmem [resolvable:$true] %s198_s14 }
  0xac   :  { %s9273_s20 = scalar_lea.hbm %s9495_s15, 512 }
  0xad   :  { %p9274_p0 = scmp.ne.s32.totalorder %s9495_s15, %s9273_s20  ;;  %p9277_p1 = scmp.lt.u32.totalorder %s9273_s20, %s9495_s15 }
  0xaf   :  { %p9279_p2 = pnand %p9277_p1, %p9274_p0 }
  0xb1   :  { %9282 = shalt.err (!%p9279_p2)
}
  0xb2   :  { %s9283_s16 = scalar_lea.vmem %s177_s10, 512  ;;  %p9288_p4 = scmp.lt.s32.totalorder %s177_s10, %s177_s10 }
  0xb3   :  { %p9284_p3 = scmp.ne.s32.totalorder %s177_s10, %s9283_s16  ;;  %p9289_p5 = scmp.lt.s32.totalorder %s9283_s16, %s9283_s16 }
  0xb5   :  { %p9290_p6 = por %p9289_p5, %p9288_p4 }
  0xb7   :  { %p9291_p7 = pnand %p9290_p6, %p9284_p3 }
  0xb9   :  { %9294 = shalt.err (!%p9291_p7)
}
  0xba   :  { %182 = dma.hbm_to_vmem [thread:$0]  %s9495_s15, 512, %s177_s10, [#allocation14], %s9357_s0, %s9357_s0, %s9358_s21  }
  0xbb   :  { %s9295_s12 = scalar_lea.hbm %s9505_s19, 512 }
  0xbc   :  { %p9296_p8 = scmp.ne.s32.totalorder %s9505_s19, %s9295_s12  ;;  %p9299_p9 = scmp.lt.u32.totalorder %s9295_s12, %s9505_s19 }
  0xbe   :  { %p9301_p10 = pnand %p9299_p9, %p9296_p8 }
  0xc0   :  { %9304 = shalt.err (!%p9301_p10)
}
  0xc1   :  { %s9305_s18 = scalar_lea.vmem %s199_s14, 512  ;;  %p9310_p12 = scmp.lt.s32.totalorder %s199_s14, %s199_s14 }
  0xc2   :  { %p9306_p11 = scmp.ne.s32.totalorder %s199_s14, %s9305_s18  ;;  %p9311_p13 = scmp.lt.s32.totalorder %s9305_s18, %s9305_s18 }
  0xc4   :  { %p9312_p0 = por %p9311_p13, %p9310_p12 }
  0xc6   :  { %p9313_p1 = pnand %p9312_p0, %p9306_p11 }
  0xc8   :  { %9316 = shalt.err (!%p9313_p1)
}
  0xc9   :  { %204 = dma.hbm_to_vmem [thread:$0]  %s9505_s19, 512, %s199_s14, [#allocation17], %s9357_s0, %s9357_s0, %s9358_s21  }
  0xca   :  { %9317 = dma.done.wait [#allocation6], 144  }
  0xcb   :  { %9318 = vsyncadd [#allocation6], 4294967152 }
  0xcc   :  { %9319 = dma.done.wait [#allocation8], 2448  }
  0xcd   :  { %9320 = vsyncadd [#allocation8], 4294964848 }
  0xce   :  { %9321 = dma.done.wait [#allocation11], 512  }
  0xcf   :  { %9322 = vsyncadd [#allocation11], 4294966784 }
  0xd0   :  { %9323 = dma.done.wait [#allocation14], 768  }
  0xd1   :  { %9324 = vsyncadd [#allocation14], 4294966528 }
  0xd2   :  { %9325 = dma.done.wait [#allocation17], 640  }
  0xd3   :  { %9326 = vsyncadd [#allocation17], 4294966656  ;;  %v272_v2 = vlaneseq  ;;  %v9369_v3 = vmov 0.0   ;;  %v11224_v4 = vmov 0   ;;  %v9371_v5 = vmov 1966171168  }
  0xd4   :  { %256 = vst [vmem:[#allocation2 + $0x48] sm:$0xff] %v9369_v3  ;;  %246 = vst [vmem:[#allocation2] sm:$0xff] %v9369_v3  ;;  %8668 = vset.pattern.permute.xlu1 %v11224_v4  ;;  %8667 = vset.pattern.permute.xlu0 %v11224_v4  ;;  %v297_v6 = vunpack.c.l.s4 %v9371_v5  ;;  %v7384_v9 = vld [vmem:[%s9412_s9 + $0x10] sm:$0xff]  ;;  %v7383_v10 = vld [vmem:[%s9412_s9 + $0x8] sm:$0xff]  ;;  %vm251_vm1 = vcmask 195584   ;;  %s9373_s19 = smov 113  }
  0xd5   :  { %247 = vst [vmem:[#allocation2 + $0x8] sm:$0xff] %v9369_v3  ;;  %248 = vst [vmem:[#allocation2 + $0x10] sm:$0xff] %v9369_v3  ;;  %v9612_v8 = vshrl.u32 %v272_v2, 7  ;;  %468 = vperm.xlu1 %8668, %v7384_v9   ;;  %389 = vperm.xlu0 %8667, %v7383_v10   ;;  %v7386_v11 = vld [vmem:[%s9412_s9 + $0x20] sm:$0xff]  ;;  %v7385_v12 = vld [vmem:[%s9412_s9 + $0x18] sm:$0xff]  ;;  %vm9623_vm0 = vcmp.lt.s32.totalorder %v272_v2, 512 }
  0xd6   :  { %249 = vst [vmem:[#allocation2 + $0x18] sm:$0xff] %v9369_v3  ;;  %250 = vst [vmem:[#allocation2 + $0x20] sm:$0xff] %v9369_v3  ;;  %v298_v7 = vunpack.c.0.s8 %v297_v6  ;;  %v9065_v14 = vld [vmem:[%s9465_s30] ss:$8 sps:$4 sm:$0xff]   ;;  %v9067_v15 = vld [vmem:[%s9465_s30 + $0x10] ss:$8 sps:$4 sm:$0xff]  }
  0xd7   :  { %v9069_v17 = vld [vmem:[%s9465_s30 + $0x4] ss:$8 sps:$4 sm:$0xff]   ;;  %v9070_v18 = vld [vmem:[%s9465_s30 + $0x14] ss:$8 sps:$4 sm:$0xff]   ;;  %v271_v21 = vld [vmem:[%s9407_s5] sm:$0xf] }
  0xd8   :  { %v9619_v13 = vsub.s32 %v298_v7, %v9612_v8  ;;  %v7387_v22 = vld [vmem:[%s9412_s9 + $0x28] sm:$0xff]  ;;  %277 = vst.msk [vmem:[#allocation2 + $0x8] ss:$8 sm:$0xf] %vm9623_vm0, %v271_v21  ;;  %s9372_s5 = smov 112   ;;  %s9374_s15 = smov 127  }
  0xd9   :  { %640 = vperm.xlu1 %8668, %v7386_v11   ;;  %546 = vperm.xlu0 %8667, %v7385_v12   ;;  %252 = vst.msk [vmem:[#allocation2 + $0x28] sm:$0xff] %vm251_vm1, %v9369_v3  ;;  %v9071_v34 = vld [vmem:[%s9465_s30 + $0x20] ss:$8 sps:$4 sm:$0x11]   ;;  %v7388_v40 = vld [vmem:[%s9412_s9 + $0x30] sm:$0xff]  ;;  %s9375_s0 = smov 15  }
  0xda   :  { %v302_v19 = vrot.slane %v9065_v14, %v9619_v13  ;;  %v309_v20 = vrot.slane %v9067_v15, %v9619_v13  ;;  %v618_v23 = vrot.slane %v9069_v17, %v9619_v13  ;;  %v625_v24 = vrot.slane %v9070_v18, %v9619_v13  ;;  %v9072_v35 = vld [vmem:[%s9465_s30 + $0x30] ss:$8 sps:$4 sm:$0x11]   ;;  %v7390_v45 = vld [vmem:[%s9412_s9 + $0x40] sm:$0xff]  ;;  %s9376_s30 = smov 17   ;;  %s9377_s22 = smov 111  }
  0xdb   :  { %v952_v38 = vrot.slane %v9071_v34, %v9619_v13  ;;  %v959_v39 = vrot.slane %v9072_v35, %v9619_v13  ;;  %v7389_v43 = vld [vmem:[%s9412_s9 + $0x38] sm:$0xff]  ;;  %v325_v46 = vld [vmem:[%s9412_s9] sm:$0xff]  ;;  %v9658_v49 = vsub.s32 0, %v9612_v8  ;;  %v9661_v51 = vsub.s32 1, %v9612_v8  ;;  %s9378_s9 = smov 110   ;;  %s9381_s26 = smov 96  }
  0xdc   :  { %v310_v25 = vcombine.low %v302_v19, %v309_v20  ;;  %v370_v26 = vcombine.high %v302_v19, %v309_v20  ;;  %v626_v27 = vcombine.low %v618_v23, %v625_v24  ;;  %v696_v28 = vcombine.high %v618_v23, %v625_v24  ;;  %v1043_v47 = vld [vmem:[%s9442_s3] sm:$0xff]  ;;  %s9379_s3 = smov 94   ;;  %s9382_s28 = smov 95  }
  0xdd   :  { %715 = vperm.xlu1 %8668, %v7387_v22   ;;  %v960_v42 = vcombine.low %v952_v38, %v959_v39  ;;  %v9670_v56 = vsub.s32 3, %v9612_v8  ;;  %v9673_v57 = vsub.s32 2, %v9612_v8  ;;  %vm381_vm2 = vcmask 916480   ;;  %s9384_s25 = smov 121   ;;  %s9385_s1 = smov 120  }
  0xde   :  { %v317_v29 = vrot.slane %v310_v25, %v9619_v13  ;;  %v377_v30 = vrot.slane %v370_v26, %v9619_v13  ;;  %v703_v32 = vrot.slane %v696_v28, %v9619_v13  ;;  %v633_v33 = vrot.slane %v626_v27, %v9619_v13  ;;  %s9386_s6 = smov 119   ;;  %s9387_s2 = smov 7  }
  0xdf   :  { %v967_v44 = vrot.slane %v960_v42, %v9619_v13  ;;  %v609_v48 = vld [vmem:[#allocation2 + $0x8] ss:$8 sm:$0xf]  ;;  %v9687_v14 = vsub.s32 4, %v9612_v8  ;;  %vm707_vm3 = vcmask 7168   ;;  %vm460_vm4 = vcmask 924672  }
  0xe0   :  { %v456_v31 = vcombine.high %v317_v29, %v317_v29  ;;  %378 = vrot.lane.b32.xlu0 %v377_v30, %s9372_s5  ;;  %v535_v36 = vcombine.high %v377_v30, %v377_v30  ;;  %v782_v37 = vcombine.high %v633_v33, %v633_v33  ;;  %v861_v41 = vcombine.high %v703_v32, %v703_v32  ;;  %v367_v62 = vld [vmem:[#allocation2] ss:$8 sm:$0xf]  ;;  %s11242_s17 = sld [smem:[#allocation24_spill]]  ;;  %s9388_s7 = smov 9  }
  0xe1   :  { %v635_v50 = vmul.f32 %v633_v33, %v609_v48  ;;  %v368_v63 = vld [vmem:[#allocation2] ss:$8 sm:$0x10]  ;;  %v694_v11 = vld [vmem:[#allocation2 + $0x8] ss:$8 sm:$0x10] }
  0xe2   :  { %457 = vrot.lane.b32.xlu1 %v456_v31, %s9373_s19  ;;  %v369_v5 = vor.u32 %v368_v63, %v367_v62  ;;  %v693_v6 = vld [vmem:[#allocation2 + $0x8] ss:$8 sm:$0xf]  ;;  %vm971_vm5 = vcmask 138240   ;;  %vm438_vm6 = vcmask 1039360   ;;  %vm786_vm7 = vcmask 121856  }
  0xe3   :  { %v651_v54 = vrot.slane %v635_v50, %v9661_v51  ;;  %v647_v55 = vrot.slane %v635_v50, %v9658_v49  ;;  %v659_v0 = vrot.slane %v635_v50, %v9670_v56  ;;  %v655_v1 = vrot.slane %v635_v50, %v9673_v57  ;;  %v937_v34 = vld [vmem:[#allocation2 + $0x8] ss:$8 sm:$0xf]  ;;  %s11243_s29 = sld [smem:[#allocation26_spill]]  ;;  %s11244_s10 = sld [smem:[#allocation29_spill]] }
  0xe4   :  { %704 = vrot.lane.b32.xlu0 %v703_v32, %s9364_s23  ;;  %v695_v18 = vor.u32 %v694_v11, %v693_v6  ;;  %v938_v35 = vld [vmem:[#allocation2 + $0x8] ss:$8 sm:$0x10]  ;;  %v454_v42 = vld [vmem:[#allocation2] ss:$8 sm:$0x10] }
  0xe5   :  { %vm865_vm8 = vcmask 130048   ;;  %vm321_vm9 = vcmask 908288   ;;  %vm517_vm10 = vcmask 1031168   ;;  %vm764_vm11 = vcmask 900096   ;;  %s11245_s11 = sld [smem:[#allocation32_spill]]  ;;  %s9389_s14 = smov 123  }
  0xe6   :  { %536 = vrot.lane.b32.xlu1 %v535_v36, %s9374_s15  ;;  %vm843_vm12 = vcmask 785408   ;;  %vm922_vm13 = vcmask 777216   ;;  %vm1028_vm14 = vcmask 769024   ;;  %vm1411_vm15 = vcmask 64512   ;;  %s9390_s20 = smov 124   ;;  %s9391_s16 = smov 3  }
  0xe7   :  { %vm1638_vm1 = vcmask 56320   ;;  %s9392_s12 = smov 125   ;;  %s9393_s18 = smov 5  }
  0xe8   :  { %783 = vrot.lane.b32.xlu0 %v782_v37, %s9375_s0  ;;  %s11246_s19 = sld [smem:[#allocation33_spill]] }
  0xe9   :  { %s11247_s0 = sld [smem:[#allocation25_spill]] }
  0xea   :  { %794 = vperm.xlu1 %8668, %v7388_v40   ;;  %v939_v40 = vor.u32 %v938_v35, %v937_v34 }
  0xec   :  { %862 = vrot.lane.b32.xlu0 %v861_v41, %s9363_s24  ;;  %v453_v41 = vld [vmem:[#allocation2] ss:$8 sm:$0xf]  ;;  %s9380_s24 = smov 126  }
  0xed   :  { %v455_v50 = vor.u32 %v454_v42, %v453_v41 }
  0xee   :  { %873 = vperm.xlu1 %8668, %v7389_v43  }
  0xf0   :  { %968 = vrot.lane.b32.xlu0 %v967_v44, %s9376_s30 }
  0xf2   :  { %979 = vperm.xlu1 %8668, %v7390_v45  }
  0xf4   :  { %318 = vrot.lane.b32.xlu0 %v317_v29, %s9377_s22 }
  0xf6   :  { %328 = vperm.xlu1 %8668, %v325_v46  }
  0xfa   :  { %1046 = vperm.xlu1 %8668, %v1043_v47  }
 0x154   :  { %v9663_v52 = vpop.permute.xlu1 %468  ;;  %v9665_v53 = vpop.permute.xlu0 %389 }
 0x158   :  { %v641_v58 = vpop.permute.xlu1 %640  ;;  %v9675_v59 = vpop.permute.xlu0 %546 }
 0x159   :  { %v665_v60 = vmul.f32 %v651_v54, %v641_v58  ;;  %v664_v61 = vmul.f32 %v647_v55, %v641_v58  ;;  %v667_v9 = vmul.f32 %v659_v0, %v641_v58  ;;  %v666_v10 = vmul.f32 %v655_v1, %v641_v58 }
 0x15b   :  { %674 = vrot.lane.b32.xlu0 %v665_v60, %s9377_s22  ;;  %672 = vrot.lane.b32.xlu1 %v664_v61, %s9377_s22 }
 0x15c   :  { %v9681_v2 = vpop.permute.xlu1 %715  ;;  %v379_v3 = vpop.permute.xlu0 %378 }
 0x15d   :  { %v380_v7 = vrot.slane %v379_v3, 7 }
 0x15f   :  { %v382_v12 = vsel %vm381_vm2, %v380_v7, %v379_v3  ;;  %678 = vrot.lane.b32.xlu0 %v667_v9, %s9377_s22  ;;  %676 = vrot.lane.b32.xlu1 %v666_v10, %s9377_s22  ;;  %v532_v3 = vld [vmem:[#allocation2] ss:$8 sm:$0xf]  ;;  %s11248_s22 = sld [smem:[#allocation27_spill]] }
 0x160   :  { %v384_v15 = vmul.f32 %v382_v12, %v369_v5  ;;  %v705_v17 = vpop.permute.xlu0 %704  ;;  %v458_v19 = vpop.permute.xlu1 %457  ;;  %v533_v5 = vld [vmem:[#allocation2] ss:$8 sm:$0x10] }
 0x161   :  { %v706_v20 = vrot.slane %v705_v17, 7  ;;  %v459_v38 = vrot.slane %v458_v19, 7  ;;  %v534_v11 = vor.u32 %v533_v5, %v532_v3 }
 0x162   :  { %v404_v21 = vrot.slane %v384_v15, %v9673_v57  ;;  %v400_v22 = vrot.slane %v384_v15, %v9661_v51  ;;  %v412_v24 = vrot.slane %v384_v15, %v9687_v14  ;;  %v408_v29 = vrot.slane %v384_v15, %v9670_v56 }
 0x163   :  { %v708_v23 = vsel %vm707_vm3, %v706_v20, %v705_v17  ;;  %v396_v37 = vrot.slane %v384_v15, %v9658_v49  ;;  %v461_v54 = vsel %vm460_vm4, %v459_v38, %v458_v19  ;;  %vm1517_vm4 = vcmask 72704  }
 0x164   :  { %v710_v25 = vmul.f32 %v708_v23, %v695_v18  ;;  %v9693_v26 = vpop.permute.xlu0 %783  ;;  %v420_v27 = vmul.f32 %v404_v21, %v9665_v53  ;;  %v419_v28 = vmul.f32 %v400_v22, %v9665_v53  ;;  %v537_v30 = vpop.permute.xlu1 %536  ;;  %v422_v32 = vmul.f32 %v412_v24, %v9665_v53 }
 0x165   :  { %v421_v33 = vmul.f32 %v408_v29, %v9665_v53  ;;  %v418_v45 = vmul.f32 %v396_v37, %v9665_v53  ;;  %v463_v0 = vmul.f32 %v461_v54, %v455_v50  ;;  %v538_v1 = vrot.slane %v537_v30, 7 }
 0x166   :  { %432 = vrot.lane.b32.xlu1 %v420_v27, %s9374_s15  ;;  %430 = vrot.lane.b32.xlu0 %v419_v28, %s9374_s15  ;;  %v722_v36 = vrot.slane %v710_v25, %v9658_v49  ;;  %v730_v46 = vrot.slane %v710_v25, %v9673_v57  ;;  %v726_v47 = vrot.slane %v710_v25, %v9661_v51  ;;  %v779_v27 = vld [vmem:[#allocation2 + $0x8] ss:$8 sm:$0xf] }
 0x167   :  { %v738_v58 = vrot.slane %v710_v25, %v9687_v14  ;;  %v734_v62 = vrot.slane %v710_v25, %v9670_v56  ;;  %v539_v12 = vsel %vm438_vm6, %v538_v1, %v537_v30  ;;  %v483_v19 = vrot.slane %v463_v0, %v9673_v57  ;;  %v780_v28 = vld [vmem:[#allocation2 + $0x8] ss:$8 sm:$0x10] }
 0x168   :  { %v9700_v31 = vpop.permute.xlu0 %862  ;;  %v744_v44 = vmul.f32 %v722_v36, %v9681_v2  ;;  %v746_v53 = vmul.f32 %v730_v46, %v9681_v2  ;;  %v745_v61 = vmul.f32 %v726_v47, %v9681_v2  ;;  %v541_v20 = vmul.f32 %v539_v12, %v534_v11  ;;  %v858_v46 = vld [vmem:[#allocation2 + $0x8] ss:$8 sm:$0xf] }
 0x169   :  { %v9708_v39 = vpop.permute.xlu1 %794  ;;  %v748_v6 = vmul.f32 %v738_v58, %v9681_v2  ;;  %v747_v7 = vmul.f32 %v734_v62, %v9681_v2  ;;  %v499_v22 = vmul.f32 %v483_v19, %v9663_v52  ;;  %v479_v23 = vrot.slane %v463_v0, %v9661_v51  ;;  %v859_v47 = vld [vmem:[#allocation2 + $0x8] ss:$8 sm:$0x10] }
 0x16a   :  { %436 = vrot.lane.b32.xlu1 %v422_v32, %s9374_s15  ;;  %434 = vrot.lane.b32.xlu0 %v421_v33, %s9374_s15  ;;  %v491_v24 = vrot.slane %v463_v0, %v9687_v14  ;;  %v785_v25 = vrot.slane %v9693_v26, 7  ;;  %v487_v32 = vrot.slane %v463_v0, %v9670_v56  ;;  %v557_v33 = vrot.slane %v541_v20, %v9661_v51 }
 0x16b   :  { %v498_v29 = vmul.f32 %v479_v23, %v9663_v52  ;;  %v781_v34 = vor.u32 %v780_v28, %v779_v27  ;;  %v475_v38 = vrot.slane %v463_v0, %v9658_v49 }
 0x16c   :  { %v969_v43 = vpop.permute.xlu0 %968  ;;  %v501_v30 = vmul.f32 %v491_v24, %v9663_v52  ;;  %v787_v35 = vsel %vm786_vm7, %v785_v25, %v9693_v26  ;;  %v500_v36 = vmul.f32 %v487_v32, %v9663_v52  ;;  %v576_v37 = vmul.f32 %v557_v33, %v9675_v59 }
 0x16d   :  { %v970_v48 = vrot.slane %v969_v43, 7  ;;  %v9723_v63 = vpop.permute.xlu1 %873  ;;  %v789_v41 = vmul.f32 %v787_v35, %v781_v34  ;;  %v497_v42 = vmul.f32 %v475_v38, %v9663_v52  ;;  %v553_v26 = vrot.slane %v541_v20, %v9658_v49 }
 0x16e   :  { %754 = vrot.lane.b32.xlu1 %v744_v44, %s9378_s9  ;;  %428 = vrot.lane.b32.xlu0 %v418_v45, %s9374_s15  ;;  %v561_v44 = vrot.slane %v541_v20, %v9673_v57  ;;  %v864_v45 = vrot.slane %v9700_v31, 7  ;;  %v569_v52 = vrot.slane %v541_v20, %v9687_v14  ;;  %vm11221_vm7 = vcmask 973824  }
 0x16f   :  { %v972_v55 = vsel %vm971_vm5, %v970_v48, %v969_v43  ;;  %v575_v50 = vmul.f32 %v553_v26, %v9675_v59  ;;  %v801_v54 = vrot.slane %v789_v41, %v9658_v49  ;;  %v805_v62 = vrot.slane %v789_v41, %v9661_v51 }
 0x170   :  { %v9718_v60 = vmul.f32 %v972_v55, %v939_v40  ;;  %v565_v40 = vrot.slane %v541_v20, %v9670_v56  ;;  %v577_v48 = vmul.f32 %v561_v44, %v9675_v59  ;;  %v860_v55 = vor.u32 %v859_v47, %v858_v46  ;;  %v319_v27 = vpop.permute.xlu0 %318  ;;  %v287_v44 = vld [vmem:[#allocation2] ss:$8 sm:$0xf] }
 0x171   :  { %v9732_v15 = vpop.permute.xlu1 %979  ;;  %v866_v58 = vsel %vm865_vm8, %v864_v45, %v9700_v31  ;;  %v809_v0 = vrot.slane %v789_v41, %v9673_v57  ;;  %v824_v3 = vmul.f32 %v805_v62, %v9708_v39  ;;  %v817_v31 = vrot.slane %v789_v41, %v9687_v14  ;;  %v288_v46 = vld [vmem:[#allocation2] ss:$8 sm:$0x10] }
 0x172   :  { %758 = vrot.lane.b32.xlu1 %v746_v53, %s9378_s9  ;;  %756 = vrot.lane.b32.xlu0 %v745_v61, %s9378_s9  ;;  %v986_v9 = vrot.slane %v9718_v60, %v9658_v49  ;;  %v990_v10 = vrot.slane %v9718_v60, %v9661_v51  ;;  %v994_v2 = vrot.slane %v9718_v60, %v9673_v57  ;;  %v320_v47 = vrot.slane %v319_v27, 7 }
 0x173   :  { %v578_v43 = vmul.f32 %v565_v40, %v9675_v59  ;;  %v579_v53 = vmul.f32 %v569_v52, %v9675_v59  ;;  %v823_v61 = vmul.f32 %v801_v54, %v9708_v39  ;;  %v868_v1 = vmul.f32 %v866_v58, %v860_v55 }
 0x174   :  { %v1008_v17 = vmul.f32 %v986_v9, %v9732_v15  ;;  %v1009_v18 = vmul.f32 %v990_v10, %v9732_v15  ;;  %v1010_v21 = vmul.f32 %v994_v2, %v9732_v15  ;;  %v825_v5 = vmul.f32 %v809_v0, %v9708_v39 }
 0x175   :  { %v884_v9 = vrot.slane %v868_v1, %v9661_v51  ;;  %v880_v10 = vrot.slane %v868_v1, %v9658_v49  ;;  %v1002_v19 = vrot.slane %v9718_v60, %v9687_v14  ;;  %v896_v20 = vrot.slane %v868_v1, %v9687_v14  ;;  %v9805_v25 = vpop.permute.xlu1 %328 }
 0x176   :  { %762 = vrot.lane.b32.xlu1 %v748_v6, %s9378_s9  ;;  %760 = vrot.lane.b32.xlu0 %v747_v7, %s9378_s9  ;;  %v813_v6 = vrot.slane %v789_v41, %v9670_v56  ;;  %v827_v7 = vmul.f32 %v817_v31, %v9708_v39  ;;  %v998_v23 = vrot.slane %v9718_v60, %v9670_v56  ;;  %s9398_s9 = smov 122  }
 0x177   :  { %v903_v11 = vmul.f32 %v884_v9, %v9723_v63  ;;  %v902_v12 = vmul.f32 %v880_v10, %v9723_v63  ;;  %v322_v54 = vsel %vm321_vm9, %v320_v47, %v319_v27 }
 0x178   :  { %v826_v59 = vmul.f32 %v813_v6, %v9708_v39  ;;  %v1011_v24 = vmul.f32 %v998_v23, %v9732_v15 }
 0x179   :  { %v9807_v28 = vpop.permute.xlu1 %1046 }
 0x17a   :  { %1018 = vrot.lane.b32.xlu1 %v1008_v17, %s9379_s3  ;;  %1020 = vrot.lane.b32.xlu0 %v1009_v18, %s9379_s3  ;;  %v892_v17 = vrot.slane %v868_v1, %v9670_v56  ;;  %v888_v18 = vrot.slane %v868_v1, %v9673_v57 }
 0x17c   :  { %v905_v2 = vmul.f32 %v892_v17, %v9723_v63  ;;  %v904_v39 = vmul.f32 %v888_v18, %v9723_v63 }
 0x17e   :  { %1022 = vrot.lane.b32.xlu1 %v1010_v21, %s9379_s3  ;;  %511 = vrot.lane.b32.xlu0 %v499_v22, %s9380_s24  ;;  %v1012_v21 = vmul.f32 %v1002_v19, %v9732_v15  ;;  %v906_v22 = vmul.f32 %v896_v20, %v9723_v63 }
 0x182   :  { %509 = vrot.lane.b32.xlu1 %v498_v29, %s9380_s24  ;;  %515 = vrot.lane.b32.xlu0 %v501_v30, %s9380_s24 }
 0x186   :  { %513 = vrot.lane.b32.xlu1 %v500_v36, %s9380_s24  ;;  %587 = vrot.lane.b32.xlu0 %v576_v37, %s9372_s5 }
 0x18a   :  { %507 = vrot.lane.b32.xlu1 %v497_v42, %s9380_s24  ;;  %591 = vrot.lane.b32.xlu0 %v578_v43, %s9372_s5 }
 0x18e   :  { %589 = vrot.lane.b32.xlu1 %v577_v48, %s9372_s5  ;;  %585 = vrot.lane.b32.xlu0 %v575_v50, %s9372_s5  ;;  %v289_v48 = vor.u32 %v288_v46, %v287_v44 }
 0x190   :  { %v324_v55 = vmul.f32 %v322_v54, %v289_v48 }
 0x192   :  { %593 = vrot.lane.b32.xlu1 %v579_v53, %s9372_s5  ;;  %833 = vrot.lane.b32.xlu0 %v823_v61, %s9381_s26  ;;  %v339_v61 = vrot.slane %v324_v55, %v9661_v51  ;;  %v335_v17 = vrot.slane %v324_v55, %v9658_v49  ;;  %v347_v19 = vrot.slane %v324_v55, %v9670_v56 }
 0x196   :  { %835 = vrot.lane.b32.xlu1 %v824_v3, %s9381_s26  ;;  %837 = vrot.lane.b32.xlu0 %v825_v5, %s9381_s26  ;;  %v358_v3 = vmul.f32 %v339_v61, %v9805_v25  ;;  %v343_v5 = vrot.slane %v324_v55, %v9673_v57 }
 0x19a   :  { %839 = vrot.lane.b32.xlu1 %v826_v59, %s9381_s26  ;;  %841 = vrot.lane.b32.xlu0 %v827_v7, %s9381_s26 }
 0x19e   :  { %914 = vrot.lane.b32.xlu1 %v903_v11, %s9382_s28  ;;  %912 = vrot.lane.b32.xlu0 %v902_v12, %s9382_s28  ;;  %v351_v11 = vrot.slane %v324_v55, %v9687_v14  ;;  %v359_v12 = vmul.f32 %v343_v5, %v9805_v25 }
 0x1a0   :  { %v361_v27 = vmul.f32 %v351_v11, %v9805_v25 }
 0x1a2   :  { %918 = vrot.lane.b32.xlu1 %v905_v2, %s9382_s28  ;;  %916 = vrot.lane.b32.xlu0 %v904_v39, %s9382_s28 }
 0x1a6   :  { %1026 = vrot.lane.b32.xlu1 %v1012_v21, %s9379_s3  ;;  %920 = vrot.lane.b32.xlu0 %v906_v22, %s9382_s28 }
 0x1aa   :  { %1024 = vrot.lane.b32.xlu0 %v1011_v24, %s9379_s3  ;;  %s11249_s3 = sld [smem:[#allocation34_spill]] }
 0x1cd   :  { %v9809_v29 = vpop.permute.xlu0 %674  ;;  %v9811_v30 = vpop.permute.xlu1 %672 }
 0x1ce   :  { %v680_v48 = vsel %vm321_vm9, %v9811_v30, %v9809_v29 }
 0x1d1   :  { %v9813_v63 = vpop.permute.xlu0 %678  ;;  %v9815_v32 = vpop.permute.xlu1 %676 }
 0x1d8   :  { %v433_v60 = vpop.permute.xlu1 %432  ;;  %v431_v33 = vpop.permute.xlu0 %430 }
 0x1d9   :  { %v440_v1 = vsel %vm438_vm6, %v431_v33, %v433_v60 }
 0x1da   :  { %v449_v7 = vadd.f32 %v440_v1, %v358_v3 }
 0x1dc   :  { %v437_v34 = vpop.permute.xlu1 %436  ;;  %v435_v35 = vpop.permute.xlu0 %434 }
 0x1dd   :  { %v441_v9 = vsel %vm438_vm6, %v433_v60, %v435_v35  ;;  %v357_v60 = vmul.f32 %v335_v17, %v9805_v25  ;;  %v442_v54 = vsel %vm438_vm6, %v435_v35, %v437_v34  ;;  %v452_v1 = vadd.f32 %v437_v34, %v361_v27 }
 0x1de   :  { %v450_v21 = vadd.f32 %v441_v9, %v359_v12 }
 0x1e0   :  { %v9817_v15 = vpop.permute.xlu1 %754  ;;  %v429_v36 = vpop.permute.xlu0 %428 }
 0x1e1   :  { %v439_v23 = vsel %vm438_vm6, %v429_v36, %v431_v33 }
 0x1e2   :  { %v448_v36 = vadd.f32 %v439_v23, %v357_v60  ;;  %v682_v23 = vsel %vm321_vm9, %v9815_v32, %v9813_v63 }
 0x1e4   :  { %v9819_v37 = vpop.permute.xlu1 %758  ;;  %v9821_v38 = vpop.permute.xlu0 %756 }
 0x1e5   :  { %v765_v35 = vsel %vm764_vm11, %v9817_v15, %v9821_v38 }
 0x1e8   :  { %v9823_v40 = vpop.permute.xlu1 %762  ;;  %v9825_v41 = vpop.permute.xlu0 %760 }
 0x1ec   :  { %v9827_v42 = vpop.permute.xlu1 %1018  ;;  %v9829_v43 = vpop.permute.xlu0 %1020 }
 0x1f0   :  { %v9831_v26 = vpop.permute.xlu1 %1022  ;;  %v512_v45 = vpop.permute.xlu0 %511 }
 0x1f4   :  { %v510_v50 = vpop.permute.xlu1 %509  ;;  %v516_v52 = vpop.permute.xlu0 %515 }
 0x1f5   :  { %v519_v59 = vsel %vm517_vm10, %v510_v50, %v512_v45 }
 0x1f6   :  { %v528_v18 = vadd.f32 %v519_v59, %v449_v7 }
 0x1f8   :  { %v514_v58 = vpop.permute.xlu1 %513  ;;  %v588_v53 = vpop.permute.xlu0 %587 }
 0x1f9   :  { %v520_v20 = vsel %vm517_vm10, %v512_v45, %v514_v58  ;;  %v360_v45 = vmul.f32 %v347_v19, %v9805_v25  ;;  %v521_v3 = vsel %vm517_vm10, %v514_v58, %v516_v52  ;;  %v766_v19 = vsel %vm764_vm11, %v9821_v38, %v9819_v37 }
 0x1fa   :  { %v529_v44 = vadd.f32 %v520_v20, %v450_v21 }
 0x1fb   :  { %v451_v59 = vadd.f32 %v442_v54, %v360_v45 }
 0x1fc   :  { %v508_v62 = vpop.permute.xlu1 %507  ;;  %v592_v0 = vpop.permute.xlu0 %591 }
 0x1fd   :  { %v518_v33 = vsel %vm517_vm10, %v508_v62, %v510_v50  ;;  %v531_v50 = vadd.f32 %v516_v52, %v452_v1 }
 0x1fe   :  { %v527_v7 = vadd.f32 %v518_v33, %v448_v36  ;;  %v768_v33 = vsel %vm764_vm11, %v9825_v41, %v9823_v40 }
 0x200   :  { %v590_v6 = vpop.permute.xlu1 %589  ;;  %v586_v31 = vpop.permute.xlu0 %585 }
 0x201   :  { %v596_v10 = vsel %vm381_vm2, %v588_v53, %v590_v6  ;;  %v597_v24 = vsel %vm381_vm2, %v590_v6, %v592_v0  ;;  %v595_v5 = vsel %vm381_vm2, %v586_v31, %v588_v53  ;;  %v681_v6 = vsel %vm321_vm9, %v9809_v29, %v9815_v32 }
 0x202   :  { %v605_v22 = vadd.f32 %v596_v10, %v528_v18  ;;  %v606_v55 = vadd.f32 %v597_v24, %v529_v44  ;;  %v530_v53 = vadd.f32 %v521_v3, %v451_v59  ;;  %v604_v31 = vadd.f32 %v595_v5, %v527_v7 }
 0x203   :  { %vm2699_vm9 = vcmask 261120  }
 0x204   :  { %v594_v2 = vpop.permute.xlu1 %593  ;;  %v9844_v39 = vpop.permute.xlu0 %833  ;;  %v689_v61 = vadd.f32 %v680_v48, %v605_v22  ;;  %v690_v62 = vadd.f32 %v681_v6, %v606_v55  ;;  %v688_v20 = vadd.f32 %v9811_v30, %v604_v31  ;;  %v767_v30 = vsel %vm764_vm11, %v9819_v37, %v9825_v41 }
 0x205   :  { %v598_v34 = vsel %vm381_vm2, %v592_v0, %v594_v2  ;;  %v608_v11 = vadd.f32 %v594_v2, %v531_v50  ;;  %v1029_v2 = vsel %vm1028_vm14, %v9827_v42, %v9829_v43  ;;  %vm9396_vm11 = vmmov 0  }
 0x206   :  { %v775_v10 = vadd.f32 %v765_v35, %v689_v61  ;;  %v607_v29 = vadd.f32 %v598_v34, %v530_v53  ;;  %v776_v21 = vadd.f32 %v766_v19, %v690_v62  ;;  %v774_v48 = vadd.f32 %v9817_v15, %v688_v20  ;;  %v1158_v20 = vld [vmem:[%s9485_s27 + $0x80] sm:$0xff] }
 0x207   :  { %v692_v27 = vadd.f32 %v9813_v63, %v608_v11  ;;  %v1030_v63 = vsel %vm1028_vm14, %v9829_v43, %v9831_v26 }
 0x208   :  { %v836_v46 = vpop.permute.xlu1 %835  ;;  %v838_v47 = vpop.permute.xlu0 %837  ;;  %v691_v24 = vadd.f32 %v682_v23, %v607_v29  ;;  %v853_v40 = vadd.f32 %v9844_v39, %v774_v48  ;;  %v9916_v29 = vld [vmem:[#allocation2 + $0x28] sm:$0xff]  ;;  %v1174_v23 = vld [vmem:[%s9485_s27 + $0x100] sm:$0xff]  ;;  %v1193_v48 = vld [vmem:[%s9485_s27 + $0x198] sm:$0xff] }
 0x209   :  { %v844_v58 = vsel %vm843_vm12, %v9844_v39, %v836_v46  ;;  %v845_v52 = vsel %vm843_vm12, %v836_v46, %v838_v47  ;;  %v778_v37 = vadd.f32 %v768_v33, %v692_v27  ;;  %v1176_v33 = vld [vmem:[%s9485_s27 + $0x110] sm:$0xff] }
 0x20a   :  { %v854_v12 = vadd.f32 %v844_v58, %v775_v10  ;;  %v855_v38 = vadd.f32 %v845_v52, %v776_v21  ;;  %v777_v61 = vadd.f32 %v767_v30, %v691_v24  ;;  %v1190_v52 = vld [vmem:[%s9485_s27 + $0x180] sm:$0xff]  ;;  %v1192_v30 = vld [vmem:[%s9485_s27 + $0x190] sm:$0xff] }
 0x20c   :  { %v840_v25 = vpop.permute.xlu1 %839  ;;  %v842_v9 = vpop.permute.xlu0 %841 }
 0x20d   :  { %v846_v36 = vsel %vm843_vm12, %v838_v47, %v840_v25  ;;  %v847_v55 = vsel %vm843_vm12, %v840_v25, %v842_v9  ;;  %vm2878_vm12 = vcmask 31744  }
 0x20e   :  { %v856_v41 = vadd.f32 %v846_v36, %v777_v61  ;;  %v857_v6 = vadd.f32 %v847_v55, %v778_v37  ;;  %v1144_v37 = vld [vmem:[%s9485_s27 + $0x10] sm:$0xff] }
 0x210   :  { %v915_v17 = vpop.permute.xlu1 %914  ;;  %v913_v18 = vpop.permute.xlu0 %912 }
 0x211   :  { %v923_v0 = vsel %vm922_vm13, %v913_v18, %v915_v17  ;;  %v932_v59 = vadd.f32 %v913_v18, %v853_v40  ;;  %v1162_v40 = vld [vmem:[%s9485_s27 + $0xa0] sm:$0xff] }
 0x212   :  { %v933_v22 = vadd.f32 %v923_v0, %v854_v12  ;;  %v1191_v0 = vld [vmem:[%s9485_s27 + $0x188] sm:$0xff] }
 0x213   :  { %v1038_v39 = vadd.f32 %v9827_v42, %v932_v59  ;;  %v8252_v21 = vpack.c.bf16 %v1191_v0, %v1190_v52  ;;  %v1178_v59 = vld [vmem:[%s9485_s27 + $0x120] sm:$0xff]  ;;  %v1167_v0 = vld [vmem:[%s9485_s27 + $0xc8] sm:$0xff] }
 0x214   :  { %v917_v60 = vpop.permute.xlu0 %916  ;;  %v1039_v44 = vadd.f32 %v1029_v2, %v933_v22  ;;  %v919_v45 = vpop.permute.xlu1 %918  ;;  %v1159_v22 = vld [vmem:[%s9485_s27 + $0x88] sm:$0xff] }
 0x215   :  { %v924_v46 = vsel %vm922_vm13, %v915_v17, %v917_v60  ;;  %v925_v3 = vsel %vm922_vm13, %v917_v60, %v919_v45  ;;  %v1049_v31 = vadd.f32 %v9807_v28, %v1038_v39  ;;  %v1175_v2 = vld [vmem:[%s9485_s27 + $0x108] sm:$0xff]  ;;  %v8220_v27 = vpack.c.bf16 %v1159_v22, %v1158_v20  ;;  %v1142_v60 = vld [vmem:[%s9485_s27] sm:$0xff]  ;;  %8253 = vmatprep.subr.bf16.mxu1 %v8252_v21  ;;  %v1164_v39 = vld [vmem:[%s9485_s27 + $0xb0] sm:$0xff] }
 0x216   :  { %v934_v32 = vadd.f32 %v924_v46, %v855_v38  ;;  %v1050_v54 = vadd.f32 %v9807_v28, %v1039_v44  ;;  %v935_v47 = vadd.f32 %v925_v3, %v856_v41  ;;  %v8254_v38 = vpack.c.bf16 %v1175_v2, %v1174_v23  ;;  %v1143_v44 = vld [vmem:[%s9485_s27 + $0x8] sm:$0xff]  ;;  %v1182_v22 = vld [vmem:[%s9485_s27 + $0x140] sm:$0xff] }
 0x217   :  { %v8222_v46 = vpack.c.bf16 %v1143_v44, %v1142_v60  ;;  %8221 = vmatprep.subr.bf16.mxu0 %v8220_v27  ;;  %v1163_v41 = vld [vmem:[%s9485_s27 + $0xa8] sm:$0xff]  ;;  %v1150_v2 = vld [vmem:[%s9485_s27 + $0x40] sm:$0xff]  ;;  %v1201_v60 = vld [vmem:[%s9485_s27 + $0x1d8] sm:$0xff] }
 0x218   :  { %v921_v1 = vpop.permute.xlu0 %920  ;;  %1061 = vrot.lane.b32.xlu0 %v1050_v54, %s9376_s30  ;;  %v1040_v15 = vadd.f32 %v1030_v63, %v934_v32  ;;  %v1027_v7 = vpop.permute.xlu1 %1026  ;;  %8255 = vmatpush3.bf16.msra.mxu1 %v8254_v38  ;;  %v8256_v32 = vpack.c.bf16 %v1193_v48, %v1192_v30  ;;  %v1161_v54 = vld [vmem:[%s9485_s27 + $0x98] sm:$0xff]  ;;  %v1183_v23 = vld [vmem:[%s9485_s27 + $0x148] sm:$0xff]  ;;  %v1200_v38 = vld [vmem:[%s9485_s27 + $0x1d0] sm:$0xff] }
 0x219   :  { %v926_v5 = vsel %vm922_vm13, %v919_v45, %v921_v1  ;;  %v1160_v45 = vld [vmem:[%s9485_s27 + $0x90] sm:$0xff]  ;;  %v1177_v63 = vld [vmem:[%s9485_s27 + $0x118] sm:$0xff]  ;;  %8223 = vmatpush3.bf16.msra.mxu0 %v8222_v46  ;;  %v1151_v27 = vld [vmem:[%s9485_s27 + $0x48] sm:$0xff]  ;;  %v8270_v30 = vpack.c.bf16 %v1183_v23, %v1182_v22  ;;  %vm2984_vm13 = vcmask 39936  }
 0x21a   :  { %v1051_v43 = vadd.f32 %v9807_v28, %v1040_v15  ;;  %v936_v25 = vadd.f32 %v926_v5, %v857_v6  ;;  %v8224_v55 = vpack.c.bf16 %v1161_v54, %v1160_v45  ;;  %v8258_v61 = vpack.c.bf16 %v1177_v63, %v1176_v33  ;;  %v1145_v1 = vld [vmem:[%s9485_s27 + $0x18] sm:$0xff]  ;;  %v1194_v15 = vld [vmem:[%s9485_s27 + $0x1a0] sm:$0xff]  ;;  %8257 = vmatprep.subr.bf16.mxu1 %v8256_v32  ;;  %v1195_v5 = vld [vmem:[%s9485_s27 + $0x1a8] sm:$0xff] }
 0x21b   :  { %v8226_v3 = vpack.c.bf16 %v1145_v1, %v1144_v37  ;;  %v8260_v6 = vpack.c.bf16 %v1195_v5, %v1194_v15  ;;  %v1168_v44 = vld [vmem:[%s9485_s27 + $0xd0] sm:$0xff]  ;;  %v1169_v46 = vld [vmem:[%s9485_s27 + $0xd8] sm:$0xff]  ;;  %v8238_v48 = vpack.c.bf16 %v1151_v27, %v1150_v2  ;;  %v8272_v45 = vpack.c.bf16 %v1201_v60, %v1200_v38  ;;  %v1203_v37 = vld [vmem:[%s9485_s27 + $0x1e8] sm:$0xff] }
 0x21c   :  { %v1025_v9 = vpop.permute.xlu0 %1024  ;;  %1063 = vrot.lane.b32.xlu1 %v1051_v43, %s9376_s30  ;;  %8225 = vmatprep.subr.bf16.mxu0 %v8224_v55  ;;  %v8228_v43 = vpack.c.bf16 %v1163_v41, %v1162_v40  ;;  %v1184_v32 = vld [vmem:[%s9485_s27 + $0x150] sm:$0xff]  ;;  %v1185_v54 = vld [vmem:[%s9485_s27 + $0x158] sm:$0xff]  ;;  %v8240_v63 = vpack.c.bf16 %v1169_v46, %v1168_v44  ;;  %v1170_v1 = vld [vmem:[%s9485_s27 + $0xe0] sm:$0xff] }
 0x21d   :  { %v1031_v35 = vsel %vm1028_vm14, %v9831_v26, %v1025_v9  ;;  %v1032_v50 = vsel %vm1028_vm14, %v1025_v9, %v1027_v7  ;;  %v1146_v7 = vld [vmem:[%s9485_s27 + $0x20] sm:$0xff]  ;;  %8259 = vmatpush3.bf16.msra.mxu1 %v8258_v61  ;;  %v1147_v9 = vld [vmem:[%s9485_s27 + $0x28] sm:$0xff]  ;;  %8227 = vmatpush3.bf16.msra.mxu0 %v8226_v3  ;;  %v1152_v33 = vld [vmem:[%s9485_s27 + $0x50] sm:$0xff]  ;;  %v8274_v3 = vpack.c.bf16 %v1185_v54, %v1184_v32  ;;  %vm3108_vm14 = vcmask 23552  }
 0x21e   :  { %v1041_v34 = vadd.f32 %v1031_v35, %v935_v47  ;;  %v1042_v58 = vadd.f32 %v1032_v50, %v936_v25  ;;  %v1179_v47 = vld [vmem:[%s9485_s27 + $0x128] sm:$0xff]  ;;  %v1196_v35 = vld [vmem:[%s9485_s27 + $0x1b0] sm:$0xff]  ;;  %v1197_v50 = vld [vmem:[%s9485_s27 + $0x1b8] sm:$0xff]  ;;  %8261 = vmatprep.subr.bf16.mxu1 %v8260_v6  ;;  %8229 = vmatprep.subr.bf16.mxu0 %v8228_v43 }
 0x21f   :  { %v8262_v25 = vpack.c.bf16 %v1179_v47, %v1178_v59  ;;  %v1153_v55 = vld [vmem:[%s9485_s27 + $0x58] sm:$0xff]  ;;  %v1202_v61 = vld [vmem:[%s9485_s27 + $0x1e0] sm:$0xff]  ;;  %v1171_v15 = vld [vmem:[%s9485_s27 + $0xe8] sm:$0xff] }
 0x220   :  { %v1053_v53 = vadd.f32 %v9807_v28, %v1042_v58  ;;  %v1052_v62 = vadd.f32 %v9807_v28, %v1041_v34  ;;  %v8230_v34 = vpack.c.bf16 %v1147_v9, %v1146_v7  ;;  %v8264_v58 = vpack.c.bf16 %v1197_v50, %v1196_v35  ;;  %v1186_v41 = vld [vmem:[%s9485_s27 + $0x160] sm:$0xff]  ;;  %v1187_v6 = vld [vmem:[%s9485_s27 + $0x168] sm:$0xff]  ;;  %v1205_v35 = vld [vmem:[%s9485_s27 + $0x1f8] sm:$0xff] }
 0x221   :  { %8263 = vmatpush3.bf16.msra.mxu1 %v8262_v25  ;;  %v8242_v5 = vpack.c.bf16 %v1153_v55, %v1152_v33  ;;  %v8276_v40 = vpack.c.bf16 %v1203_v37, %v1202_v61  ;;  %v8244_v43 = vpack.c.bf16 %v1171_v15, %v1170_v1  ;;  %v8278_v59 = vpack.c.bf16 %v1187_v6, %v1186_v41  ;;  %v1154_v47 = vld [vmem:[%s9485_s27 + $0x60] sm:$0xff]  ;;  %v1155_v7 = vld [vmem:[%s9485_s27 + $0x68] sm:$0xff]  ;;  %v1204_v25 = vld [vmem:[%s9485_s27 + $0x1f0] sm:$0xff] }
 0x222   :  { %1067 = vrot.lane.b32.xlu1 %v1053_v53, %s9376_s30  ;;  %1065 = vrot.lane.b32.xlu0 %v1052_v62, %s9376_s30  ;;  %v1165_v53 = vld [vmem:[%s9485_s27 + $0xb8] sm:$0xff]  ;;  %v1180_v62 = vld [vmem:[%s9485_s27 + $0x130] sm:$0xff]  ;;  %v8246_v9 = vpack.c.bf16 %v1155_v7, %v1154_v47 }
 0x223   :  { %8231 = vmatpush3.bf16.msra.mxu0 %v8230_v34  ;;  %8265 = vmatprep.subr.bf16.mxu1 %v8264_v58  ;;  %v1172_v50 = vld [vmem:[%s9485_s27 + $0xf0] sm:$0xff]  ;;  %v1173_v34 = vld [vmem:[%s9485_s27 + $0xf8] sm:$0xff]  ;;  %v8280_v58 = vpack.c.bf16 %v1205_v35, %v1204_v25 }
 0x226   :  { %1059 = vrot.lane.b32.xlu0 %v1049_v31, %s9376_s30  ;;  %v8232_v31 = vpack.c.bf16 %v1165_v53, %v1164_v39  ;;  %v8248_v39 = vpack.c.bf16 %v1173_v34, %v1172_v50  ;;  %v1188_v53 = vld [vmem:[%s9485_s27 + $0x170] sm:$0xff]  ;;  %v10024_v50 = vsub.s32 5, %v9612_v8  ;;  %s9397_s30 = smov 2  }
 0x228   :  { %8233 = vmatprep.subr.bf16.mxu0 %v8232_v31 }
 0x28a   :  { %v1062_v26 = vpop.permute.xlu0 %1061 }
 0x28e   :  { %v1064_v10 = vpop.permute.xlu1 %1063 }
 0x28f   :  { %v9913_v42 = vsel %vm971_vm5, %v1062_v26, %v1064_v10 }
 0x290   :  { %1078 = vst [vmem:[#allocation2 + $0x10] sm:$0xff] %v9913_v42 }
 0x294   :  { %v1068_v11 = vpop.permute.xlu1 %1067  ;;  %v1066_v12 = vpop.permute.xlu0 %1065 }
 0x295   :  { %v9919_v28 = vsel %vm971_vm5, %v1064_v10, %v1066_v12  ;;  %v9922_v17 = vsel %vm971_vm5, %v1066_v12, %v1068_v11  ;;  %v1148_v10 = vld [vmem:[%s9485_s27 + $0x30] sm:$0xff]  ;;  %v1149_v11 = vld [vmem:[%s9485_s27 + $0x38] sm:$0xff]  ;;  %v1198_v12 = vld [vmem:[%s9485_s27 + $0x1c0] sm:$0xff] }
 0x296   :  { %1079 = vst [vmem:[#allocation2 + $0x18] sm:$0xff] %v9919_v28  ;;  %1080 = vst [vmem:[#allocation2 + $0x20] sm:$0xff] %v9922_v17  ;;  %v8669_v18 = vpack.i.bf16 %v9919_v28, %v9913_v42  ;;  %v8674_v19 = vpack.i.bf16 %v9916_v29, %v9922_v17  ;;  %v8234_v20 = vpack.c.bf16 %v1149_v11, %v1148_v10  ;;  %v1156_v11 = vld [vmem:[%s9485_s27 + $0x70] sm:$0xff] }
 0x298   :  { %v1060_v24 = vpop.permute.xlu0 %1059  ;;  %8670 = vrot.lane.b32.xlu1 %v8669_v18, %s9374_s15  ;;  %8675 = vrot.lane.b32.xlu0 %v8674_v19, %s9374_s15  ;;  %v1199_v18 = vld [vmem:[%s9485_s27 + $0x1c8] sm:$0xff]  ;;  %v1166_v19 = vld [vmem:[%s9485_s27 + $0xc0] sm:$0xff] }
 0x299   :  { %v9947_v36 = vsel %vm971_vm5, %v1060_v24, %v1062_v26  ;;  %v1181_v26 = vld [vmem:[%s9485_s27 + $0x138] sm:$0xff]  ;;  %v8268_v21 = vpack.c.bf16 %v1199_v18, %v1198_v12  ;;  %v8236_v24 = vpack.c.bf16 %v1167_v0, %v1166_v19  ;;  %8235 = vmatpush3.bf16.msra.mxu0 %v8234_v20  ;;  %vm2249_vm5 = vcmask 982016  }
 0x29a   :  { %v8266_v52 = vpack.c.bf16 %v1181_v26, %v1180_v62  ;;  %v1189_v62 = vld [vmem:[%s9485_s27 + $0x178] sm:$0xff] }
 0x29b   :  { %8237 = vmatprep.subr.bf16.mxu0 %v8236_v24  ;;  %v8282_v31 = vpack.c.bf16 %v1189_v62, %v1188_v53  ;;  %v1157_v12 = vld [vmem:[%s9485_s27 + $0x78] sm:$0xff]  ;;  %s11241_s27 = sld [smem:[#allocation31_spill]] }
 0x29c   :  { %1091 = vrot.lane.b32.xlu1 %v9947_v36, %s9374_s15  ;;  %8267 = vmatpush3.bf16.msra.mxu1 %v8266_v52  ;;  %v8250_v20 = vpack.c.bf16 %v1157_v12, %v1156_v11  ;;  %v10037_v12 = vld [vmem:[#allocation2 + $0x48] sm:$0xff] }
 0x29d   :  { %8269 = vmatprep.subr.bf16.mxu1 %v8268_v21  ;;  %8239 = vmatpush3.bf16.msra.mxu0 %v8238_v48 }
 0x29e   :  { %8241 = vmatprep.subr.bf16.mxu0 %v8240_v63 }
 0x2a0   :  { %8271 = vmatpush3.bf16.msra.mxu1 %v8270_v30 }
 0x2a1   :  { %8273 = vmatprep.subr.bf16.mxu1 %v8272_v45  ;;  %8243 = vmatpush3.bf16.msra.mxu0 %v8242_v5  ;;  %v11226_v5 = vmov 1   ;;  %v1355_v25 = vld [vmem:[%s11241_s27] sm:$0xff] }
 0x2a2   :  { %8245 = vmatprep.subr.bf16.mxu0 %v8244_v43  ;;  %8689 = vset.pattern.permute.xlu1 %v11226_v5 }
 0x2a4   :  { %8275 = vmatpush3.bf16.msra.mxu1 %v8274_v3 }
 0x2a5   :  { %8277 = vmatprep.subr.bf16.mxu1 %v8276_v40  ;;  %8247 = vmatpush3.bf16.msra.mxu0 %v8246_v9  ;;  %v10019_v9 = vld [vmem:[#allocation10] sm:$0xff] }
 0x2a6   :  { %8249 = vmatprep.subr.bf16.mxu0 %v8248_v39  ;;  %v1620_v35 = vrot.slane %v10019_v9, %v9673_v57  ;;  %v1982_v34 = vrot.slane %v10019_v9, %v10024_v50  ;;  %v1379_v39 = vrot.slane %v10019_v9, %v9658_v49 }
 0x2a8   :  { %8279 = vmatpush3.bf16.msra.mxu1 %v8278_v59 }
 0x2a9   :  { %8281 = vmatprep.subr.bf16.mxu1 %v8280_v58  ;;  %8251 = vmatpush3.bf16.msra.mxu0 %v8250_v20  ;;  %v1393_v58 = vrot.slane %v10019_v9, %v9661_v51  ;;  %v10050_v20 = vsub.s32 7, %v9612_v8 }
 0x2ac   :  { %8283 = vmatpush3.bf16.msra.mxu1 %v8282_v31 }
 0x30a   :  { %v8671_v26 = vpop.permute.xlu1 %8670  ;;  %v8676_v10 = vpop.permute.xlu0 %8675 }
 0x30b   :  { %v8673_v18 = vunpack.i.h.bf16 %v8671_v26  ;;  %v8672_v19 = vunpack.i.l.bf16 %v8671_v26  ;;  %v8678_v52 = vunpack.i.h.bf16 %v8676_v10  ;;  %v8677_v0 = vunpack.i.l.bf16 %v8676_v10 }
 0x30d   :  { %v1114_v21 = vmax.f32 %v9916_v29, %v8678_v52  ;;  %v1104_v22 = vsel %vm438_vm6, %v8677_v0, %v8678_v52  ;;  %v1102_v23 = vsel %vm438_vm6, %v8672_v19, %v8673_v18  ;;  %v1103_v2 = vsel %vm438_vm6, %v8673_v18, %v8677_v0 }
 0x30e   :  { %v1092_v24 = vpop.permute.xlu1 %1091  ;;  %v1112_v27 = vmax.f32 %v9922_v17, %v1104_v22  ;;  %v1110_v38 = vmax.f32 %v9913_v42, %v1102_v23  ;;  %v1111_v60 = vmax.f32 %v9919_v28, %v1103_v2  ;;  %v10044_v52 = vsub.s32 6, %v9612_v8  ;;  %v7451_v22 = vld [vmem:[#allocation10 + $0x8] ss:$0 sm:$0xff] }
 0x30f   :  { %v1101_v30 = vsel %vm438_vm6, %v1092_v24, %v8672_v19  ;;  %v1745_v19 = vrot.slane %v10019_v9, %v9670_v56 }
 0x310   :  { %v8684_v44 = vpack.i.bf16 %v1114_v21, %v1112_v27  ;;  %v8679_v46 = vpack.i.bf16 %v1111_v60, %v1110_v38  ;;  %v1109_v29 = vmax.f32 %v9947_v36, %v1101_v30  ;;  %v2106_v0 = vrot.slane %v10019_v9, %v10044_v52 }
 0x311   :  { %v2231_v21 = vrot.slane %v10019_v9, %v10050_v20 }
 0x312   :  { %8685 = vrot.lane.b32.xlu1 %v8684_v44, %s9372_s5  ;;  %8680 = vrot.lane.b32.xlu0 %v8679_v46, %s9372_s5  ;;  %v7403_v44 = vld [vmem:[%s11242_s17 + $0x40] sm:$0xff] }
 0x316   :  { %1120 = vrot.lane.b32.xlu0 %v1109_v29, %s9372_s5  ;;  %s9394_s5 = smov 4  }
 0x384   :  { %v8686_v48 = vpop.permute.xlu1 %8685  ;;  %v8681_v45 = vpop.permute.xlu0 %8680 }
 0x385   :  { %v8688_v17 = vunpack.i.h.bf16 %v8686_v48  ;;  %v8687_v32 = vunpack.i.l.bf16 %v8686_v48  ;;  %v8683_v54 = vunpack.i.h.bf16 %v8681_v45  ;;  %v8682_v33 = vunpack.i.l.bf16 %v8681_v45 }
 0x387   :  { %v1131_v28 = vsel %vm381_vm2, %v8682_v33, %v8683_v54  ;;  %v1133_v63 = vsel %vm381_vm2, %v8687_v32, %v8688_v17  ;;  %v1132_v55 = vsel %vm381_vm2, %v8683_v54, %v8687_v32 }
 0x388   :  { %v1121_v61 = vpop.permute.xlu0 %1120  ;;  %v1139_v37 = vmax.f32 %v1110_v38, %v1131_v28  ;;  %v1141_v1 = vmax.f32 %v1112_v27, %v1133_v63  ;;  %v1140_v15 = vmax.f32 %v1111_v60, %v1132_v55 }
 0x389   :  { %v1130_v36 = vsel %vm381_vm2, %v1121_v61, %v8682_v33  ;;  %vm2124_vm2 = vcmask 990208  }
 0x38a   :  { %v1138_v3 = vmax.f32 %v1109_v29, %v1130_v36  ;;  %1270 = vmatprep.mubr.f32.mxu0 %v1139_v37  ;;  %1340 = vmatprep.mubr.f32.mxu1 %v1141_v1 }
 0x38b   :  { %1341 = vmatmul.mubr.f32.vlgmr.msra.gmra.mrb[0].mxu1 %v1140_v15  ;;  %v7391_v15 = vld [vmem:[%s11242_s17 + $0x20] sm:$0xff] }
 0x38c   :  { %1271 = vmatmul.mubr.f32.vlgmr.msra.gmra.mrb[0].mxu0 %v1138_v3  ;;  %7821 = vmatprep.mubr.msk.f32.mxu1 %vm1411_vm15, %v7391_v15  ;;  %v7428_v15 = vld [vmem:[%s11242_s17 + $0xa8] sm:$0xff] }
 0x38d   :  { %7837 = vmatprep.mubr.msk.f32.mxu0 %vm1411_vm15, %v7403_v44  ;;  %v7414_v44 = vld [vmem:[%s11242_s17 + $0x78] sm:$0xff] }
 0x45e   :  { %v7609_v40 = vpop.f32.mrb[0].mxu1 }
 0x45f   :  { %v7574_v41 = vpop.f32.mrb[0].mxu0  ;;  %v7610_v6 = vpop.f32.mrb[1].mxu1 }
 0x460   :  { %v7611_v43 = vadd.f32 %v7610_v6, %v7609_v40  ;;  %v7575_v59 = vpop.f32.mrb[1].mxu0 }
 0x461   :  { %v7576_v47 = vadd.f32 %v7575_v59, %v7574_v41 }
 0x463   :  { %v1343_v7 = vadd.f32 %v7611_v43, %v7576_v47 }
 0x465   :  { %1346 = vadd.xlane.f32.xlu1 %v1343_v7 }
 0x476   :  { %1366 = vperm.xlu1 %8689, %v1355_v25  }
 0x47a   :  { %1622 = vrot.lane.b32.xlu1 %v1620_v35, %s9384_s25  ;;  %v2481_v35 = vld [vmem:[%s11243_s29 + $0x18] sm:$0xff] }
 0x47b   :  { %8690 = vset.pattern.permute.xlu1 %v11224_v4 }
 0x47e   :  { %1984 = vrot.lane.b32.xlu1 %v1982_v34, %s9364_s23  ;;  %v2478_v34 = vld [vmem:[%s11243_s29] sm:$0xff] }
 0x482   :  { %1395 = vrot.lane.b32.xlu1 %v1393_v58, %s9385_s1  ;;  %v2480_v58 = vld [vmem:[%s11243_s29 + $0x10] sm:$0xff] }
 0x486   :  { %1381 = vrot.lane.b32.xlu1 %v1379_v39, %s9386_s6 }
 0x4f2   :  { %v1347_v53 = vpop.xlane.xlu1 %1346 }
 0x4f3   :  { %v1349_v62 = vmul.f32 0.0078125, %v1347_v53 }
 0x4f5   :  { %v1350_v31 = vsub.f32 %v1343_v7, %v1349_v62 }
 0x4f6   :  { %v1367_v26 = vpop.permute.xlu1 %1366 }
 0x4f7   :  { %v1351_v10 = vmul.f32 %v1350_v31, %v1350_v31 }
 0x4f9   :  { %1352 = vadd.xlane.f32.xlu0 %v1351_v10  ;;  %v7404_v10 = vld [vmem:[%s11242_s17 + $0x48] sm:$0xff] }
 0x4fa   :  { %v1623_v11 = vpop.permute.xlu1 %1622 }
 0x4fb   :  { %v1625_v18 = vmul.f32 %v10037_v12, %v1623_v11 }
 0x4fd   :  { %1634 = vrot.lane.b32.xlu1 %v1625_v18, %s9387_s2  ;;  %v1869_v18 = vrot.slane %v10019_v9, %v9687_v14 }
 0x4fe   :  { %v1985_v45 = vpop.permute.xlu1 %1984 }
 0x4ff   :  { %v1988_v61 = vmul.f32 %v1985_v45, %v9913_v42 }
 0x502   :  { %v1396_v63 = vpop.permute.xlu1 %1395 }
 0x503   :  { %v1398_v55 = vmul.f32 %v10037_v12, %v1396_v63 }
 0x506   :  { %v1382_v3 = vpop.permute.xlu1 %1381 }
 0x507   :  { %v1384_v40 = vmul.f32 %v10037_v12, %v1382_v3 }
 0x50f   :  { %1361 = vperm.xlu0 %8667, %v1355_v25   ;;  %v2479_v25 = vld [vmem:[%s11243_s29 + $0x8] sm:$0xff] }
 0x513   :  { %1747 = vrot.lane.b32.xlu0 %v1745_v19, %s9374_s15 }
 0x517   :  { %2108 = vrot.lane.b32.xlu0 %v2106_v0, %s9387_s2 }
 0x51b   :  { %2233 = vrot.lane.b32.xlu0 %v2231_v21, %s9358_s21  ;;  %v7406_v21 = vld [vmem:[%s11242_s17 + $0x58] sm:$0xff] }
 0x51f   :  { %2358 = vrot.lane.b32.xlu0 %v7451_v22, %s9388_s7 }
 0x56f   :  { %v1635_v39 = vpop.permute.xlu1 %1634 }
 0x586   :  { %v1353_v23 = vpop.xlane.xlu0 %1352 }
 0x587   :  { %v1354_v2 = vmul.f32 0.0078125, %v1353_v23 }
 0x589   :  { %v1356_v24 = vadd.f32 1e-05, %v1354_v2  ;;  %v7411_v2 = vld [vmem:[%s11242_s17 + $0x60] sm:$0xff] }
 0x58b   :  { %9073 = vrsqrt.f32 %v1356_v24  ;;  %v7412_v24 = vld [vmem:[%s11242_s17 + $0x68] sm:$0xff] }
 0x58e   :  { %v1362_v27 = vpop.permute.xlu0 %1361 }
 0x592   :  { %v1748_v38 = vpop.permute.xlu0 %1747 }
 0x593   :  { %v1750_v8 = vmul.f32 %v10037_v12, %v1748_v38 }
 0x595   :  { %v9074_v60 = vpop.eup %9073  ;;  %1759 = vrot.lane.b32.xlu1 %v1750_v8, %s9364_s23 }
 0x596   :  { %v1358_v46 = vmul.f32 %v9074_v60, %v1350_v31  ;;  %v2109_v54 = vpop.permute.xlu0 %2108 }
 0x597   :  { %v2112_v37 = vmul.f32 %v2109_v54, %v9913_v42 }
 0x598   :  { %v1364_v30 = vmul.f32 %v1362_v27, %v1358_v46  ;;  %v7413_v27 = vld [vmem:[%s11242_s17 + $0x70] sm:$0xff]  ;;  %v7419_v46 = vld [vmem:[%s11242_s17 + $0x80] sm:$0xff] }
 0x59a   :  { %v1369_v29 = vadd.f32 %v1367_v26, %v1364_v30  ;;  %v2234_v1 = vpop.permute.xlu0 %2233 }
 0x59b   :  { %v2237_v41 = vmul.f32 %v2234_v1, %v9913_v42 }
 0x59c   :  { %v10061_v48 = vmax.f32 %v1369_v29, 0.0  ;;  %v7420_v29 = vld [vmem:[%s11242_s17 + $0x88] sm:$0xff] }
 0x59e   :  { %v1626_v17 = vmul.f32 %v1623_v11, %v10061_v48  ;;  %v1987_v32 = vmul.f32 %v1985_v45, %v10061_v48  ;;  %v1751_v33 = vmul.f32 %v1748_v38, %v10061_v48  ;;  %v2111_v28 = vmul.f32 %v2109_v54, %v10061_v48  ;;  %v2359_v6 = vpop.permute.xlu0 %2358  ;;  %v7405_v11 = vld [vmem:[%s11242_s17 + $0x50] sm:$0xff] }
 0x59f   :  { %v2236_v36 = vmul.f32 %v2234_v1, %v10061_v48  ;;  %v1399_v43 = vmul.f32 %v1396_v63, %v10061_v48  ;;  %v2361_v59 = vmul.f32 %v2359_v6, %v10061_v48  ;;  %v1385_v47 = vmul.f32 %v1382_v3, %v10061_v48  ;;  %v7421_v45 = vld [vmem:[%s11242_s17 + $0x90] sm:$0xff]  ;;  %v7427_v63 = vld [vmem:[%s11242_s17 + $0xa0] sm:$0xff] }
 0x5a0   :  { %1636 = vrot.lane.b32.xlu0 %v1626_v17, %s9387_s2  ;;  %1996 = vrot.lane.b32.xlu1 %v1987_v32, %s9374_s15  ;;  %v2362_v7 = vmul.f32 %v2359_v6, %v9913_v42  ;;  %v1870_v23 = vmul.f32 %v1869_v18, %v10061_v48  ;;  %v7429_v3 = vld [vmem:[%s11242_s17 + $0xb0] sm:$0xff]  ;;  %v7430_v6 = vld [vmem:[%s11242_s17 + $0xb8] sm:$0xff] }
 0x5a1   :  { %v7453_v18 = vld [vmem:[%s11242_s17 + $0x108] sm:$0xff] }
 0x5a4   :  { %1761 = vrot.lane.b32.xlu0 %v1751_v33, %s9364_s23  ;;  %2120 = vrot.lane.b32.xlu1 %v2111_v28, %s9384_s25  ;;  %v7422_v33 = vld [vmem:[%s11242_s17 + $0x98] sm:$0xff]  ;;  %v7392_v28 = vld [vmem:[%s11242_s17 + $0x28] sm:$0xff] }
 0x5a8   :  { %1998 = vrot.lane.b32.xlu0 %v1988_v61, %s9374_s15  ;;  %1407 = vrot.lane.b32.xlu1 %v1398_v55, %s9358_s21  ;;  %v7393_v55 = vld [vmem:[%s11242_s17 + $0x30] sm:$0xff] }
 0x5ac   :  { %2122 = vrot.lane.b32.xlu0 %v2112_v37, %s9384_s25  ;;  %2245 = vrot.lane.b32.xlu1 %v2236_v36, %s9385_s1  ;;  %v7394_v36 = vld [vmem:[%s11242_s17 + $0x38] sm:$0xff] }
 0x5b0   :  { %2247 = vrot.lane.b32.xlu0 %v2237_v41, %s9385_s1  ;;  %1513 = vrot.lane.b32.xlu1 %v1384_v40, %s9388_s7  ;;  %v1386_v40 = vld [vmem:[%s11242_s17] sm:$0xff] }
 0x5b4   :  { %1409 = vrot.lane.b32.xlu0 %v1399_v43, %s9358_s21  ;;  %2370 = vrot.lane.b32.xlu1 %v2361_v59, %s9386_s6  ;;  %v1387_v43 = vld [vmem:[%s11242_s17 + $0x8] sm:$0xff]  ;;  %v7435_v59 = vld [vmem:[%s11242_s17 + $0xc0] sm:$0xff] }
 0x5b8   :  { %1515 = vrot.lane.b32.xlu0 %v1385_v47, %s9388_s7  ;;  %2484 = vperm.xlu1 %8690, %v2478_v34   ;;  %v1388_v47 = vld [vmem:[%s11242_s17 + $0x10] sm:$0xff] }
 0x5b9   :  { %v7437_v34 = vld [vmem:[%s11242_s17 + $0xd0] sm:$0xff] }
 0x5bc   :  { %2372 = vrot.lane.b32.xlu0 %v2362_v7, %s9386_s6  ;;  %2494 = vperm.xlu1 %8690, %v2480_v58   ;;  %v7436_v7 = vld [vmem:[%s11242_s17 + $0xc8] sm:$0xff] }
 0x5c0   :  { %2489 = vperm.xlu0 %8667, %v2479_v25   ;;  %v1389_v25 = vld [vmem:[%s11242_s17 + $0x18] sm:$0xff] }
 0x5c4   :  { %2499 = vperm.xlu0 %8667, %v2481_v35  }
 0x607   :  { %v1760_v53 = vpop.permute.xlu1 %1759 }
 0x612   :  { %v1637_v62 = vpop.permute.xlu0 %1636  ;;  %v1997_v31 = vpop.permute.xlu1 %1996 }
 0x613   :  { %v1639_v26 = vsel %vm1638_vm1, %v1635_v39, %v1637_v62  ;;  %v7443_v62 = vld [vmem:[%s11242_s17 + $0xe0] sm:$0xff] }
 0x614   :  { %7835 = vmatprep.subr.mxu0 %v1639_v26 }
 0x615   :  { %7836 = vmatpush3.msra.mxu0 %v1639_v26  ;;  %v7445_v26 = vld [vmem:[%s11242_s17 + $0xf0] sm:$0xff] }
 0x616   :  { %v1762_v19 = vpop.permute.xlu0 %1761  ;;  %7838 = vmatmul.mubr.msk.f32.vlgmr.msra.gmra.mrb[2].mxu0 %vm1411_vm15, %v7404_v10  ;;  %v2121_v22 = vpop.permute.xlu1 %2120  ;;  %v7446_v10 = vld [vmem:[%s11242_s17 + $0xf8] sm:$0xff] }
 0x617   :  { %v1763_v0 = vsel %vm707_vm3, %v1760_v53, %v1762_v19  ;;  %7840 = vmatprep.mubr.msk.f32.mxu0 %vm1411_vm15, %v7405_v11  ;;  %v7438_v53 = vld [vmem:[%s11242_s17 + $0xd8] sm:$0xff]  ;;  %v7452_v11 = vld [vmem:[%s11242_s17 + $0x100] sm:$0xff]  ;;  %v7454_v19 = vld [vmem:[%s11242_s17 + $0x110] sm:$0xff] }
 0x618   :  { %7843 = vmatprep.subr.mxu0 %v1763_v0 }
 0x619   :  { %7844 = vmatpush3.msra.mxu0 %v1763_v0  ;;  %v7455_v0 = vld [vmem:[%s11242_s17 + $0x118] sm:$0xff] }
 0x61a   :  { %v1999_v9 = vpop.permute.xlu0 %1998  ;;  %7841 = vmatmul.mubr.msk.f32.gmra.mrb[4].mxu0 %vm1411_vm15, %v7406_v21  ;;  %7851 = vmatprep.subr.mxu0 %v1870_v23  ;;  %v1408_v38 = vpop.permute.xlu1 %1407 }
 0x61b   :  { %7845 = vmatprep.mubr.msk.f32.mxu0 %vm1411_vm15, %v7411_v2  ;;  %v2000_v60 = vsel %vm438_vm6, %v1997_v31, %v1999_v9  ;;  %v7444_v31 = vld [vmem:[%s11242_s17 + $0xe8] sm:$0xff] }
 0x61e   :  { %v2123_v8 = vpop.permute.xlu0 %2122  ;;  %7846 = vmatmul.mubr.msk.f32.vlgmr.msra.gmra.mrb[2].mxu0 %vm1411_vm15, %v7412_v24  ;;  %v2246_v48 = vpop.permute.xlu1 %2245 }
 0x61f   :  { %7852 = vmatpush3.msra.mxu0 %v1870_v23  ;;  %7848 = vmatprep.mubr.msk.f32.mxu0 %vm1411_vm15, %v7413_v27  ;;  %v2125_v32 = vsel %vm2124_vm2, %v2121_v22, %v2123_v8 }
 0x620   :  { %7859 = vmatprep.subr.mxu0 %v2000_v60 }
 0x622   :  { %v2248_v30 = vpop.permute.xlu0 %2247  ;;  %7849 = vmatmul.mubr.msk.f32.gmra.mrb[4].mxu0 %vm1411_vm15, %v7414_v44  ;;  %v1514_v61 = vpop.permute.xlu1 %1513 }
 0x623   :  { %7853 = vmatprep.mubr.msk.f32.mxu0 %vm1411_vm15, %v7419_v46  ;;  %v2250_v41 = vsel %vm2249_vm5, %v2246_v48, %v2248_v30 }
 0x626   :  { %v1410_v17 = vpop.permute.xlu0 %1409  ;;  %7854 = vmatmul.mubr.msk.f32.vlgmr.msra.gmra.mrb[2].mxu0 %vm1411_vm15, %v7420_v29  ;;  %v2371_v58 = vpop.permute.xlu1 %2370 }
 0x627   :  { %7860 = vmatpush3.msra.mxu0 %v2000_v60  ;;  %v1412_v54 = vsel %vm1411_vm15, %v1408_v38, %v1410_v17  ;;  %7856 = vmatprep.mubr.msk.f32.mxu0 %vm1411_vm15, %v7421_v45 }
 0x628   :  { %7867 = vmatprep.subr.mxu0 %v2125_v32  ;;  %7819 = vmatprep.subr.mxu1 %v1412_v54 }
 0x629   :  { %7820 = vmatpush3.msra.mxu1 %v1412_v54 }
 0x62a   :  { %v1516_v37 = vpop.permute.xlu0 %1515  ;;  %7857 = vmatmul.mubr.msk.f32.gmra.mrb[4].mxu0 %vm1411_vm15, %v7422_v33  ;;  %7822 = vmatmul.mubr.msk.f32.vlgmr.msra.gmra.mrb[2].mxu1 %vm1411_vm15, %v7392_v28  ;;  %v2598_v33 = vld [vmem:[%s11244_s10] sm:$0xff]  ;;  %v2599_v28 = vld [vmem:[%s11244_s10 + $0x8] sm:$0xff] }
 0x62b   :  { %v1518_v1 = vsel %vm1517_vm4, %v1514_v61, %v1516_v37  ;;  %7861 = vmatprep.mubr.msk.f32.mxu0 %vm1411_vm15, %v7427_v63  ;;  %7824 = vmatprep.mubr.msk.f32.mxu1 %vm1411_vm15, %v7393_v55  ;;  %v2600_v63 = vld [vmem:[%s11244_s10 + $0x10] sm:$0xff]  ;;  %v8284_v37 = vpack.c.bf16 %v2599_v28, %v2598_v33 }
 0x62c   :  { %7827 = vmatprep.subr.mxu1 %v1518_v1 }
 0x62d   :  { %7828 = vmatpush3.msra.mxu1 %v1518_v1  ;;  %v2601_v1 = vld [vmem:[%s11244_s10 + $0x18] sm:$0xff] }
 0x62e   :  { %7862 = vmatmul.mubr.msk.f32.vlgmr.msra.gmra.mrb[2].mxu0 %vm1411_vm15, %v7428_v15  ;;  %7825 = vmatmul.mubr.msk.f32.gmra.mrb[4].mxu1 %vm1411_vm15, %v7394_v36  ;;  %v2373_v35 = vpop.permute.xlu0 %2372  ;;  %v8288_v36 = vpack.c.bf16 %v2601_v1, %v2600_v63 }
 0x62f   :  { %7868 = vmatpush3.msra.mxu0 %v2125_v32  ;;  %7864 = vmatprep.mubr.msk.f32.mxu0 %vm1411_vm15, %v7429_v3  ;;  %v2375_v39 = vsel %vm11221_vm7, %v2371_v58, %v2373_v35  ;;  %v2602_v3 = vld [vmem:[%s11244_s10 + $0x20] sm:$0xff]  ;;  %v2607_v35 = vld [vmem:[%s11244_s10 + $0x48] sm:$0xff]  ;;  %v2608_v58 = vld [vmem:[%s11244_s10 + $0x50] sm:$0xff]  ;;  %vm3826_vm7 = vcmask 253952  }
 0x630   :  { %7875 = vmatprep.subr.mxu0 %v2250_v41  ;;  %7829 = vmatprep.mubr.msk.f32.mxu1 %vm1411_vm15, %v1386_v40  ;;  %v2603_v40 = vld [vmem:[%s11244_s10 + $0x28] sm:$0xff] }
 0x631   :  { %8285 = vmatprep.subr.bf16.mxu1 %v8284_v37 }
 0x632   :  { %7865 = vmatmul.mubr.msk.f32.gmra.mrb[4].mxu0 %vm1411_vm15, %v7430_v6  ;;  %7830 = vmatmul.mubr.msk.f32.vlgmr.msra.gmra.mrb[2].mxu1 %vm1411_vm15, %v1387_v43  ;;  %v8292_v43 = vpack.c.bf16 %v2603_v40, %v2602_v3 }
 0x633   :  { %7869 = vmatprep.mubr.msk.f32.mxu0 %vm1411_vm15, %v7435_v59  ;;  %7832 = vmatprep.mubr.msk.f32.mxu1 %vm1411_vm15, %v1388_v47  ;;  %v2604_v59 = vld [vmem:[%s11244_s10 + $0x30] sm:$0xff]  ;;  %v2605_v47 = vld [vmem:[%s11244_s10 + $0x38] sm:$0xff] }
 0x634   :  { %8287 = vmatpush3.bf16.msra.mxu1 %v8284_v37 }
 0x635   :  { %8289 = vmatprep.subr.bf16.mxu1 %v8288_v36 }
 0x636   :  { %7870 = vmatmul.mubr.msk.f32.vlgmr.msra.gmra.mrb[2].mxu0 %vm1411_vm15, %v7436_v7  ;;  %7833 = vmatmul.mubr.msk.f32.gmra.mrb[4].mxu1 %vm1411_vm15, %v1389_v25  ;;  %v8296_v7 = vpack.c.bf16 %v2605_v47, %v2604_v59  ;;  %v2606_v25 = vld [vmem:[%s11244_s10 + $0x40] sm:$0xff] }
 0x637   :  { %7876 = vmatpush3.msra.mxu0 %v2250_v41  ;;  %7872 = vmatprep.mubr.msk.f32.mxu0 %vm1411_vm15, %v7437_v34  ;;  %v2485_v8 = vpop.permute.xlu1 %2484  ;;  %v8300_v34 = vpack.c.bf16 %v2607_v35, %v2606_v25 }
 0x638   :  { %7883 = vmatprep.subr.mxu0 %v2375_v39  ;;  %8291 = vmatpush3.bf16.msra.mxu1 %v8288_v36 }
 0x639   :  { %8293 = vmatprep.subr.bf16.mxu1 %v8292_v43 }
 0x63a   :  { %7873 = vmatmul.mubr.msk.f32.gmra.mrb[4].mxu0 %vm1411_vm15, %v7438_v53 }
 0x63b   :  { %7877 = vmatprep.mubr.msk.f32.mxu0 %vm1411_vm15, %v7443_v62  ;;  %v2495_v61 = vpop.permute.xlu1 %2494  ;;  %v2610_v62 = vld [vmem:[%s11244_s10 + $0x60] sm:$0xff] }
 0x63c   :  { %8295 = vmatpush3.bf16.msra.mxu1 %v8292_v43 }
 0x63d   :  { %8297 = vmatprep.subr.bf16.mxu1 %v8296_v7 }
 0x63e   :  { %7878 = vmatmul.mubr.msk.f32.vlgmr.msra.gmra.mrb[2].mxu0 %vm1411_vm15, %v7444_v31  ;;  %v2611_v31 = vld [vmem:[%s11244_s10 + $0x68] sm:$0xff] }
 0x63f   :  { %7884 = vmatpush3.msra.mxu0 %v2375_v39  ;;  %7880 = vmatprep.mubr.msk.f32.mxu0 %vm1411_vm15, %v7445_v26  ;;  %v2490_v9 = vpop.permute.xlu0 %2489  ;;  %v2609_v39 = vld [vmem:[%s11244_s10 + $0x58] sm:$0xff]  ;;  %v8308_v26 = vpack.c.bf16 %v2611_v31, %v2610_v62 }
 0x640   :  { %8299 = vmatpush3.bf16.msra.mxu1 %v8296_v7  ;;  %v8304_v53 = vpack.c.bf16 %v2609_v39, %v2608_v58 }
 0x641   :  { %8301 = vmatprep.subr.bf16.mxu1 %v8300_v34 }
 0x642   :  { %7881 = vmatmul.mubr.msk.f32.gmra.mrb[4].mxu0 %vm1411_vm15, %v7446_v10  ;;  %v2612_v10 = vld [vmem:[%s11244_s10 + $0x70] sm:$0xff] }
 0x643   :  { %7885 = vmatprep.mubr.msk.f32.mxu0 %vm1411_vm15, %v7452_v11  ;;  %v2500_v17 = vpop.permute.xlu0 %2499  ;;  %v2613_v11 = vld [vmem:[%s11244_s10 + $0x78] sm:$0xff] }
 0x644   :  { %8303 = vmatpush3.bf16.msra.mxu1 %v8300_v34 }
 0x645   :  { %8305 = vmatprep.subr.bf16.mxu1 %v8304_v53 }
 0x646   :  { %7886 = vmatmul.mubr.msk.f32.vlgmr.msra.gmra.mrb[2].mxu0 %vm1411_vm15, %v7453_v18  ;;  %v8312_v18 = vpack.c.bf16 %v2613_v11, %v2612_v10 }
 0x647   :  { %7888 = vmatprep.mubr.msk.f32.mxu0 %vm1411_vm15, %v7454_v19 }
 0x648   :  { %8307 = vmatpush3.bf16.msra.mxu1 %v8304_v53 }
 0x649   :  { %8309 = vmatprep.subr.bf16.mxu1 %v8308_v26 }
 0x64a   :  { %7889 = vmatmul.mubr.msk.f32.gmra.mrb[4].mxu0 %vm1411_vm15, %v7455_v0 }
 0x64b   :  { %7992 = vmatprep.mubr.msk.f32.mxu0 %vm9396_vm11, %v10037_v12 }
 0x64c   :  { %8311 = vmatpush3.bf16.msra.mxu1 %v8308_v26 }
 0x64d   :  { %8313 = vmatprep.subr.bf16.mxu1 %v8312_v18 }
 0x650   :  { %8315 = vmatpush3.bf16.msra.mxu1 %v8312_v18 }
 0x705   :  { %v7831_v21 = vpop.f32.mrb[2].mxu1 }
 0x706   :  { %v1598_v22 = vpop.f32.mrb[3].mxu1 }
 0x709   :  { %v7834_v23 = vpop.f32.mrb[4].mxu1 }
 0x70a   :  { %v1608_v2 = vpop.f32.mrb[5].mxu1 }
 0x719   :  { %v7887_v24 = vpop.f32.mrb[2].mxu0 }
 0x71a   :  { %v8547_v27 = vadd.f32 %v7887_v24, %v7831_v21  ;;  %v2455_v38 = vpop.f32.mrb[3].mxu0 }
 0x71b   :  { %v8548_v60 = vadd.f32 %v2455_v38, %v1598_v22 }
 0x71c   :  { %v10176_v44 = vadd.f32 %v8547_v27, %v2490_v9 }
 0x71d   :  { %v10178_v46 = vadd.f32 %v8548_v60, %v2485_v8  ;;  %v7890_v30 = vpop.f32.mrb[4].mxu0 }
 0x71e   :  { %2507 = vst [vmem:[#allocation2 + $0x38] sm:$0xff] %v10176_v44  ;;  %v8549_v29 = vadd.f32 %v7890_v30, %v7834_v23  ;;  %v2465_v48 = vpop.f32.mrb[5].mxu0  ;;  %v8691_v45 = vpack.i.bf16 %v10037_v12, %v10176_v44 }
 0x71f   :  { %2506 = vst [vmem:[#allocation2 + $0x8] sm:$0xff] %v10178_v46  ;;  %v8550_v32 = vadd.f32 %v2465_v48, %v1608_v2  ;;  %v8696_v54 = vpack.i.bf16 %v9913_v42, %v10178_v46 }
 0x720   :  { %v10189_v55 = vadd.f32 %v8549_v29, %v2500_v17  ;;  %8692 = vrot.lane.b32.xlu0 %v8691_v45, %s9374_s15 }
 0x721   :  { %v10193_v15 = vadd.f32 %v8550_v32, %v2495_v61  ;;  %8697 = vrot.lane.b32.xlu1 %v8696_v54, %s9374_s15 }
 0x722   :  { %2509 = vst [vmem:[#allocation2 + $0x98] sm:$0xff] %v10189_v55  ;;  %v8706_v41 = vpack.i.bf16 %v10037_v12, %v10189_v55 }
 0x723   :  { %2508 = vst [vmem:[#allocation2 + $0x68] sm:$0xff] %v10193_v15  ;;  %v8701_v6 = vpack.i.bf16 %v10037_v12, %v10193_v15 }
 0x724   :  { %8707 = vrot.lane.b32.xlu0 %v8706_v41, %s9374_s15 }
 0x725   :  { %8702 = vrot.lane.b32.xlu1 %v8701_v6, %s9374_s15 }
 0x792   :  { %v8693_v19 = vpop.permute.xlu0 %8692 }
 0x793   :  { %v8695_v0 = vunpack.i.h.bf16 %v8693_v19  ;;  %v8694_v21 = vunpack.i.l.bf16 %v8693_v19  ;;  %v8698_v22 = vpop.permute.xlu1 %8697 }
 0x794   :  { %v8700_v23 = vunpack.i.h.bf16 %v8698_v22  ;;  %v8699_v2 = vunpack.i.l.bf16 %v8698_v22 }
 0x795   :  { %v2559_v9 = vmax.f32 %v10037_v12, %v8695_v0  ;;  %v2543_v24 = vsel %vm438_vm6, %v8694_v21, %v8695_v0 }
 0x796   :  { %v2551_v27 = vmax.f32 %v10176_v44, %v2543_v24  ;;  %v2558_v38 = vmax.f32 %v9913_v42, %v8700_v23  ;;  %v2542_v8 = vsel %vm438_vm6, %v8699_v2, %v8700_v23  ;;  %v8708_v60 = vpop.permute.xlu0 %8707  ;;  %v2742_v2 = vld [vmem:[%s11245_s11 + $0x8] sm:$0xff]  ;;  %v2743_v24 = vld [vmem:[%s11245_s11 + $0x10] sm:$0xff] }
 0x797   :  { %v2550_v30 = vmax.f32 %v10178_v46, %v2542_v8  ;;  %v8710_v29 = vunpack.i.h.bf16 %v8708_v60  ;;  %v8709_v48 = vunpack.i.l.bf16 %v8708_v60  ;;  %v8703_v45 = vpop.permute.xlu1 %8702 }
 0x798   :  { %v8705_v17 = vunpack.i.h.bf16 %v8703_v45  ;;  %v8704_v32 = vunpack.i.l.bf16 %v8703_v45  ;;  %v8711_v54 = vpack.i.bf16 %v2559_v9, %v2551_v27  ;;  %v2741_v9 = vld [vmem:[%s11245_s11] sm:$0xff] }
 0x799   :  { %v2561_v33 = vmax.f32 %v10037_v12, %v8710_v29  ;;  %v2545_v28 = vsel %vm438_vm6, %v8709_v48, %v8710_v29  ;;  %v8716_v63 = vpack.i.bf16 %v2558_v38, %v2550_v30 }
 0x79a   :  { %v2553_v44 = vmax.f32 %v10189_v55, %v2545_v28  ;;  %v2560_v42 = vmax.f32 %v10037_v12, %v8705_v17  ;;  %v2544_v61 = vsel %vm438_vm6, %v8704_v32, %v8705_v17  ;;  %8712 = vrot.lane.b32.xlu0 %v8711_v54, %s9385_s1 }
 0x79b   :  { %v2552_v46 = vmax.f32 %v10193_v15, %v2544_v61  ;;  %8717 = vrot.lane.b32.xlu1 %v8716_v63, %s9385_s1 }
 0x79c   :  { %v8726_v37 = vpack.i.bf16 %v2561_v33, %v2553_v44 }
 0x79d   :  { %v8721_v1 = vpack.i.bf16 %v2560_v42, %v2552_v46 }
 0x79e   :  { %8727 = vrot.lane.b32.xlu0 %v8726_v37, %s9385_s1 }
 0x79f   :  { %8722 = vrot.lane.b32.xlu1 %v8721_v1, %s9385_s1 }
 0x80c   :  { %v8713_v36 = vpop.permute.xlu0 %8712 }
 0x80d   :  { %v8715_v3 = vunpack.i.h.bf16 %v8713_v36  ;;  %v8714_v40 = vunpack.i.l.bf16 %v8713_v36  ;;  %v8718_v55 = vpop.permute.xlu1 %8717 }
 0x80e   :  { %v8720_v41 = vunpack.i.h.bf16 %v8718_v55  ;;  %v8719_v6 = vunpack.i.l.bf16 %v8718_v55 }
 0x80f   :  { %v2587_v43 = vsel %vm2249_vm5, %v8714_v40, %v8715_v3  ;;  %v10268_v3 = vld [vmem:[#allocation12] sm:$0xff] }
 0x810   :  { %v8728_v59 = vpop.permute.xlu0 %8727  ;;  %v2586_v47 = vsel %vm2249_vm5, %v8719_v6, %v8720_v41  ;;  %v2595_v34 = vmax.f32 %v2551_v27, %v2587_v43  ;;  %v2744_v27 = vld [vmem:[%s11245_s11 + $0x18] sm:$0xff]  ;;  %v2822_v40 = vrot.slane %v10268_v3, %v9658_v49  ;;  %v3194_v55 = vrot.slane %v10268_v3, %v9670_v56 }
 0x811   :  { %v8730_v15 = vunpack.i.h.bf16 %v8728_v59  ;;  %v8729_v7 = vunpack.i.l.bf16 %v8728_v59  ;;  %v8723_v25 = vpop.permute.xlu1 %8722  ;;  %v2594_v35 = vmax.f32 %v2550_v30, %v2586_v47  ;;  %v2839_v41 = vrot.slane %v10268_v3, %v9661_v51  ;;  %v7468_v47 = vld [vmem:[#allocation12 + $0x8] ss:$0 sm:$0xff] }
 0x812   :  { %v8725_v58 = vunpack.i.h.bf16 %v8723_v25  ;;  %v8724_v39 = vunpack.i.l.bf16 %v8723_v25  ;;  %v3506_v6 = vrot.slane %v10268_v3, %v10044_v52  ;;  %v3069_v43 = vrot.slane %v10268_v3, %v9673_v57 }
 0x813   :  { %7923 = vmatprep.mubr.f32.mxu1 %v2594_v35  ;;  %v2589_v53 = vsel %vm2249_vm5, %v8729_v7, %v8730_v15  ;;  %v3402_v59 = vrot.slane %v10268_v3, %v10024_v50  ;;  %v3610_v15 = vrot.slane %v10268_v3, %v10050_v20 }
 0x814   :  { %7924 = vmatmul.mubr.f32.vlgmr.msra.gmra.mrb[6].mxu1 %v2595_v34  ;;  %v2588_v62 = vsel %vm2249_vm5, %v8724_v39, %v8725_v58  ;;  %v2597_v26 = vmax.f32 %v2553_v44, %v2589_v53 }
 0x815   :  { %v2596_v31 = vmax.f32 %v2552_v46, %v2588_v62 }
 0x817   :  { %7926 = vmatprep.mubr.f32.mxu1 %v2596_v31 }
 0x818   :  { %7927 = vmatmul.mubr.f32.gmra.mrb[8].mxu1 %v2597_v26 }
 0x819   :  { %7937 = vmatprep.mubr.msk.f32.mxu1 %vm9396_vm11, %v10037_v12 }
 0x8e7   :  { %v7925_v10 = vpop.f32.mrb[6].mxu1 }
 0x8e8   :  { %v2680_v11 = vpop.f32.mrb[7].mxu1  ;;  %v2703_v18 = vsel %vm2699_vm9, %v7925_v10, 0.0 }
 0x8e9   :  { %2704 = vadd.xlane.f32.xlu0 %v2703_v18  ;;  %v2700_v19 = vsel %vm2699_vm9, %v2680_v11, 0.0 }
 0x8ea   :  { %2701 = vadd.xlane.f32.xlu1 %v2700_v19 }
 0x8eb   :  { %v7928_v0 = vpop.f32.mrb[8].mxu1 }
 0x8ec   :  { %v2690_v21 = vpop.f32.mrb[9].mxu1  ;;  %v2709_v22 = vsel %vm2699_vm9, %v7928_v0, 0.0 }
 0x8ed   :  { %v2706_v23 = vsel %vm2699_vm9, %v2690_v21, 0.0 }
 0x8ee   :  { %2710 = vadd.xlane.f32.xlu1 %v2709_v22  ;;  %2707 = vadd.xlane.f32.xlu0 %v2706_v23 }
 0x8ff   :  { %2764 = vperm.xlu1 %8690, %v2742_v2  }
 0x903   :  { %8731 = vset.pattern.permute.xlu1 %v11226_v5 }
 0x904   :  { %2759 = vperm.xlu0 %8667, %v2741_v9   ;;  %2782 = vperm.xlu1 %8731, %v2741_v9  }
 0x908   :  { %8733 = vset.pattern.permute.xlu1 %v11224_v4  ;;  %8732 = vset.pattern.permute.xlu0 %v11226_v5 }
 0x909   :  { %2769 = vperm.xlu1 %8733, %v2743_v24   ;;  %2786 = vperm.xlu0 %8732, %v2742_v2  }
 0x90d   :  { %2774 = vperm.xlu1 %8733, %v2744_v27  }
 0x911   :  { %8734 = vset.pattern.permute.xlu1 %v11226_v5 }
 0x976   :  { %v2705_v38 = vpop.xlane.xlu0 %2704 }
 0x977   :  { %v2714_v8 = vmul.f32 0.03125, %v2705_v38  ;;  %v2702_v60 = vpop.xlane.xlu1 %2701 }
 0x978   :  { %v2713_v30 = vmul.f32 0.03125, %v2702_v60 }
 0x979   :  { %v10248_v29 = vsub.f32 %v7925_v10, %v2714_v8 }
 0x97a   :  { %v10250_v48 = vsub.f32 %v2680_v11, %v2713_v30 }
 0x97b   :  { %v2711_v45 = vpop.xlane.xlu1 %2710  ;;  %v2708_v17 = vpop.xlane.xlu0 %2707  ;;  %v2722_v32 = vmul.f32 %v10248_v29, %v10248_v29 }
 0x97c   :  { %v2716_v54 = vmul.f32 0.03125, %v2711_v45  ;;  %v2715_v33 = vmul.f32 0.03125, %v2708_v17  ;;  %v2721_v28 = vmul.f32 %v10250_v48, %v10250_v48 }
 0x97d   :  { %v2728_v63 = vsel %vm2699_vm9, %v2722_v32, 0.0 }
 0x97e   :  { %v10257_v44 = vsub.f32 %v7928_v0, %v2716_v54  ;;  %v10259_v42 = vsub.f32 %v2690_v21, %v2715_v33  ;;  %2729 = vadd.xlane.f32.xlu1 %v2728_v63  ;;  %v2725_v61 = vsel %vm2699_vm9, %v2721_v28, 0.0 }
 0x97f   :  { %2726 = vadd.xlane.f32.xlu0 %v2725_v61  ;;  %v2765_v7 = vpop.permute.xlu1 %2764 }
 0x980   :  { %v2724_v46 = vmul.f32 %v10257_v44, %v10257_v44  ;;  %v2723_v37 = vmul.f32 %v10259_v42, %v10259_v42 }
 0x982   :  { %v2734_v1 = vsel %vm2699_vm9, %v2724_v46, 0.0  ;;  %v2731_v36 = vsel %vm2699_vm9, %v2723_v37, 0.0 }
 0x983   :  { %2735 = vadd.xlane.f32.xlu1 %v2734_v1  ;;  %2732 = vadd.xlane.f32.xlu0 %v2731_v36  ;;  %v2783_v25 = vpop.permute.xlu1 %2782  ;;  %v2760_v34 = vpop.permute.xlu0 %2759 }
 0x988   :  { %v2770_v35 = vpop.permute.xlu1 %2769  ;;  %v2787_v39 = vpop.permute.xlu0 %2786 }
 0x98c   :  { %v2775_v58 = vpop.permute.xlu1 %2774 }
 0x994   :  { %2794 = vperm.xlu1 %8734, %v2744_v27  }
 0x998   :  { %2824 = vrot.lane.b32.xlu1 %v2822_v40, %s9389_s14 }
 0x999   :  { %2790 = vperm.xlu0 %8732, %v2743_v24  }
 0x99c   :  { %3196 = vrot.lane.b32.xlu1 %v3194_v55, %s9374_s15 }
 0x99d   :  { %2841 = vrot.lane.b32.xlu0 %v2839_v41, %s9390_s20 }
 0x99e   :  { %8855 = vset.pattern.permute.xlu0 %v11224_v4 }
 0x9a0   :  { %3508 = vrot.lane.b32.xlu1 %v3506_v6, %s9391_s16 }
 0x9a1   :  { %3071 = vrot.lane.b32.xlu0 %v3069_v43, %s9392_s12 }
 0x9a4   :  { %3716 = vrot.lane.b32.xlu1 %v7468_v47, %s9393_s18 }
 0x9a5   :  { %3404 = vrot.lane.b32.xlu0 %v3402_v59, %s9364_s23 }
 0x9a9   :  { %3612 = vrot.lane.b32.xlu0 %v3610_v15, %s9394_s5 }
 0xa0b   :  { %v2730_v53 = vpop.xlane.xlu1 %2729 }
 0xa0c   :  { %v2738_v62 = vmul.f32 0.03125, %v2730_v53  ;;  %v2727_v31 = vpop.xlane.xlu0 %2726 }
 0xa0d   :  { %v2737_v26 = vmul.f32 0.03125, %v2727_v31  ;;  %v11222_v31 = vmov 0.0|0.0  }
 0xa0e   :  { %v2746_v10 = vadd.f32 1e-05, %v2738_v62  ;;  %8316 = vmatprep.subr.bf16.mxu1 %v11222_v31  ;;  %8346 = vmatprep.subr.bf16.mxu0 %v11222_v31 }
 0xa0f   :  { %v2745_v11 = vadd.f32 1e-05, %v2737_v26 }
 0xa10   :  { %9075 = vrsqrt.f32 %v2746_v10  ;;  %v2736_v18 = vpop.xlane.xlu1 %2735  ;;  %v2733_v19 = vpop.xlane.xlu0 %2732 }
 0xa11   :  { %9077 = vrsqrt.f32 %v2745_v11  ;;  %v2740_v0 = vmul.f32 0.03125, %v2736_v18  ;;  %v2739_v21 = vmul.f32 0.03125, %v2733_v19 }
 0xa13   :  { %v2748_v22 = vadd.f32 1e-05, %v2740_v0  ;;  %v2747_v23 = vadd.f32 1e-05, %v2739_v21 }
 0xa14   :  { %v2795_v46 = vpop.permute.xlu1 %2794 }
 0xa15   :  { %9079 = vrsqrt.f32 %v2748_v22 }
 0xa16   :  { %9081 = vrsqrt.f32 %v2747_v23 }
 0xa1a   :  { %v9076_v2 = vpop.eup %9075 }
 0xa1b   :  { %v9078_v9 = vpop.eup %9077  ;;  %v2754_v24 = vmul.f32 %v9076_v2, %v10248_v29  ;;  %v2791_v29 = vpop.permute.xlu0 %2790 }
 0xa1c   :  { %v2753_v27 = vmul.f32 %v9078_v9, %v10250_v48 }
 0xa1d   :  { %v2778_v38 = vmul.f32 %v2765_v7, %v2754_v24  ;;  %v2825_v7 = vpop.permute.xlu1 %2824 }
 0xa1e   :  { %v2777_v8 = vmul.f32 %v2760_v34, %v2753_v27  ;;  %v2829_v34 = vmul.f32 %v10037_v12, %v2825_v7 }
 0xa1f   :  { %v9080_v60 = vpop.eup %9079  ;;  %v2798_v30 = vadd.f32 %v2787_v39, %v2778_v38 }
 0xa20   :  { %v9082_v45 = vpop.eup %9081  ;;  %v2797_v17 = vadd.f32 %v2783_v25, %v2777_v8  ;;  %v2756_v32 = vmul.f32 %v9080_v60, %v10257_v44  ;;  %v2842_v44 = vpop.permute.xlu0 %2841 }
 0xa21   :  { %v2802_v54 = vmax.f32 %v2798_v30, 0.0  ;;  %v2755_v33 = vmul.f32 %v9082_v45, %v10259_v42  ;;  %v2846_v55 = vmul.f32 %v10037_v12, %v2842_v44  ;;  %v3197_v8 = vpop.permute.xlu1 %3196 }
 0xa22   :  { %v2801_v28 = vmax.f32 %v2797_v17, 0.0  ;;  %v2780_v63 = vmul.f32 %v2775_v58, %v2756_v32  ;;  %v3201_v60 = vmul.f32 %v10037_v12, %v3197_v8 }
 0xa23   :  { %2806 = vst.msk [vmem:[#allocation2 + $0x38] sm:$0xff] %vm2699_vm9, %v2802_v54  ;;  %v2779_v61 = vmul.f32 %v2770_v35, %v2755_v33 }
 0xa24   :  { %2805 = vst.msk [vmem:[#allocation2 + $0x8] sm:$0xff] %vm2699_vm9, %v2801_v28  ;;  %v2800_v48 = vadd.f32 %v2795_v46, %v2780_v63  ;;  %v3072_v19 = vpop.permute.xlu0 %3071 }
 0xa25   :  { %v2799_v37 = vadd.f32 %v2791_v29, %v2779_v61  ;;  %v3076_v0 = vmul.f32 %v10037_v12, %v3072_v19  ;;  %v3509_v61 = vpop.permute.xlu1 %3508 }
 0xa26   :  { %v2804_v1 = vmax.f32 %v2800_v48, 0.0 }
 0xa27   :  { %v2803_v36 = vmax.f32 %v2799_v37, 0.0 }
 0xa28   :  { %2808 = vst.msk [vmem:[#allocation2 + $0x98] sm:$0xff] %vm2699_vm9, %v2804_v1  ;;  %v3405_v46 = vpop.permute.xlu0 %3404 }
 0xa29   :  { %2807 = vst.msk [vmem:[#allocation2 + $0x68] sm:$0xff] %vm2699_vm9, %v2803_v36 }
 0xa2a   :  { %v10301_v40 = vld [vmem:[#allocation2 + $0x38] sm:$0xff] }
 0xa2b   :  { %v10303_v42 = vld [vmem:[#allocation2 + $0x8] sm:$0xff]  ;;  %v2847_v41 = vmul.f32 %v2842_v44, %v10301_v40  ;;  %v2830_v53 = vmul.f32 %v2825_v7, %v10301_v40  ;;  %v3077_v23 = vmul.f32 %v3072_v19, %v10301_v40  ;;  %v3202_v17 = vmul.f32 %v3197_v8, %v10301_v40 }
 0xa2c   :  { %v2845_v6 = vmul.f32 %v2842_v44, %v10303_v42  ;;  %v2828_v62 = vmul.f32 %v2825_v7, %v10303_v42  ;;  %v3075_v2 = vmul.f32 %v3072_v19, %v10303_v42  ;;  %v3200_v32 = vmul.f32 %v3197_v8, %v10303_v42 }
 0xa2d   :  { %v8735_v59 = vpack.i.bf16 %v2847_v41, %v2846_v55  ;;  %v8760_v26 = vpack.i.bf16 %v2830_v53, %v2829_v34  ;;  %v8780_v9 = vpack.i.bf16 %v3077_v23, %v3076_v0  ;;  %v8800_v54 = vpack.i.bf16 %v3202_v17, %v3201_v60  ;;  %v3815_v23 = vld [vmem:[#allocation3] sm:$0x1] }
 0xa2e   :  { %v8740_v47 = vpack.i.bf16 %v2845_v6, %v2846_v55  ;;  %v8755_v10 = vpack.i.bf16 %v2828_v62, %v2829_v34  ;;  %v8775_v24 = vpack.i.bf16 %v3075_v2, %v3076_v0  ;;  %v8795_v33 = vpack.i.bf16 %v3200_v32, %v3201_v60  ;;  %v10376_v2 = vld [vmem:[%s11246_s19] sm:$0x1] }
 0xa2f   :  { %v10308_v43 = vld [vmem:[#allocation2 + $0x98] sm:$0xff]  ;;  %8736 = vrot.lane.b32.xlu1 %v8735_v59, %s9394_s5  ;;  %v3512_v12 = vmul.f32 %v3509_v61, %v10301_v40  ;;  %v3408_v29 = vmul.f32 %v3405_v46, %v10301_v40  ;;  %v3511_v48 = vmul.f32 %v3509_v61, %v10303_v42  ;;  %v3407_v37 = vmul.f32 %v3405_v46, %v10303_v42  ;;  %v3717_v59 = vpop.permute.xlu1 %3716 }
 0xa30   :  { %v10310_v15 = vld [vmem:[#allocation2 + $0x68] sm:$0xff]  ;;  %8741 = vrot.lane.b32.xlu0 %v8740_v47, %s9394_s5  ;;  %v2851_v25 = vmul.f32 %v2842_v44, %v10308_v43  ;;  %v2834_v11 = vmul.f32 %v2825_v7, %v10308_v43  ;;  %v3081_v27 = vmul.f32 %v3072_v19, %v10308_v43  ;;  %v3206_v28 = vmul.f32 %v3197_v8, %v10308_v43  ;;  %v3613_v47 = vpop.permute.xlu0 %3612 }
 0xa31   :  { %v2849_v35 = vmul.f32 %v2842_v44, %v10310_v15  ;;  %v2832_v18 = vmul.f32 %v2825_v7, %v10310_v15  ;;  %v3079_v38 = vmul.f32 %v3072_v19, %v10310_v15  ;;  %v3204_v63 = vmul.f32 %v3197_v8, %v10310_v15 }
 0xa32   :  { %v8745_v58 = vpack.i.bf16 %v2851_v25, %v2846_v55  ;;  %v8765_v21 = vpack.i.bf16 %v2834_v11, %v2829_v34  ;;  %v8785_v30 = vpack.i.bf16 %v3081_v27, %v3076_v0  ;;  %v8810_v1 = vpack.i.bf16 %v3206_v28, %v3201_v60 }
 0xa33   :  { %v8750_v39 = vpack.i.bf16 %v2849_v35, %v2846_v55  ;;  %v8770_v22 = vpack.i.bf16 %v2832_v18, %v2829_v34  ;;  %v8790_v45 = vpack.i.bf16 %v3079_v38, %v3076_v0  ;;  %v8805_v36 = vpack.i.bf16 %v3204_v63, %v3201_v60 }
 0xa34   :  { %8746 = vrot.lane.b32.xlu1 %v8745_v58, %s9394_s5  ;;  %v3514_v44 = vmul.f32 %v3509_v61, %v10308_v43  ;;  %v3410_v55 = vmul.f32 %v3405_v46, %v10308_v43  ;;  %v3513_v41 = vmul.f32 %v3509_v61, %v10310_v15  ;;  %v3409_v6 = vmul.f32 %v3405_v46, %v10310_v15 }
 0xa35   :  { %8751 = vrot.lane.b32.xlu0 %v8750_v39, %s9394_s5  ;;  %v8820_v7 = vpack.i.bf16 %v3512_v12, %v3511_v48  ;;  %v8815_v25 = vpack.i.bf16 %v3408_v29, %v3407_v37  ;;  %v3720_v35 = vmul.f32 %v3717_v59, %v10301_v40  ;;  %v3616_v34 = vmul.f32 %v3613_v47, %v10301_v40 }
 0xa36   :  { %v3719_v58 = vmul.f32 %v3717_v59, %v10303_v42  ;;  %v3615_v39 = vmul.f32 %v3613_v47, %v10303_v42  ;;  %v8835_v53 = vpack.i.bf16 %v3514_v44, %v3513_v41  ;;  %v8825_v62 = vpack.i.bf16 %v3410_v55, %v3409_v6  ;;  %v2853_v6 = vld [vmem:[#allocation5 + $0x1] sm:$0x1] }
 0xa37   :  { %v3721_v11 = vmul.f32 %v3717_v59, %v10310_v15  ;;  %v3617_v18 = vmul.f32 %v3613_v47, %v10310_v15 }
 0xa38   :  { %8761 = vrot.lane.b32.xlu1 %v8760_v26, %s9393_s18  ;;  %v3722_v26 = vmul.f32 %v3717_v59, %v10308_v43  ;;  %v8840_v19 = vpack.i.bf16 %v3720_v35, %v3719_v58  ;;  %v8830_v0 = vpack.i.bf16 %v3616_v34, %v3615_v39 }
 0xa39   :  { %8756 = vrot.lane.b32.xlu0 %v8755_v10, %s9393_s18  ;;  %v3618_v10 = vmul.f32 %v3613_v47, %v10308_v43 }
 0xa3c   :  { %8766 = vrot.lane.b32.xlu1 %v8765_v21, %s9393_s18  ;;  %v8850_v21 = vpack.i.bf16 %v3722_v26, %v3721_v11 }
 0xa3d   :  { %8771 = vrot.lane.b32.xlu0 %v8770_v22, %s9393_s18  ;;  %v8845_v22 = vpack.i.bf16 %v3618_v10, %v3617_v18 }
 0xa40   :  { %8781 = vrot.lane.b32.xlu1 %v8780_v9, %s9391_s16  ;;  %v7471_v9 = vld [vmem:[%s11247_s0 + $0x20] sm:$0xff] }
 0xa41   :  { %8776 = vrot.lane.b32.xlu0 %v8775_v24, %s9391_s16 }
 0xa44   :  { %8786 = vrot.lane.b32.xlu1 %v8785_v30, %s9391_s16 }
 0xa45   :  { %8791 = vrot.lane.b32.xlu0 %v8790_v45, %s9391_s16 }
 0xa48   :  { %8801 = vrot.lane.b32.xlu1 %v8800_v54, %s9364_s23 }
 0xa49   :  { %8796 = vrot.lane.b32.xlu0 %v8795_v33, %s9364_s23 }
 0xa4c   :  { %8811 = vrot.lane.b32.xlu1 %v8810_v1, %s9364_s23 }
 0xa4d   :  { %8806 = vrot.lane.b32.xlu0 %v8805_v36, %s9364_s23 }
 0xa50   :  { %8821 = vrot.lane.b32.xlu1 %v8820_v7, %s9392_s12 }
 0xa51   :  { %8816 = vrot.lane.b32.xlu0 %v8815_v25, %s9374_s15 }
 0xa54   :  { %8836 = vrot.lane.b32.xlu1 %v8835_v53, %s9392_s12 }
 0xa55   :  { %8826 = vrot.lane.b32.xlu0 %v8825_v62, %s9374_s15  ;;  %v10389_v62 = vld [vmem:[#allocation2 + $0x48] sm:$0xff] }
 0xa58   :  { %8841 = vrot.lane.b32.xlu1 %v8840_v19, %s9389_s14 }
 0xa59   :  { %8831 = vrot.lane.b32.xlu0 %v8830_v0, %s9390_s20 }
 0xa5c   :  { %8851 = vrot.lane.b32.xlu1 %v8850_v21, %s9389_s14 }
 0xa5d   :  { %8846 = vrot.lane.b32.xlu0 %v8845_v22, %s9390_s20 }
 0xa61   :  { %3818 = vperm.xlu0 %8855, %v3815_v23  }
 0xa65   :  { %3934 = vperm.xlu0 %8855, %v10376_v2  }
 0xa69   :  { %4023 = vperm.xlu0 %8855, %v7471_v9   ;;  %v2835_v9 = vld [vmem:[#allocation5] sm:$0x1] }
 0xaa1   :  { %v8737_v24 = vpop.permute.xlu1 %8736 }
 0xaa2   :  { %v8739_v27 = vunpack.i.h.bf16 %v8737_v24  ;;  %v8738_v38 = vunpack.i.l.bf16 %v8737_v24  ;;  %v8742_v8 = vpop.permute.xlu0 %8741 }
 0xaa3   :  { %v8744_v60 = vunpack.i.h.bf16 %v8742_v8  ;;  %v8743_v30 = vunpack.i.l.bf16 %v8742_v8 }
 0xaa4   :  { %v2880_v45 = vsel %vm2878_vm12, %v8738_v38, %v8739_v27 }
 0xaa5   :  { %v2879_v17 = vsel %vm2878_vm12, %v8743_v30, %v8744_v60 }
 0xaa6   :  { %v8747_v32 = vpop.permute.xlu1 %8746  ;;  %v8317_v33 = vpack.c.bf16 %v2880_v45, %v2879_v17 }
 0xaa7   :  { %v8752_v54 = vpop.permute.xlu0 %8751  ;;  %v8749_v28 = vunpack.i.h.bf16 %v8747_v32  ;;  %v8748_v63 = vunpack.i.l.bf16 %v8747_v32 }
 0xaa8   :  { %v8754_v61 = vunpack.i.h.bf16 %v8752_v54  ;;  %v8753_v46 = vunpack.i.l.bf16 %v8752_v54  ;;  %8318 = vmatpush3.bf16.msra.mxu1 %v8317_v33 }
 0xaa9   :  { %v2882_v12 = vsel %vm2878_vm12, %v8748_v63, %v8749_v28  ;;  %8319 = vmatprep.subr.bf16.mxu1 %v11222_v31 }
 0xaaa   :  { %v2881_v29 = vsel %vm2878_vm12, %v8753_v46, %v8754_v61  ;;  %v8762_v48 = vpop.permute.xlu1 %8761 }
 0xaab   :  { %v8757_v37 = vpop.permute.xlu0 %8756  ;;  %v8320_v1 = vpack.c.bf16 %v2882_v12, %v2881_v29  ;;  %v8764_v36 = vunpack.i.h.bf16 %v8762_v48  ;;  %v8763_v44 = vunpack.i.l.bf16 %v8762_v48 }
 0xaac   :  { %v8759_v55 = vunpack.i.h.bf16 %v8757_v37  ;;  %v8758_v41 = vunpack.i.l.bf16 %v8757_v37  ;;  %v3083_v37 = vld [vmem:[#allocation5 + $0x2] sm:$0x1] }
 0xaad   :  { %8321 = vmatpush3.bf16.msra.mxu1 %v8320_v1  ;;  %v2986_v59 = vsel %vm2984_vm13, %v8763_v44, %v8764_v36 }
 0xaae   :  { %v2985_v47 = vsel %vm2984_vm13, %v8758_v41, %v8759_v55  ;;  %8322 = vmatprep.subr.bf16.mxu1 %v11222_v31  ;;  %v8767_v7 = vpop.permute.xlu1 %8766 }
 0xaaf   :  { %v8772_v25 = vpop.permute.xlu0 %8771  ;;  %v8323_v35 = vpack.c.bf16 %v2986_v59, %v2985_v47  ;;  %v8769_v34 = vunpack.i.h.bf16 %v8767_v7  ;;  %v8768_v58 = vunpack.i.l.bf16 %v8767_v7 }
 0xab0   :  { %v8774_v39 = vunpack.i.h.bf16 %v8772_v25  ;;  %v8773_v53 = vunpack.i.l.bf16 %v8772_v25  ;;  %7938 = vmatmul.mubr.msk.f32.vlgmr.msra.gmra.mrb[10].mxu1 %vm2699_vm9, %v2853_v6  ;;  %v3318_v6 = vrot.slane %v10268_v3, %v9687_v14 }
 0xab1   :  { %8324 = vmatpush3.bf16.msra.mxu1 %v8323_v35  ;;  %7948 = vmatprep.mubr.msk.f32.mxu1 %vm9396_vm11, %v10389_v62  ;;  %v2988_v26 = vsel %vm2984_vm13, %v8768_v58, %v8769_v34 }
 0xab2   :  { %v2987_v10 = vsel %vm2984_vm13, %v8773_v53, %v8774_v39  ;;  %8325 = vmatprep.subr.bf16.mxu1 %v11222_v31  ;;  %v8782_v11 = vpop.permute.xlu1 %8781  ;;  %v3319_v3 = vmul.f32 %v3318_v6, %v10303_v42 }
 0xab3   :  { %v8777_v18 = vpop.permute.xlu0 %8776  ;;  %v8326_v19 = vpack.c.bf16 %v2988_v26, %v2987_v10  ;;  %v8784_v0 = vunpack.i.h.bf16 %v8782_v11  ;;  %v8783_v21 = vunpack.i.l.bf16 %v8782_v11  ;;  %v3320_v26 = vmul.f32 %v3318_v6, %v10301_v40 }
 0xab4   :  { %v8779_v22 = vunpack.i.h.bf16 %v8777_v18  ;;  %v8778_v23 = vunpack.i.l.bf16 %v8777_v18  ;;  %v3208_v18 = vld [vmem:[#allocation5 + $0x3] sm:$0x1] }
 0xab5   :  { %8327 = vmatpush3.bf16.msra.mxu1 %v8326_v19  ;;  %v3110_v24 = vsel %vm3108_vm14, %v8783_v21, %v8784_v0  ;;  %v8341_v21 = vpack.c.bf16 %v3320_v26, %v3319_v3 }
 0xab6   :  { %v3109_v27 = vsel %vm3108_vm14, %v8778_v23, %v8779_v22  ;;  %8328 = vmatprep.subr.bf16.mxu1 %v11222_v31  ;;  %v8787_v38 = vpop.permute.xlu1 %8786  ;;  %v3321_v22 = vmul.f32 %v3318_v6, %v10310_v15  ;;  %v3322_v23 = vmul.f32 %v3318_v6, %v10308_v43 }
 0xab7   :  { %v8792_v8 = vpop.permute.xlu0 %8791  ;;  %v8329_v60 = vpack.c.bf16 %v3110_v24, %v3109_v27  ;;  %v8789_v30 = vunpack.i.h.bf16 %v8787_v38  ;;  %v8788_v45 = vunpack.i.l.bf16 %v8787_v38 }
 0xab8   :  { %v8794_v17 = vunpack.i.h.bf16 %v8792_v8  ;;  %v8793_v32 = vunpack.i.l.bf16 %v8792_v8  ;;  %7949 = vmatmul.mubr.msk.f32.vlgmr.msra.gmra.mrb[12].mxu1 %vm2699_vm9, %v2835_v9  ;;  %v8344_v8 = vpack.c.bf16 %v3322_v23, %v3321_v22 }
 0xab9   :  { %8330 = vmatpush3.bf16.msra.mxu1 %v8329_v60  ;;  %7959 = vmatprep.mubr.msk.f32.mxu1 %vm9396_vm11, %v10389_v62  ;;  %v3112_v54 = vsel %vm3108_vm14, %v8788_v45, %v8789_v30  ;;  %v3412_v30 = vld [vmem:[#allocation5 + $0x5] sm:$0x1]  ;;  %v3324_v45 = vld [vmem:[#allocation5 + $0x4] sm:$0x1] }
 0xaba   :  { %v3111_v33 = vsel %vm3108_vm14, %v8793_v32, %v8794_v17  ;;  %8331 = vmatprep.subr.bf16.mxu1 %v11222_v31  ;;  %v8802_v28 = vpop.permute.xlu1 %8801 }
 0xabb   :  { %v8797_v63 = vpop.permute.xlu0 %8796  ;;  %v8332_v61 = vpack.c.bf16 %v3112_v54, %v3111_v33  ;;  %v8804_v46 = vunpack.i.h.bf16 %v8802_v28  ;;  %v8803_v12 = vunpack.i.l.bf16 %v8802_v28 }
 0xabc   :  { %v8799_v29 = vunpack.i.h.bf16 %v8797_v63  ;;  %v8798_v48 = vunpack.i.l.bf16 %v8797_v63 }
 0xabd   :  { %8333 = vmatpush3.bf16.msra.mxu1 %v8332_v61  ;;  %v3234_v1 = vsel %vm707_vm3, %v8803_v12, %v8804_v46 }
 0xabe   :  { %v3233_v36 = vsel %vm707_vm3, %v8798_v48, %v8799_v29  ;;  %8334 = vmatprep.subr.bf16.mxu1 %v11222_v31  ;;  %v8812_v44 = vpop.permute.xlu1 %8811 }
 0xabf   :  { %v8807_v55 = vpop.permute.xlu0 %8806  ;;  %v8335_v41 = vpack.c.bf16 %v3234_v1, %v3233_v36  ;;  %v8814_v59 = vunpack.i.h.bf16 %v8812_v44  ;;  %v8813_v47 = vunpack.i.l.bf16 %v8812_v44  ;;  %v3620_v36 = vld [vmem:[#allocation5 + $0x7] sm:$0x1]  ;;  %v3516_v44 = vld [vmem:[#allocation5 + $0x6] sm:$0x1] }
 0xac0   :  { %v8809_v7 = vunpack.i.h.bf16 %v8807_v55  ;;  %v8808_v25 = vunpack.i.l.bf16 %v8807_v55  ;;  %7960 = vmatmul.mubr.msk.f32.vlgmr.msra.gmra.mrb[14].mxu1 %vm2699_vm9, %v3083_v37 }
 0xac1   :  { %8336 = vmatpush3.bf16.msra.mxu1 %v8335_v41  ;;  %7970 = vmatprep.mubr.msk.f32.mxu1 %vm9396_vm11, %v10389_v62  ;;  %v3236_v35 = vsel %vm707_vm3, %v8813_v47, %v8814_v59  ;;  %v3724_v47 = vld [vmem:[#allocation5 + $0x8] sm:$0x1] }
 0xac2   :  { %v3235_v34 = vsel %vm707_vm3, %v8808_v25, %v8809_v7  ;;  %8337 = vmatprep.subr.bf16.mxu1 %v11222_v31  ;;  %v8822_v58 = vpop.permute.xlu1 %8821 }
 0xac3   :  { %v8817_v39 = vpop.permute.xlu0 %8816  ;;  %v8338_v53 = vpack.c.bf16 %v3236_v35, %v3235_v34  ;;  %v8824_v42 = vunpack.i.h.bf16 %v8822_v58  ;;  %v8823_v38 = vunpack.i.l.bf16 %v8822_v58 }
 0xac4   :  { %v8819_v10 = vunpack.i.h.bf16 %v8817_v39  ;;  %v8818_v11 = vunpack.i.l.bf16 %v8817_v39 }
 0xac5   :  { %8339 = vmatpush3.bf16.msra.mxu1 %v8338_v53  ;;  %v8353_v54 = vpack.c.bf16 %v8824_v42, %v8823_v38 }
 0xac6   :  { %v8347_v19 = vpack.c.bf16 %v8819_v10, %v8818_v11  ;;  %8340 = vmatprep.subr.bf16.mxu1 %v11222_v31  ;;  %v8837_v9 = vpop.permute.xlu1 %8836 }
 0xac7   :  { %v8827_v0 = vpop.permute.xlu0 %8826  ;;  %v8839_v33 = vunpack.i.h.bf16 %v8837_v9  ;;  %v8838_v28 = vunpack.i.l.bf16 %v8837_v9 }
 0xac8   :  { %v8829_v24 = vunpack.i.h.bf16 %v8827_v0  ;;  %v8828_v27 = vunpack.i.l.bf16 %v8827_v0  ;;  %7971 = vmatmul.mubr.msk.f32.vlgmr.msra.gmra.mrb[16].mxu1 %vm2699_vm9, %v3208_v18  ;;  %8348 = vmatpush3.bf16.msra.mxu0 %v8347_v19 }
 0xac9   :  { %8342 = vmatpush3.bf16.msra.mxu1 %v8341_v21  ;;  %8349 = vmatprep.subr.bf16.mxu0 %v11222_v31  ;;  %v8356_v29 = vpack.c.bf16 %v8839_v33, %v8838_v28  ;;  %v3842_v28 = vld [vmem:[#allocation15 + $0x18] sm:$0xff] }
 0xaca   :  { %v8350_v40 = vpack.c.bf16 %v8829_v24, %v8828_v27  ;;  %8343 = vmatprep.subr.bf16.mxu1 %v11222_v31  ;;  %7981 = vmatprep.mubr.msk.f32.mxu1 %vm9396_vm11, %v10389_v62  ;;  %v8842_v17 = vpop.permute.xlu1 %8841 }
 0xacb   :  { %v8832_v15 = vpop.permute.xlu0 %8831  ;;  %v8844_v48 = vunpack.i.h.bf16 %v8842_v17  ;;  %v8843_v37 = vunpack.i.l.bf16 %v8842_v17  ;;  %v3839_v17 = vld [vmem:[#allocation15] sm:$0xff] }
 0xacc   :  { %v8834_v43 = vunpack.i.h.bf16 %v8832_v15  ;;  %v8833_v60 = vunpack.i.l.bf16 %v8832_v15  ;;  %8351 = vmatpush3.bf16.msra.mxu0 %v8350_v40 }
 0xacd   :  { %8345 = vmatpush3.bf16.msra.mxu1 %v8344_v8  ;;  %8358 = vmatprep.subr.bf16.mxu0 %v11222_v31  ;;  %v8365_v55 = vpack.c.bf16 %v8844_v48, %v8843_v37  ;;  %v7473_v37 = vld [vmem:[%s11247_s0 + $0x30] sm:$0xff] }
 0xace   :  { %v8359_v32 = vpack.c.bf16 %v8834_v43, %v8833_v60  ;;  %8352 = vmatprep.subr.bf16.mxu1 %v11222_v31  ;;  %v8852_v1 = vpop.permute.xlu1 %8851 }
 0xacf   :  { %v8847_v63 = vpop.permute.xlu0 %8846  ;;  %7993 = vmatmul.mubr.msk.f32.vlgmr.msra.gmra.mrb[6].mxu0 %vm2699_vm9, %v3412_v30  ;;  %v8854_v41 = vunpack.i.h.bf16 %v8852_v1  ;;  %v8853_v6 = vunpack.i.l.bf16 %v8852_v1  ;;  %v7474_v1 = vld [vmem:[%s11247_s0 + $0x38] sm:$0xff] }
 0xad0   :  { %v8849_v61 = vunpack.i.h.bf16 %v8847_v63  ;;  %v8848_v46 = vunpack.i.l.bf16 %v8847_v63  ;;  %7982 = vmatmul.mubr.msk.f32.vlgmr.msra.gmra.mrb[18].mxu1 %vm2699_vm9, %v3324_v45  ;;  %8360 = vmatpush3.bf16.msra.mxu0 %v8359_v32  ;;  %v3840_v32 = vld [vmem:[#allocation15 + $0x8] sm:$0xff] }
 0xad1   :  { %8354 = vmatpush3.bf16.msra.mxu1 %v8353_v54  ;;  %8361 = vmatprep.subr.bf16.mxu0 %v11222_v31  ;;  %v8368_v59 = vpack.c.bf16 %v8854_v41, %v8853_v6  ;;  %v3841_v54 = vld [vmem:[#allocation15 + $0x10] sm:$0xff]  ;;  %v8371_v33 = vpack.c.bf16 %v3840_v32, %v3839_v17  ;;  %v7485_v6 = vld [vmem:[%s11247_s0 + $0x90] sm:$0xff] }
 0xad2   :  { %v8362_v12 = vpack.c.bf16 %v8849_v61, %v8848_v46  ;;  %8355 = vmatprep.subr.bf16.mxu1 %v11222_v31  ;;  %8003 = vmatprep.mubr.msk.f32.mxu1 %vm9396_vm11, %v10389_v62  ;;  %v8374_v63 = vpack.c.bf16 %v3842_v28, %v3841_v54  ;;  %v7487_v41 = vld [vmem:[%s11247_s0 + $0xa0] sm:$0xff]  ;;  %v7497_v32 = vld [vmem:[%s11247_s0 + $0xf0] sm:$0xff]  ;;  %v7502_v28 = vld [vmem:[%s11247_s0 + $0x118] sm:$0xff] }
 0xad3   :  { %8014 = vmatprep.mubr.msk.f32.mxu0 %vm9396_vm11, %v10389_v62 }
 0xad4   :  { %8363 = vmatpush3.bf16.msra.mxu0 %v8362_v12  ;;  %v7472_v12 = vld [vmem:[%s11247_s0 + $0x28] sm:$0xff] }
 0xad5   :  { %8357 = vmatpush3.bf16.msra.mxu1 %v8356_v29  ;;  %8370 = vmatprep.subr.bf16.mxu0 %v11222_v31  ;;  %v10452_v29 = vld [vmem:[#allocation13] sm:$0xff] }
 0xad6   :  { %8364 = vmatprep.subr.bf16.mxu1 %v11222_v31  ;;  %v4010_v48 = vrot.slane %v10452_v29, 1 }
 0xad7   :  { %8015 = vmatmul.mubr.msk.f32.vlgmr.msra.gmra.mrb[8].mxu0 %vm2699_vm9, %v3620_v36  ;;  %v7478_v36 = vld [vmem:[%s11247_s0 + $0x58] sm:$0xff] }
 0xad8   :  { %8004 = vmatmul.mubr.msk.f32.vlgmr.msra.gmra.mrb[20].mxu1 %vm2699_vm9, %v3516_v44  ;;  %8036 = vmatprep.mubr.msk.f32.mxu0 %vm9396_vm11, %v10389_v62  ;;  %v7483_v44 = vld [vmem:[%s11247_s0 + $0x80] sm:$0xff] }
 0xad9   :  { %8366 = vmatpush3.bf16.msra.mxu1 %v8365_v55  ;;  %8025 = vmatprep.mubr.msk.f32.mxu1 %vm9396_vm11, %v10389_v62  ;;  %v7484_v55 = vld [vmem:[%s11247_s0 + $0x88] sm:$0xff] }
 0xada   :  { %8367 = vmatprep.subr.bf16.mxu1 %v11222_v31  ;;  %8372 = vmatpush3.bf16.msra.mxu0 %v8371_v33  ;;  %v3953_v33 = vld [vmem:[#allocation13 + $0x8] sm:$0x1] }
 0xadb   :  { %8373 = vmatprep.subr.bf16.mxu0 %v11222_v31 }
 0xadd   :  { %8369 = vmatpush3.bf16.msra.mxu1 %v8368_v59  ;;  %v7486_v59 = vld [vmem:[%s11247_s0 + $0x98] sm:$0xff] }
 0xade   :  { %8375 = vmatpush3.bf16.msra.mxu0 %v8374_v63  ;;  %v10507_v63 = vld [vmem:[#allocation2] ss:$0 sm:$0xff] }
 0xae0   :  { %8026 = vmatmul.mubr.msk.f32.vlgmr.msra.gmra.mrb[22].mxu1 %vm2699_vm9, %v3724_v47  ;;  %v3819_v38 = vpop.permute.xlu0 %3818  ;;  %v7492_v47 = vld [vmem:[%s11247_s0 + $0xc8] sm:$0xff] }
 0xae1   :  { %v3824_v15 = vrot.slane %v3819_v38, %v9658_v49  ;;  %v7491_v38 = vld [vmem:[%s11247_s0 + $0xc0] sm:$0xff] }
 0xb83   :  { %v2956_v7 = vpop.f32.mrb[10].mxu1 }
 0xb84   :  { %v7939_v25 = vpop.f32.mrb[11].mxu1 }
 0xb8b   :  { %v3062_v35 = vpop.f32.mrb[12].mxu1 }
 0xb8c   :  { %v3063_v34 = vadd.f32 %v3062_v35, %v2956_v7  ;;  %v7950_v58 = vpop.f32.mrb[13].mxu1  ;;  %v7495_v7 = vld [vmem:[%s11247_s0 + $0xe0] sm:$0xff] }
 0xb8d   :  { %v7493_v58 = vld [vmem:[%s11247_s0 + $0xd0] sm:$0xff] }
 0xb93   :  { %v3186_v39 = vpop.f32.mrb[14].mxu1 }
 0xb94   :  { %v3190_v53 = vadd.f32 %v3186_v39, %v3063_v34  ;;  %v7961_v3 = vpop.f32.mrb[15].mxu1  ;;  %v4403_v34 = vrot.slane %v10452_v29, 6  ;;  %v7494_v39 = vld [vmem:[%s11247_s0 + $0xd8] sm:$0xff] }
 0xb95   :  { %v7498_v3 = vld [vmem:[%s11247_s0 + $0xf8] sm:$0xff] }
 0xb9b   :  { %v3310_v26 = vpop.f32.mrb[16].mxu1 }
 0xb9c   :  { %v3314_v10 = vadd.f32 %v3310_v26, %v3190_v53  ;;  %v7972_v11 = vpop.f32.mrb[17].mxu1  ;;  %v7500_v53 = vld [vmem:[%s11247_s0 + $0x108] sm:$0xff]  ;;  %v7501_v26 = vld [vmem:[%s11247_s0 + $0x110] sm:$0xff] }
 0xb9d   :  { %v3965_v11 = vld [vmem:[%s11247_s0 + $0x18] sm:$0xff] }
 0xba2   :  { %v3498_v18 = vpop.f32.mrb[6].mxu0 }
 0xba3   :  { %v3394_v62 = vpop.f32.mrb[18].mxu1  ;;  %v7994_v19 = vpop.f32.mrb[7].mxu0 }
 0xba4   :  { %v3398_v0 = vadd.f32 %v3394_v62, %v3314_v10  ;;  %v7983_v21 = vpop.f32.mrb[19].mxu1  ;;  %v3962_v10 = vld [vmem:[%s11247_s0] sm:$0xff] }
 0xba5   :  { %v7476_v21 = vld [vmem:[%s11247_s0 + $0x48] sm:$0xff] }
 0xba6   :  { %v3502_v22 = vadd.f32 %v3498_v18, %v3398_v0  ;;  %v7475_v0 = vld [vmem:[%s11247_s0 + $0x40] sm:$0xff] }
 0xbaa   :  { %v3706_v23 = vpop.f32.mrb[8].mxu0 }
 0xbab   :  { %v3602_v9 = vpop.f32.mrb[20].mxu1  ;;  %v8016_v24 = vpop.f32.mrb[9].mxu0 }
 0xbac   :  { %v3606_v27 = vadd.f32 %v3602_v9, %v3502_v22  ;;  %v8005_v40 = vpop.f32.mrb[21].mxu1  ;;  %v7479_v22 = vld [vmem:[%s11247_s0 + $0x60] sm:$0xff]  ;;  %v7477_v9 = vld [vmem:[%s11247_s0 + $0x50] sm:$0xff]  ;;  %v4192_v24 = vrot.slane %v10452_v29, 3 }
 0xbad   :  { %v7482_v40 = vld [vmem:[%s11247_s0 + $0x78] sm:$0xff] }
 0xbae   :  { %v3710_v42 = vadd.f32 %v3706_v23, %v3606_v27  ;;  %v4101_v23 = vrot.slane %v10452_v29, 2  ;;  %v7481_v27 = vld [vmem:[%s11247_s0 + $0x70] sm:$0xff] }
 0xbb3   :  { %v3810_v8 = vpop.f32.mrb[22].mxu1 }
 0xbb4   :  { %v3814_v43 = vadd.f32 %v3810_v8, %v3710_v42  ;;  %v8027_v60 = vpop.f32.mrb[23].mxu1  ;;  %v7488_v42 = vld [vmem:[%s11247_s0 + $0xa8] sm:$0xff]  ;;  %v7489_v8 = vld [vmem:[%s11247_s0 + $0xb0] sm:$0xff] }
 0xbb5   :  { %v7496_v60 = vld [vmem:[%s11247_s0 + $0xe8] sm:$0xff] }
 0xbb6   :  { %v3825_v30 = vadd.f32 %v3824_v15, %v3814_v43  ;;  %v4341_v15 = vrot.slane %v10452_v29, 5  ;;  %v7490_v43 = vld [vmem:[%s11247_s0 + $0xb8] sm:$0xff] }
 0xbb8   :  { %3827 = vst.msk [vmem:[#allocation2 + $0x8] sm:$0x1] %vm3826_vm7, %v3825_v30  ;;  %vm3916_vm7 = vcmask 57344   ;;  %v7499_v30 = vld [vmem:[%s11247_s0 + $0x100] sm:$0xff] }
 0xbbf   :  { %v3828_v45 = vld [vmem:[#allocation2 + $0x8] ss:$0 sm:$0xff] }
 0xbc0   :  { %3830 = vrot.lane.b32.xlu1 %v3828_v45, %s9374_s15 }
 0xc32   :  { %v3831_v61 = vpop.permute.xlu1 %3830 }
 0xc33   :  { %v3833_v46 = vmax.f32 %v3828_v45, %v3831_v61  ;;  %v4465_v45 = vrot.slane %v10452_v29, 7 }
 0xc35   :  { %3835 = vrot.lane.b32.xlu1 %v3833_v46, %s9390_s20 }
 0xc39   :  { %3943 = vperm.xlu1 %8734, %v10376_v2   ;;  %v7480_v2 = vld [vmem:[%s11247_s0 + $0x68] sm:$0xff] }
 0xc3d   :  { %8856 = vset.pattern.permute.xlu1 %v11224_v4 }
 0xc3e   :  { %4028 = vperm.xlu1 %8856, %v7472_v12  }
 0xc42   :  { %4011 = vrot.lane.b32.xlu1 %v4010_v48, %s9380_s24  ;;  %v10514_v48 = vpop.permute.xlu0 %3934 }
 0xc46   :  { %4033 = vperm.xlu1 %8856, %v7473_v37   ;;  %v3964_v37 = vld [vmem:[%s11247_s0 + $0x10] sm:$0xff] }
 0xc4a   :  { %4038 = vperm.xlu1 %8856, %v7474_v1  }
 0xc4e   :  { %4210 = vperm.xlu1 %8856, %v7480_v2   ;;  %v10518_v2 = vpop.permute.xlu0 %4023 }
 0xc52   :  { %4129 = vperm.xlu1 %8856, %v7478_v36  }
 0xc56   :  { %4291 = vperm.xlu1 %8856, %v7483_v44  }
 0xc5a   :  { %4296 = vperm.xlu1 %8856, %v7484_v55  }
 0xc5e   :  { %4353 = vperm.xlu1 %8856, %v7487_v41  }
 0xc62   :  { %4301 = vperm.xlu1 %8856, %v7485_v6  }
 0xc66   :  { %4306 = vperm.xlu1 %8856, %v7486_v59  }
 0xc6a   :  { %4420 = vperm.xlu1 %8856, %v7492_v47  }
 0xc6e   :  { %4477 = vperm.xlu1 %8856, %v7495_v7  }
 0xc72   :  { %4404 = vrot.lane.b32.xlu1 %v4403_v34, %s9364_s23 }
 0xc76   :  { %4425 = vperm.xlu1 %8856, %v7493_v58  }
 0xc7a   :  { %4430 = vperm.xlu1 %8856, %v7494_v39  }
 0xc7e   :  { %4544 = vperm.xlu1 %8856, %v7500_v53  }
 0xc82   :  { %4492 = vperm.xlu1 %8856, %v7498_v3  }
 0xc86   :  { %4549 = vperm.xlu1 %8856, %v7501_v26  }
 0xc8a   :  { %3968 = vperm.xlu1 %8856, %v3962_v10  }
 0xc8e   :  { %3957 = vrot.lane.b32.xlu1 %v10452_v29, %s9392_s12 }
 0xc92   :  { %3983 = vperm.xlu1 %8856, %v3965_v11  }
 0xca7   :  { %v3836_v25 = vpop.permute.xlu1 %3835 }
 0xca8   :  { %v3838_v35 = vmax.f32 %v3833_v46, %v3836_v25  ;;  %v3963_v46 = vld [vmem:[%s11247_s0 + $0x8] sm:$0xff] }
 0xcaa   :  { %8037 = vmatmul.mubr.msk.f32.vlgmr.msra.gmra.mrb[10].mxu0 %vm2699_vm9, %v3838_v35 }
 0xcb8   :  { %v10500_v17 = vpop.permute.xlu1 %3943 }
 0xcbd   :  { %v10503_v54 = vpop.permute.xlu1 %4028 }
 0xcc1   :  { %v10509_v61 = vpop.permute.xlu1 %4011 }
 0xcc2   :  { %v4014_v12 = vmul.f32 %v10509_v61, %v10507_v63 }
 0xcc4   :  { %v4044_v1 = vrot.slane %v4014_v12, %v9658_v49 }
 0xcc6   :  { %v4049_v36 = vmul.f32 %v4044_v1, %v10518_v2  ;;  %v4051_v44 = vmul.f32 %v4044_v1, %v10503_v54 }
 0xd7d   :  { %v3912_v18 = vpop.f32.mrb[10].mxu0 }
 0xd7e   :  { %v8038_v62 = vpop.f32.mrb[11].mxu0  ;;  %v3917_v19 = vsel %vm3916_vm7, %v3912_v18, 0.0 }
 0xd7f   :  { %3918 = vadd.xlane.f32.xlu0 %v3917_v19 }
 0xd95   :  { %4114 = vperm.xlu0 %8855, %v7475_v0  }
 0xd99   :  { %4119 = vperm.xlu0 %8855, %v7476_v21  }
 0xd9d   :  { %4205 = vperm.xlu0 %8855, %v7479_v22   ;;  %v4590_v22 = vld [vmem:[%s11248_s22 + $0x8] sm:$0xff] }
 0xda1   :  { %4102 = vrot.lane.b32.xlu0 %v4101_v23, %s9374_s15 }
 0xda5   :  { %4124 = vperm.xlu0 %8855, %v7477_v9  }
 0xda9   :  { %4193 = vrot.lane.b32.xlu0 %v4192_v24, %s9374_s15  ;;  %v4592_v24 = vld [vmem:[%s11248_s22 + $0x18] sm:$0xff] }
 0xdad   :  { %4215 = vperm.xlu0 %8855, %v7481_v27  }
 0xdb1   :  { %4220 = vperm.xlu0 %8855, %v7482_v40  }
 0xdb5   :  { %4358 = vperm.xlu0 %8855, %v7488_v42  }
 0xdb9   :  { %4415 = vperm.xlu0 %8855, %v7491_v38  }
 0xdbd   :  { %4342 = vrot.lane.b32.xlu0 %v4341_v15, %s9364_s23 }
 0xdc1   :  { %4363 = vperm.xlu0 %8855, %v7489_v8  }
 0xdc5   :  { %4368 = vperm.xlu0 %8855, %v7490_v43  }
 0xdc9   :  { %4482 = vperm.xlu0 %8855, %v7496_v60  }
 0xdcd   :  { %4539 = vperm.xlu0 %8855, %v7499_v30  }
 0xdd1   :  { %4466 = vrot.lane.b32.xlu0 %v4465_v45, %s9397_s30  ;;  %v4589_v45 = vld [vmem:[%s11248_s22] sm:$0xff] }
 0xdd5   :  { %4487 = vperm.xlu0 %8855, %v7497_v32  }
 0xdd9   :  { %4528 = vrot.lane.b32.xlu0 %v3953_v33, %s9391_s16  ;;  %v4591_v33 = vld [vmem:[%s11248_s22 + $0x10] sm:$0xff] }
 0xddd   :  { %4554 = vperm.xlu0 %8855, %v7502_v28  }
 0xde1   :  { %3973 = vperm.xlu0 %8855, %v3963_v46  }
 0xde5   :  { %3978 = vperm.xlu0 %8855, %v3964_v37  }
 0xde9   :  { %4065 = vrot.lane.b32.xlu0 %v4049_v36, %s9374_s15 }
 0xded   :  { %4069 = vrot.lane.b32.xlu0 %v4051_v44, %s9374_s15 }
 0xe0c   :  { %v3919_v55 = vpop.xlane.xlu0 %3918 }
 0xe0d   :  { %v3921_v41 = vmul.f32 0.125, %v3919_v55 }
 0xe0f   :  { %v10524_v6 = vsub.f32 %v3912_v18, %v3921_v41  ;;  %v10549_v18 = vpop.permute.xlu1 %4033 }
 0xe10   :  { %v4053_v0 = vmul.f32 %v4044_v1, %v10549_v18 }
 0xe11   :  { %v3923_v59 = vmul.f32 %v10524_v6, %v10524_v6 }
 0xe13   :  { %v3924_v47 = vsel %vm3916_vm7, %v3923_v59, 0.0  ;;  %v10560_v23 = vpop.permute.xlu1 %4038 }
 0xe14   :  { %3925 = vadd.xlane.f32.xlu1 %v3924_v47  ;;  %v10529_v7 = vpop.permute.xlu0 %4114  ;;  %v4055_v27 = vmul.f32 %v4044_v1, %v10560_v23 }
 0xe17   :  { %v10566_v40 = vpop.permute.xlu1 %4210 }
 0xe18   :  { %v10531_v25 = vpop.permute.xlu0 %4119 }
 0xe1b   :  { %v10571_v38 = vpop.permute.xlu1 %4129 }
 0xe1c   :  { %v10533_v35 = vpop.permute.xlu0 %4205 }
 0xe1f   :  { %v4292_v60 = vpop.permute.xlu1 %4291 }
 0xe20   :  { %v10535_v34 = vpop.permute.xlu0 %4102 }
 0xe21   :  { %v4105_v58 = vmul.f32 %v10535_v34, %v10507_v63 }
 0xe23   :  { %v4135_v39 = vrot.slane %v4105_v58, %v9658_v49  ;;  %v10582_v32 = vpop.permute.xlu1 %4296 }
 0xe24   :  { %v10540_v53 = vpop.permute.xlu0 %4124 }
 0xe25   :  { %v4140_v3 = vmul.f32 %v4135_v39, %v10529_v7  ;;  %v4142_v11 = vmul.f32 %v4135_v39, %v10531_v25  ;;  %v4144_v15 = vmul.f32 %v4135_v39, %v10540_v53  ;;  %v4146_v8 = vmul.f32 %v4135_v39, %v10571_v38 }
 0xe27   :  { %4156 = vrot.lane.b32.xlu0 %v4140_v3, %s9380_s24  ;;  %v4354_v28 = vpop.permute.xlu1 %4353 }
 0xe28   :  { %v10544_v26 = vpop.permute.xlu0 %4193 }
 0xe29   :  { %v4196_v10 = vmul.f32 %v10544_v26, %v10507_v63 }
 0xe2b   :  { %v4226_v62 = vrot.slane %v4196_v10, %v9658_v49  ;;  %4160 = vrot.lane.b32.xlu0 %v4142_v11, %s9380_s24  ;;  %v10585_v46 = vpop.permute.xlu1 %4301 }
 0xe2c   :  { %v10553_v19 = vpop.permute.xlu0 %4215 }
 0xe2d   :  { %v4235_v21 = vmul.f32 %v4226_v62, %v10553_v19  ;;  %v4231_v9 = vmul.f32 %v4226_v62, %v10533_v35  ;;  %v4233_v42 = vmul.f32 %v4226_v62, %v10566_v40 }
 0xe2f   :  { %4255 = vrot.lane.b32.xlu1 %v4235_v21, %s9380_s24  ;;  %4073 = vrot.lane.b32.xlu0 %v4053_v0, %s9374_s15  ;;  %v4307_v12 = vpop.permute.xlu1 %4306 }
 0xe30   :  { %v10576_v43 = vpop.permute.xlu0 %4220 }
 0xe31   :  { %v4237_v30 = vmul.f32 %v4226_v62, %v10576_v43 }
 0xe33   :  { %4600 = vperm.xlu1 %8856, %v4590_v22   ;;  %4247 = vrot.lane.b32.xlu0 %v4231_v9, %s9380_s24  ;;  %v10587_v37 = vpop.permute.xlu1 %4420 }
 0xe34   :  { %v10607_v10 = vpop.permute.xlu0 %4358 }
 0xe37   :  { %4610 = vperm.xlu1 %8856, %v4592_v24   ;;  %4077 = vrot.lane.b32.xlu0 %v4055_v27, %s9374_s15  ;;  %v10589_v1 = vpop.permute.xlu1 %4477  ;;  %v3940_v24 = vrot.slane %v10514_v48, %v9658_v49 }
 0xe38   :  { %v4416_v21 = vpop.permute.xlu0 %4415 }
 0xe3b   :  { %4251 = vrot.lane.b32.xlu0 %v4233_v42, %s9380_s24  ;;  %v4405_v36 = vpop.permute.xlu1 %4404 }
 0xe3c   :  { %v4343_v22 = vpop.permute.xlu0 %4342 }
 0xe3f   :  { %4164 = vrot.lane.b32.xlu0 %v4144_v15, %s9380_s24  ;;  %v10591_v44 = vpop.permute.xlu1 %4425  ;;  %v3949_v15 = vrot.slane %v10500_v17, %v9658_v49 }
 0xe40   :  { %v4364_v42 = vpop.permute.xlu0 %4363 }
 0xe43   :  { %4168 = vrot.lane.b32.xlu0 %v4146_v8, %s9380_s24  ;;  %v10593_v55 = vpop.permute.xlu1 %4430 }
 0xe47   :  { %4259 = vrot.lane.b32.xlu0 %v4237_v30, %s9380_s24  ;;  %v10595_v41 = vpop.permute.xlu1 %4544 }
 0xe4b   :  { %4595 = vperm.xlu0 %8855, %v4589_v45   ;;  %v10597_v59 = vpop.permute.xlu1 %4492  ;;  %v4369_v45 = vpop.permute.xlu0 %4368 }
 0xe4f   :  { %4605 = vperm.xlu0 %8855, %v4591_v33   ;;  %v10599_v47 = vpop.permute.xlu1 %4549  ;;  %v10615_v33 = vpop.permute.xlu0 %4482 }
 0xe53   :  { %v10601_v58 = vpop.permute.xlu1 %3968 }
 0xe57   :  { %v10603_v39 = vpop.permute.xlu1 %3957 }
 0xe5b   :  { %v10605_v3 = vpop.permute.xlu1 %3983 }
 0xea1   :  { %v3926_v11 = vpop.xlane.xlu1 %3925 }
 0xea2   :  { %v3927_v62 = vmul.f32 0.125, %v3926_v11 }
 0xea4   :  { %v3929_v0 = vadd.f32 1e-05, %v3927_v62 }
 0xea6   :  { %9083 = vrsqrt.f32 %v3929_v0 }
 0xeb0   :  { %v9084_v9 = vpop.eup %9083 }
 0xeb1   :  { %v3931_v27 = vmul.f32 %v9084_v9, %v10524_v6 }
 0xeb3   :  { %v3941_v8 = vmul.f32 %v3940_v24, %v3931_v27 }
 0xeb5   :  { %v3950_v30 = vadd.f32 %v3949_v15, %v3941_v8 }
 0xeb7   :  { %3951 = vst.msk [vmem:[#allocation2 + $0x8] sm:$0x1] %vm3916_vm7, %v3950_v30 }
 0xebe   :  { %v10617_v11 = vld [vmem:[#allocation2 + $0x8] ss:$0 sm:$0xff] }
 0xebf   :  { %v4283_v62 = vmul.f32 %v10617_v11, %v10452_v29  ;;  %v4015_v48 = vmul.f32 %v10509_v61, %v10617_v11  ;;  %v4197_v6 = vmul.f32 %v10544_v26, %v10617_v11  ;;  %v4345_v9 = vmul.f32 %v4343_v22, %v10617_v11  ;;  %v4540_v61 = vpop.permute.xlu0 %4539 }
 0xec0   :  { %v4106_v29 = vmul.f32 %v10535_v34, %v10617_v11  ;;  %v4407_v26 = vmul.f32 %v4405_v36, %v10617_v11 }
 0xec1   :  { %v10626_v17 = vrot.slane %v4283_v62, %v9687_v14  ;;  %v4048_v0 = vrot.slane %v4015_v48, %v9658_v49  ;;  %v4230_v15 = vrot.slane %v4197_v6, %v9658_v49 }
 0xec2   :  { %v4436_v48 = vrot.slane %v4407_v26, %v9658_v49 }
 0xec3   :  { %v4313_v24 = vmul.f32 %v10626_v17, %v4292_v60  ;;  %v4050_v27 = vmul.f32 %v4048_v0, %v10518_v2  ;;  %v4236_v8 = vmul.f32 %v4230_v15, %v10553_v19  ;;  %v4052_v22 = vmul.f32 %v4048_v0, %v10503_v54  ;;  %v4467_v34 = vpop.permute.xlu0 %4466 }
 0xec4   :  { %v4374_v60 = vrot.slane %v4345_v9, %v9658_v49  ;;  %v4139_v2 = vrot.slane %v4106_v29, %v9658_v49  ;;  %v4437_v19 = vmul.f32 %v4436_v48, %v4416_v21  ;;  %v4316_v6 = vmul.f32 %v10626_v17, %v4307_v12 }
 0xec5   :  { %4321 = vrot.lane.b32.xlu0 %v4313_v24, %s9392_s12  ;;  %4067 = vrot.lane.b32.xlu1 %v4050_v27, %s9374_s15  ;;  %v4232_v24 = vmul.f32 %v4230_v15, %v10533_v35  ;;  %v4056_v27 = vmul.f32 %v4048_v0, %v10560_v23  ;;  %v4469_v35 = vmul.f32 %v4467_v34, %v10617_v11 }
 0xec6   :  { %v4375_v30 = vmul.f32 %v4374_v60, %v4354_v28  ;;  %v4141_v62 = vmul.f32 %v4139_v2, %v10529_v7  ;;  %v4143_v54 = vmul.f32 %v4139_v2, %v10531_v25  ;;  %v4054_v28 = vmul.f32 %v4048_v0, %v10549_v18 }
 0xec7   :  { %v4488_v36 = vpop.permute.xlu0 %4487  ;;  %v4377_v9 = vmul.f32 %v4374_v60, %v4364_v42  ;;  %v4378_v25 = vmul.f32 %v4374_v60, %v4369_v45  ;;  %v4234_v42 = vmul.f32 %v4230_v15, %v10566_v40  ;;  %v4440_v45 = vmul.f32 %v4436_v48, %v10593_v55 }
 0xec8   :  { %v4145_v23 = vmul.f32 %v4139_v2, %v10540_v53  ;;  %v4498_v0 = vrot.slane %v4469_v35, %v9658_v49  ;;  %v4147_v40 = vmul.f32 %v4139_v2, %v10571_v38  ;;  %v4314_v55 = vmul.f32 %v10626_v17, %v10582_v32 }
 0xec9   :  { %4257 = vrot.lane.b32.xlu0 %v4236_v8, %s9380_s24  ;;  %4071 = vrot.lane.b32.xlu1 %v4052_v22, %s9374_s15  ;;  %v4238_v53 = vmul.f32 %v4230_v15, %v10576_v43  ;;  %v4376_v38 = vmul.f32 %v4374_v60, %v10607_v10  ;;  %v4438_v32 = vmul.f32 %v4436_v48, %v10587_v37 }
 0xeca   :  { %v4501_v29 = vmul.f32 %v4498_v0, %v4488_v36  ;;  %v4499_v15 = vmul.f32 %v4498_v0, %v10589_v1  ;;  %v4500_v10 = vmul.f32 %v4498_v0, %v10615_v33  ;;  %v4502_v1 = vmul.f32 %v4498_v0, %v10597_v59 }
 0xecb   :  { %v4529_v7 = vpop.permute.xlu0 %4528 }
 0xecc   :  { %v4531_v21 = vmul.f32 %v4529_v7, %v10617_v11 }
 0xecd   :  { %4383 = vrot.lane.b32.xlu0 %v4375_v30, %s9390_s20  ;;  %4158 = vrot.lane.b32.xlu1 %v4141_v62, %s9380_s24 }
 0xece   :  { %v4560_v12 = vrot.slane %v4531_v21, %v9658_v49 }
 0xecf   :  { %v4555_v26 = vpop.permute.xlu0 %4554 }
 0xed0   :  { %v4561_v18 = vmul.f32 %v4560_v12, %v4540_v61  ;;  %v4563_v61 = vmul.f32 %v4560_v12, %v10599_v47  ;;  %v4315_v47 = vmul.f32 %v10626_v17, %v10585_v46  ;;  %v4439_v17 = vmul.f32 %v4436_v48, %v10591_v44  ;;  %v10712_v48 = vpop.permute.xlu1 %4255 }
 0xed1   :  { %4445 = vrot.lane.b32.xlu0 %v4437_v19, %s9390_s20  ;;  %4162 = vrot.lane.b32.xlu1 %v4143_v54, %s9380_s24  ;;  %v4562_v37 = vmul.f32 %v4560_v12, %v10595_v41  ;;  %v4564_v30 = vmul.f32 %v4560_v12, %v4555_v26 }
 0xed3   :  { %v10682_v8 = vpop.permute.xlu0 %3973 }
 0xed4   :  { %v10714_v19 = vpop.permute.xlu1 %4600 }
 0xed5   :  { %4327 = vrot.lane.b32.xlu0 %v4316_v6, %s9392_s12  ;;  %4075 = vrot.lane.b32.xlu1 %v4054_v28, %s9374_s15 }
 0xed7   :  { %v10688_v22 = vpop.permute.xlu0 %3978 }
 0xed8   :  { %v10718_v36 = vpop.permute.xlu1 %4610 }
 0xed9   :  { %4387 = vrot.lane.b32.xlu0 %v4377_v9, %s9390_s20  ;;  %4249 = vrot.lane.b32.xlu1 %v4232_v24, %s9380_s24 }
 0xedb   :  { %v4066_v43 = vpop.permute.xlu0 %4065 }
 0xedd   :  { %4389 = vrot.lane.b32.xlu0 %v4378_v25, %s9390_s20  ;;  %4079 = vrot.lane.b32.xlu1 %v4056_v27, %s9374_s15 }
 0xedf   :  { %v10695_v2 = vpop.permute.xlu0 %4069 }
 0xee1   :  { %4569 = vrot.lane.b32.xlu0 %v4561_v18, %s9398_s9  ;;  %4253 = vrot.lane.b32.xlu1 %v4234_v42, %s9380_s24 }
 0xee3   :  { %v4157_v46 = vpop.permute.xlu0 %4156 }
 0xee5   :  { %4451 = vrot.lane.b32.xlu0 %v4440_v45, %s9390_s20  ;;  %4166 = vrot.lane.b32.xlu1 %v4145_v23, %s9380_s24 }
 0xee7   :  { %v10702_v60 = vpop.permute.xlu0 %4160 }
 0xee9   :  { %4511 = vrot.lane.b32.xlu0 %v4501_v29, %s9389_s14  ;;  %4170 = vrot.lane.b32.xlu1 %v4147_v40, %s9380_s24  ;;  %v3960_v29 = vmul.f32 %v10603_v39, %v10507_v63  ;;  %v3961_v40 = vmul.f32 %v10603_v39, %v10617_v11 }
 0xeeb   :  { %v4074_v34 = vpop.permute.xlu0 %4073  ;;  %v3993_v26 = vrot.slane %v3961_v40, %v9658_v49 }
 0xeed   :  { %4573 = vrot.lane.b32.xlu0 %v4563_v61, %s9398_s9  ;;  %4323 = vrot.lane.b32.xlu1 %v4314_v55, %s9392_s12  ;;  %v3989_v55 = vrot.slane %v3960_v29, %v9658_v49 }
 0xeef   :  { %v4248_v33 = vpop.permute.xlu0 %4247 }
 0xef1   :  { %4261 = vrot.lane.b32.xlu1 %v4238_v53, %s9380_s24  ;;  %s11252_s24 = sld [smem:[#allocation28_spill]] }
 0xef3   :  { %v10708_v62 = vpop.permute.xlu0 %4077 }
 0xef5   :  { %4385 = vrot.lane.b32.xlu1 %v4376_v38, %s9390_s20 }
 0xef7   :  { %v10710_v44 = vpop.permute.xlu0 %4251 }
 0xef9   :  { %4325 = vrot.lane.b32.xlu1 %v4315_v47, %s9392_s12 }
 0xefb   :  { %v4165_v41 = vpop.permute.xlu0 %4164 }
 0xefd   :  { %4447 = vrot.lane.b32.xlu1 %v4438_v32, %s9390_s20  ;;  %v3994_v32 = vmul.f32 %v3989_v55, %v10601_v58 }
 0xeff   :  { %v10716_v54 = vpop.permute.xlu0 %4168 }
 0xf01   :  { %4507 = vrot.lane.b32.xlu1 %v4499_v15, %s9389_s14  ;;  %v3995_v15 = vmul.f32 %v3993_v26, %v10601_v58  ;;  %v3999_v58 = vmul.f32 %v3993_v26, %v10688_v22 }
 0xf03   :  { %v10720_v59 = vpop.permute.xlu0 %4259 }
 0xf05   :  { %4509 = vrot.lane.b32.xlu1 %v4500_v10, %s9389_s14 }
 0xf07   :  { %v10722_v28 = vpop.permute.xlu0 %4595 }
 0xf09   :  { %4449 = vrot.lane.b32.xlu1 %v4439_v17, %s9390_s20 }
 0xf0b   :  { %v10724_v24 = vpop.permute.xlu0 %4605 }
 0xf0d   :  { %4571 = vrot.lane.b32.xlu1 %v4562_v37, %s9398_s9 }
 0xf11   :  { %4513 = vrot.lane.b32.xlu1 %v4502_v1, %s9389_s14 }
 0xf15   :  { %4575 = vrot.lane.b32.xlu1 %v4564_v30, %s9398_s9 }
 0xf37   :  { %v4068_v6 = vpop.permute.xlu1 %4067  ;;  %v4322_v25 = vpop.permute.xlu0 %4321 }
 0xf38   :  { %v4081_v38 = vsel %vm438_vm6, %v4066_v43, %v4068_v6  ;;  %v4094_v39 = vadd.f32 %v4068_v6, %v3995_v15  ;;  %v3998_v6 = vmul.f32 %v3989_v55, %v10688_v22  ;;  %v4000_v22 = vmul.f32 %v3989_v55, %v10605_v3 }
 0xf39   :  { %v4093_v10 = vadd.f32 %v4081_v38, %v3994_v32  ;;  %v3997_v32 = vmul.f32 %v3993_v26, %v10682_v8 }
 0xf3b   :  { %v4072_v7 = vpop.permute.xlu1 %4071  ;;  %v10726_v12 = vpop.permute.xlu0 %4257 }
 0xf3f   :  { %v4159_v9 = vpop.permute.xlu1 %4158  ;;  %v4384_v35 = vpop.permute.xlu0 %4383 }
 0xf40   :  { %v4172_v63 = vsel %vm517_vm10, %v4157_v46, %v4159_v9  ;;  %v4185_v30 = vadd.f32 %v4159_v9, %v4094_v39  ;;  %v4082_v9 = vsel %vm438_vm6, %v10695_v2, %v4072_v7  ;;  %v4621_v39 = vld [vmem:[#allocation16] sm:$0xff] }
 0xf41   :  { %v4184_v1 = vadd.f32 %v4172_v63, %v4093_v10  ;;  %8039 = vmatprep.subr.mxu1 %v4621_v39 }
 0xf42   :  { %8040 = vmatpush3.msra.mxu1 %v4621_v39 }
 0xf43   :  { %v4163_v21 = vpop.permute.xlu1 %4162  ;;  %v4446_v23 = vpop.permute.xlu0 %4445 }
 0xf47   :  { %v4076_v27 = vpop.permute.xlu1 %4075  ;;  %v10738_v53 = vpop.permute.xlu0 %4327 }
 0xf48   :  { %v4083_v46 = vsel %vm438_vm6, %v4074_v34, %v4076_v27 }
 0xf4b   :  { %v4250_v18 = vpop.permute.xlu1 %4249  ;;  %v10746_v11 = vpop.permute.xlu0 %4387 }
 0xf4c   :  { %v4263_v17 = vsel %vm517_vm10, %v4248_v33, %v4250_v18  ;;  %v4276_v40 = vadd.f32 %v4250_v18, %v4185_v30  ;;  %v4098_v33 = vadd.f32 %v4076_v27, %v3999_v58  ;;  %v4097_v18 = vadd.f32 %v4083_v46, %v3998_v6 }
 0xf4d   :  { %v4275_v29 = vadd.f32 %v4263_v17, %v4184_v1  ;;  %v4096_v17 = vadd.f32 %v4072_v7, %v3997_v32  ;;  %v4173_v27 = vsel %vm517_vm10, %v10702_v60, %v4163_v21  ;;  %v4001_v7 = vmul.f32 %v3993_v26, %v10605_v3 }
 0xf4e   :  { %v4334_v5 = vadd.f32 %v4322_v25, %v4276_v40 }
 0xf4f   :  { %v4080_v42 = vpop.permute.xlu1 %4079  ;;  %v10749_v31 = vpop.permute.xlu0 %4389  ;;  %v4333_v4 = vadd.f32 %v4322_v25, %v4275_v29  ;;  %v3996_v25 = vmul.f32 %v3989_v55, %v10682_v8  ;;  %v4187_v8 = vadd.f32 %v4163_v21, %v4096_v17 }
 0xf50   :  { %v4396_v10 = vadd.f32 %v4384_v35, %v4334_v5  ;;  %v4100_v40 = vadd.f32 %v4080_v42, %v4001_v7 }
 0xf51   :  { %v4395_v63 = vadd.f32 %v4384_v35, %v4333_v4  ;;  %v4265_v4 = vsel %vm517_vm10, %v10712_v48, %v10726_v12  ;;  %v4095_v5 = vadd.f32 %v4082_v9, %v3996_v25 }
 0xf53   :  { %v10728_v45 = vpop.permute.xlu1 %4253  ;;  %v4570_v1 = vpop.permute.xlu0 %4569  ;;  %v4186_v55 = vadd.f32 %v4173_v27, %v4095_v5 }
 0xf54   :  { %v4264_v35 = vsel %vm517_vm10, %v10710_v44, %v10728_v45  ;;  %v4278_v44 = vadd.f32 %v10728_v45, %v4187_v8 }
 0xf55   :  { %v4277_v6 = vadd.f32 %v4264_v35, %v4186_v55 }
 0xf57   :  { %v4167_v0 = vpop.permute.xlu1 %4166  ;;  %v4452_v32 = vpop.permute.xlu0 %4451 }
 0xf58   :  { %v4174_v15 = vsel %vm517_vm10, %v4165_v41, %v4167_v0  ;;  %v4189_v34 = vadd.f32 %v4167_v0, %v4098_v33  ;;  %v4084_v41 = vsel %vm438_vm6, %v10708_v62, %v4080_v42  ;;  %v4457_v0 = vadd.f32 %v4446_v23, %v4395_v63 }
 0xf59   :  { %v4188_v2 = vadd.f32 %v4174_v15, %v4097_v18  ;;  %v4458_v62 = vadd.f32 %v4446_v23, %v4396_v10  ;;  %v4099_v29 = vadd.f32 %v4084_v41, %v4000_v22 }
 0xf5a   :  { %v4280_v58 = vadd.f32 %v10726_v12, %v4189_v34 }
 0xf5b   :  { %v10734_v61 = vpop.permute.xlu1 %4170  ;;  %v4279_v3 = vadd.f32 %v4265_v4, %v4188_v2 }
 0xf5c   :  { %v4175_v60 = vsel %vm517_vm10, %v10716_v54, %v10734_v61  ;;  %v4191_v54 = vadd.f32 %v10734_v61, %v4100_v40 }
 0xf5d   :  { %v4190_v33 = vadd.f32 %v4175_v60, %v4099_v29 }
 0xf5f   :  { %v10741_v47 = vpop.permute.xlu1 %4323 }
 0xf60   :  { %v4335_v12 = vadd.f32 %v10741_v47, %v4277_v6 }
 0xf63   :  { %v4262_v37 = vpop.permute.xlu1 %4261 }
 0xf64   :  { %v4266_v21 = vsel %vm517_vm10, %v10720_v59, %v4262_v37  ;;  %v4282_v63 = vadd.f32 %v4262_v37, %v4191_v54  ;;  %v4336_v59 = vadd.f32 %v10741_v47, %v4278_v44 }
 0xf65   :  { %v4281_v18 = vadd.f32 %v4266_v21, %v4190_v33 }
 0xf66   :  { %v4340_v34 = vadd.f32 %v10738_v53, %v4282_v63 }
 0xf67   :  { %v4386_v43 = vpop.permute.xlu1 %4385  ;;  %v4339_v37 = vadd.f32 %v10738_v53, %v4281_v18 }
 0xf68   :  { %v4397_v45 = vadd.f32 %v4386_v43, %v4335_v12  ;;  %v4398_v17 = vadd.f32 %v4386_v43, %v4336_v59 }
 0xf69   :  { %v4401_v60 = vadd.f32 %v10749_v31, %v4339_v37  ;;  %v4783_v37 = vld [vmem:[%s11249_s3] sm:$0xff] }
 0xf6b   :  { %v4326_v38 = vpop.permute.xlu1 %4325  ;;  %v4463_v40 = vadd.f32 %v4452_v32, %v4401_v60 }
 0xf6c   :  { %v4337_v23 = vadd.f32 %v4326_v38, %v4279_v3  ;;  %v4338_v15 = vadd.f32 %v4326_v38, %v4280_v58 }
 0xf6e   :  { %v4399_v61 = vadd.f32 %v10746_v11, %v4337_v23  ;;  %v4400_v38 = vadd.f32 %v10746_v11, %v4338_v15  ;;  %v4402_v11 = vadd.f32 %v10749_v31, %v4340_v34  ;;  %v11250_v34 = vmov 1  }
 0xf6f   :  { %v4448_v30 = vpop.permute.xlu1 %4447 }
 0xf70   :  { %v4459_v22 = vadd.f32 %v4448_v30, %v4397_v45  ;;  %v4460_v27 = vadd.f32 %v4448_v30, %v4398_v17  ;;  %v4464_v58 = vadd.f32 %v4452_v32, %v4402_v11  ;;  %v4784_v32 = vld [vmem:[%s11249_s3 + $0x8] sm:$0xff] }
 0xf73   :  { %v4508_v48 = vpop.permute.xlu1 %4507 }
 0xf74   :  { %v4519_v26 = vadd.f32 %v4508_v48, %v4457_v0  ;;  %v4520_v46 = vadd.f32 %v4508_v48, %v4458_v62 }
 0xf76   :  { %v4581_v9 = vadd.f32 %v4570_v1, %v4519_v26  ;;  %v4582_v42 = vadd.f32 %v4570_v1, %v4520_v46  ;;  %v4512_v1 = vpop.permute.xlu0 %4511 }
 0xf77   :  { %v4510_v10 = vpop.permute.xlu1 %4509 }
 0xf78   :  { %v4614_v39 = vadd.f32 %v10722_v28, %v4582_v42  ;;  %v4613_v25 = vadd.f32 %v10722_v28, %v4581_v9  ;;  %v4521_v2 = vadd.f32 %v4510_v10, %v4459_v22  ;;  %v4522_v43 = vadd.f32 %v4510_v10, %v4460_v27  ;;  %v4785_v27 = vld [vmem:[%s11249_s3 + $0x10] sm:$0xff] }
 0xf79   :  { %v11251_v22 = vmov 0  }
 0xf7a   :  { %4632 = vrot.lane.b32.xlu1 %v4614_v39, %s9391_s16  ;;  %4630 = vrot.lane.b32.xlu0 %v4613_v25, %s9391_s16  ;;  %v4574_v0 = vpop.permute.xlu0 %4573 }
 0xf7b   :  { %v4450_v47 = vpop.permute.xlu1 %4449 }
 0xf7c   :  { %v4461_v41 = vadd.f32 %v4450_v47, %v4399_v61  ;;  %v4462_v28 = vadd.f32 %v4450_v47, %v4400_v38  ;;  %v4786_v47 = vld [vmem:[%s11249_s3 + $0x18] sm:$0xff] }
 0xf7e   :  { %v4523_v4 = vadd.f32 %v4512_v1, %v4461_v41  ;;  %v4524_v5 = vadd.f32 %v4512_v1, %v4462_v28 }
 0xf7f   :  { %v4572_v8 = vpop.permute.xlu1 %4571 }
 0xf80   :  { %v4583_v7 = vadd.f32 %v4572_v8, %v4521_v2  ;;  %v4584_v35 = vadd.f32 %v4572_v8, %v4522_v43  ;;  %v4585_v62 = vadd.f32 %v4574_v0, %v4523_v4  ;;  %v4586_v55 = vadd.f32 %v4574_v0, %v4524_v5 }
 0xf82   :  { %v4615_v53 = vadd.f32 %v10714_v19, %v4583_v7  ;;  %v4616_v30 = vadd.f32 %v10714_v19, %v4584_v35  ;;  %v4618_v3 = vadd.f32 %v10724_v24, %v4586_v55  ;;  %v4617_v31 = vadd.f32 %v10724_v24, %v4585_v62 }
 0xf83   :  { %v4514_v29 = vpop.permute.xlu1 %4513 }
 0xf84   :  { %4636 = vrot.lane.b32.xlu1 %v4616_v30, %s9391_s16  ;;  %4634 = vrot.lane.b32.xlu0 %v4615_v53, %s9391_s16  ;;  %v4525_v48 = vadd.f32 %v4514_v29, %v4463_v40  ;;  %v4526_v21 = vadd.f32 %v4514_v29, %v4464_v58 }
 0xf87   :  { %v4576_v26 = vpop.permute.xlu1 %4575 }
 0xf88   :  { %v4587_v46 = vadd.f32 %v4576_v26, %v4525_v48  ;;  %v4588_v6 = vadd.f32 %v4576_v26, %v4526_v21  ;;  %4640 = vrot.lane.b32.xlu1 %v4618_v3, %s9391_s16  ;;  %4638 = vrot.lane.b32.xlu0 %v4617_v31, %s9391_s16  ;;  %v10845_v3 = vld [vmem:[#allocation12] sm:$0xff] }
 0xf89   :  { %v4882_v31 = vrot.slane %v10845_v3, %v9661_v51  ;;  %v4864_v26 = vrot.slane %v10845_v3, %v9658_v49 }
 0xf8a   :  { %v4619_v19 = vadd.f32 %v10718_v36, %v4587_v46  ;;  %v4620_v44 = vadd.f32 %v10718_v36, %v4588_v6  ;;  %v5127_v46 = vrot.slane %v10845_v3, %v9673_v57  ;;  %v5261_v6 = vrot.slane %v10845_v3, %v9670_v56 }
 0xf8c   :  { %4644 = vrot.lane.b32.xlu1 %v4620_v44, %s9391_s16  ;;  %4642 = vrot.lane.b32.xlu0 %v4619_v19, %s9391_s16  ;;  %v5489_v19 = vrot.slane %v10845_v3, %v10024_v50  ;;  %v5603_v44 = vrot.slane %v10845_v3, %v10044_v52 }
 0xf90   :  { %4806 = vperm.xlu0 %8855, %v4784_v32  }
 0xfec   :  { %v4631_v33 = vpop.permute.xlu0 %4630  ;;  %v4633_v54 = vpop.permute.xlu1 %4632 }
 0xfed   :  { %v4646_v24 = vsel %vm3108_vm14, %v4631_v33, %v4633_v54  ;;  %v7523_v33 = vld [vmem:[#allocation12 + $0x8] ss:$0 sm:$0xff] }
 0xfee   :  { %8041 = vmatprep.mubr.msk.f32.mxu1 %vm1411_vm15, %v4646_v24 }
 0xff6   :  { %v4635_v23 = vpop.permute.xlu0 %4634  ;;  %v4637_v15 = vpop.permute.xlu1 %4636 }
 0xff7   :  { %v4647_v9 = vsel %vm3108_vm14, %v4635_v23, %v4637_v15 }
 0xff8   :  { %8042 = vmatmul.mubr.msk.f32.vlgmr.msra.gmra.mrb[24].mxu1 %vm1411_vm15, %v4647_v9 }
 0xffa   :  { %v4639_v42 = vpop.permute.xlu0 %4638  ;;  %v4641_v36 = vpop.permute.xlu1 %4640 }
 0xffb   :  { %v4648_v12 = vsel %vm3108_vm14, %v4639_v42, %v4641_v36 }
 0xffc   :  { %8044 = vmatprep.mubr.msk.f32.mxu1 %vm1411_vm15, %v4648_v12 }
 0xffe   :  { %v4643_v18 = vpop.permute.xlu0 %4642  ;;  %v4645_v63 = vpop.permute.xlu1 %4644 }
 0xfff   :  { %v4649_v10 = vsel %vm3108_vm14, %v4643_v18, %v4645_v63 }
0x1000   :  { %8045 = vmatmul.mubr.msk.f32.gmra.mrb[26].mxu1 %vm1411_vm15, %v4649_v10 }
0x100f   :  { %v10823_v41 = vpop.permute.xlu0 %4806 }
0x10cb   :  { %v8043_v59 = vpop.f32.mrb[24].mxu1 }
0x10cc   :  { %v4724_v39 = vpop.f32.mrb[25].mxu1  ;;  %v4746_v25 = vsel %vm2699_vm9, %v8043_v59, 0.0 }
0x10cd   :  { %4747 = vadd.xlane.f32.xlu1 %v4746_v25  ;;  %v4743_v45 = vsel %vm2699_vm9, %v4724_v39, 0.0 }
0x10ce   :  { %4744 = vadd.xlane.f32.xlu0 %v4743_v45 }
0x10d3   :  { %v8046_v17 = vpop.f32.mrb[26].mxu1 }
0x10d4   :  { %v4734_v61 = vpop.f32.mrb[27].mxu1  ;;  %v4752_v38 = vsel %vm2699_vm9, %v8046_v17, 0.0 }
0x10d5   :  { %4753 = vadd.xlane.f32.xlu0 %v4752_v38  ;;  %v4749_v1 = vsel %vm2699_vm9, %v4734_v61, 0.0 }
0x10d9   :  { %4750 = vadd.xlane.f32.xlu0 %v4749_v1 }
0x10de   :  { %4801 = vperm.xlu1 %8856, %v4783_v37  }
0x10e2   :  { %8857 = vset.pattern.permute.xlu1 %v11250_v34 }
0x10e3   :  { %4824 = vperm.xlu1 %8857, %v4783_v37  }
0x10e7   :  { %4828 = vperm.xlu1 %8857, %v4784_v32   ;;  %v5717_v32 = vrot.slane %v10845_v3, %v10050_v20 }
0x10eb   :  { %8858 = vset.pattern.permute.xlu1 %v11251_v22 }
0x10ec   :  { %4816 = vperm.xlu1 %8858, %v4786_v47  }
0x10ef   :  { %4811 = vperm.xlu0 %8855, %v4785_v27  }
0x10f0   :  { %8860 = vset.pattern.permute.xlu1 %v11250_v34 }
0x10f3   :  { %8859 = vset.pattern.permute.xlu0 %v11250_v34 }
0x115a   :  { %v4748_v28 = vpop.xlane.xlu1 %4747 }
0x115b   :  { %v4756_v2 = vmul.f32 0.03125, %v4748_v28  ;;  %v4745_v43 = vpop.xlane.xlu0 %4744 }
0x115c   :  { %v4755_v4 = vmul.f32 0.03125, %v4745_v43 }
0x115d   :  { %v10825_v5 = vsub.f32 %v8043_v59, %v4756_v2 }
0x115e   :  { %v10827_v8 = vsub.f32 %v4724_v39, %v4755_v4  ;;  %v4802_v54 = vpop.permute.xlu1 %4801 }
0x115f   :  { %v4764_v7 = vmul.f32 %v10825_v5, %v10825_v5 }
0x1160   :  { %v4763_v35 = vmul.f32 %v10827_v8, %v10827_v8 }
0x1161   :  { %v4770_v60 = vsel %vm2699_vm9, %v4764_v7, 0.0 }
0x1162   :  { %v4754_v11 = vpop.xlane.xlu0 %4753  ;;  %4771 = vadd.xlane.f32.xlu0 %v4770_v60  ;;  %v4767_v0 = vsel %vm2699_vm9, %v4763_v35, 0.0  ;;  %v4825_v24 = vpop.permute.xlu1 %4824 }
0x1163   :  { %v4758_v62 = vmul.f32 0.03125, %v4754_v11  ;;  %4768 = vadd.xlane.f32.xlu1 %v4767_v0 }
0x1165   :  { %v10835_v55 = vsub.f32 %v8046_v17, %v4758_v62 }
0x1166   :  { %v4751_v53 = vpop.xlane.xlu0 %4750  ;;  %v4829_v23 = vpop.permute.xlu1 %4828 }
0x1167   :  { %v4757_v30 = vmul.f32 0.03125, %v4751_v53  ;;  %v4766_v29 = vmul.f32 %v10835_v55, %v10835_v55 }
0x1169   :  { %v10839_v40 = vsub.f32 %v4734_v61, %v4757_v30  ;;  %v4776_v58 = vsel %vm2699_vm9, %v4766_v29, 0.0  ;;  %v10878_v30 = vld [vmem:[#allocation2 + $0x48] sm:$0xff] }
0x116a   :  { %4777 = vadd.xlane.f32.xlu0 %v4776_v58 }
0x116b   :  { %v4765_v48 = vmul.f32 %v10839_v40, %v10839_v40  ;;  %v4817_v9 = vpop.permute.xlu1 %4816 }
0x116d   :  { %v4773_v21 = vsel %vm2699_vm9, %v4765_v48, 0.0 }
0x116e   :  { %4774 = vadd.xlane.f32.xlu1 %v4773_v21  ;;  %v4812_v15 = vpop.permute.xlu0 %4811 }
0x117f   :  { %4836 = vperm.xlu1 %8860, %v4786_v47  }
0x1180   :  { %4832 = vperm.xlu0 %8859, %v4785_v27  }
0x1183   :  { %4884 = vrot.lane.b32.xlu1 %v4882_v31, %s9390_s20 }
0x1184   :  { %4866 = vrot.lane.b32.xlu0 %v4864_v26, %s9389_s14  ;;  %8981 = vset.pattern.permute.xlu1 %v11251_v22 }
0x1185   :  { %8982 = vset.pattern.permute.xlu0 %v11251_v22 }
0x1187   :  { %5129 = vrot.lane.b32.xlu1 %v5127_v46, %s9392_s12 }
0x1188   :  { %5263 = vrot.lane.b32.xlu0 %v5261_v6, %s9374_s15 }
0x118b   :  { %5491 = vrot.lane.b32.xlu1 %v5489_v19, %s9364_s23 }
0x118c   :  { %5605 = vrot.lane.b32.xlu0 %v5603_v44, %s9391_s16 }
0x118f   :  { %5719 = vrot.lane.b32.xlu1 %v5717_v32, %s9394_s5 }
0x1190   :  { %5833 = vrot.lane.b32.xlu0 %v7523_v33, %s9393_s18 }
0x11ef   :  { %v4772_v42 = vpop.xlane.xlu0 %4771 }
0x11f0   :  { %v4780_v36 = vmul.f32 0.03125, %v4772_v42  ;;  %v4769_v12 = vpop.xlane.xlu1 %4768  ;;  %v10903_v42 = vrot.slane %v10845_v3, %v9687_v14 }
0x11f1   :  { %v4779_v18 = vmul.f32 0.03125, %v4769_v12 }
0x11f2   :  { %v4788_v63 = vadd.f32 1e-05, %v4780_v36 }
0x11f3   :  { %v4787_v10 = vadd.f32 1e-05, %v4779_v18 }
0x11f4   :  { %9085 = vrsqrt.f32 %v4788_v63 }
0x11f5   :  { %9087 = vrsqrt.f32 %v4787_v10 }
0x11f7   :  { %v4778_v59 = vpop.xlane.xlu0 %4777 }
0x11f8   :  { %v4782_v39 = vmul.f32 0.03125, %v4778_v59 }
0x11fa   :  { %v4790_v25 = vadd.f32 1e-05, %v4782_v39 }
0x11fb   :  { %v4775_v45 = vpop.xlane.xlu1 %4774 }
0x11fc   :  { %9089 = vrsqrt.f32 %v4790_v25  ;;  %v4781_v17 = vmul.f32 0.03125, %v4775_v45 }
0x11fe   :  { %v9086_v61 = vpop.eup %9085  ;;  %v4789_v38 = vadd.f32 1e-05, %v4781_v17 }
0x11ff   :  { %v9088_v1 = vpop.eup %9087  ;;  %v4796_v37 = vmul.f32 %v9086_v61, %v10825_v5  ;;  %v4837_v35 = vpop.permute.xlu1 %4836 }
0x1200   :  { %v4795_v47 = vmul.f32 %v9088_v1, %v10827_v8  ;;  %9091 = vrsqrt.f32 %v4789_v38  ;;  %v4833_v58 = vpop.permute.xlu0 %4832 }
0x1201   :  { %v4820_v22 = vmul.f32 %v10823_v41, %v4796_v37 }
0x1202   :  { %v4819_v27 = vmul.f32 %v4802_v54, %v4795_v47 }
0x1203   :  { %v4840_v28 = vadd.f32 %v4829_v23, %v4820_v22  ;;  %v4885_v62 = vpop.permute.xlu1 %4884 }
0x1204   :  { %v4839_v2 = vadd.f32 %v4825_v24, %v4819_v27  ;;  %v4889_v29 = vmul.f32 %v10878_v30, %v4885_v62  ;;  %v4867_v32 = vpop.permute.xlu0 %4866 }
0x1205   :  { %v4844_v43 = vmax.f32 %v4840_v28, 0.0  ;;  %v4869_v24 = vmul.f32 %v10878_v30, %v4867_v32 }
0x1206   :  { %v9090_v4 = vpop.eup %9089  ;;  %v4843_v7 = vmax.f32 %v4839_v2, 0.0 }
0x1207   :  { %4848 = vst.msk [vmem:[#allocation2 + $0x38] sm:$0xff] %vm2699_vm9, %v4844_v43  ;;  %v4798_v60 = vmul.f32 %v9090_v4, %v10835_v55  ;;  %v5130_v39 = vpop.permute.xlu1 %5129 }
0x1208   :  { %4847 = vst.msk [vmem:[#allocation2 + $0x8] sm:$0xff] %vm2699_vm9, %v4843_v7  ;;  %v5132_v3 = vmul.f32 %v10878_v30, %v5130_v39  ;;  %v5264_v27 = vpop.permute.xlu0 %5263 }
0x1209   :  { %v4822_v11 = vmul.f32 %v4817_v9, %v4798_v60  ;;  %v5266_v28 = vmul.f32 %v10878_v30, %v5264_v27 }
0x120a   :  { %v9092_v5 = vpop.eup %9091 }
0x120b   :  { %v4842_v0 = vadd.f32 %v4837_v35, %v4822_v11  ;;  %v4797_v8 = vmul.f32 %v9092_v5, %v10839_v40 }
0x120d   :  { %v4846_v41 = vmax.f32 %v4842_v0, 0.0  ;;  %v4821_v53 = vmul.f32 %v4812_v15, %v4797_v8  ;;  %v4896_v15 = vld [vmem:[#allocation7 + $0x10] sm:$0xff]  ;;  %v5492_v0 = vpop.permute.xlu1 %5491 }
0x120e   :  { %v10881_v48 = vld [vmem:[#allocation2 + $0x38] sm:$0xff]  ;;  %8055 = vmatprep.mubr.msk.f32.mxu0 %vm2699_vm9, %v4896_v15 }
0x120f   :  { %4850 = vst.msk [vmem:[#allocation2 + $0x98] sm:$0xff] %vm2699_vm9, %v4846_v41  ;;  %v4841_v55 = vadd.f32 %v4833_v58, %v4821_v53  ;;  %v10884_v21 = vld [vmem:[#allocation2 + $0x8] sm:$0xff]  ;;  %v4890_v31 = vmul.f32 %v4885_v62, %v10881_v48  ;;  %v4872_v18 = vmul.f32 %v4867_v32, %v10881_v48  ;;  %v5135_v47 = vmul.f32 %v5130_v39, %v10881_v48  ;;  %v5606_v58 = vpop.permute.xlu0 %5605 }
0x1210   :  { %v4888_v40 = vmul.f32 %v4885_v62, %v10884_v21  ;;  %v4870_v23 = vmul.f32 %v4867_v32, %v10884_v21  ;;  %v5133_v38 = vmul.f32 %v5130_v39, %v10884_v21  ;;  %v5267_v7 = vmul.f32 %v5264_v27, %v10884_v21 }
0x1211   :  { %v4845_v26 = vmax.f32 %v4841_v55, 0.0  ;;  %v8861_v46 = vpack.i.bf16 %v4890_v31, %v4889_v29  ;;  %v8886_v45 = vpack.i.bf16 %v4872_v18, %v4869_v24  ;;  %v8906_v2 = vpack.i.bf16 %v5135_v47, %v5132_v3  ;;  %v5956_v47 = vld [vmem:[#allocation18] sm:$0xff] }
0x1212   :  { %v8866_v6 = vpack.i.bf16 %v4888_v40, %v4889_v29  ;;  %v8876_v12 = vpack.i.bf16 %v4870_v23, %v4869_v24  ;;  %v8901_v37 = vpack.i.bf16 %v5133_v38, %v5132_v3  ;;  %v8921_v60 = vpack.i.bf16 %v5267_v7, %v5266_v28 }
0x1213   :  { %4849 = vst.msk [vmem:[#allocation2 + $0x68] sm:$0xff] %vm2699_vm9, %v4845_v26  ;;  %8862 = vrot.lane.b32.xlu1 %v8861_v46, %s9394_s5  ;;  %v5269_v11 = vmul.f32 %v5264_v27, %v10881_v48  ;;  %v5495_v8 = vmul.f32 %v5492_v0, %v10881_v48  ;;  %v5609_v55 = vmul.f32 %v5606_v58, %v10881_v48  ;;  %v5720_v46 = vpop.permute.xlu1 %5719  ;;  %v5834_v23 = vpop.permute.xlu0 %5833 }
0x1214   :  { %8867 = vrot.lane.b32.xlu0 %v8866_v6, %s9394_s5  ;;  %v5608_v26 = vmul.f32 %v5606_v58, %v10884_v21 }
0x1215   :  { %v8926_v41 = vpack.i.bf16 %v5269_v11, %v5266_v28 }
0x1216   :  { %v10890_v19 = vld [vmem:[#allocation2 + $0x98] sm:$0xff] }
0x1217   :  { %v4894_v44 = vmul.f32 %v4885_v62, %v10890_v19  ;;  %v5399_v59 = vmul.f32 %v10903_v42, %v10890_v19  ;;  %v4876_v61 = vmul.f32 %v4867_v32, %v10890_v19  ;;  %v5139_v4 = vmul.f32 %v5130_v39, %v10890_v19 }
0x1219   :  { %v8871_v54 = vpack.i.bf16 %v4894_v44, %v4889_v29  ;;  %v8891_v1 = vpack.i.bf16 %v4876_v61, %v4869_v24  ;;  %v8911_v35 = vpack.i.bf16 %v5139_v4, %v5132_v3  ;;  %v5497_v44 = vmul.f32 %v5492_v0, %v10890_v19 }
0x121a   :  { %v10894_v33 = vld [vmem:[#allocation2 + $0x68] sm:$0xff]  ;;  %v5839_v61 = vmul.f32 %v5834_v23, %v10890_v19 }
0x121b   :  { %8872 = vrot.lane.b32.xlu1 %v8871_v54, %s9394_s5  ;;  %v4892_v9 = vmul.f32 %v4885_v62, %v10894_v33  ;;  %v4874_v63 = vmul.f32 %v4867_v32, %v10894_v33  ;;  %v5398_v10 = vmul.f32 %v10903_v42, %v10894_v33  ;;  %v5137_v22 = vmul.f32 %v5130_v39, %v10894_v33 }
0x121c   :  { %v5271_v5 = vmul.f32 %v5264_v27, %v10894_v33  ;;  %v5494_v62 = vmul.f32 %v5492_v0, %v10884_v21  ;;  %v5496_v31 = vmul.f32 %v5492_v0, %v10894_v33  ;;  %v5722_v32 = vmul.f32 %v5720_v46, %v10884_v21 }
0x121d   :  { %v8881_v36 = vpack.i.bf16 %v4892_v9, %v4889_v29  ;;  %v10914_v25 = vpack.c.bf16 %v5399_v59, %v5398_v10  ;;  %v8896_v17 = vpack.i.bf16 %v4874_v63, %v4869_v24  ;;  %v8916_v43 = vpack.i.bf16 %v5137_v22, %v5132_v3  ;;  %v5957_v22 = vld [vmem:[#allocation18 + $0x8] sm:$0xff] }
0x121e   :  { %v8931_v53 = vpack.i.bf16 %v5271_v5, %v5266_v28  ;;  %v5273_v29 = vmul.f32 %v5264_v27, %v10890_v19  ;;  %v8941_v6 = vpack.i.bf16 %v5495_v8, %v5494_v62  ;;  %v5610_v54 = vmul.f32 %v5606_v58, %v10894_v33 }
0x121f   :  { %8882 = vrot.lane.b32.xlu0 %v8881_v36, %s9394_s5  ;;  %8877 = vrot.lane.b32.xlu1 %v8876_v12, %s9393_s18  ;;  %v5723_v24 = vmul.f32 %v5720_v46, %v10881_v48  ;;  %v8946_v15 = vpack.i.bf16 %v5497_v44, %v5496_v31  ;;  %v8951_v9 = vpack.i.bf16 %v5609_v55, %v5608_v26 }
0x1220   :  { %v8936_v40 = vpack.i.bf16 %v5273_v29, %v5266_v28  ;;  %v5611_v36 = vmul.f32 %v5606_v58, %v10890_v19  ;;  %v5836_v12 = vmul.f32 %v5834_v23, %v10884_v21  ;;  %v5724_v18 = vmul.f32 %v5720_v46, %v10894_v33 }
0x1221   :  { %v5837_v63 = vmul.f32 %v5834_v23, %v10881_v48  ;;  %v8961_v59 = vpack.i.bf16 %v5723_v24, %v5722_v32  ;;  %v5725_v39 = vmul.f32 %v5720_v46, %v10890_v19  ;;  %v5838_v3 = vmul.f32 %v5834_v23, %v10894_v33  ;;  %v4897_v24 = vld [vmem:[#allocation7 + $0x18] sm:$0xff] }
0x1222   :  { %v8956_v10 = vpack.i.bf16 %v5611_v36, %v5610_v54  ;;  %v8448_v27 = vpack.c.bf16 %v5957_v22, %v5956_v47 }
0x1223   :  { %8887 = vrot.lane.b32.xlu0 %v8886_v45, %s9393_s18  ;;  %8897 = vrot.lane.b32.xlu1 %v8896_v17, %s9393_s18  ;;  %v8966_v45 = vpack.i.bf16 %v5725_v39, %v5724_v18  ;;  %v8971_v17 = vpack.i.bf16 %v5837_v63, %v5836_v12  ;;  %v8976_v38 = vpack.i.bf16 %v5839_v61, %v5838_v3  ;;  %v4877_v18 = vld [vmem:[#allocation7] sm:$0xff] }
0x1224   :  { %8449 = vmatprep.subr.bf16.mxu1 %v8448_v27 }
0x1225   :  { %8451 = vmatpush3.bf16.msra.mxu1 %v8448_v27  ;;  %v4878_v27 = vld [vmem:[#allocation7 + $0x8] sm:$0xff] }
0x1227   :  { %8892 = vrot.lane.b32.xlu0 %v8891_v1, %s9393_s18  ;;  %8902 = vrot.lane.b32.xlu1 %v8901_v37, %s9391_s16  ;;  %v5943_v1 = vld [vmem:[%s11252_s24 + $0x8] sm:$0xff]  ;;  %v5942_v37 = vld [vmem:[%s11252_s24] sm:$0xff] }
0x122b   :  { %8907 = vrot.lane.b32.xlu0 %v8906_v2, %s9391_s16  ;;  %8917 = vrot.lane.b32.xlu1 %v8916_v43, %s9391_s16 }
0x122f   :  { %8912 = vrot.lane.b32.xlu0 %v8911_v35, %s9391_s16  ;;  %8922 = vrot.lane.b32.xlu1 %v8921_v60, %s9364_s23 }
0x1233   :  { %8927 = vrot.lane.b32.xlu0 %v8926_v41, %s9364_s23  ;;  %8932 = vrot.lane.b32.xlu1 %v8931_v53, %s9364_s23 }
0x1237   :  { %8937 = vrot.lane.b32.xlu0 %v8936_v40, %s9364_s23  ;;  %8942 = vrot.lane.b32.xlu1 %v8941_v6, %s9374_s15 }
0x123b   :  { %8947 = vrot.lane.b32.xlu0 %v8946_v15, %s9374_s15  ;;  %8952 = vrot.lane.b32.xlu1 %v8951_v9, %s9392_s12 }
0x123f   :  { %8957 = vrot.lane.b32.xlu0 %v8956_v10, %s9392_s12  ;;  %8962 = vrot.lane.b32.xlu1 %v8961_v59, %s9390_s20 }
0x1243   :  { %8967 = vrot.lane.b32.xlu0 %v8966_v45, %s9390_s20  ;;  %8972 = vrot.lane.b32.xlu1 %v8971_v17, %s9389_s14 }
0x1247   :  { %8977 = vrot.lane.b32.xlu0 %v8976_v38, %s9389_s14  ;;  %5946 = vperm.xlu1 %8981, %v5942_v37  }
0x124b   :  { %5951 = vperm.xlu0 %8982, %v5943_v1  }
0x1285   :  { %v8863_v33 = vpop.permute.xlu1 %8862 }
0x1286   :  { %v8865_v28 = vunpack.i.h.bf16 %v8863_v33  ;;  %v8864_v2 = vunpack.i.l.bf16 %v8863_v33  ;;  %v8868_v19 = vpop.permute.xlu0 %8867 }
0x1287   :  { %v8870_v43 = vunpack.i.h.bf16 %v8868_v19  ;;  %v8869_v4 = vunpack.i.l.bf16 %v8868_v19 }
0x1288   :  { %v4923_v7 = vsel %vm2878_vm12, %v8864_v2, %v8865_v28 }
0x1289   :  { %v4922_v35 = vsel %vm2878_vm12, %v8869_v4, %v8870_v43  ;;  %v5141_v4 = vld [vmem:[#allocation7 + $0x20] sm:$0xff] }
0x128a   :  { %v8376_v60 = vpack.c.bf16 %v4923_v7, %v4922_v35 }
0x128c   :  { %8377 = vmatprep.subr.bf16.mxu0 %v8376_v60 }
0x128d   :  { %v8873_v11 = vpop.permute.xlu1 %8872  ;;  %8379 = vmatpush3.bf16.msra.mxu0 %v8376_v60 }
0x128e   :  { %v8875_v5 = vunpack.i.h.bf16 %v8873_v11  ;;  %v8874_v0 = vunpack.i.l.bf16 %v8873_v11 }
0x1290   :  { %v4925_v31 = vsel %vm2878_vm12, %v8874_v0, %v8875_v5 }
0x1291   :  { %v8878_v8 = vpop.permute.xlu1 %8877  ;;  %v8883_v62 = vpop.permute.xlu0 %8882 }
0x1292   :  { %v8885_v41 = vunpack.i.h.bf16 %v8883_v62  ;;  %v8884_v53 = vunpack.i.l.bf16 %v8883_v62  ;;  %v8880_v29 = vunpack.i.h.bf16 %v8878_v8  ;;  %v8879_v58 = vunpack.i.l.bf16 %v8878_v8 }
0x1294   :  { %v4924_v55 = vsel %vm2878_vm12, %v8884_v53, %v8885_v41  ;;  %v5035_v23 = vsel %vm2984_vm13, %v8879_v58, %v8880_v29 }
0x1295   :  { %v8898_v26 = vpop.permute.xlu1 %8897  ;;  %v8888_v46 = vpop.permute.xlu0 %8887  ;;  %v8380_v40 = vpack.c.bf16 %v4925_v31, %v4924_v55  ;;  %v5142_v31 = vld [vmem:[#allocation7 + $0x28] sm:$0xff] }
0x1296   :  { %v8890_v6 = vunpack.i.h.bf16 %v8888_v46  ;;  %v8889_v44 = vunpack.i.l.bf16 %v8888_v46  ;;  %v8900_v32 = vunpack.i.h.bf16 %v8898_v26  ;;  %v8899_v54 = vunpack.i.l.bf16 %v8898_v26 }
0x1297   :  { %8381 = vmatprep.subr.bf16.mxu0 %v8380_v40 }
0x1298   :  { %8383 = vmatpush3.bf16.msra.mxu0 %v8380_v40  ;;  %v5036_v15 = vsel %vm2984_vm13, %v8889_v44, %v8890_v6  ;;  %v5037_v3 = vsel %vm2984_vm13, %v8899_v54, %v8900_v32  ;;  %v5275_v44 = vld [vmem:[#allocation7 + $0x30] sm:$0xff] }
0x1299   :  { %v8903_v9 = vpop.permute.xlu1 %8902  ;;  %v8893_v36 = vpop.permute.xlu0 %8892  ;;  %v8384_v12 = vpack.c.bf16 %v5036_v15, %v5035_v23  ;;  %v5397_v23 = vmul.f32 %v10903_v42, %v10881_v48 }
0x129a   :  { %v8895_v63 = vunpack.i.h.bf16 %v8893_v36  ;;  %v8894_v10 = vunpack.i.l.bf16 %v8893_v36  ;;  %v8905_v59 = vunpack.i.h.bf16 %v8903_v9  ;;  %v8904_v39 = vunpack.i.l.bf16 %v8903_v9 }
0x129b   :  { %8056 = vmatmul.mubr.msk.f32.vlgmr.msra.gmra.mrb[12].mxu0 %vm2699_vm9, %v4897_v24  ;;  %8385 = vmatprep.subr.bf16.mxu0 %v8384_v12  ;;  %v5396_v24 = vmul.f32 %v10903_v42, %v10884_v21 }
0x129c   :  { %8387 = vmatpush3.bf16.msra.mxu0 %v8384_v12  ;;  %v5038_v45 = vsel %vm2984_vm13, %v8894_v10, %v8895_v63  ;;  %8066 = vmatprep.mubr.msk.f32.mxu0 %vm2699_vm9, %v4877_v18  ;;  %v5167_v33 = vsel %vm3108_vm14, %v8904_v39, %v8905_v59  ;;  %v5276_v63 = vld [vmem:[#allocation7 + $0x38] sm:$0xff]  ;;  %v5401_v10 = vld [vmem:[#allocation7 + $0x40] sm:$0xff] }
0x129d   :  { %v8918_v17 = vpop.permute.xlu1 %8917  ;;  %v8908_v61 = vpop.permute.xlu0 %8907  ;;  %v8388_v38 = vpack.c.bf16 %v5038_v45, %v5037_v3  ;;  %v8408_v12 = vpack.c.bf16 %v5397_v23, %v5396_v24  ;;  %v11253_v24 = vmov 0.0|0.0  }
0x129e   :  { %v8910_v1 = vunpack.i.h.bf16 %v8908_v61  ;;  %v8909_v37 = vunpack.i.l.bf16 %v8908_v61  ;;  %v8920_v47 = vunpack.i.h.bf16 %v8918_v17  ;;  %v8919_v22 = vunpack.i.l.bf16 %v8918_v17  ;;  %v5402_v17 = vld [vmem:[#allocation7 + $0x48] sm:$0xff]  ;;  %v5499_v61 = vld [vmem:[#allocation7 + $0x50] sm:$0xff] }
0x129f   :  { %8389 = vmatprep.subr.bf16.mxu0 %v8388_v38 }
0x12a0   :  { %8391 = vmatpush3.bf16.msra.mxu0 %v8388_v38  ;;  %v5168_v28 = vsel %vm3108_vm14, %v8909_v37, %v8910_v1  ;;  %v5169_v5 = vsel %vm3108_vm14, %v8919_v22, %v8920_v47 }
0x12a1   :  { %v8923_v2 = vpop.permute.xlu1 %8922  ;;  %v8913_v19 = vpop.permute.xlu0 %8912  ;;  %v8392_v43 = vpack.c.bf16 %v5168_v28, %v5167_v33 }
0x12a2   :  { %v8915_v7 = vunpack.i.h.bf16 %v8913_v19  ;;  %v8914_v35 = vunpack.i.l.bf16 %v8913_v19  ;;  %v8925_v60 = vunpack.i.h.bf16 %v8923_v2  ;;  %v8924_v11 = vunpack.i.l.bf16 %v8923_v2  ;;  %v5500_v2 = vld [vmem:[#allocation7 + $0x58] sm:$0xff] }
0x12a3   :  { %8067 = vmatmul.mubr.msk.f32.vlgmr.msra.gmra.mrb[12].mxu0 %vm2699_vm9, %v4878_v27  ;;  %8393 = vmatprep.subr.bf16.mxu0 %v8392_v43 }
0x12a4   :  { %8395 = vmatpush3.bf16.msra.mxu0 %v8392_v43  ;;  %v5170_v0 = vsel %vm3108_vm14, %v8914_v35, %v8915_v7  ;;  %8077 = vmatprep.mubr.msk.f32.mxu0 %vm2699_vm9, %v5141_v4  ;;  %v5301_v26 = vsel %vm707_vm3, %v8924_v11, %v8925_v60 }
0x12a5   :  { %v8933_v8 = vpop.permute.xlu1 %8932  ;;  %v8928_v62 = vpop.permute.xlu0 %8927  ;;  %v8396_v41 = vpack.c.bf16 %v5170_v0, %v5169_v5  ;;  %v5614_v0 = vld [vmem:[#allocation7 + $0x68] sm:$0xff] }
0x12a6   :  { %v8930_v53 = vunpack.i.h.bf16 %v8928_v62  ;;  %v8929_v29 = vunpack.i.l.bf16 %v8928_v62  ;;  %v8935_v58 = vunpack.i.h.bf16 %v8933_v8  ;;  %v8934_v55 = vunpack.i.l.bf16 %v8933_v8  ;;  %v5727_v8 = vld [vmem:[#allocation7 + $0x70] sm:$0xff] }
0x12a7   :  { %8397 = vmatprep.subr.bf16.mxu0 %v8396_v41 }
0x12a8   :  { %8399 = vmatpush3.bf16.msra.mxu0 %v8396_v41  ;;  %v5302_v46 = vsel %vm707_vm3, %v8929_v29, %v8930_v53  ;;  %v5303_v15 = vsel %vm707_vm3, %v8934_v55, %v8935_v58 }
0x12a9   :  { %v8938_v40 = vpop.permute.xlu0 %8937  ;;  %v8400_v6 = vpack.c.bf16 %v5302_v46, %v5301_v26  ;;  %v8943_v18 = vpop.permute.xlu1 %8942  ;;  %v5728_v26 = vld [vmem:[#allocation7 + $0x78] sm:$0xff]  ;;  %v5841_v46 = vld [vmem:[#allocation7 + $0x80] sm:$0xff] }
0x12aa   :  { %v8940_v32 = vunpack.i.h.bf16 %v8938_v40  ;;  %v8939_v54 = vunpack.i.l.bf16 %v8938_v40  ;;  %v8945_v59 = vunpack.i.h.bf16 %v8943_v18  ;;  %v8944_v21 = vunpack.i.l.bf16 %v8943_v18 }
0x12ab   :  { %8078 = vmatmul.mubr.msk.f32.vlgmr.msra.gmra.mrb[12].mxu0 %vm2699_vm9, %v5142_v31  ;;  %8401 = vmatprep.subr.bf16.mxu0 %v8400_v6 }
0x12ac   :  { %8403 = vmatpush3.bf16.msra.mxu0 %v8400_v6  ;;  %v5304_v9 = vsel %vm707_vm3, %v8939_v54, %v8940_v32  ;;  %8088 = vmatprep.mubr.msk.f32.mxu0 %vm2699_vm9, %v5275_v44  ;;  %v8416_v42 = vpack.c.bf16 %v8945_v59, %v8944_v21  ;;  %v5842_v6 = vld [vmem:[#allocation7 + $0x88] sm:$0xff]  ;;  %v6057_v59 = vld [vmem:[%s9535_s4] sm:$0xff] }
0x12ad   :  { %v8404_v36 = vpack.c.bf16 %v5304_v9, %v5303_v15  ;;  %v8948_v48 = vpop.permute.xlu0 %8947  ;;  %v8953_v45 = vpop.permute.xlu1 %8952  ;;  %v5958_v44 = vld [vmem:[#allocation18 + $0x10] sm:$0xff]  ;;  %v5959_v32 = vld [vmem:[#allocation18 + $0x18] sm:$0xff] }
0x12ae   :  { %v8950_v39 = vunpack.i.h.bf16 %v8948_v48  ;;  %v8949_v3 = vunpack.i.l.bf16 %v8948_v48  ;;  %v8955_v38 = vunpack.i.h.bf16 %v8953_v45  ;;  %v8954_v1 = vunpack.i.l.bf16 %v8953_v45 }
0x12af   :  { %8405 = vmatprep.subr.bf16.mxu0 %v8404_v36  ;;  %v8452_v54 = vpack.c.bf16 %v5959_v32, %v5958_v44 }
0x12b0   :  { %8407 = vmatpush3.bf16.msra.mxu0 %v8404_v36  ;;  %v8420_v37 = vpack.c.bf16 %v8950_v39, %v8949_v3  ;;  %v8424_v22 = vpack.c.bf16 %v8955_v38, %v8954_v1  ;;  %v6058_v38 = vld [vmem:[%s9535_s4 + $0x8] sm:$0xff]  ;;  %s11254_s4 = sld [smem:[#allocation30_spill]] }
0x12b1   :  { %8409 = vmatprep.subr.bf16.mxu0 %v8408_v12  ;;  %v8958_v47 = vpop.permute.xlu0 %8957  ;;  %v8963_v28 = vpop.permute.xlu1 %8962  ;;  %8453 = vmatprep.subr.bf16.mxu1 %v8452_v54  ;;  %v6091_v1 = vld [vmem:[#allocation10] sm:$0xff] }
0x12b2   :  { %v8960_v27 = vunpack.i.h.bf16 %v8958_v47  ;;  %v8959_v33 = vunpack.i.l.bf16 %v8958_v47  ;;  %v8965_v19 = vunpack.i.h.bf16 %v8963_v28  ;;  %v8964_v43 = vunpack.i.l.bf16 %v8963_v28  ;;  %8455 = vmatpush3.bf16.msra.mxu1 %v8452_v54 }
0x12b3   :  { %8089 = vmatmul.mubr.msk.f32.vlgmr.msra.gmra.mrb[12].mxu0 %vm2699_vm9, %v5276_v63  ;;  %8456 = vmatprep.subr.bf16.mxu1 %v11253_v24  ;;  %v6113_v47 = vrot.slane %v6091_v1, %v9661_v51  ;;  %v6599_v28 = vrot.slane %v6091_v1, %v10024_v50  ;;  %v6807_v51 = vrot.slane %v6091_v1, %v10050_v20 }
0x12b4   :  { %8411 = vmatpush3.bf16.msra.mxu0 %v8408_v12  ;;  %8099 = vmatprep.mubr.msk.f32.mxu0 %vm2699_vm9, %v5401_v10  ;;  %v8428_v4 = vpack.c.bf16 %v8960_v27, %v8959_v33  ;;  %v8432_v35 = vpack.c.bf16 %v8965_v19, %v8964_v43  ;;  %v6305_v27 = vrot.slane %v6091_v1, %v9673_v57 }
0x12b5   :  { %8413 = vmatprep.subr.bf16.mxu0 %v10914_v25  ;;  %v8968_v7 = vpop.permute.xlu0 %8967  ;;  %v8973_v5 = vpop.permute.xlu1 %8972  ;;  %v6703_v33 = vrot.slane %v6091_v1, %v10044_v52 }
0x12b6   :  { %v8970_v60 = vunpack.i.h.bf16 %v8968_v7  ;;  %v8969_v11 = vunpack.i.l.bf16 %v8968_v7  ;;  %v8975_v62 = vunpack.i.h.bf16 %v8973_v5  ;;  %v8974_v41 = vunpack.i.l.bf16 %v8973_v5 }
0x12b8   :  { %8415 = vmatpush3.bf16.msra.mxu0 %v10914_v25  ;;  %v5613_v25 = vld [vmem:[#allocation7 + $0x60] sm:$0xff]  ;;  %v8436_v53 = vpack.c.bf16 %v8970_v60, %v8969_v11  ;;  %v8440_v58 = vpack.c.bf16 %v8975_v62, %v8974_v41 }
0x12b9   :  { %8417 = vmatprep.subr.bf16.mxu0 %v8416_v42  ;;  %v8978_v29 = vpop.permute.xlu0 %8977 }
0x12ba   :  { %v8980_v55 = vunpack.i.h.bf16 %v8978_v29  ;;  %v8979_v31 = vunpack.i.l.bf16 %v8978_v29 }
0x12bb   :  { %8100 = vmatmul.mubr.msk.f32.vlgmr.msra.gmra.mrb[12].mxu0 %vm2699_vm9, %v5402_v17 }
0x12bc   :  { %8419 = vmatpush3.bf16.msra.mxu0 %v8416_v42  ;;  %8110 = vmatprep.mubr.msk.f32.mxu0 %vm2699_vm9, %v5499_v61  ;;  %v8444_v40 = vpack.c.bf16 %v8980_v55, %v8979_v31 }
0x12bd   :  { %8421 = vmatprep.subr.bf16.mxu0 %v8420_v37 }
0x12c0   :  { %8423 = vmatpush3.bf16.msra.mxu0 %v8420_v37  ;;  %v6100_v37 = vrot.slane %v6091_v1, %v9658_v49 }
0x12c1   :  { %8425 = vmatprep.subr.bf16.mxu0 %v8424_v22 }
0x12c3   :  { %8111 = vmatmul.mubr.msk.f32.vlgmr.msra.gmra.mrb[12].mxu0 %vm2699_vm9, %v5500_v2  ;;  %v7536_v2 = vld [vmem:[#allocation10 + $0x8] ss:$0 sm:$0xff] }
0x12c4   :  { %8427 = vmatpush3.bf16.msra.mxu0 %v8424_v22  ;;  %8121 = vmatprep.mubr.msk.f32.mxu0 %vm2699_vm9, %v5613_v25  ;;  %v6409_v22 = vrot.slane %v6091_v1, %v9670_v56 }
0x12c5   :  { %8429 = vmatprep.subr.bf16.mxu0 %v8428_v4 }
0x12c6   :  { %v5947_v23 = vpop.permute.xlu1 %5946 }
0x12c8   :  { %8431 = vmatpush3.bf16.msra.mxu0 %v8428_v4 }
0x12c9   :  { %8433 = vmatprep.subr.bf16.mxu0 %v8432_v35 }
0x12ca   :  { %v5952_v15 = vpop.permute.xlu0 %5951 }
0x12cb   :  { %8122 = vmatmul.mubr.msk.f32.vlgmr.msra.gmra.mrb[12].mxu0 %vm2699_vm9, %v5614_v0 }
0x12cc   :  { %8435 = vmatpush3.bf16.msra.mxu0 %v8432_v35  ;;  %8132 = vmatprep.mubr.msk.f32.mxu0 %vm2699_vm9, %v5727_v8 }
0x12cd   :  { %8437 = vmatprep.subr.bf16.mxu0 %v8436_v53 }
0x12d0   :  { %8439 = vmatpush3.bf16.msra.mxu0 %v8436_v53 }
0x12d1   :  { %8441 = vmatprep.subr.bf16.mxu0 %v8440_v58 }
0x12d3   :  { %8133 = vmatmul.mubr.msk.f32.vlgmr.msra.gmra.mrb[12].mxu0 %vm2699_vm9, %v5728_v26 }
0x12d4   :  { %8443 = vmatpush3.bf16.msra.mxu0 %v8440_v58  ;;  %8143 = vmatprep.mubr.msk.f32.mxu0 %vm2699_vm9, %v5841_v46 }
0x12d5   :  { %8445 = vmatprep.subr.bf16.mxu0 %v8444_v40 }
0x12d8   :  { %8447 = vmatpush3.bf16.msra.mxu0 %v8444_v40 }
0x12db   :  { %8144 = vmatmul.mubr.msk.f32.vlgmr.msra.gmra.mrb[12].mxu0 %vm2699_vm9, %v5842_v6  ;;  %v6513_v6 = vrot.slane %v6091_v1, %v9687_v14 }
0x12dc   :  { %7222 = vmatprep.mubr.f32.mxu0 %v10878_v30 }
0x13ae   :  { %v8145_v9 = vpop.f32.mrb[12].mxu0 }
0x13af   :  { %v5931_v36 = vpop.f32.mrb[13].mxu0  ;;  %v5955_v18 = vadd.f32 %v8145_v9, %v5952_v15 }
0x13b0   :  { %v5954_v12 = vadd.f32 %v5947_v23, %v5931_v36 }
0x13b2   :  { %8154 = vmatprep.mubr.msk.f32.mxu1 %vm2699_vm9, %v5954_v12 }
0x13b3   :  { %8155 = vmatmul.mubr.msk.f32.vlgmr.msra.gmra.mrb[28].mxu1 %vm2699_vm9, %v5955_v18 }
0x13b4   :  { %8161 = vmatprep.mubr.msk.f32.mxu1 %vm9396_vm11, %v10878_v30 }
0x1486   :  { %v8156_v63 = vpop.f32.mrb[28].mxu1 }
0x1487   :  { %6043 = vadd.xlane.f32.xlu0 %v8156_v63  ;;  %v6032_v10 = vpop.f32.mrb[29].mxu1 }
0x1488   :  { %6041 = vadd.xlane.f32.xlu1 %v6032_v10 }
0x1499   :  { %6067 = vperm.xlu1 %8981, %v6057_v59  }
0x149d   :  { %8983 = vset.pattern.permute.xlu1 %v11250_v34 }
0x149e   :  { %6078 = vperm.xlu1 %8983, %v6057_v59  }
0x1514   :  { %v6044_v21 = vpop.xlane.xlu0 %6043 }
0x1515   :  { %v6046_v48 = vmul.f32 0.0078125, %v6044_v21  ;;  %v6042_v42 = vpop.xlane.xlu1 %6041 }
0x1516   :  { %v6045_v39 = vmul.f32 0.0078125, %v6042_v42 }
0x1517   :  { %v6048_v3 = vsub.f32 %v8156_v63, %v6046_v48 }
0x1518   :  { %v6047_v45 = vsub.f32 %v6032_v10, %v6045_v39 }
0x1519   :  { %v6050_v17 = vmul.f32 %v6048_v3, %v6048_v3  ;;  %v6068_v56 = vpop.permute.xlu1 %6067 }
0x151a   :  { %v6049_v61 = vmul.f32 %v6047_v45, %v6047_v45 }
0x151b   :  { %6053 = vadd.xlane.f32.xlu0 %v6050_v17 }
0x151c   :  { %6051 = vadd.xlane.f32.xlu1 %v6049_v61 }
0x151d   :  { %v6079_v25 = vpop.permute.xlu1 %6078 }
0x152d   :  { %6082 = vperm.xlu1 %8983, %v6058_v38  }
0x1531   :  { %6072 = vperm.xlu0 %8982, %v6058_v38   ;;  %6102 = vrot.lane.b32.xlu1 %v6100_v37, %s9386_s6 }
0x1535   :  { %6115 = vrot.lane.b32.xlu0 %v6113_v47, %s9385_s1  ;;  %6411 = vrot.lane.b32.xlu1 %v6409_v22, %s9374_s15  ;;  %v6593_v22 = vld [vmem:[#allocation2 + $0x10] sm:$0xff] }
0x1539   :  { %6307 = vrot.lane.b32.xlu0 %v6305_v27, %s9384_s25  ;;  %6705 = vrot.lane.b32.xlu1 %v6703_v33, %s9387_s2 }
0x153d   :  { %6601 = vrot.lane.b32.xlu0 %v6599_v28, %s9364_s23  ;;  %6913 = vrot.lane.b32.xlu1 %v7536_v2, %s9388_s7 }
0x1541   :  { %6809 = vrot.lane.b32.xlu0 %v6807_v51, %s9358_s21 }
0x15a8   :  { %v6054_v57 = vpop.xlane.xlu0 %6053 }
0x15a9   :  { %v6056_v19 = vmul.f32 0.0078125, %v6054_v57  ;;  %v6052_v52 = vpop.xlane.xlu1 %6051 }
0x15aa   :  { %v6055_v43 = vmul.f32 0.0078125, %v6052_v52 }
0x15ab   :  { %v6060_v4 = vadd.f32 1e-05, %v6056_v19 }
0x15ac   :  { %v6059_v7 = vadd.f32 1e-05, %v6055_v43 }
0x15ad   :  { %9093 = vrsqrt.f32 %v6060_v4  ;;  %v6083_v20 = vpop.permute.xlu1 %6082 }
0x15ae   :  { %9095 = vrsqrt.f32 %v6059_v7 }
0x15b0   :  { %v6073_v5 = vpop.permute.xlu0 %6072 }
0x15b1   :  { %v6103_v46 = vpop.permute.xlu1 %6102 }
0x15b2   :  { %v6105_v40 = vmul.f32 %v10878_v30, %v6103_v46 }
0x15b4   :  { %v6116_v58 = vpop.permute.xlu0 %6115 }
0x15b5   :  { %v6118_v55 = vmul.f32 %v10878_v30, %v6116_v58  ;;  %v6412_v59 = vpop.permute.xlu1 %6411 }
0x15b6   :  { %v6414_v21 = vmul.f32 %v10878_v30, %v6412_v59 }
0x15b7   :  { %v9094_v50 = vpop.eup %9093 }
0x15b8   :  { %v9096_v35 = vpop.eup %9095  ;;  %v6064_v60 = vmul.f32 %v9094_v50, %v6048_v3  ;;  %v6308_v15 = vpop.permute.xlu0 %6307 }
0x15b9   :  { %v6063_v11 = vmul.f32 %v9096_v35, %v6047_v45  ;;  %v6310_v9 = vmul.f32 %v10878_v30, %v6308_v15  ;;  %v6706_v27 = vpop.permute.xlu1 %6705 }
0x15ba   :  { %v6076_v0 = vmul.f32 %v6073_v5, %v6064_v60  ;;  %v6711_v28 = vmul.f32 %v10878_v30, %v6706_v27  ;;  %v6709_v19 = vmul.f32 %v6706_v27, %v6593_v22 }
0x15bb   :  { %v6075_v8 = vmul.f32 %v6068_v56, %v6063_v11 }
0x15bc   :  { %v6086_v62 = vadd.f32 %v6083_v20, %v6076_v0  ;;  %v6602_v17 = vpop.permute.xlu0 %6601 }
0x15bd   :  { %v6085_v41 = vadd.f32 %v6079_v25, %v6075_v8  ;;  %v6607_v61 = vmul.f32 %v10878_v30, %v6602_v17  ;;  %v6605_v33 = vmul.f32 %v6602_v17, %v6593_v22  ;;  %v6914_v60 = vpop.permute.xlu1 %6913 }
0x15be   :  { %v11026_v53 = vmax.f32 %v6086_v62, 0.0  ;;  %v6919_v11 = vmul.f32 %v10878_v30, %v6914_v60  ;;  %v6917_v62 = vmul.f32 %v6914_v60, %v6593_v22 }
0x15bf   :  { %v11028_v29 = vmax.f32 %v6085_v41, 0.0 }
0x15c0   :  { %6090 = vst [vmem:[#allocation2 + $0x38] sm:$0xff] %v11026_v53  ;;  %v6121_v31 = vmul.f32 %v6116_v58, %v11026_v53  ;;  %v6108_v32 = vmul.f32 %v6103_v46, %v11026_v53  ;;  %v6313_v36 = vmul.f32 %v6308_v15, %v11026_v53  ;;  %v11048_v10 = vmul.f32 %v6513_v6, %v11026_v53  ;;  %v6810_v56 = vpop.permute.xlu0 %6809 }
0x15c1   :  { %6089 = vst [vmem:[#allocation2 + $0x8] sm:$0xff] %v11028_v29  ;;  %v6119_v26 = vmul.f32 %v6116_v58, %v11028_v29  ;;  %v6106_v44 = vmul.f32 %v6103_v46, %v11028_v29  ;;  %v6311_v12 = vmul.f32 %v6308_v15, %v11028_v29  ;;  %v11045_v14 = vmul.f32 %v6513_v6, %v11028_v29 }
0x15c2   :  { %v8984_v54 = vpack.i.bf16 %v6121_v31, %v6118_v55  ;;  %v8989_v18 = vpack.i.bf16 %v6108_v32, %v6105_v40  ;;  %v6415_v42 = vmul.f32 %v6412_v59, %v11028_v29  ;;  %v6417_v39 = vmul.f32 %v6412_v59, %v11026_v53 }
0x15c3   :  { %v8999_v23 = vpack.i.bf16 %v6119_v26, %v6118_v55  ;;  %v9004_v63 = vpack.i.bf16 %v6106_v44, %v6105_v40  ;;  %v8469_v48 = vpack.c.bf16 %v11048_v10, %v11045_v14  ;;  %v8994_v3 = vpack.i.bf16 %v6313_v36, %v6310_v9  ;;  %v7012_v55 = vld [vmem:[#allocation4] sm:$0x1] }
0x15c4   :  { %8985 = vrot.lane.b32.xlu1 %v8984_v54, %s9358_s21  ;;  %v9009_v45 = vpack.i.bf16 %v6311_v12, %v6310_v9  ;;  %v6604_v38 = vmul.f32 %v6602_v17, %v11028_v29  ;;  %v6606_v1 = vmul.f32 %v6602_v17, %v11026_v53  ;;  %v9019_v37 = vpack.i.bf16 %v6417_v39, %v6414_v21  ;;  %v6609_v14 = vld [vmem:[#allocation9 + $0x5] sm:$0x1] }
0x15c5   :  { %9000 = vrot.lane.b32.xlu0 %v8999_v23, %s9358_s21  ;;  %v9014_v47 = vpack.i.bf16 %v6415_v42, %v6414_v21  ;;  %v6708_v2 = vmul.f32 %v6706_v27, %v11028_v29  ;;  %v6710_v51 = vmul.f32 %v6706_v27, %v11026_v53  ;;  %v6812_v52 = vmul.f32 %v6810_v56, %v11028_v29 }
0x15c6   :  { %v9024_v25 = vpack.i.bf16 %v6607_v61, %v6606_v1  ;;  %v9039_v57 = vpack.i.bf16 %v6605_v33, %v6604_v38  ;;  %v6813_v43 = vmul.f32 %v6810_v56, %v6593_v22  ;;  %v6814_v4 = vmul.f32 %v6810_v56, %v11026_v53  ;;  %v6109_v38 = vld [vmem:[#allocation9] sm:$0x1] }
0x15c7   :  { %v6815_v7 = vmul.f32 %v10878_v30, %v6810_v56  ;;  %v9029_v50 = vpack.i.bf16 %v6711_v28, %v6710_v51  ;;  %v9044_v35 = vpack.i.bf16 %v6709_v19, %v6708_v2  ;;  %v6916_v5 = vmul.f32 %v6914_v60, %v11028_v29  ;;  %v6315_v56 = vld [vmem:[#allocation9 + $0x2] sm:$0x1] }
0x15c8   :  { %8990 = vrot.lane.b32.xlu1 %v8989_v18, %s9388_s7  ;;  %v6918_v0 = vmul.f32 %v6914_v60, %v11026_v53  ;;  %v9049_v20 = vpack.i.bf16 %v6813_v43, %v6812_v52  ;;  %v6123_v18 = vld [vmem:[#allocation9 + $0x1] sm:$0x1]  ;;  %v6419_v60 = vld [vmem:[#allocation9 + $0x3] sm:$0x1] }
0x15c9   :  { %9005 = vrot.lane.b32.xlu0 %v9004_v63, %s9388_s7  ;;  %v9034_v8 = vpack.i.bf16 %v6815_v7, %v6814_v4  ;;  %v9054_v58 = vpack.i.bf16 %v6917_v62, %v6916_v5 }
0x15ca   :  { %v9059_v41 = vpack.i.bf16 %v6919_v11, %v6918_v0 }
0x15cc   :  { %8995 = vrot.lane.b32.xlu1 %v8994_v3, %s9387_s2 }
0x15cd   :  { %9010 = vrot.lane.b32.xlu0 %v9009_v45, %s9387_s2 }
0x15d0   :  { %9020 = vrot.lane.b32.xlu1 %v9019_v37, %s9364_s23 }
0x15d1   :  { %9015 = vrot.lane.b32.xlu0 %v9014_v47, %s9364_s23 }
0x15d4   :  { %9025 = vrot.lane.b32.xlu1 %v9024_v25, %s9374_s15 }
0x15d5   :  { %9040 = vrot.lane.b32.xlu0 %v9039_v57, %s9374_s15 }
0x15d8   :  { %9030 = vrot.lane.b32.xlu1 %v9029_v50, %s9384_s25 }
0x15d9   :  { %9045 = vrot.lane.b32.xlu0 %v9044_v35, %s9384_s25 }
0x15dc   :  { %9035 = vrot.lane.b32.xlu1 %v9034_v8, %s9385_s1 }
0x15dd   :  { %9050 = vrot.lane.b32.xlu0 %v9049_v20, %s9385_s1 }
0x15e0   :  { %9060 = vrot.lane.b32.xlu1 %v9059_v41, %s9386_s6 }
0x15e1   :  { %9055 = vrot.lane.b32.xlu0 %v9054_v58, %s9386_s6 }
0x15e5   :  { %7015 = vperm.xlu0 %8982, %v7012_v55   ;;  %v6517_v55 = vld [vmem:[#allocation9 + $0x4] sm:$0x1] }
0x1636   :  { %v8986_v31 = vpop.permute.xlu1 %8985 }
0x1637   :  { %v9001_v26 = vpop.permute.xlu0 %9000  ;;  %v8988_v29 = vunpack.i.h.bf16 %v8986_v31  ;;  %v8987_v46 = vunpack.i.l.bf16 %v8986_v31 }
0x1638   :  { %v9003_v53 = vunpack.i.h.bf16 %v9001_v26  ;;  %v9002_v40 = vunpack.i.l.bf16 %v9001_v26 }
0x1639   :  { %v6137_v6 = vsel %vm1411_vm15, %v8987_v46, %v8988_v29 }
0x163a   :  { %v6136_v44 = vsel %vm1411_vm15, %v9002_v40, %v9003_v53  ;;  %v8991_v54 = vpop.permute.xlu1 %8990 }
0x163b   :  { %v8457_v32 = vpack.c.bf16 %v6137_v6, %v6136_v44  ;;  %v9006_v23 = vpop.permute.xlu0 %9005  ;;  %v8993_v15 = vunpack.i.h.bf16 %v8991_v54  ;;  %v8992_v9 = vunpack.i.l.bf16 %v8991_v54 }
0x163c   :  { %v9008_v36 = vunpack.i.h.bf16 %v9006_v23  ;;  %v9007_v12 = vunpack.i.l.bf16 %v9006_v23 }
0x163d   :  { %8458 = vmatpush3.bf16.msra.mxu1 %v8457_v32  ;;  %v6226_v63 = vsel %vm1517_vm4, %v8992_v9, %v8993_v15 }
0x163e   :  { %v6225_v59 = vsel %vm1517_vm4, %v9007_v12, %v9008_v36  ;;  %8459 = vmatprep.subr.bf16.mxu1 %v11253_v24  ;;  %v8996_v42 = vpop.permute.xlu1 %8995 }
0x163f   :  { %v8460_v21 = vpack.c.bf16 %v6226_v63, %v6225_v59  ;;  %v9011_v39 = vpop.permute.xlu0 %9010  ;;  %v8998_v3 = vunpack.i.h.bf16 %v8996_v42  ;;  %v8997_v45 = vunpack.i.l.bf16 %v8996_v42  ;;  %v6713_v63 = vld [vmem:[#allocation9 + $0x6] sm:$0x1] }
0x1640   :  { %v9013_v17 = vunpack.i.h.bf16 %v9011_v39  ;;  %v9012_v61 = vunpack.i.l.bf16 %v9011_v39  ;;  %8162 = vmatmul.mubr.msk.f32.vlgmr.msra.gmra.mrb[30].mxu1 %vm865_vm8, %v6123_v18  ;;  %v6817_v39 = vld [vmem:[#allocation9 + $0x7] sm:$0x1] }
0x1641   :  { %8461 = vmatpush3.bf16.msra.mxu1 %v8460_v21  ;;  %8168 = vmatprep.mubr.msk.f32.mxu1 %vm9396_vm11, %v10878_v30  ;;  %v6329_v1 = vsel %vm1638_vm1, %v8997_v45, %v8998_v3  ;;  %v6921_v45 = vld [vmem:[#allocation9 + $0x8] sm:$0x1] }
0x1642   :  { %v6328_v37 = vsel %vm1638_vm1, %v9012_v61, %v9013_v17  ;;  %8462 = vmatprep.subr.bf16.mxu1 %v11253_v24  ;;  %v9021_v22 = vpop.permute.xlu1 %9020  ;;  %v7024_v17 = vld [vmem:[%s11254_s4 + $0x8] sm:$0xff] }
0x1643   :  { %v8463_v47 = vpack.c.bf16 %v6329_v1, %v6328_v37  ;;  %v9016_v27 = vpop.permute.xlu0 %9015  ;;  %v9023_v33 = vunpack.i.h.bf16 %v9021_v22  ;;  %v9022_v28 = vunpack.i.l.bf16 %v9021_v22  ;;  %v7028_v61 = vld [vmem:[%s11254_s4 + $0x28] sm:$0xff]  ;;  %v7023_v37 = vld [vmem:[%s11254_s4] sm:$0xff] }
0x1644   :  { %v9018_v2 = vunpack.i.h.bf16 %v9016_v27  ;;  %v9017_v51 = vunpack.i.l.bf16 %v9016_v27  ;;  %8169 = vmatmul.mubr.msk.f32.vlgmr.msra.gmra.mrb[32].mxu1 %vm865_vm8, %v6109_v38  ;;  %v7026_v38 = vld [vmem:[%s11254_s4 + $0x18] sm:$0xff]  ;;  %v8483_v1 = vpack.c.bf16 %v7028_v61, %v7024_v17  ;;  %v7064_v17 = vld [vmem:[%s11254_s4 + $0x148] sm:$0xff] }
0x1645   :  { %8464 = vmatpush3.bf16.msra.mxu1 %v8463_v47  ;;  %8175 = vmatprep.mubr.msk.f32.mxu1 %vm9396_vm11, %v10878_v30  ;;  %v6433_v25 = vsel %vm707_vm3, %v9022_v28, %v9023_v33  ;;  %v7027_v47 = vld [vmem:[%s11254_s4 + $0x20] sm:$0xff]  ;;  %v7025_v33 = vld [vmem:[%s11254_s4 + $0x10] sm:$0xff]  ;;  %v7068_v61 = vld [vmem:[%s11254_s4 + $0x168] sm:$0xff] }
0x1646   :  { %v6432_v57 = vsel %vm707_vm3, %v9017_v51, %v9018_v2  ;;  %8465 = vmatprep.subr.bf16.mxu1 %v11253_v24  ;;  %v9026_v52 = vpop.permute.xlu1 %9025  ;;  %vm11255_vm3 = vcmask 973824   ;;  %v8485_v27 = vpack.c.bf16 %v7027_v47, %v7023_v37  ;;  %v7029_v28 = vld [vmem:[%s11254_s4 + $0x30] sm:$0xff]  ;;  %v7032_v51 = vld [vmem:[%s11254_s4 + $0x48] sm:$0xff]  ;;  %v7063_v37 = vld [vmem:[%s11254_s4 + $0x140] sm:$0xff] }
0x1647   :  { %v8466_v19 = vpack.c.bf16 %v6433_v25, %v6432_v57  ;;  %v9041_v43 = vpop.permute.xlu0 %9040  ;;  %v9028_v4 = vunpack.i.h.bf16 %v9026_v52  ;;  %v9027_v7 = vunpack.i.l.bf16 %v9026_v52  ;;  %v8517_v2 = vpack.c.bf16 %v7029_v28, %v7025_v33  ;;  %v7034_v25 = vld [vmem:[%s11254_s4 + $0x58] sm:$0xff]  ;;  %v7031_v52 = vld [vmem:[%s11254_s4 + $0x40] sm:$0xff]  ;;  %v7065_v33 = vld [vmem:[%s11254_s4 + $0x150] sm:$0xff] }
0x1648   :  { %v9043_v50 = vunpack.i.h.bf16 %v9041_v43  ;;  %v9042_v35 = vunpack.i.l.bf16 %v9041_v43  ;;  %8176 = vmatmul.mubr.msk.f32.vlgmr.msra.gmra.mrb[34].mxu1 %vm865_vm8, %v6315_v56  ;;  %v7036_v56 = vld [vmem:[%s11254_s4 + $0x68] sm:$0xff]  ;;  %v7035_v43 = vld [vmem:[%s11254_s4 + $0x60] sm:$0xff]  ;;  %v7069_v28 = vld [vmem:[%s11254_s4 + $0x170] sm:$0xff] }
0x1649   :  { %8467 = vmatpush3.bf16.msra.mxu1 %v8466_v19  ;;  %8182 = vmatprep.mubr.msk.f32.mxu1 %vm9396_vm11, %v10878_v30  ;;  %v6623_v11 = vsel %vm438_vm6, %v9027_v7, %v9028_v4  ;;  %v9118_v30 = vld [vmem:[#allocation2 + $0x48] sm:$0xff]  ;;  %v8487_v57 = vpack.c.bf16 %v7036_v56, %v7032_v51  ;;  %v7038_v19 = vld [vmem:[%s11254_s4 + $0x78] sm:$0xff]  ;;  %v8489_v7 = vpack.c.bf16 %v7035_v43, %v7031_v52  ;;  %v7067_v47 = vld [vmem:[%s11254_s4 + $0x160] sm:$0xff] }
0x164a   :  { %8468 = vmatprep.subr.bf16.mxu1 %v11253_v24  ;;  %v6622_v5 = vsel %vm438_vm6, %v9042_v35, %v9043_v50  ;;  %v9031_v0 = vpop.permute.xlu1 %9030  ;;  %vm11256_vm6 = vmmov %vm11255_vm3  ;;  %v8519_v4 = vpack.c.bf16 %v7038_v19, %v7034_v25  ;;  %v7033_v50 = vld [vmem:[%s11254_s4 + $0x50] sm:$0xff]  ;;  %v7072_v51 = vld [vmem:[%s11254_s4 + $0x188] sm:$0xff] }
0x164b   :  { %v9046_v8 = vpop.permute.xlu0 %9045  ;;  %v9033_v20 = vunpack.i.h.bf16 %v9031_v0  ;;  %v9032_v62 = vunpack.i.l.bf16 %v9031_v0  ;;  %v8472_v31 = vpack.c.bf16 %v6623_v11, %v6622_v5  ;;  %v7037_v35 = vld [vmem:[%s11254_s4 + $0x70] sm:$0xff]  ;;  %v7040_v11 = vld [vmem:[%s11254_s4 + $0x88] sm:$0xff]  ;;  %v7042_v0 = vld [vmem:[%s11254_s4 + $0x98] sm:$0xff] }
0x164c   :  { %v9048_v41 = vunpack.i.h.bf16 %v9046_v8  ;;  %v9047_v58 = vunpack.i.l.bf16 %v9046_v8  ;;  %8183 = vmatmul.mubr.msk.f32.vlgmr.msra.gmra.mrb[36].mxu1 %vm865_vm8, %v6419_v60  ;;  %v8521_v60 = vpack.c.bf16 %v7037_v35, %v7033_v50  ;;  %v7044_v5 = vld [vmem:[%s11254_s4 + $0xa8] sm:$0xff]  ;;  %v7074_v25 = vld [vmem:[%s11254_s4 + $0x198] sm:$0xff]  ;;  %v7071_v52 = vld [vmem:[%s11254_s4 + $0x180] sm:$0xff] }
0x164d   :  { %8470 = vmatpush3.bf16.msra.mxu1 %v8469_v48  ;;  %8189 = vmatprep.mubr.msk.f32.mxu1 %vm9396_vm11, %v9118_v30  ;;  %v6727_v26 = vsel %vm2124_vm2, %v9032_v62, %v9033_v20  ;;  %v8491_v8 = vpack.c.bf16 %v7044_v5, %v7040_v11  ;;  %v7046_v20 = vld [vmem:[%s11254_s4 + $0xb8] sm:$0xff]  ;;  %v7039_v62 = vld [vmem:[%s11254_s4 + $0x80] sm:$0xff]  ;;  %v7076_v56 = vld [vmem:[%s11254_s4 + $0x1a8] sm:$0xff] }
0x164e   :  { %8471 = vmatprep.subr.bf16.mxu1 %v11253_v24  ;;  %v6726_v29 = vsel %vm2124_vm2, %v9047_v58, %v9048_v41  ;;  %v9036_v46 = vpop.permute.xlu1 %9035  ;;  %v7043_v41 = vld [vmem:[%s11254_s4 + $0xa0] sm:$0xff]  ;;  %v8523_v58 = vpack.c.bf16 %v7046_v20, %v7042_v0  ;;  %v7078_v19 = vld [vmem:[%s11254_s4 + $0x1b8] sm:$0xff]  ;;  %v7073_v50 = vld [vmem:[%s11254_s4 + $0x190] sm:$0xff] }
0x164f   :  { %v9051_v53 = vpop.permute.xlu0 %9050  ;;  %v9038_v40 = vunpack.i.h.bf16 %v9036_v46  ;;  %v9037_v6 = vunpack.i.l.bf16 %v9036_v46  ;;  %v8475_v10 = vpack.c.bf16 %v6727_v26, %v6726_v29  ;;  %v7048_v29 = vld [vmem:[%s11254_s4 + $0xc8] sm:$0xff]  ;;  %v7075_v43 = vld [vmem:[%s11254_s4 + $0x1a0] sm:$0xff]  ;;  %v7077_v35 = vld [vmem:[%s11254_s4 + $0x1b0] sm:$0xff] }
0x1650   :  { %v9053_v44 = vunpack.i.h.bf16 %v9051_v53  ;;  %v9052_v32 = vunpack.i.l.bf16 %v9051_v53  ;;  %8190 = vmatmul.mubr.msk.f32.vlgmr.msra.gmra.mrb[38].mxu1 %vm865_vm8, %v6517_v55  ;;  %v7041_v55 = vld [vmem:[%s11254_s4 + $0x90] sm:$0xff]  ;;  %v7052_v46 = vld [vmem:[%s11254_s4 + $0xe8] sm:$0xff]  ;;  %v7050_v53 = vld [vmem:[%s11254_s4 + $0xd8] sm:$0xff] }
0x1651   :  { %8473 = vmatpush3.bf16.msra.mxu1 %v8472_v31  ;;  %8196 = vmatprep.mubr.msk.f32.mxu1 %vm9396_vm11, %v9118_v30  ;;  %v6831_v48 = vsel %vm2249_vm5, %v9037_v6, %v9038_v40  ;;  %v7045_v31 = vld [vmem:[%s11254_s4 + $0xb0] sm:$0xff]  ;;  %v8495_v40 = vpack.c.bf16 %v7052_v46, %v7048_v29  ;;  %v7054_v6 = vld [vmem:[%s11254_s4 + $0xf8] sm:$0xff]  ;;  %v7080_v11 = vld [vmem:[%s11254_s4 + $0x1c8] sm:$0xff] }
0x1652   :  { %8474 = vmatprep.subr.bf16.mxu1 %v11253_v24  ;;  %v6830_v54 = vsel %vm2249_vm5, %v9052_v32, %v9053_v44  ;;  %v9061_v23 = vpop.permute.xlu1 %9060  ;;  %v8525_v26 = vpack.c.bf16 %v7045_v31, %v7041_v55  ;;  %v7047_v44 = vld [vmem:[%s11254_s4 + $0xc0] sm:$0xff]  ;;  %v7084_v5 = vld [vmem:[%s11254_s4 + $0x1e8] sm:$0xff]  ;;  %v7082_v0 = vld [vmem:[%s11254_s4 + $0x1d8] sm:$0xff] }
0x1653   :  { %v9056_v15 = vpop.permute.xlu0 %9055  ;;  %v9063_v9 = vunpack.i.h.bf16 %v9061_v23  ;;  %v9062_v36 = vunpack.i.l.bf16 %v9061_v23  ;;  %v8478_v59 = vpack.c.bf16 %v6831_v48, %v6830_v54  ;;  %v7051_v32 = vld [vmem:[%s11254_s4 + $0xe0] sm:$0xff]  ;;  %v7049_v48 = vld [vmem:[%s11254_s4 + $0xd0] sm:$0xff]  ;;  %v7086_v20 = vld [vmem:[%s11254_s4 + $0x1f8] sm:$0xff] }
0x1654   :  { %v9058_v12 = vunpack.i.h.bf16 %v9056_v15  ;;  %v9057_v18 = vunpack.i.l.bf16 %v9056_v15  ;;  %8197 = vmatmul.mubr.msk.f32.vlgmr.msra.gmra.mrb[40].mxu1 %vm865_vm8, %v6609_v14  ;;  %v8527_v14 = vpack.c.bf16 %v7054_v6, %v7050_v53  ;;  %v7053_v54 = vld [vmem:[%s11254_s4 + $0xf0] sm:$0xff]  ;;  %v7056_v15 = vld [vmem:[%s11254_s4 + $0x108] sm:$0xff] }
0x1655   :  { %8476 = vmatpush3.bf16.msra.mxu1 %v8475_v10  ;;  %8203 = vmatprep.mubr.msk.f32.mxu1 %vm9396_vm11, %v9118_v30  ;;  %v6935_v21 = vsel %vm11255_vm3, %v9062_v36, %v9063_v9  ;;  %v8497_v10 = vpack.c.bf16 %v7051_v32, %v7047_v44  ;;  %v8529_v23 = vpack.c.bf16 %v7053_v54, %v7049_v48  ;;  %v7060_v9 = vld [vmem:[%s11254_s4 + $0x128] sm:$0xff]  ;;  %v7058_v36 = vld [vmem:[%s11254_s4 + $0x118] sm:$0xff]  ;;  %v7081_v55 = vld [vmem:[%s11254_s4 + $0x1d0] sm:$0xff] }
0x1656   :  { %8477 = vmatprep.subr.bf16.mxu1 %v11253_v24  ;;  %v6934_v42 = vsel %vm11256_vm6, %v9057_v18, %v9058_v12  ;;  %v8499_v12 = vpack.c.bf16 %v7060_v9, %v7056_v15  ;;  %v7062_v18 = vld [vmem:[%s11254_s4 + $0x138] sm:$0xff]  ;;  %v7085_v31 = vld [vmem:[%s11254_s4 + $0x1f0] sm:$0xff] }
0x1657   :  { %v8481_v3 = vpack.c.bf16 %v6935_v21, %v6934_v42  ;;  %v8531_v21 = vpack.c.bf16 %v7062_v18, %v7058_v36 }
0x1658   :  { %8204 = vmatmul.mubr.msk.f32.vlgmr.msra.gmra.mrb[42].mxu1 %vm865_vm8, %v6713_v63  ;;  %v7055_v63 = vld [vmem:[%s11254_s4 + $0x100] sm:$0xff] }
0x1659   :  { %8479 = vmatpush3.bf16.msra.mxu1 %v8478_v59  ;;  %8210 = vmatprep.mubr.msk.f32.mxu1 %vm9396_vm11, %v9118_v30  ;;  %v7059_v59 = vld [vmem:[%s11254_s4 + $0x120] sm:$0xff] }
0x165a   :  { %8480 = vmatprep.subr.bf16.mxu1 %v11253_v24  ;;  %v7030_v24 = vld [vmem:[%s11254_s4 + $0x38] sm:$0xff]  ;;  %v8501_v42 = vpack.c.bf16 %v7059_v59, %v7055_v63 }
0x165b   :  { %v8515_v22 = vpack.c.bf16 %v7030_v24, %v7026_v38  ;;  %v7066_v38 = vld [vmem:[%s11254_s4 + $0x158] sm:$0xff] }
0x165c   :  { %8211 = vmatmul.mubr.msk.f32.vlgmr.msra.gmra.mrb[44].mxu1 %vm865_vm8, %v6817_v39  ;;  %v7057_v39 = vld [vmem:[%s11254_s4 + $0x110] sm:$0xff]  ;;  %v7070_v24 = vld [vmem:[%s11254_s4 + $0x178] sm:$0xff] }
0x165d   :  { %8482 = vmatpush3.bf16.msra.mxu1 %v8481_v3  ;;  %8217 = vmatprep.mubr.msk.f32.mxu1 %vm9396_vm11, %v9118_v30  ;;  %v7061_v3 = vld [vmem:[%s11254_s4 + $0x130] sm:$0xff] }
0x165e   :  { %8484 = vmatprep.subr.bf16.mxu1 %v8483_v1  ;;  %8516 = vmatprep.subr.bf16.mxu0 %v8515_v22  ;;  %v8503_v1 = vpack.c.bf16 %v7068_v61, %v7064_v17  ;;  %v8535_v22 = vpack.c.bf16 %v7070_v24, %v7066_v38 }
0x165f   :  { %8518 = vmatpush1.bf16.msra.mxu0 %v8517_v2  ;;  %v8537_v2 = vpack.c.bf16 %v7069_v28, %v7065_v33 }
0x1660   :  { %8218 = vmatmul.mubr.msk.f32.vlgmr.msra.gmra.mrb[46].mxu1 %vm865_vm8, %v6921_v45  ;;  %8520 = vmatprep.subr.bf16.mxu0 %v8519_v4  ;;  %v8533_v45 = vpack.c.bf16 %v7061_v3, %v7057_v39  ;;  %v8539_v4 = vpack.c.bf16 %v7078_v19, %v7074_v25  ;;  %vm7229_vm8 = vcmask 1040384   ;;  %v7259_v19 = vld [vmem:[%s9540_s8] sm:$0x1] }
0x1661   :  { %7151 = vmatprep.mubr.f32.mxu1 %v9118_v30  ;;  %8486 = vmatpush1.bf16.msra.mxu1 %v8485_v27  ;;  %v8493_v30 = vpack.c.bf16 %v7043_v41, %v7039_v62  ;;  %v8505_v27 = vpack.c.bf16 %v7067_v47, %v7063_v37  ;;  %v7079_v62 = vld [vmem:[%s11254_s4 + $0x1c0] sm:$0xff] }
0x1662   :  { %8488 = vmatprep.subr.bf16.mxu1 %v8487_v57  ;;  %v8507_v57 = vpack.c.bf16 %v7076_v56, %v7072_v51  ;;  %v7083_v41 = vld [vmem:[%s11254_s4 + $0x1e0] sm:$0xff] }
0x1663   :  { %8522 = vmatpush1.bf16.msra.mxu0 %v8521_v60  ;;  %v8541_v60 = vpack.c.bf16 %v7077_v35, %v7073_v50 }
0x1664   :  { %8524 = vmatprep.subr.bf16.mxu0 %v8523_v58  ;;  %v8543_v58 = vpack.c.bf16 %v7086_v20, %v7082_v0 }
0x1665   :  { %8490 = vmatpush1.bf16.msra.mxu1 %v8489_v7  ;;  %v8509_v7 = vpack.c.bf16 %v7075_v43, %v7071_v52 }
0x1666   :  { %8492 = vmatprep.subr.bf16.mxu1 %v8491_v8  ;;  %v8511_v8 = vpack.c.bf16 %v7084_v5, %v7080_v11 }
0x1667   :  { %8526 = vmatpush1.bf16.msra.mxu0 %v8525_v26  ;;  %v8545_v26 = vpack.c.bf16 %v7085_v31, %v7081_v55 }
0x1668   :  { %8528 = vmatprep.subr.bf16.mxu0 %v8527_v14 }
0x1669   :  { %8494 = vmatpush1.bf16.msra.mxu1 %v8493_v30  ;;  %v8513_v30 = vpack.c.bf16 %v7083_v41, %v7079_v62 }
0x166a   :  { %8496 = vmatprep.subr.bf16.mxu1 %v8495_v40 }
0x166b   :  { %8530 = vmatpush1.bf16.msra.mxu0 %v8529_v23 }
0x166c   :  { %8532 = vmatprep.subr.bf16.mxu0 %v8531_v21 }
0x166d   :  { %8498 = vmatpush1.bf16.msra.mxu1 %v8497_v10 }
0x166e   :  { %8500 = vmatprep.subr.bf16.mxu1 %v8499_v12 }
0x166f   :  { %8534 = vmatpush1.bf16.msra.mxu0 %v8533_v45  ;;  %v7016_v45 = vpop.permute.xlu0 %7015 }
0x1670   :  { %8536 = vmatprep.subr.bf16.mxu0 %v8535_v22  ;;  %v7021_v61 = vrot.slane %v7016_v45, %v9658_v49 }
0x1671   :  { %8502 = vmatpush1.bf16.msra.mxu1 %v8501_v42 }
0x1672   :  { %8504 = vmatprep.subr.bf16.mxu1 %v8503_v1 }
0x1673   :  { %8538 = vmatpush1.bf16.msra.mxu0 %v8537_v2 }
0x1674   :  { %8540 = vmatprep.subr.bf16.mxu0 %v8539_v4 }
0x1675   :  { %8506 = vmatpush1.bf16.msra.mxu1 %v8505_v27 }
0x1676   :  { %8508 = vmatprep.subr.bf16.mxu1 %v8507_v57 }
0x1677   :  { %8542 = vmatpush1.bf16.msra.mxu0 %v8541_v60 }
0x1678   :  { %8544 = vmatprep.subr.bf16.mxu0 %v8543_v58 }
0x1679   :  { %8510 = vmatpush1.bf16.msra.mxu1 %v8509_v7 }
0x167a   :  { %8512 = vmatprep.subr.bf16.mxu1 %v8511_v8 }
0x167b   :  { %8546 = vmatpush1.bf16.msra.mxu0 %v8545_v26 }
0x167d   :  { %8514 = vmatpush1.bf16.msra.mxu1 %v8513_v30 }
0x1713   :  { %v6209_v29 = vpop.f32.mrb[30].mxu1 }
0x1714   :  { %v8163_v46 = vpop.f32.mrb[31].mxu1 }
0x1717   :  { %v6298_v53 = vpop.f32.mrb[32].mxu1 }
0x1718   :  { %v6299_v40 = vadd.f32 %v6298_v53, %v6209_v29  ;;  %v8170_v6 = vpop.f32.mrb[33].mxu1 }
0x171b   :  { %v6401_v44 = vpop.f32.mrb[34].mxu1 }
0x171c   :  { %v6405_v32 = vadd.f32 %v6401_v44, %v6299_v40  ;;  %v8177_v14 = vpop.f32.mrb[35].mxu1 }
0x171f   :  { %v6505_v10 = vpop.f32.mrb[36].mxu1 }
0x1720   :  { %v6509_v48 = vadd.f32 %v6505_v10, %v6405_v32  ;;  %v8184_v54 = vpop.f32.mrb[37].mxu1 }
0x1723   :  { %v6587_v23 = vpop.f32.mrb[38].mxu1 }
0x1724   :  { %v6591_v15 = vadd.f32 %v6587_v23, %v6509_v48  ;;  %v8191_v9 = vpop.f32.mrb[39].mxu1 }
0x1727   :  { %v6695_v36 = vpop.f32.mrb[40].mxu1 }
0x1728   :  { %v6699_v12 = vadd.f32 %v6695_v36, %v6591_v15  ;;  %v8198_v18 = vpop.f32.mrb[41].mxu1 }
0x172b   :  { %v6799_v63 = vpop.f32.mrb[42].mxu1 }
0x172c   :  { %v6803_v59 = vadd.f32 %v6799_v63, %v6699_v12  ;;  %v8205_v21 = vpop.f32.mrb[43].mxu1 }
0x172f   :  { %v6903_v42 = vpop.f32.mrb[44].mxu1 }
0x1730   :  { %v6907_v39 = vadd.f32 %v6903_v42, %v6803_v59  ;;  %v8212_v3 = vpop.f32.mrb[45].mxu1 }
0x1733   :  { %v7007_v17 = vpop.f32.mrb[46].mxu1 }
0x1734   :  { %v7011_v38 = vadd.f32 %v7007_v17, %v6907_v39  ;;  %v8219_v1 = vpop.f32.mrb[47].mxu1 }
0x1736   :  { %v7022_v24 = vadd.f32 %v7021_v61, %v7011_v38 }
0x1738   :  { %7152 = vmatmul.mubr.f32.vlgmr.msra.gmra.mrb[48].mxu1 %v7022_v24  ;;  %7223 = vmatmul.mubr.f32.vlgmr.msra.gmra.mrb[14].mxu0 %v7022_v24 }
0x180b   :  { %v7153_v37 = vpop.f32.mrb[48].mxu1  ;;  %v7224_v47 = vpop.f32.mrb[14].mxu0 }
0x180c   :  { %v7230_v22 = vsel %vm7229_vm8, %v7153_v37, 0.0  ;;  %v7155_v27 = vpop.f32.mrb[49].mxu1  ;;  %v7226_v33 = vpop.f32.mrb[15].mxu0  ;;  %v7233_v51 = vsel %vm7229_vm8, %v7224_v47, 0.0 }
0x180d   :  { %v7231_v28 = vsel %vm7229_vm8, %v7155_v27, 0.0  ;;  %v7235_v25 = vsel %vm7229_vm8, %v7226_v33, 0.0 }
0x180e   :  { %v7232_v2 = vadd.f32 %v7231_v28, %v7230_v22 }
0x1810   :  { %v7234_v56 = vadd.f32 %v7233_v51, %v7232_v2 }
0x1812   :  { %v7236_v57 = vadd.f32 %v7235_v25, %v7234_v56 }
0x1814   :  { %7237 = vadd.xlane.f32.xlu1 %v7236_v57 }
0x1825   :  { %7280 = vperm.xlu1 %8983, %v7259_v19  }
0x18a1   :  { %v7238_v52 = vpop.xlane.xlu1 %7237 }
0x18a2   :  { %v7240_v43 = vmul.f32 0.001953125, %v7238_v52 }
0x18a4   :  { %v7241_v4 = vsub.f32 %v7153_v37, %v7240_v43  ;;  %v7242_v7 = vsub.f32 %v7155_v27, %v7240_v43  ;;  %v7243_v50 = vsub.f32 %v7224_v47, %v7240_v43  ;;  %v7244_v35 = vsub.f32 %v7226_v33, %v7240_v43 }
0x18a5   :  { %v7281_v53 = vpop.permute.xlu1 %7280 }
0x18a6   :  { %v7245_v60 = vmul.f32 %v7241_v4, %v7241_v4  ;;  %v7246_v11 = vmul.f32 %v7242_v7, %v7242_v7  ;;  %v7247_v5 = vmul.f32 %v7243_v50, %v7243_v50  ;;  %v7248_v0 = vmul.f32 %v7244_v35, %v7244_v35 }
0x18a7   :  { %v7286_v48 = vrot.slane %v7281_v53, %v9658_v49 }
0x18a8   :  { %v7249_v8 = vsel %vm7229_vm8, %v7245_v60, 0.0  ;;  %v7250_v20 = vsel %vm7229_vm8, %v7246_v11, 0.0  ;;  %v7252_v41 = vsel %vm7229_vm8, %v7247_v5, 0.0  ;;  %v7254_v30 = vsel %vm7229_vm8, %v7248_v0, 0.0 }
0x18a9   :  { %v7251_v62 = vadd.f32 %v7250_v20, %v7249_v8 }
0x18ab   :  { %v7253_v58 = vadd.f32 %v7252_v41, %v7251_v62 }
0x18ad   :  { %v7255_v55 = vadd.f32 %v7254_v30, %v7253_v58 }
0x18af   :  { %7256 = vadd.xlane.f32.xlu0 %v7255_v55 }
0x18c5   :  { %7268 = vperm.xlu0 %8982, %v7259_v19  }
0x18c9   :  { %9064 = vset.pattern.permute.xlu0 %v11250_v34 }
0x193c   :  { %v7257_v31 = vpop.xlane.xlu0 %7256 }
0x193d   :  { %v7258_v26 = vmul.f32 0.001953125, %v7257_v31 }
0x193f   :  { %v7260_v29 = vadd.f32 1e-05, %v7258_v26 }
0x1941   :  { %9097 = vrsqrt.f32 %v7260_v29 }
0x1944   :  { %v7269_v46 = vpop.permute.xlu0 %7268 }
0x1945   :  { %v7274_v6 = vrot.slane %v7269_v46, %v9658_v49 }
0x194b   :  { %v9098_v40 = vpop.eup %9097 }
0x194c   :  { %v7262_v44 = vmul.f32 %v9098_v40, %v7241_v4  ;;  %v7263_v32 = vmul.f32 %v9098_v40, %v7242_v7  ;;  %v7264_v14 = vmul.f32 %v9098_v40, %v7243_v50  ;;  %v7265_v10 = vmul.f32 %v9098_v40, %v7244_v35 }
0x194e   :  { %v7275_v54 = vmul.f32 %v7274_v6, %v7262_v44  ;;  %v7276_v23 = vmul.f32 %v7274_v6, %v7263_v32  ;;  %v7277_v15 = vmul.f32 %v7274_v6, %v7264_v14  ;;  %v7278_v9 = vmul.f32 %v7274_v6, %v7265_v10 }
0x1950   :  { %v7287_v34 = vadd.f32 %v7286_v48, %v7275_v54  ;;  %v7288_v36 = vadd.f32 %v7286_v48, %v7276_v23  ;;  %v7289_v12 = vadd.f32 %v7286_v48, %v7277_v15  ;;  %v7290_v18 = vadd.f32 %v7286_v48, %v7278_v9 }
0x1952   :  { %v7538_v63 = vmul.f32 -1.442695, %v7287_v34  ;;  %v7539_v59 = vmul.f32 -1.442695, %v7288_v36  ;;  %v7540_v21 = vmul.f32 -1.442695, %v7289_v12 }
0x1953   :  { %v7541_v42 = vmul.f32 -1.442695, %v7290_v18 }
0x1954   :  { %9099 = vpow2.f32 %v7538_v63 }
0x1955   :  { %9101 = vpow2.f32 %v7539_v59 }
0x1956   :  { %9103 = vpow2.f32 %v7540_v21 }
0x1957   :  { %9105 = vpow2.f32 %v7541_v42 }
0x195e   :  { %v9100_v39 = vpop.eup %9099 }
0x195f   :  { %v9102_v3 = vpop.eup %9101  ;;  %v7303_v45 = vadd.f32 1.0, %v9100_v39 }
0x1960   :  { %v9104_v49 = vpop.eup %9103  ;;  %v7304_v17 = vadd.f32 1.0, %v9102_v3 }
0x1961   :  { %v9106_v61 = vpop.eup %9105  ;;  %v7305_v38 = vadd.f32 1.0, %v9104_v49  ;;  %9107 = vrcp.f32 %v7303_v45 }
0x1962   :  { %v7306_v1 = vadd.f32 1.0, %v9106_v61  ;;  %9109 = vrcp.f32 %v7304_v17 }
0x1963   :  { %9111 = vrcp.f32 %v7305_v38 }
0x1964   :  { %9113 = vrcp.f32 %v7306_v1 }
0x196b   :  { %v9108_v24 = vpop.eup %9107 }
0x196c   :  { %v9110_v37 = vpop.eup %9109 }
0x196d   :  { %v9112_v47 = vpop.eup %9111  ;;  %v7319_v22 = vcombine.low %v9108_v24, %v9110_v37 }
0x196e   :  { %v9114_v27 = vpop.eup %9113 }
0x196f   :  { %v7320_v33 = vcombine.low %v9112_v47, %v9114_v27  ;;  %v7327_v28 = vrot.slane %v7319_v22, %v9619_v13 }
0x1971   :  { %v7334_v2 = vrot.slane %v7320_v33, %v9619_v13 }
0x1973   :  { %v7335_v51 = vcombine.low %v7327_v28, %v7334_v2 }
0x1975   :  { %v7342_v56 = vrot.slane %v7335_v51, %v9619_v13 }
0x1977   :  { %7344 = vst.msk [vmem:[%s9545_s13] sm:$0xf] %vm9623_vm0, %v7342_v56 }
0x1978   :  { %7349 = vsyncpa [#allocation6], 1 }
0x1979   :  { %7350 = vsyncpa [#allocation8], 1 }
0x197a   :  { %7351 = vsyncpa [#allocation11], 1 }
0x197b   :  { %7352 = vsyncpa [#allocation14], 1 }
0x197c   :  { %7353 = vsyncpa [#allocation17], 1 }

</bundles_post_ra>
